<compile_context>
chip_gen: v7x
topology: tpu7x:2x2x1
jax: 0.10.0
libtpu: 0.0.40
codegen_flags: <defaults>
</compile_context>

<pallas_src>
import jax
import jax.numpy as jnp
from jax.experimental import pallas as pl
from jax.experimental.pallas import tpu as pltpu


def _round_up(v, m):
    return ((v + m - 1) // m) * m


# ---------------------------------------------------------------------------
# Host-side constant matrices (built once, fetched once into VMEM)
# ---------------------------------------------------------------------------
def _box_filter_matrix(n, k=3):
    """K[(y*n+x),(y'*n+x')] = 1 iff |y-y'|<=1 and |x-x'|<=1.
    flat_img @ K == zero-padded 'same' 3x3 box sum of the n x n image."""
    idx = jnp.arange(n)
    band = (jnp.abs(idx[:, None] - idx[None, :]) <= (k // 2)).astype(jnp.float32)
    return jnp.kron(band, band)                                   # (n*n, n*n)


def _pool_corner_matrices(n):
    """Four stacked 0/1 matrices; flat_map @ P[c] selects corner c of every
    non-overlapping 2x2 window (stride-2 pooling).  Shape (4, n*n, (n//2)**2)."""
    m = n // 2
    qy, qx = jnp.meshgrid(jnp.arange(m), jnp.arange(m), indexing="ij")
    rows = jnp.arange(n * n)
    mats = []
    for dy in (0, 1):
        for dx in (0, 1):
            src = ((2 * qy + dy) * n + (2 * qx + dx)).reshape(-1)  # (m*m,)
            mats.append((rows[:, None] == src[None, :]).astype(jnp.float32))
    return jnp.stack(mats, axis=0)


def _resident_spec(arr):
    """Full-array block + constant index map -> fetched once, stays in VMEM."""
    nd = arr.ndim
    return pl.BlockSpec(arr.shape, lambda b, _nd=nd: (0,) * _nd)


# ---------------------------------------------------------------------------
# Fused PCILTCNN kernel: TB images per grid step, batch on the sublane axis.
# ---------------------------------------------------------------------------
def _pciltcnn_kernel(x_ref, k1_ref, pc1_ref, ws1p_ref, ws1n_ref, bc1_ref,
                     k2_ref, pc2_ref, t2_ref, ws2p_ref, ws2n_ref, bc2_ref,
                     w1_ref, bf1_ref, w2_ref, bf2_ref, out_ref):
    f32 = jnp.float32

    # ---- conv1 (PCILT): quantize + 3x3 'same' box-sum on the MXU (bf16 exact) ---
    q1 = jnp.clip(jnp.round(x_ref[...] * 255.0), 0.0, 255.0)       # (TB, 784)
    s1 = jnp.dot(q1.astype(jnp.bfloat16), k1_ref[...],
                 preferred_element_type=f32)                       # (TB, 784)

    # ---- relu + 2x2 max-pool fused through the per-channel affine --------------
    # pooling = 4 corner-select matmuls + elementwise max/min (no unaligned slices)
    proj = [jnp.dot(s1, pc1_ref[i], preferred_element_type=f32) for i in range(4)]
    s1max = jnp.maximum(jnp.maximum(proj[0], proj[1]),
                        jnp.maximum(proj[2], proj[3]))             # (TB, 196)
    s1min = jnp.minimum(jnp.minimum(proj[0], proj[1]),
                        jnp.minimum(proj[2], proj[3]))             # (TB, 196)

    # max_w relu(ws*s_w + b) == relu(ws_pos*max(s) + ws_neg*min(s) + b)
    a1 = jnp.maximum(ws1p_ref[...] * s1max[None]
                     + ws1n_ref[...] * s1min[None] + bc1_ref[...], 0.0)  # (O1,TB,196)

    # ---- conv2 (PCILT): per-channel quantize, channel sum, 3x3 box-sum ---------
    q2 = jnp.clip(jnp.round(a1 * 255.0), 0.0, 255.0)               # (O1, TB, 196)
    csum = jnp.sum(q2, axis=0)                                     # (TB, 196)  f32 exact
    s2 = jnp.dot(csum, k2_ref[...], preferred_element_type=f32)    # (TB, 196)

    proj = [jnp.dot(s2, pc2_ref[i], preferred_element_type=f32) for i in range(4)]
    s2max = jnp.maximum(jnp.maximum(proj[0], proj[1]),
                        jnp.maximum(proj[2], proj[3]))             # (TB, 49)
    s2min = jnp.minimum(jnp.minimum(proj[0], proj[1]),
                        jnp.minimum(proj[2], proj[3]))             # (TB, 49)

    # ---- tile pooled maps to 64*49 lanes so fc1 is one deep-K matmul ------------
    s2max_t = jnp.dot(s2max, t2_ref[...], preferred_element_type=f32)  # (TB, 3136)
    s2min_t = jnp.dot(s2min, t2_ref[...], preferred_element_type=f32)  # (TB, 3136)
    a2 = jnp.maximum(ws2p_ref[...] * s2max_t
                     + ws2n_ref[...] * s2min_t + bc2_ref[...], 0.0)     # (TB, 3136)

    # ---- fc1 -> relu -> fc2 -> log_softmax -------------------------------------
    h = jnp.maximum(jnp.dot(a2, w1_ref[...], preferred_element_type=f32)
                    + bf1_ref[...], 0.0)                           # (TB, 128)
    logits = jnp.dot(h, w2_ref[...], preferred_element_type=f32) + bf2_ref[...]

    m = jnp.max(logits, axis=1, keepdims=True)
    z = logits - m
    lse = jnp.log(jnp.sum(jnp.exp(z), axis=1, keepdims=True))
    out_ref[...] = z - lse                                         # (TB, ncls)


# ---------------------------------------------------------------------------
# Wrapper: parameter massaging + the single pallas_call
# ---------------------------------------------------------------------------
def pciltcnn_forward(x, params, *, tile_batch=128):
    B, C, H, W = x.shape
    assert (C, H, W) == (1, 28, 28), "PCILTCNN hardwires 1x28x28 (fc1 = 64*7*7)"
    n1, m1 = H, H // 2                      # 28, 14
    n2, m2 = m1, m1 // 2                    # 14, 7
    o1 = params["w_conv1"].shape[0]         # 32
    o2 = params["w_conv2"].shape[0]         # 64
    hid = params["w_fc1"].shape[1]          # 128
    ncls = params["w_fc2"].shape[1]         # 10

    # --- batch tiling: TB images per step, TB a multiple of 8 ------------------
    b8 = _round_up(max(B, 1), 8)
    tb = max(8, min(_round_up(tile_batch, 8), _round_up((b8 + 1) // 2, 8)))
    b_pad = _round_up(b8, tb)
    grid = b_pad // tb

    x_flat = x.reshape(B, H * W).astype(jnp.float32)
    if b_pad > B:
        x_flat = jnp.pad(x_flat, ((0, b_pad - B), (0, 0)))

    # --- VMEM-resident constants ------------------------------------------------
    k1 = _box_filter_matrix(n1).astype(jnp.bfloat16)    # (784,784)  0/1, bf16 exact
    pc1 = _pool_corner_matrices(n1)                     # (4,784,196) f32
    k2 = _box_filter_matrix(n2)                         # (196,196)  f32
    pc2 = _pool_corner_matrices(n2)                     # (4,196,49) f32
    t2 = jnp.tile(jnp.eye(m2 * m2, dtype=jnp.float32), (1, o2))   # (49, 3136)

    ws1 = jnp.sum(params["w_conv1"], axis=(1, 2, 3)).astype(jnp.float32)
    ws1p = jnp.maximum(ws1, 0.0).reshape(o1, 1, 1)
    ws1n = jnp.minimum(ws1, 0.0).reshape(o1, 1, 1)
    bc1 = params["b_conv1"].astype(jnp.float32).reshape(o1, 1, 1)

    ws2 = jnp.sum(params["w_conv2"], axis=(1, 2, 3)).astype(jnp.float32)
    nfeat = o2 * m2 * m2                                           # 3136
    ws2p = jnp.repeat(jnp.maximum(ws2, 0.0), m2 * m2).reshape(1, nfeat)
    ws2n = jnp.repeat(jnp.minimum(ws2, 0.0), m2 * m2).reshape(1, nfeat)
    bc2 = jnp.repeat(params["b_conv2"].astype(jnp.float32), m2 * m2).reshape(1, nfeat)

    w1 = params["w_fc1"].astype(jnp.float32)                       # (3136, hid)
    bf1 = params["b_fc1"].astype(jnp.float32).reshape(1, hid)
    w2 = params["w_fc2"].astype(jnp.float32)                       # (hid, ncls)
    bf2 = params["b_fc2"].astype(jnp.float32).reshape(1, ncls)

    consts = [k1, pc1, ws1p, ws1n, bc1, k2, pc2, t2, ws2p, ws2n, bc2,
              w1, bf1, w2, bf2]
    const_bytes = int(sum(int(a.size) * a.dtype.itemsize for a in consts))

    nn1, mm1, nn2, mm2 = n1 * n1, m1 * m1, n2 * n2, m2 * m2
    flops_per_img = 2 * (nn1 * nn1 + 4 * nn1 * mm1 + nn2 * nn2 + 4 * nn2 * mm2
                         + 2 * mm2 * nfeat + nfeat * hid + hid * ncls)
    cost = pl.CostEstimate(
        flops=int(b_pad) * int(flops_per_img),
        transcendentals=int(b_pad) * (ncls + 1),
        bytes_accessed=int(x_flat.size) * 4 + int(b_pad) * ncls * 4 + const_bytes)

    out = pl.pallas_call(
        _pciltcnn_kernel,
        out_shape=jax.ShapeDtypeStruct((b_pad, ncls), jnp.float32),
        grid=(grid,),
        in_specs=[pl.BlockSpec((tb, H * W), lambda b: (b, 0))]
                 + [_resident_spec(a) for a in consts],
        out_specs=pl.BlockSpec((tb, ncls), lambda b: (b, 0)),
        compiler_params=pltpu.CompilerParams(
            dimension_semantics=("parallel",),
            vmem_limit_bytes=48 * 1024 * 1024),
        cost_estimate=cost,
    )(x_flat, *consts)

    return out[:B]


# ---------------------------------------------------------------------------
# Pure-XLA reference with the same semantics as the PyTorch module (self-check)
# ---------------------------------------------------------------------------
def _reference_forward(x, params):
    def pcilt_conv(xin, w, b):
        q = jnp.clip(jnp.round(xin * 255.0), 0.0, 255.0)
        s = jnp.sum(q, axis=1, keepdims=True)                     # channel sum
        box = jax.lax.reduce_window(s, 0.0, jax.lax.add, (1, 1, 3, 3),
                                    (1, 1, 1, 1),
                                    [(0, 0), (0, 0), (1, 1), (1, 1)])
        ws = jnp.sum(w, axis=(1, 2, 3))
        return ws[None, :, None, None] * box + b[None, :, None, None]

    def maxpool2(v):
        return jax.lax.reduce_window(v, -jnp.inf, jax.lax.max,
                                     (1, 1, 2, 2), (1, 1, 2, 2), "VALID")

    y = maxpool2(jax.nn.relu(pcilt_conv(x, params["w_conv1"], params["b_conv1"])))
    y = maxpool2(jax.nn.relu(pcilt_conv(y, params["w_conv2"], params["b_conv2"])))
    y = y.reshape(y.shape[0], -1)
    y = jax.nn.relu(y @ params["w_fc1"] + params["b_fc1"])
    y = y @ params["w_fc2"] + params["b_fc2"]
    return jax.nn.log_softmax(y, axis=-1)


if __name__ == "__main__":
    key = jax.random.PRNGKey(0)
    kc1, kc2, kf1, kf2, kx = jax.random.split(key, 5)

    B = 2
    # fc1 = Linear(64*7*7, 128) hardwires the spatial size: input must be 1x28x28.
    x = jax.random.uniform(kx, (B, 1, 28, 28), dtype=jnp.float32)

    params = {
        # conv1: 1 -> 32, 3x3, pad 1 ; conv2: 32 -> 64, 3x3, pad 1
        # (scaled randn so activations stay in a numerically tame range)
        "w_conv1": 3e-4 * jax.random.normal(kc1, (32, 1, 3, 3), jnp.float32),
        "b_conv1": jnp.zeros((32,), jnp.float32),
        "w_conv2": 3e-6 * jax.random.normal(kc2, (64, 32, 3, 3), jnp.float32),
        "b_conv2": jnp.zeros((64,), jnp.float32),
        # fc layers stored as (in, out); rows of w_fc1 follow the NCHW flatten
        # order c*49 + y*7 + x, exactly like x.view(B, -1) in the reference.
        "w_fc1": 3e-2 * jax.random.normal(kf1, (64 * 7 * 7, 128), jnp.float32),
        "b_fc1": jnp.zeros((128,), jnp.float32),
        "w_fc2": 1e-1 * jax.random.normal(kf2, (128, 10), jnp.float32),
        "b_fc2": jnp.zeros((10,), jnp.float32),
    }

    out = jax.block_until_ready(pciltcnn_forward(x, params))
    ref = jax.block_until_ready(_reference_forward(x, params))

    assert out.shape == (B, 10)
    assert bool(jnp.all(jnp.isfinite(out)))
    row_sums = jnp.sum(jnp.exp(out), axis=1)
    assert bool(jnp.all(jnp.abs(row_sums - 1.0) < 1e-3))
    assert bool(jnp.allclose(out, ref, atol=1e-2, rtol=1e-2))
    print("KERNEL_OK")
</pallas_src>

<mosaic_0001>
module attributes {stable_mosaic.version = 11 : i64} {
  func.func @_pciltcnn_kernel(%arg0: i32, %arg1: memref<8x784xf32, #tpu.memory_space<vmem>>, %arg2: memref<784x784xbf16, #tpu.memory_space<vmem>>, %arg3: memref<4x784x196xf32, #tpu.memory_space<vmem>>, %arg4: memref<32x1x1xf32, #tpu.memory_space<vmem>>, %arg5: memref<32x1x1xf32, #tpu.memory_space<vmem>>, %arg6: memref<32x1x1xf32, #tpu.memory_space<vmem>>, %arg7: memref<196x196xf32, #tpu.memory_space<vmem>>, %arg8: memref<4x196x49xf32, #tpu.memory_space<vmem>>, %arg9: memref<49x3136xf32, #tpu.memory_space<vmem>>, %arg10: memref<1x3136xf32, #tpu.memory_space<vmem>>, %arg11: memref<1x3136xf32, #tpu.memory_space<vmem>>, %arg12: memref<1x3136xf32, #tpu.memory_space<vmem>>, %arg13: memref<3136x128xf32, #tpu.memory_space<vmem>>, %arg14: memref<1x128xf32, #tpu.memory_space<vmem>>, %arg15: memref<128x10xf32, #tpu.memory_space<vmem>>, %arg16: memref<1x10xf32, #tpu.memory_space<vmem>>, %arg17: memref<8x10xf32, #tpu.memory_space<vmem>>) attributes {dimension_semantics = [#tpu.dimension_semantics<parallel>], iteration_bounds = array<i64: 1>, scalar_prefetch = 0 : i64, scratch_operands = 0 : i64, tpu.core_type = #tpu.core_type<tc>, window_params = [{transform_indices = @transform_0, window_bounds = array<i64: 8, 784>}, {pipeline_mode = #tpu.pipeline_mode<synchronous>, transform_indices = @transform_1, window_bounds = array<i64: 784, 784>}, {pipeline_mode = #tpu.pipeline_mode<synchronous>, transform_indices = @transform_2, window_bounds = array<i64: 4, 784, 196>}, {pipeline_mode = #tpu.pipeline_mode<synchronous>, transform_indices = @transform_3, window_bounds = array<i64: 32, 1, 1>}, {pipeline_mode = #tpu.pipeline_mode<synchronous>, transform_indices = @transform_4, window_bounds = array<i64: 32, 1, 1>}, {pipeline_mode = #tpu.pipeline_mode<synchronous>, transform_indices = @transform_5, window_bounds = array<i64: 32, 1, 1>}, {pipeline_mode = #tpu.pipeline_mode<synchronous>, transform_indices = @transform_6, window_bounds = array<i64: 196, 196>}, {pipeline_mode = #tpu.pipeline_mode<synchronous>, transform_indices = @transform_7, window_bounds = array<i64: 4, 196, 49>}, {pipeline_mode = #tpu.pipeline_mode<synchronous>, transform_indices = @transform_8, window_bounds = array<i64: 49, 3136>}, {pipeline_mode = #tpu.pipeline_mode<synchronous>, transform_indices = @transform_9, window_bounds = array<i64: 1, 3136>}, {pipeline_mode = #tpu.pipeline_mode<synchronous>, transform_indices = @transform_10, window_bounds = array<i64: 1, 3136>}, {pipeline_mode = #tpu.pipeline_mode<synchronous>, transform_indices = @transform_11, window_bounds = array<i64: 1, 3136>}, {pipeline_mode = #tpu.pipeline_mode<synchronous>, transform_indices = @transform_12, window_bounds = array<i64: 3136, 128>}, {pipeline_mode = #tpu.pipeline_mode<synchronous>, transform_indices = @transform_13, window_bounds = array<i64: 1, 128>}, {pipeline_mode = #tpu.pipeline_mode<synchronous>, transform_indices = @transform_14, window_bounds = array<i64: 128, 10>}, {pipeline_mode = #tpu.pipeline_mode<synchronous>, transform_indices = @transform_15, window_bounds = array<i64: 1, 10>}, {transform_indices = @transform_16, window_bounds = array<i64: 8, 10>}]} {
    %c0 = arith.constant 0 : index
    %c0_0 = arith.constant 0 : index
    %0 = vector.load %arg1[%c0, %c0_0] : memref<8x784xf32, #tpu.memory_space<vmem>>, vector<8x784xf32>
    %cst = arith.constant 2.550000e+02 : f32
    %1 = vector.broadcast %cst : f32 to vector<8x784xf32>
    %2 = arith.mulf %0, %1 : vector<8x784xf32>
    %3 = math.roundeven %2 : vector<8x784xf32>
    %cst_1 = arith.constant 0.000000e+00 : f32
    %cst_2 = arith.constant 2.550000e+02 : f32
    %4 = vector.broadcast %cst_1 : f32 to vector<8x784xf32>
    %5 = arith.maximumf %4, %3 : vector<8x784xf32>
    %6 = vector.broadcast %cst_2 : f32 to vector<8x784xf32>
    %7 = arith.minimumf %6, %5 : vector<8x784xf32>
    %8 = arith.truncf %7 : vector<8x784xf32> to vector<8x784xbf16>
    %c0_3 = arith.constant 0 : index
    %c0_4 = arith.constant 0 : index
    %9 = vector.load %arg2[%c0_3, %c0_4] : memref<784x784xbf16, #tpu.memory_space<vmem>>, vector<784x784xbf16>
    %cst_5 = arith.constant dense<0.000000e+00> : vector<8x784xf32>
    %10 = tpu.matmul %8, %9, %cst_5 {dimension_numbers = #tpu.dot_dimension_numbers<[1], [0], [0], [1], [0, 0, 1, 1], [], []>} : vector<8x784xbf16>, vector<784x784xbf16>, vector<8x784xf32> -> vector<8x784xf32>
    %c0_6 = arith.constant 0 : index
    %c0_7 = arith.constant 0 : index
    %c0_8 = arith.constant 0 : index
    %11 = vector.load %arg3[%c0_6, %c0_7, %c0_8] : memref<4x784x196xf32, #tpu.memory_space<vmem>>, vector<1x784x196xf32>
    %12 = vector.shape_cast %11 : vector<1x784x196xf32> to vector<784x196xf32>
    %cst_9 = arith.constant dense<0.000000e+00> : vector<8x196xf32>
    %13 = tpu.matmul %10, %12, %cst_9 {dimension_numbers = #tpu.dot_dimension_numbers<[1], [0], [0], [1], [0, 0, 1, 1], [], []>} : vector<8x784xf32>, vector<784x196xf32>, vector<8x196xf32> -> vector<8x196xf32>
    %c1 = arith.constant 1 : index
    %c0_10 = arith.constant 0 : index
    %c0_11 = arith.constant 0 : index
    %14 = vector.load %arg3[%c1, %c0_10, %c0_11] : memref<4x784x196xf32, #tpu.memory_space<vmem>>, vector<1x784x196xf32>
    %15 = vector.shape_cast %14 : vector<1x784x196xf32> to vector<784x196xf32>
    %cst_12 = arith.constant dense<0.000000e+00> : vector<8x196xf32>
    %16 = tpu.matmul %10, %15, %cst_12 {dimension_numbers = #tpu.dot_dimension_numbers<[1], [0], [0], [1], [0, 0, 1, 1], [], []>} : vector<8x784xf32>, vector<784x196xf32>, vector<8x196xf32> -> vector<8x196xf32>
    %c2 = arith.constant 2 : index
    %c0_13 = arith.constant 0 : index
    %c0_14 = arith.constant 0 : index
    %17 = vector.load %arg3[%c2, %c0_13, %c0_14] : memref<4x784x196xf32, #tpu.memory_space<vmem>>, vector<1x784x196xf32>
    %18 = vector.shape_cast %17 : vector<1x784x196xf32> to vector<784x196xf32>
    %cst_15 = arith.constant dense<0.000000e+00> : vector<8x196xf32>
    %19 = tpu.matmul %10, %18, %cst_15 {dimension_numbers = #tpu.dot_dimension_numbers<[1], [0], [0], [1], [0, 0, 1, 1], [], []>} : vector<8x784xf32>, vector<784x196xf32>, vector<8x196xf32> -> vector<8x196xf32>
    %c3 = arith.constant 3 : index
    %c0_16 = arith.constant 0 : index
    %c0_17 = arith.constant 0 : index
    %20 = vector.load %arg3[%c3, %c0_16, %c0_17] : memref<4x784x196xf32, #tpu.memory_space<vmem>>, vector<1x784x196xf32>
    %21 = vector.shape_cast %20 : vector<1x784x196xf32> to vector<784x196xf32>
    %cst_18 = arith.constant dense<0.000000e+00> : vector<8x196xf32>
    %22 = tpu.matmul %10, %21, %cst_18 {dimension_numbers = #tpu.dot_dimension_numbers<[1], [0], [0], [1], [0, 0, 1, 1], [], []>} : vector<8x784xf32>, vector<784x196xf32>, vector<8x196xf32> -> vector<8x196xf32>
    %23 = arith.maximumf %13, %16 : vector<8x196xf32>
    %24 = arith.maximumf %19, %22 : vector<8x196xf32>
    %25 = arith.maximumf %23, %24 : vector<8x196xf32>
    %26 = arith.minimumf %13, %16 : vector<8x196xf32>
    %27 = arith.minimumf %19, %22 : vector<8x196xf32>
    %28 = arith.minimumf %26, %27 : vector<8x196xf32>
    %c0_19 = arith.constant 0 : index
    %c0_20 = arith.constant 0 : index
    %c0_21 = arith.constant 0 : index
    %29 = vector.load %arg4[%c0_19, %c0_20, %c0_21] : memref<32x1x1xf32, #tpu.memory_space<vmem>>, vector<32x1x1xf32>
    %30 = vector.shape_cast %25 : vector<8x196xf32> to vector<1x8x196xf32>
    %31 = vector.broadcast %29 : vector<32x1x1xf32> to vector<32x8x196xf32>
    %32 = vector.broadcast %30 : vector<1x8x196xf32> to vector<32x8x196xf32>
    %33 = arith.mulf %31, %32 : vector<32x8x196xf32>
    %c0_22 = arith.constant 0 : index
    %c0_23 = arith.constant 0 : index
    %c0_24 = arith.constant 0 : index
    %34 = vector.load %arg5[%c0_22, %c0_23, %c0_24] : memref<32x1x1xf32, #tpu.memory_space<vmem>>, vector<32x1x1xf32>
    %35 = vector.shape_cast %28 : vector<8x196xf32> to vector<1x8x196xf32>
    %36 = vector.broadcast %34 : vector<32x1x1xf32> to vector<32x8x196xf32>
    %37 = vector.broadcast %35 : vector<1x8x196xf32> to vector<32x8x196xf32>
    %38 = arith.mulf %36, %37 : vector<32x8x196xf32>
    %39 = arith.addf %33, %38 : vector<32x8x196xf32>
    %c0_25 = arith.constant 0 : index
    %c0_26 = arith.constant 0 : index
    %c0_27 = arith.constant 0 : index
    %40 = vector.load %arg6[%c0_25, %c0_26, %c0_27] : memref<32x1x1xf32, #tpu.memory_space<vmem>>, vector<32x1x1xf32>
    %41 = vector.broadcast %40 : vector<32x1x1xf32> to vector<32x8x196xf32>
    %42 = arith.addf %39, %41 : vector<32x8x196xf32>
    %cst_28 = arith.constant 0.000000e+00 : f32
    %43 = vector.broadcast %cst_28 : f32 to vector<32x8x196xf32>
    %44 = arith.maximumf %42, %43 : vector<32x8x196xf32>
    %cst_29 = arith.constant 2.550000e+02 : f32
    %45 = vector.broadcast %cst_29 : f32 to vector<32x8x196xf32>
    %46 = arith.mulf %44, %45 : vector<32x8x196xf32>
    %47 = math.roundeven %46 : vector<32x8x196xf32>
    %cst_30 = arith.constant 0.000000e+00 : f32
    %cst_31 = arith.constant 2.550000e+02 : f32
    %48 = vector.broadcast %cst_30 : f32 to vector<32x8x196xf32>
    %49 = arith.maximumf %48, %47 : vector<32x8x196xf32>
    %50 = vector.broadcast %cst_31 : f32 to vector<32x8x196xf32>
    %51 = arith.minimumf %50, %49 : vector<32x8x196xf32>
    %cst_32 = arith.constant dense<0.000000e+00> : vector<8x196xf32>
    %52 = vector.multi_reduction <add>, %51, %cst_32 [0] : vector<32x8x196xf32> to vector<8x196xf32>
    %c0_33 = arith.constant 0 : index
    %c0_34 = arith.constant 0 : index
    %53 = vector.load %arg7[%c0_33, %c0_34] : memref<196x196xf32, #tpu.memory_space<vmem>>, vector<196x196xf32>
    %cst_35 = arith.constant dense<0.000000e+00> : vector<8x196xf32>
    %54 = tpu.matmul %52, %53, %cst_35 {dimension_numbers = #tpu.dot_dimension_numbers<[1], [0], [0], [1], [0, 0, 1, 1], [], []>} : vector<8x196xf32>, vector<196x196xf32>, vector<8x196xf32> -> vector<8x196xf32>
    %c0_36 = arith.constant 0 : index
    %c0_37 = arith.constant 0 : index
    %c0_38 = arith.constant 0 : index
    %55 = vector.load %arg8[%c0_36, %c0_37, %c0_38] : memref<4x196x49xf32, #tpu.memory_space<vmem>>, vector<1x196x49xf32>
    %56 = vector.shape_cast %55 : vector<1x196x49xf32> to vector<196x49xf32>
    %cst_39 = arith.constant dense<0.000000e+00> : vector<8x49xf32>
    %57 = tpu.matmul %54, %56, %cst_39 {dimension_numbers = #tpu.dot_dimension_numbers<[1], [0], [0], [1], [0, 0, 1, 1], [], []>} : vector<8x196xf32>, vector<196x49xf32>, vector<8x49xf32> -> vector<8x49xf32>
    %c1_40 = arith.constant 1 : index
    %c0_41 = arith.constant 0 : index
    %c0_42 = arith.constant 0 : index
    %58 = vector.load %arg8[%c1_40, %c0_41, %c0_42] : memref<4x196x49xf32, #tpu.memory_space<vmem>>, vector<1x196x49xf32>
    %59 = vector.shape_cast %58 : vector<1x196x49xf32> to vector<196x49xf32>
    %cst_43 = arith.constant dense<0.000000e+00> : vector<8x49xf32>
    %60 = tpu.matmul %54, %59, %cst_43 {dimension_numbers = #tpu.dot_dimension_numbers<[1], [0], [0], [1], [0, 0, 1, 1], [], []>} : vector<8x196xf32>, vector<196x49xf32>, vector<8x49xf32> -> vector<8x49xf32>
    %c2_44 = arith.constant 2 : index
    %c0_45 = arith.constant 0 : index
    %c0_46 = arith.constant 0 : index
    %61 = vector.load %arg8[%c2_44, %c0_45, %c0_46] : memref<4x196x49xf32, #tpu.memory_space<vmem>>, vector<1x196x49xf32>
    %62 = vector.shape_cast %61 : vector<1x196x49xf32> to vector<196x49xf32>
    %cst_47 = arith.constant dense<0.000000e+00> : vector<8x49xf32>
    %63 = tpu.matmul %54, %62, %cst_47 {dimension_numbers = #tpu.dot_dimension_numbers<[1], [0], [0], [1], [0, 0, 1, 1], [], []>} : vector<8x196xf32>, vector<196x49xf32>, vector<8x49xf32> -> vector<8x49xf32>
    %c3_48 = arith.constant 3 : index
    %c0_49 = arith.constant 0 : index
    %c0_50 = arith.constant 0 : index
    %64 = vector.load %arg8[%c3_48, %c0_49, %c0_50] : memref<4x196x49xf32, #tpu.memory_space<vmem>>, vector<1x196x49xf32>
    %65 = vector.shape_cast %64 : vector<1x196x49xf32> to vector<196x49xf32>
    %cst_51 = arith.constant dense<0.000000e+00> : vector<8x49xf32>
    %66 = tpu.matmul %54, %65, %cst_51 {dimension_numbers = #tpu.dot_dimension_numbers<[1], [0], [0], [1], [0, 0, 1, 1], [], []>} : vector<8x196xf32>, vector<196x49xf32>, vector<8x49xf32> -> vector<8x49xf32>
    %67 = arith.maximumf %57, %60 : vector<8x49xf32>
    %68 = arith.maximumf %63, %66 : vector<8x49xf32>
    %69 = arith.maximumf %67, %68 : vector<8x49xf32>
    %70 = arith.minimumf %57, %60 : vector<8x49xf32>
    %71 = arith.minimumf %63, %66 : vector<8x49xf32>
    %72 = arith.minimumf %70, %71 : vector<8x49xf32>
    %c0_52 = arith.constant 0 : index
    %c0_53 = arith.constant 0 : index
    %73 = vector.load %arg9[%c0_52, %c0_53] : memref<49x3136xf32, #tpu.memory_space<vmem>>, vector<49x3136xf32>
    %cst_54 = arith.constant dense<0.000000e+00> : vector<8x3136xf32>
    %74 = tpu.matmul %69, %73, %cst_54 {dimension_numbers = #tpu.dot_dimension_numbers<[1], [0], [0], [1], [0, 0, 1, 1], [], []>} : vector<8x49xf32>, vector<49x3136xf32>, vector<8x3136xf32> -> vector<8x3136xf32>
    %c0_55 = arith.constant 0 : index
    %c0_56 = arith.constant 0 : index
    %75 = vector.load %arg9[%c0_55, %c0_56] : memref<49x3136xf32, #tpu.memory_space<vmem>>, vector<49x3136xf32>
    %cst_57 = arith.constant dense<0.000000e+00> : vector<8x3136xf32>
    %76 = tpu.matmul %72, %75, %cst_57 {dimension_numbers = #tpu.dot_dimension_numbers<[1], [0], [0], [1], [0, 0, 1, 1], [], []>} : vector<8x49xf32>, vector<49x3136xf32>, vector<8x3136xf32> -> vector<8x3136xf32>
    %c0_58 = arith.constant 0 : index
    %c0_59 = arith.constant 0 : index
    %77 = vector.load %arg10[%c0_58, %c0_59] : memref<1x3136xf32, #tpu.memory_space<vmem>>, vector<1x3136xf32>
    %78 = vector.broadcast %77 : vector<1x3136xf32> to vector<8x3136xf32>
    %79 = arith.mulf %78, %74 : vector<8x3136xf32>
    %c0_60 = arith.constant 0 : index
    %c0_61 = arith.constant 0 : index
    %80 = vector.load %arg11[%c0_60, %c0_61] : memref<1x3136xf32, #tpu.memory_space<vmem>>, vector<1x3136xf32>
    %81 = vector.broadcast %80 : vector<1x3136xf32> to vector<8x3136xf32>
    %82 = arith.mulf %81, %76 : vector<8x3136xf32>
    %83 = arith.addf %79, %82 : vector<8x3136xf32>
    %c0_62 = arith.constant 0 : index
    %c0_63 = arith.constant 0 : index
    %84 = vector.load %arg12[%c0_62, %c0_63] : memref<1x3136xf32, #tpu.memory_space<vmem>>, vector<1x3136xf32>
    %85 = vector.broadcast %84 : vector<1x3136xf32> to vector<8x3136xf32>
    %86 = arith.addf %83, %85 : vector<8x3136xf32>
    %cst_64 = arith.constant 0.000000e+00 : f32
    %87 = vector.broadcast %cst_64 : f32 to vector<8x3136xf32>
    %88 = arith.maximumf %86, %87 : vector<8x3136xf32>
    %c0_65 = arith.constant 0 : index
    %c0_66 = arith.constant 0 : index
    %89 = vector.load %arg13[%c0_65, %c0_66] : memref<3136x128xf32, #tpu.memory_space<vmem>>, vector<3136x128xf32>
    %cst_67 = arith.constant dense<0.000000e+00> : vector<8x128xf32>
    %90 = tpu.matmul %88, %89, %cst_67 {dimension_numbers = #tpu.dot_dimension_numbers<[1], [0], [0], [1], [0, 0, 1, 1], [], []>} : vector<8x3136xf32>, vector<3136x128xf32>, vector<8x128xf32> -> vector<8x128xf32>
    %c0_68 = arith.constant 0 : index
    %c0_69 = arith.constant 0 : index
    %91 = vector.load %arg14[%c0_68, %c0_69] : memref<1x128xf32, #tpu.memory_space<vmem>>, vector<1x128xf32>
    %92 = vector.broadcast %91 : vector<1x128xf32> to vector<8x128xf32>
    %93 = arith.addf %90, %92 : vector<8x128xf32>
    %cst_70 = arith.constant 0.000000e+00 : f32
    %94 = vector.broadcast %cst_70 : f32 to vector<8x128xf32>
    %95 = arith.maximumf %93, %94 : vector<8x128xf32>
    %c0_71 = arith.constant 0 : index
    %c0_72 = arith.constant 0 : index
    %96 = vector.load %arg15[%c0_71, %c0_72] : memref<128x10xf32, #tpu.memory_space<vmem>>, vector<128x10xf32>
    %cst_73 = arith.constant dense<0.000000e+00> : vector<8x10xf32>
    %97 = tpu.matmul %95, %96, %cst_73 {dimension_numbers = #tpu.dot_dimension_numbers<[1], [0], [0], [1], [0, 0, 1, 1], [], []>} : vector<8x128xf32>, vector<128x10xf32>, vector<8x10xf32> -> vector<8x10xf32>
    %c0_74 = arith.constant 0 : index
    %c0_75 = arith.constant 0 : index
    %98 = vector.load %arg16[%c0_74, %c0_75] : memref<1x10xf32, #tpu.memory_space<vmem>>, vector<1x10xf32>
    %99 = vector.broadcast %98 : vector<1x10xf32> to vector<8x10xf32>
    %100 = arith.addf %97, %99 : vector<8x10xf32>
    %cst_76 = arith.constant dense<0xFF800000> : vector<8xf32>
    %101 = vector.multi_reduction <maximumf>, %100, %cst_76 [1] : vector<8x10xf32> to vector<8xf32>
    %102 = vector.shape_cast %101 : vector<8xf32> to vector<8x1xf32>
    %103 = vector.broadcast %102 : vector<8x1xf32> to vector<8x10xf32>
    %104 = arith.subf %100, %103 : vector<8x10xf32>
    %105 = math.exp %104 : vector<8x10xf32>
    %cst_77 = arith.constant dense<0.000000e+00> : vector<8xf32>
    %106 = vector.multi_reduction <add>, %105, %cst_77 [1] : vector<8x10xf32> to vector<8xf32>
    %107 = vector.shape_cast %106 : vector<8xf32> to vector<8x1xf32>
    %108 = math.log %107 : vector<8x1xf32>
    %109 = vector.broadcast %108 : vector<8x1xf32> to vector<8x10xf32>
    %110 = arith.subf %104, %109 : vector<8x10xf32>
    %c0_78 = arith.constant 0 : index
    %c0_79 = arith.constant 0 : index
    %111 = vector.load %arg17[%c0_78, %c0_79] : memref<8x10xf32, #tpu.memory_space<vmem>>, vector<8x10xf32>
    tpu.vector_store %arg17[%c0_78, %c0_79], %110 {strides = array<i32>} : memref<8x10xf32, #tpu.memory_space<vmem>>, vector<8x10xf32>,
    return
  }
  func.func @transform_0(%arg0: i32) -> (i32, i32) {
    %c0_i32 = arith.constant 0 : i32
    %c0_i32_0 = arith.constant 0 : i32
    return %arg0, %c0_i32 : i32, i32
  }
  func.func @transform_1(%arg0: i32) -> (i32, i32) {
    %c0_i32 = arith.constant 0 : i32
    %c0_i32_0 = arith.constant 0 : i32
    %c0_i32_1 = arith.constant 0 : i32
    return %c0_i32, %c0_i32_0 : i32, i32
  }
  func.func @transform_2(%arg0: i32) -> (i32, i32, i32) {
    %c0_i32 = arith.constant 0 : i32
    %c0_i32_0 = arith.constant 0 : i32
    %c0_i32_1 = arith.constant 0 : i32
    %c0_i32_2 = arith.constant 0 : i32
    return %c0_i32, %c0_i32_0, %c0_i32_1 : i32, i32, i32
  }
  func.func @transform_3(%arg0: i32) -> (i32, i32, i32) {
    %c0_i32 = arith.constant 0 : i32
    %c0_i32_0 = arith.constant 0 : i32
    %c0_i32_1 = arith.constant 0 : i32
    %c0_i32_2 = arith.constant 0 : i32
    return %c0_i32, %c0_i32_0, %c0_i32_1 : i32, i32, i32
  }
  func.func @transform_4(%arg0: i32) -> (i32, i32, i32) {
    %c0_i32 = arith.constant 0 : i32
    %c0_i32_0 = arith.constant 0 : i32
    %c0_i32_1 = arith.constant 0 : i32
    %c0_i32_2 = arith.constant 0 : i32
    return %c0_i32, %c0_i32_0, %c0_i32_1 : i32, i32, i32
  }
  func.func @transform_5(%arg0: i32) -> (i32, i32, i32) {
    %c0_i32 = arith.constant 0 : i32
    %c0_i32_0 = arith.constant 0 : i32
    %c0_i32_1 = arith.constant 0 : i32
    %c0_i32_2 = arith.constant 0 : i32
    return %c0_i32, %c0_i32_0, %c0_i32_1 : i32, i32, i32
  }
  func.func @transform_6(%arg0: i32) -> (i32, i32) {
    %c0_i32 = arith.constant 0 : i32
    %c0_i32_0 = arith.constant 0 : i32
    %c0_i32_1 = arith.constant 0 : i32
    return %c0_i32, %c0_i32_0 : i32, i32
  }
  func.func @transform_7(%arg0: i32) -> (i32, i32, i32) {
    %c0_i32 = arith.constant 0 : i32
    %c0_i32_0 = arith.constant 0 : i32
    %c0_i32_1 = arith.constant 0 : i32
    %c0_i32_2 = arith.constant 0 : i32
    return %c0_i32, %c0_i32_0, %c0_i32_1 : i32, i32, i32
  }
  func.func @transform_8(%arg0: i32) -> (i32, i32) {
    %c0_i32 = arith.constant 0 : i32
    %c0_i32_0 = arith.constant 0 : i32
    %c0_i32_1 = arith.constant 0 : i32
    return %c0_i32, %c0_i32_0 : i32, i32
  }
  func.func @transform_9(%arg0: i32) -> (i32, i32) {
    %c0_i32 = arith.constant 0 : i32
    %c0_i32_0 = arith.constant 0 : i32
    %c0_i32_1 = arith.constant 0 : i32
    return %c0_i32, %c0_i32_0 : i32, i32
  }
  func.func @transform_10(%arg0: i32) -> (i32, i32) {
    %c0_i32 = arith.constant 0 : i32
    %c0_i32_0 = arith.constant 0 : i32
    %c0_i32_1 = arith.constant 0 : i32
    return %c0_i32, %c0_i32_0 : i32, i32
  }
  func.func @transform_11(%arg0: i32) -> (i32, i32) {
    %c0_i32 = arith.constant 0 : i32
    %c0_i32_0 = arith.constant 0 : i32
    %c0_i32_1 = arith.constant 0 : i32
    return %c0_i32, %c0_i32_0 : i32, i32
  }
  func.func @transform_12(%arg0: i32) -> (i32, i32) {
    %c0_i32 = arith.constant 0 : i32
    %c0_i32_0 = arith.constant 0 : i32
    %c0_i32_1 = arith.constant 0 : i32
    return %c0_i32, %c0_i32_0 : i32, i32
  }
  func.func @transform_13(%arg0: i32) -> (i32, i32) {
    %c0_i32 = arith.constant 0 : i32
    %c0_i32_0 = arith.constant 0 : i32
    %c0_i32_1 = arith.constant 0 : i32
    return %c0_i32, %c0_i32_0 : i32, i32
  }
  func.func @transform_14(%arg0: i32) -> (i32, i32) {
    %c0_i32 = arith.constant 0 : i32
    %c0_i32_0 = arith.constant 0 : i32
    %c0_i32_1 = arith.constant 0 : i32
    return %c0_i32, %c0_i32_0 : i32, i32
  }
  func.func @transform_15(%arg0: i32) -> (i32, i32) {
    %c0_i32 = arith.constant 0 : i32
    %c0_i32_0 = arith.constant 0 : i32
    %c0_i32_1 = arith.constant 0 : i32
    return %c0_i32, %c0_i32_0 : i32, i32
  }
  func.func @transform_16(%arg0: i32) -> (i32, i32) {
    %c0_i32 = arith.constant 0 : i32
    %c0_i32_0 = arith.constant 0 : i32
    return %arg0, %c0_i32 : i32, i32
  }
}

</mosaic_0001>

<bundles_post_ra>
// kernel: tpu_custom_call.1
= control target key start
LH: loop header
LB: loop body
LE: loop exit
PB: predicated region body
PF: predicated region fallthrough
CT: control target
= control target key end

     0   :  { %s24019_s0 = inlined_call_operand.vmem [shape: f32[8,784], index: 0, kind: input, shape index: {}]   ;;  %s24020_s1 = inlined_call_operand.vmem [shape: bf16[784,784], index: 1, kind: input, shape index: {}]   ;;  %s24021_s2 = inlined_call_operand.vmem [shape: f32[4,784,196], index: 2, kind: input, shape index: {}]   ;;  %s24022_s3 = inlined_call_operand.vmem [shape: f32[32,1,1], index: 3, kind: input, shape index: {}]   ;;  %s24023_s4 = inlined_call_operand.vmem [shape: f32[32,1,1], index: 4, kind: input, shape index: {}]   ;;  %s24024_s5 = inlined_call_operand.vmem [shape: f32[32,1,1], index: 5, kind: input, shape index: {}]   ;;  %s24025_s6 = inlined_call_operand.vmem [shape: f32[196,196], index: 6, kind: input, shape index: {}]   ;;  %s24026_s7 = inlined_call_operand.vmem [shape: f32[4,196,49], index: 7, kind: input, shape index: {}]   ;;  %s24027_s8 = inlined_call_operand.vmem [shape: f32[49,3136], index: 8, kind: input, shape index: {}]   ;;  %s24028_s9 = inlined_call_operand.vmem [shape: f32[1,3136], index: 9, kind: input, shape index: {}]   ;;  %s24029_s10 = inlined_call_operand.vmem [shape: f32[1,3136], index: 10, kind: input, shape index: {}]   ;;  %s24030_s11 = inlined_call_operand.vmem [shape: f32[1,3136], index: 11, kind: input, shape index: {}]   ;;  %s24031_s12 = inlined_call_operand.vmem [shape: f32[3136,128], index: 12, kind: input, shape index: {}]   ;;  %s24032_s13 = inlined_call_operand.vmem [shape: f32[1,128], index: 13, kind: input, shape index: {}]   ;;  %s24033_s14 = inlined_call_operand.vmem [shape: f32[128,10], index: 14, kind: input, shape index: {}]   ;;  %s24034_s15 = inlined_call_operand.vmem [shape: f32[1,10], index: 15, kind: input, shape index: {}]   ;;  %s24035_s16 = inlined_call_operand.hbm [shape: f32[8,10], index: 16, kind: output, shape index: {}]  }
   0x1   :  { %24246 = sst [smem:[#allocation130_spill]] %s24019_s0 }
   0x2   :  { %v14741_v0 = vld [vmem:[%s24020_s1 + $0x4] ss:$28 sps:$4 sm:$0xff]   ;;  %v14743_v1 = vld [vmem:[%s24020_s1 + $0xc] ss:$28 sps:$4 sm:$0xff]   ;;  %v14747_v4 = vld [vmem:[%s24020_s1 + $0x3c] ss:$28 sps:$4 sm:$0xff]  }
   0x3   :  { %2257 = vmatprep.subr.bf16.mxu0 %v14741_v0  ;;  %v14745_v2 = vld [vmem:[%s24020_s1] ss:$28 sps:$4 sm:$0xff]   ;;  %v14746_v3 = vld [vmem:[%s24020_s1 + $0x8] ss:$28 sps:$4 sm:$0xff]   ;;  %2421 = vmatprep.subr.bf16.mxu1 %v14743_v1  ;;  %v14751_v6 = vld [vmem:[%s24020_s1 + $0x38] ss:$28 sps:$4 sm:$0xff]  }
   0x4   :  { %2258 = vmatpush1.bf16.msra.mxu0 %v14745_v2  ;;  %2422 = vmatpush1.bf16.msra.mxu1 %v14746_v3  ;;  %v14749_v5 = vld [vmem:[%s24020_s1 + $0x44] ss:$28 sps:$4 sm:$0xff]   ;;  %v14753_v8 = vld [vmem:[%s24020_s1 + $0x74] ss:$28 sps:$4 sm:$0xff]   ;;  %v14755_v9 = vld [vmem:[%s24020_s1 + $0x7c] ss:$28 sps:$4 sm:$0xff]  }
   0x5   :  { %2259 = vmatprep.subr.bf16.mxu0 %v14747_v4  ;;  %v14752_v7 = vld [vmem:[%s24020_s1 + $0x40] ss:$28 sps:$4 sm:$0xff]   ;;  %2423 = vmatprep.subr.bf16.mxu1 %v14749_v5  ;;  %v14757_v10 = vld [vmem:[%s24020_s1 + $0x70] ss:$28 sps:$4 sm:$0xff]   ;;  %v14758_v11 = vld [vmem:[%s24020_s1 + $0x78] ss:$28 sps:$4 sm:$0xff]  }
   0x6   :  { %v14759_v12 = vld [vmem:[%s24020_s1 + $0xac] ss:$28 sps:$4 sm:$0xff]   ;;  %v14761_v13 = vld [vmem:[%s24020_s1 + $0xb4] ss:$28 sps:$4 sm:$0xff]   ;;  %v14765_v16 = vld [vmem:[%s24020_s1 + $0xe4] ss:$28 sps:$4 sm:$0xff]  }
   0x7   :  { %v14763_v14 = vld [vmem:[%s24020_s1 + $0xa8] ss:$28 sps:$4 sm:$0xff]   ;;  %v14764_v15 = vld [vmem:[%s24020_s1 + $0xb0] ss:$28 sps:$4 sm:$0xff]   ;;  %v14769_v18 = vld [vmem:[%s24020_s1 + $0xe0] ss:$28 sps:$4 sm:$0xff]  }
   0x8   :  { %2260 = vmatpush1.bf16.msra.mxu0 %v14751_v6  ;;  %2424 = vmatpush1.bf16.msra.mxu1 %v14752_v7  ;;  %v14767_v17 = vld [vmem:[%s24020_s1 + $0xec] ss:$28 sps:$4 sm:$0xff]   ;;  %v14771_v20 = vld [vmem:[%s24020_s1 + $0x11c] ss:$28 sps:$4 sm:$0xff]   ;;  %v14773_v21 = vld [vmem:[%s24020_s1 + $0x124] ss:$28 sps:$4 sm:$0xff]  }
   0x9   :  { %2261 = vmatprep.subr.bf16.mxu0 %v14753_v8  ;;  %2425 = vmatprep.subr.bf16.mxu1 %v14755_v9  ;;  %v14770_v19 = vld [vmem:[%s24020_s1 + $0xe8] ss:$28 sps:$4 sm:$0xff]   ;;  %v14775_v22 = vld [vmem:[%s24020_s1 + $0x118] ss:$28 sps:$4 sm:$0xff]   ;;  %v14776_v23 = vld [vmem:[%s24020_s1 + $0x120] ss:$28 sps:$4 sm:$0xff]  }
   0xa   :  { %v14777_v24 = vld [vmem:[%s24020_s1 + $0x154] ss:$28 sps:$4 sm:$0xff]   ;;  %v14779_v25 = vld [vmem:[%s24020_s1 + $0x15c] ss:$28 sps:$4 sm:$0xff]   ;;  %v14783_v28 = vld [vmem:[%s24020_s1 + $0x18c] ss:$28 sps:$4 sm:$0xff]  }
   0xb   :  { %v14781_v26 = vld [vmem:[%s24020_s1 + $0x150] ss:$28 sps:$4 sm:$0xff]   ;;  %v14782_v27 = vld [vmem:[%s24020_s1 + $0x158] ss:$28 sps:$4 sm:$0xff]   ;;  %v14787_v30 = vld [vmem:[%s24020_s1 + $0x188] ss:$28 sps:$4 sm:$0xff]  }
   0xc   :  { %2262 = vmatpush1.bf16.msra.mxu0 %v14757_v10  ;;  %2426 = vmatpush1.bf16.msra.mxu1 %v14758_v11  ;;  %v14785_v29 = vld [vmem:[%s24020_s1 + $0x194] ss:$28 sps:$4 sm:$0xff]   ;;  %v14789_v32 = vld [vmem:[%s24020_s1 + $0x1c4] ss:$28 sps:$4 sm:$0xff]   ;;  %v14791_v33 = vld [vmem:[%s24020_s1 + $0x1cc] ss:$28 sps:$4 sm:$0xff]  }
   0xd   :  { %2263 = vmatprep.subr.bf16.mxu0 %v14759_v12  ;;  %2427 = vmatprep.subr.bf16.mxu1 %v14761_v13  ;;  %v14788_v31 = vld [vmem:[%s24020_s1 + $0x190] ss:$28 sps:$4 sm:$0xff]   ;;  %v14793_v34 = vld [vmem:[%s24020_s1 + $0x1c0] ss:$28 sps:$4 sm:$0xff]   ;;  %v14794_v35 = vld [vmem:[%s24020_s1 + $0x1c8] ss:$28 sps:$4 sm:$0xff]  }
   0xe   :  { %v14795_v36 = vld [vmem:[%s24020_s1 + $0x1fc] ss:$28 sps:$4 sm:$0xff]   ;;  %v14797_v37 = vld [vmem:[%s24020_s1 + $0x204] ss:$28 sps:$4 sm:$0xff]   ;;  %v14801_v40 = vld [vmem:[%s24020_s1 + $0x234] ss:$28 sps:$4 sm:$0xff]  }
   0xf   :  { %v14799_v38 = vld [vmem:[%s24020_s1 + $0x1f8] ss:$28 sps:$4 sm:$0xff]   ;;  %v14800_v39 = vld [vmem:[%s24020_s1 + $0x200] ss:$28 sps:$4 sm:$0xff]   ;;  %v14805_v42 = vld [vmem:[%s24020_s1 + $0x230] ss:$28 sps:$4 sm:$0xff]  }
  0x10   :  { %2264 = vmatpush1.bf16.msra.mxu0 %v14763_v14  ;;  %2428 = vmatpush1.bf16.msra.mxu1 %v14764_v15  ;;  %v14803_v41 = vld [vmem:[%s24020_s1 + $0x23c] ss:$28 sps:$4 sm:$0xff]   ;;  %v14807_v44 = vld [vmem:[%s24020_s1 + $0x26c] ss:$28 sps:$4 sm:$0xff]   ;;  %v14809_v45 = vld [vmem:[%s24020_s1 + $0x274] ss:$28 sps:$4 sm:$0xff]  }
  0x11   :  { %2265 = vmatprep.subr.bf16.mxu0 %v14765_v16  ;;  %2429 = vmatprep.subr.bf16.mxu1 %v14767_v17  ;;  %v14806_v43 = vld [vmem:[%s24020_s1 + $0x238] ss:$28 sps:$4 sm:$0xff]   ;;  %s24247_s25 = sld [smem:[#allocation130_spill]]  ;;  %v14811_v47 = vld [vmem:[%s24020_s1 + $0x268] ss:$28 sps:$4 sm:$0xff]   ;;  %vm2253_vm0 = vcmask 130048  }
  0x12   :  { %v14812_v49 = vld [vmem:[%s24020_s1 + $0x270] ss:$28 sps:$4 sm:$0xff]   ;;  %v14813_v50 = vld [vmem:[%s24020_s1 + $0x2a4] ss:$28 sps:$4 sm:$0xff]   ;;  %v14819_v58 = vld [vmem:[%s24020_s1 + $0x2dc] ss:$28 sps:$4 sm:$0xff]  }
  0x13   :  { %v14815_v51 = vld [vmem:[%s24020_s1 + $0x2ac] ss:$28 sps:$4 sm:$0xff]   ;;  %v14817_v56 = vld [vmem:[%s24020_s1 + $0x2a0] ss:$28 sps:$4 sm:$0xff]   ;;  %v14823_v63 = vld [vmem:[%s24020_s1 + $0x2d8] ss:$28 sps:$4 sm:$0xff]  }
  0x14   :  { %2266 = vmatpush1.bf16.msra.mxu0 %v14769_v18  ;;  %2430 = vmatpush1.bf16.msra.mxu1 %v14770_v19  ;;  %v14818_v57 = vld [vmem:[%s24020_s1 + $0x2a8] ss:$28 sps:$4 sm:$0xff]   ;;  %v14824_v0 = vld [vmem:[%s24020_s1 + $0x2e0] ss:$28 sps:$4 sm:$0xff]   ;;  %v14825_v1 = vld [vmem:[%s24020_s1 + $0x314] ss:$28 sps:$4 sm:$0xff]  }
  0x15   :  { %2267 = vmatprep.subr.bf16.mxu0 %v14771_v20  ;;  %2431 = vmatprep.subr.bf16.mxu1 %v14773_v21  ;;  %v14821_v59 = vld [vmem:[%s24020_s1 + $0x2e4] ss:$28 sps:$4 sm:$0xff]   ;;  %v14827_v2 = vld [vmem:[%s24020_s1 + $0x31c] ss:$28 sps:$4 sm:$0xff]   ;;  %v14829_v4 = vld [vmem:[%s24020_s1 + $0x310] ss:$28 sps:$4 sm:$0xff]  }
  0x16   :  { %v14830_v5 = vld [vmem:[%s24020_s1 + $0x318] ss:$28 sps:$4 sm:$0xff]   ;;  %v14831_v6 = vld [vmem:[%s24020_s1 + $0x34c] ss:$28 sps:$4 sm:$0xff]   ;;  %v14839_v11 = vld [vmem:[%s24020_s1 + $0x384] ss:$28 sps:$4 sm:$0xff]  }
  0x17   :  { %v56_v46 = vld [vmem:[%s24247_s25 + $0x8] sm:$0xff]  ;;  %v55_v53 = vld [vmem:[%s24247_s25] sm:$0xff]  ;;  %v14833_v7 = vld [vmem:[%s24020_s1 + $0x354] ss:$28 sps:$4 sm:$0xff]  }
  0x18   :  { %2268 = vmatpush1.bf16.msra.mxu0 %v14775_v22  ;;  %2432 = vmatpush1.bf16.msra.mxu1 %v14776_v23  ;;  %v63_v48 = vmul.f32 255.0, %v56_v46  ;;  %v62_v55 = vmul.f32 255.0, %v55_v53  ;;  %v14835_v9 = vld [vmem:[%s24020_s1 + $0x348] ss:$28 sps:$4 sm:$0xff]   ;;  %v14836_v10 = vld [vmem:[%s24020_s1 + $0x350] ss:$28 sps:$4 sm:$0xff]  }
  0x19   :  { %2269 = vmatprep.subr.bf16.mxu0 %v14777_v24  ;;  %2433 = vmatprep.subr.bf16.mxu1 %v14779_v25  ;;  %v14842_v12 = vld [vmem:[%s24020_s1 + $0x38c] ss:$28 sps:$4 sm:$0xff]   ;;  %v14837_v14 = vld [vmem:[%s24020_s1 + $0x380] ss:$28 sps:$4 sm:$0xff]   ;;  %v14843_v18 = vld [vmem:[%s24020_s1 + $0x3b8] ss:$28 sps:$4 sm:$0xff]  }
  0x1a   :  { %v14664_v52 = vround.rtne.f32 %v63_v48  ;;  %v14663_v62 = vround.rtne.f32 %v62_v55  ;;  %v14840_v15 = vld [vmem:[%s24020_s1 + $0x388] ss:$28 sps:$4 sm:$0xff]   ;;  %v14845_v16 = vld [vmem:[%s24020_s1 + $0x3bc] ss:$28 sps:$4 sm:$0xff]   ;;  %v14851_v20 = vld [vmem:[%s24020_s1 + $0x3f4] ss:$28 sps:$4 sm:$0xff]  }
  0x1b   :  { %v14848_v17 = vld [vmem:[%s24020_s1 + $0x3c4] ss:$28 sps:$4 sm:$0xff]   ;;  %v14854_v21 = vld [vmem:[%s24020_s1 + $0x3fc] ss:$28 sps:$4 sm:$0xff]   ;;  %v15259_v22 = vmov 0  }
  0x1c   :  { %2270 = vmatpush1.bf16.msra.mxu0 %v14781_v26  ;;  %2434 = vmatpush1.bf16.msra.mxu1 %v14782_v27  ;;  %v77_v54 = vmax.f32 %v14664_v52, 0.0  ;;  %v76_v3 = vmax.f32 %v14663_v62, 0.0  ;;  %v14846_v19 = vld [vmem:[%s24020_s1 + $0x3c0] ss:$28 sps:$4 sm:$0xff]   ;;  %v14849_v23 = vld [vmem:[%s24020_s1 + $0x3f0] ss:$28 sps:$4 sm:$0xff]  }
  0x1d   :  { %2271 = vmatprep.subr.bf16.mxu0 %v14783_v28  ;;  %2435 = vmatprep.subr.bf16.mxu1 %v14785_v29  ;;  %v14852_v24 = vld [vmem:[%s24020_s1 + $0x3f8] ss:$28 sps:$4 sm:$0xff]   ;;  %v14857_v25 = vld [vmem:[%s24020_s1 + $0x42c] ss:$28 sps:$4 sm:$0xff]   ;;  %v14863_v29 = vld [vmem:[%s24020_s1 + $0x464] ss:$28 sps:$4 sm:$0xff]  }
  0x1e   :  { %v84_v60 = vmin.f32 %v77_v54, 255.0  ;;  %v83_v8 = vmin.f32 %v76_v3, 255.0  ;;  %14739 = vset.pattern.permute.xlu0 %v15259_v22  ;;  %14740 = vset.pattern.permute.xlu1 %v15259_v22  ;;  %v14860_v26 = vld [vmem:[%s24020_s1 + $0x434] ss:$28 sps:$4 sm:$0xff]   ;;  %v14855_v27 = vld [vmem:[%s24020_s1 + $0x428] ss:$28 sps:$4 sm:$0xff]  }
  0x1f   :  { %v14858_v28 = vld [vmem:[%s24020_s1 + $0x430] ss:$28 sps:$4 sm:$0xff]   ;;  %v14879_v46 = vld [vmem:[%s24020_s1 + $0x508] ss:$28 sps:$4 sm:$0xff]   ;;  %v14885_v52 = vld [vmem:[%s24020_s1 + $0x540] ss:$28 sps:$4 sm:$0xff]  }
  0x20   :  { %2272 = vmatpush1.bf16.msra.mxu0 %v14787_v30  ;;  %2436 = vmatpush1.bf16.msra.mxu1 %v14788_v31  ;;  %v15517_v61 = vpack.c.bf16 %v84_v60, %v84_v60  ;;  %v15557_v13 = vpack.c.bf16 %v83_v8, %v83_v8  ;;  %v14866_v30 = vld [vmem:[%s24020_s1 + $0x46c] ss:$28 sps:$4 sm:$0xff]   ;;  %v14861_v31 = vld [vmem:[%s24020_s1 + $0x460] ss:$28 sps:$4 sm:$0xff]  }
  0x21   :  { %2273 = vmatprep.subr.bf16.mxu0 %v14789_v32  ;;  %2437 = vmatprep.subr.bf16.mxu1 %v14791_v33  ;;  %v14864_v32 = vld [vmem:[%s24020_s1 + $0x468] ss:$28 sps:$4 sm:$0xff]   ;;  %v14869_v33 = vld [vmem:[%s24020_s1 + $0x49c] ss:$28 sps:$4 sm:$0xff]   ;;  %v14897_v62 = vld [vmem:[%s24020_s1 + $0x5b0] ss:$28 sps:$4 sm:$0xff]  }
  0x22   :  { %2289 = vmatprep.mubr.bf16.mxu0 %v15517_v61  ;;  %2453 = vmatprep.mubr.bf16.mxu1 %v15517_v61  ;;  %v14888_v53 = vld [vmem:[%s24020_s1 + $0x548] ss:$28 sps:$4 sm:$0xff]   ;;  %v14893_v55 = vld [vmem:[%s24020_s1 + $0x57c] ss:$28 sps:$4 sm:$0xff]   ;;  %v14906_v3 = vld [vmem:[%s24020_s1 + $0x5f0] ss:$28 sps:$4 sm:$0xff]  }
  0x23   :  { %v14902_v60 = vld [vmem:[%s24020_s1 + $0x5bc] ss:$28 sps:$4 sm:$0xff]   ;;  %v14912_v8 = vld [vmem:[%s24020_s1 + $0x628] ss:$28 sps:$4 sm:$0xff]  }
  0x24   :  { %2274 = vmatpush1.bf16.msra.mxu0 %v14793_v34  ;;  %2438 = vmatpush1.bf16.msra.mxu1 %v14794_v35  ;;  %v14872_v34 = vld [vmem:[%s24020_s1 + $0x4a4] ss:$28 sps:$4 sm:$0xff]   ;;  %v14867_v35 = vld [vmem:[%s24020_s1 + $0x498] ss:$28 sps:$4 sm:$0xff]  }
  0x25   :  { %2275 = vmatprep.subr.bf16.mxu0 %v14795_v36  ;;  %2439 = vmatprep.subr.bf16.mxu1 %v14797_v37  ;;  %v14870_v36 = vld [vmem:[%s24020_s1 + $0x4a0] ss:$28 sps:$4 sm:$0xff]   ;;  %v14875_v37 = vld [vmem:[%s24020_s1 + $0x4d4] ss:$28 sps:$4 sm:$0xff]  }
  0x28   :  { %2276 = vmatpush1.bf16.msra.mxu0 %v14799_v38  ;;  %2440 = vmatpush1.bf16.msra.mxu1 %v14800_v39  ;;  %v14878_v38 = vld [vmem:[%s24020_s1 + $0x4dc] ss:$28 sps:$4 sm:$0xff]  }
  0x29   :  { %2277 = vmatprep.subr.bf16.mxu0 %v14801_v40  ;;  %2441 = vmatprep.subr.bf16.mxu1 %v14803_v41  ;;  %v58_v39 = vld [vmem:[%s24247_s25 + $0x18] sm:$0xff]  ;;  %v14873_v40 = vld [vmem:[%s24020_s1 + $0x4d0] ss:$28 sps:$4 sm:$0xff]  }
  0x2a   :  { %v65_v41 = vmul.f32 255.0, %v58_v39  ;;  %v14947_v39 = vld [vmem:[%s24020_s1 + $0x774] ss:$28 sps:$4 sm:$0xff]  }
  0x2c   :  { %2278 = vmatpush1.bf16.msra.mxu0 %v14805_v42  ;;  %2442 = vmatpush1.bf16.msra.mxu1 %v14806_v43  ;;  %v14876_v42 = vld [vmem:[%s24020_s1 + $0x4d8] ss:$28 sps:$4 sm:$0xff]   ;;  %v14881_v43 = vld [vmem:[%s24020_s1 + $0x50c] ss:$28 sps:$4 sm:$0xff]  }
  0x2d   :  { %2279 = vmatprep.subr.bf16.mxu0 %v14807_v44  ;;  %2443 = vmatprep.subr.bf16.mxu1 %v14809_v45  ;;  %v14884_v44 = vld [vmem:[%s24020_s1 + $0x514] ss:$28 sps:$4 sm:$0xff]   ;;  %v14666_v45 = vround.rtne.f32 %v65_v41 }
  0x2f   :  { %v79_v48 = vmax.f32 %v14666_v45, 0.0  ;;  %v14953_v45 = vld [vmem:[%s24020_s1 + $0x7ac] ss:$28 sps:$4 sm:$0xff]  }
  0x30   :  { %2280 = vmatpush1.bf16.msra.mxu0 %v14811_v47  ;;  %2444 = vmatpush1.bf16.msra.mxu1 %v14812_v49  ;;  %v14882_v47 = vld [vmem:[%s24020_s1 + $0x510] ss:$28 sps:$4 sm:$0xff]   ;;  %v14887_v49 = vld [vmem:[%s24020_s1 + $0x544] ss:$28 sps:$4 sm:$0xff]  }
  0x31   :  { %2281 = vmatprep.subr.bf16.mxu0 %v14813_v50  ;;  %2445 = vmatprep.subr.bf16.mxu1 %v14815_v51  ;;  %v14890_v50 = vld [vmem:[%s24020_s1 + $0x54c] ss:$28 sps:$4 sm:$0xff]   ;;  %v86_v51 = vmin.f32 %v79_v48, 255.0 }
  0x32   :  { %v14951_v48 = vld [vmem:[%s24020_s1 + $0x7a8] ss:$28 sps:$4 sm:$0xff]  }
  0x33   :  { %v15668_v54 = vpack.c.bf16 %v86_v51, %v86_v51  ;;  %v14962_v51 = vld [vmem:[%s24020_s1 + $0x7ec] ss:$28 sps:$4 sm:$0xff]  }
  0x34   :  { %2282 = vmatpush1.bf16.msra.mxu0 %v14817_v56  ;;  %2446 = vmatpush1.bf16.msra.mxu1 %v14818_v57  ;;  %v14896_v56 = vld [vmem:[%s24020_s1 + $0x584] ss:$28 sps:$4 sm:$0xff]   ;;  %v14891_v57 = vld [vmem:[%s24020_s1 + $0x578] ss:$28 sps:$4 sm:$0xff]  }
  0x35   :  { %2283 = vmatprep.subr.bf16.mxu0 %v14819_v58  ;;  %2447 = vmatprep.subr.bf16.mxu1 %v14821_v59  ;;  %v14894_v58 = vld [vmem:[%s24020_s1 + $0x580] ss:$28 sps:$4 sm:$0xff]   ;;  %v14899_v59 = vld [vmem:[%s24020_s1 + $0x5b4] ss:$28 sps:$4 sm:$0xff]  }
  0x38   :  { %2284 = vmatpush1.bf16.msra.mxu0 %v14823_v63  ;;  %2448 = vmatpush1.bf16.msra.mxu1 %v14824_v0  ;;  %v14900_v63 = vld [vmem:[%s24020_s1 + $0x5b8] ss:$28 sps:$4 sm:$0xff]   ;;  %v14905_v0 = vld [vmem:[%s24020_s1 + $0x5ec] ss:$28 sps:$4 sm:$0xff]  }
  0x39   :  { %2285 = vmatprep.subr.bf16.mxu0 %v14825_v1  ;;  %2449 = vmatprep.subr.bf16.mxu1 %v14827_v2  ;;  %v14908_v1 = vld [vmem:[%s24020_s1 + $0x5f4] ss:$28 sps:$4 sm:$0xff]   ;;  %v14903_v2 = vld [vmem:[%s24020_s1 + $0x5e8] ss:$28 sps:$4 sm:$0xff]  }
  0x3c   :  { %2286 = vmatpush1.bf16.msra.mxu0 %v14829_v4  ;;  %2450 = vmatpush1.bf16.msra.mxu1 %v14830_v5  ;;  %v14911_v4 = vld [vmem:[%s24020_s1 + $0x624] ss:$28 sps:$4 sm:$0xff]   ;;  %v57_v5 = vld [vmem:[%s24247_s25 + $0x10] sm:$0xff] }
  0x3d   :  { %2287 = vmatprep.subr.bf16.mxu0 %v14831_v6  ;;  %2451 = vmatprep.subr.bf16.mxu1 %v14833_v7  ;;  %v14914_v6 = vld [vmem:[%s24020_s1 + $0x62c] ss:$28 sps:$4 sm:$0xff]   ;;  %v14909_v7 = vld [vmem:[%s24020_s1 + $0x620] ss:$28 sps:$4 sm:$0xff]  }
  0x40   :  { %2288 = vmatpush1.bf16.msra.mxu0 %v14835_v9  ;;  %2452 = vmatpush1.bf16.msra.mxu1 %v14836_v10  ;;  %v64_v9 = vmul.f32 255.0, %v57_v5  ;;  %v14917_v10 = vld [vmem:[%s24020_s1 + $0x65c] ss:$28 sps:$4 sm:$0xff]   ;;  %v14986_v5 = vld [vmem:[%s24020_s1 + $0x8cc] ss:$28 sps:$4 sm:$0xff]  }
  0x41   :  { %2298 = vmatprep.subr.bf16.mxu0 %v14839_v11  ;;  %2462 = vmatprep.subr.bf16.mxu1 %v14842_v12  ;;  %v14920_v11 = vld [vmem:[%s24020_s1 + $0x664] ss:$28 sps:$4 sm:$0xff]   ;;  %v14915_v12 = vld [vmem:[%s24020_s1 + $0x658] ss:$28 sps:$4 sm:$0xff]  }
  0x43   :  { %2290 = vmatmul.mubr.bf16.vlgmr.msra.gmra.mrb[0].mxu0 %v15557_v13  ;;  %2454 = vmatmul.mubr.bf16.vlgmr.msra.gmra.mrb[0].mxu1 %v15557_v13 }
  0x44   :  { %2299 = vmatpush1.bf16.msra.mxu0 %v14837_v14  ;;  %2463 = vmatpush1.bf16.msra.mxu1 %v14840_v15  ;;  %v14918_v14 = vld [vmem:[%s24020_s1 + $0x660] ss:$28 sps:$4 sm:$0xff]   ;;  %v14665_v15 = vround.rtne.f32 %v64_v9 }
  0x45   :  { %2300 = vmatprep.subr.bf16.mxu0 %v14845_v16  ;;  %2464 = vmatprep.subr.bf16.mxu1 %v14848_v17  ;;  %v14923_v16 = vld [vmem:[%s24020_s1 + $0x694] ss:$28 sps:$4 sm:$0xff]   ;;  %v14926_v17 = vld [vmem:[%s24020_s1 + $0x69c] ss:$28 sps:$4 sm:$0xff]   ;;  %v14992_v9 = vld [vmem:[%s24020_s1 + $0x904] ss:$28 sps:$4 sm:$0xff]  }
  0x46   :  { %2330 = vmatprep.mubr.bf16.mxu0 %v15668_v54  ;;  %2494 = vmatprep.mubr.bf16.mxu1 %v15668_v54 }
  0x48   :  { %2301 = vmatpush1.bf16.msra.mxu0 %v14843_v18  ;;  %2465 = vmatpush1.bf16.msra.mxu1 %v14846_v19  ;;  %v14921_v18 = vld [vmem:[%s24020_s1 + $0x690] ss:$28 sps:$4 sm:$0xff]   ;;  %v14924_v19 = vld [vmem:[%s24020_s1 + $0x698] ss:$28 sps:$4 sm:$0xff]  }
  0x49   :  { %2302 = vmatprep.subr.bf16.mxu0 %v14851_v20  ;;  %2466 = vmatprep.subr.bf16.mxu1 %v14854_v21  ;;  %v78_v20 = vmax.f32 %v14665_v15, 0.0  ;;  %v14929_v21 = vld [vmem:[%s24020_s1 + $0x6cc] ss:$28 sps:$4 sm:$0xff]  }
  0x4a   :  { %v14993_v15 = vld [vmem:[%s24020_s1 + $0x930] ss:$28 sps:$4 sm:$0xff]  }
  0x4c   :  { %2303 = vmatpush1.bf16.msra.mxu0 %v14849_v23  ;;  %2467 = vmatpush1.bf16.msra.mxu1 %v14852_v24  ;;  %v14932_v23 = vld [vmem:[%s24020_s1 + $0x6d4] ss:$28 sps:$4 sm:$0xff]   ;;  %v14927_v24 = vld [vmem:[%s24020_s1 + $0x6c8] ss:$28 sps:$4 sm:$0xff]  }
  0x4d   :  { %2304 = vmatprep.subr.bf16.mxu0 %v14857_v25  ;;  %2468 = vmatprep.subr.bf16.mxu1 %v14860_v26  ;;  %v14930_v25 = vld [vmem:[%s24020_s1 + $0x6d0] ss:$28 sps:$4 sm:$0xff]   ;;  %v85_v26 = vmin.f32 %v78_v20, 255.0 }
  0x4e   :  { %v15002_v20 = vld [vmem:[%s24020_s1 + $0x970] ss:$28 sps:$4 sm:$0xff]  }
  0x50   :  { %2305 = vmatpush1.bf16.msra.mxu0 %v14855_v27  ;;  %2469 = vmatpush1.bf16.msra.mxu1 %v14858_v28  ;;  %v14935_v27 = vld [vmem:[%s24020_s1 + $0x704] ss:$28 sps:$4 sm:$0xff]   ;;  %v14938_v28 = vld [vmem:[%s24020_s1 + $0x70c] ss:$28 sps:$4 sm:$0xff]  }
  0x51   :  { %2306 = vmatprep.subr.bf16.mxu0 %v14863_v29  ;;  %2470 = vmatprep.subr.bf16.mxu1 %v14866_v30  ;;  %v14933_v29 = vld [vmem:[%s24020_s1 + $0x700] ss:$28 sps:$4 sm:$0xff]   ;;  %v15768_v30 = vpack.c.bf16 %v85_v26, %v85_v26 }
  0x54   :  { %2307 = vmatpush1.bf16.msra.mxu0 %v14861_v31  ;;  %2471 = vmatpush1.bf16.msra.mxu1 %v14864_v32  ;;  %v14936_v31 = vld [vmem:[%s24020_s1 + $0x708] ss:$28 sps:$4 sm:$0xff]   ;;  %v14941_v32 = vld [vmem:[%s24020_s1 + $0x73c] ss:$28 sps:$4 sm:$0xff]  }
  0x55   :  { %2308 = vmatprep.subr.bf16.mxu0 %v14869_v33  ;;  %2472 = vmatprep.subr.bf16.mxu1 %v14872_v34  ;;  %v14944_v33 = vld [vmem:[%s24020_s1 + $0x744] ss:$28 sps:$4 sm:$0xff]   ;;  %v60_v34 = vld [vmem:[%s24247_s25 + $0x28] sm:$0xff] }
  0x58   :  { %2309 = vmatpush1.bf16.msra.mxu0 %v14867_v35  ;;  %2473 = vmatpush1.bf16.msra.mxu1 %v14870_v36  ;;  %v67_v35 = vmul.f32 255.0, %v60_v34  ;;  %v14939_v36 = vld [vmem:[%s24020_s1 + $0x738] ss:$28 sps:$4 sm:$0xff]  }
  0x59   :  { %2310 = vmatprep.subr.bf16.mxu0 %v14875_v37  ;;  %2474 = vmatprep.subr.bf16.mxu1 %v14878_v38  ;;  %v14942_v37 = vld [vmem:[%s24020_s1 + $0x740] ss:$28 sps:$4 sm:$0xff]   ;;  %v15019_v34 = vld [vmem:[%s24020_s1 + $0xa14] ss:$28 sps:$4 sm:$0xff]  }
  0x5a   :  { %v14668_v38 = vround.rtne.f32 %v67_v35  ;;  %v15022_v35 = vld [vmem:[%s24020_s1 + $0xa1c] ss:$28 sps:$4 sm:$0xff]  }
  0x5c   :  { %2311 = vmatpush1.bf16.msra.mxu0 %v14873_v40  ;;  %2475 = vmatpush1.bf16.msra.mxu1 %v14876_v42  ;;  %v14950_v40 = vld [vmem:[%s24020_s1 + $0x77c] ss:$28 sps:$4 sm:$0xff]   ;;  %v81_v41 = vmax.f32 %v14668_v38, 0.0  ;;  %v14945_v42 = vld [vmem:[%s24020_s1 + $0x770] ss:$28 sps:$4 sm:$0xff]  }
  0x5d   :  { %2312 = vmatprep.subr.bf16.mxu0 %v14881_v43  ;;  %2476 = vmatprep.subr.bf16.mxu1 %v14884_v44  ;;  %v14948_v43 = vld [vmem:[%s24020_s1 + $0x778] ss:$28 sps:$4 sm:$0xff]   ;;  %v15025_v38 = vld [vmem:[%s24020_s1 + $0xa4c] ss:$28 sps:$4 sm:$0xff]  }
  0x5e   :  { %v88_v44 = vmin.f32 %v81_v41, 255.0  ;;  %v15028_v41 = vld [vmem:[%s24020_s1 + $0xa54] ss:$28 sps:$4 sm:$0xff]  }
  0x60   :  { %2313 = vmatpush1.bf16.msra.mxu0 %v14879_v46  ;;  %2477 = vmatpush1.bf16.msra.mxu1 %v14882_v47  ;;  %v14956_v46 = vld [vmem:[%s24020_s1 + $0x7b4] ss:$28 sps:$4 sm:$0xff]   ;;  %v15808_v47 = vpack.c.bf16 %v88_v44, %v88_v44 }
  0x61   :  { %2314 = vmatprep.subr.bf16.mxu0 %v14887_v49  ;;  %2478 = vmatprep.subr.bf16.mxu1 %v14890_v50  ;;  %v14954_v49 = vld [vmem:[%s24020_s1 + $0x7b0] ss:$28 sps:$4 sm:$0xff]   ;;  %v14959_v50 = vld [vmem:[%s24020_s1 + $0x7e4] ss:$28 sps:$4 sm:$0xff]  }
  0x64   :  { %2315 = vmatpush1.bf16.msra.mxu0 %v14885_v52  ;;  %2479 = vmatpush1.bf16.msra.mxu1 %v14888_v53  ;;  %v14957_v52 = vld [vmem:[%s24020_s1 + $0x7e0] ss:$28 sps:$4 sm:$0xff]   ;;  %v14960_v53 = vld [vmem:[%s24020_s1 + $0x7e8] ss:$28 sps:$4 sm:$0xff]  }
  0x65   :  { %2316 = vmatprep.subr.bf16.mxu0 %v14893_v55  ;;  %2480 = vmatprep.subr.bf16.mxu1 %v14896_v56  ;;  %v14965_v55 = vld [vmem:[%s24020_s1 + $0x81c] ss:$28 sps:$4 sm:$0xff]   ;;  %v14968_v56 = vld [vmem:[%s24020_s1 + $0x824] ss:$28 sps:$4 sm:$0xff]  }
  0x68   :  { %2317 = vmatpush1.bf16.msra.mxu0 %v14891_v57  ;;  %2481 = vmatpush1.bf16.msra.mxu1 %v14894_v58  ;;  %v14963_v57 = vld [vmem:[%s24020_s1 + $0x818] ss:$28 sps:$4 sm:$0xff]   ;;  %v14966_v58 = vld [vmem:[%s24020_s1 + $0x820] ss:$28 sps:$4 sm:$0xff]  }
  0x69   :  { %2318 = vmatprep.subr.bf16.mxu0 %v14899_v59  ;;  %2482 = vmatprep.subr.bf16.mxu1 %v14902_v60  ;;  %v14971_v59 = vld [vmem:[%s24020_s1 + $0x854] ss:$28 sps:$4 sm:$0xff]   ;;  %v14974_v60 = vld [vmem:[%s24020_s1 + $0x85c] ss:$28 sps:$4 sm:$0xff]  }
  0x6c   :  { %2319 = vmatpush1.bf16.msra.mxu0 %v14897_v62  ;;  %2483 = vmatpush1.bf16.msra.mxu1 %v14900_v63  ;;  %v14969_v62 = vld [vmem:[%s24020_s1 + $0x850] ss:$28 sps:$4 sm:$0xff]   ;;  %v14972_v63 = vld [vmem:[%s24020_s1 + $0x858] ss:$28 sps:$4 sm:$0xff]  }
  0x6d   :  { %2320 = vmatprep.subr.bf16.mxu0 %v14905_v0  ;;  %2484 = vmatprep.subr.bf16.mxu1 %v14908_v1  ;;  %v14977_v0 = vld [vmem:[%s24020_s1 + $0x88c] ss:$28 sps:$4 sm:$0xff]   ;;  %v14980_v1 = vld [vmem:[%s24020_s1 + $0x894] ss:$28 sps:$4 sm:$0xff]  }
  0x70   :  { %2321 = vmatpush1.bf16.msra.mxu0 %v14903_v2  ;;  %2485 = vmatpush1.bf16.msra.mxu1 %v14906_v3  ;;  %v14975_v2 = vld [vmem:[%s24020_s1 + $0x888] ss:$28 sps:$4 sm:$0xff]   ;;  %v14978_v3 = vld [vmem:[%s24020_s1 + $0x890] ss:$28 sps:$4 sm:$0xff]  }
  0x71   :  { %2322 = vmatprep.subr.bf16.mxu0 %v14911_v4  ;;  %2486 = vmatprep.subr.bf16.mxu1 %v14914_v6  ;;  %v14983_v4 = vld [vmem:[%s24020_s1 + $0x8c4] ss:$28 sps:$4 sm:$0xff]  }
  0x72   :  { %v14981_v6 = vld [vmem:[%s24020_s1 + $0x8c0] ss:$28 sps:$4 sm:$0xff]  }
  0x74   :  { %2323 = vmatpush1.bf16.msra.mxu0 %v14909_v7  ;;  %2487 = vmatpush1.bf16.msra.mxu1 %v14912_v8  ;;  %v14984_v7 = vld [vmem:[%s24020_s1 + $0x8c8] ss:$28 sps:$4 sm:$0xff]   ;;  %v14989_v8 = vld [vmem:[%s24020_s1 + $0x8fc] ss:$28 sps:$4 sm:$0xff]  }
  0x75   :  { %2324 = vmatprep.subr.bf16.mxu0 %v14917_v10  ;;  %2488 = vmatprep.subr.bf16.mxu1 %v14920_v11  ;;  %v14987_v10 = vld [vmem:[%s24020_s1 + $0x8f8] ss:$28 sps:$4 sm:$0xff]   ;;  %v14990_v11 = vld [vmem:[%s24020_s1 + $0x900] ss:$28 sps:$4 sm:$0xff]  }
  0x78   :  { %2325 = vmatpush1.bf16.msra.mxu0 %v14915_v12  ;;  %2489 = vmatpush1.bf16.msra.mxu1 %v14918_v14  ;;  %v14995_v12 = vld [vmem:[%s24020_s1 + $0x934] ss:$28 sps:$4 sm:$0xff]   ;;  %v14998_v14 = vld [vmem:[%s24020_s1 + $0x93c] ss:$28 sps:$4 sm:$0xff]  }
  0x79   :  { %2326 = vmatprep.subr.bf16.mxu0 %v14923_v16  ;;  %2490 = vmatprep.subr.bf16.mxu1 %v14926_v17  ;;  %v14996_v16 = vld [vmem:[%s24020_s1 + $0x938] ss:$28 sps:$4 sm:$0xff]   ;;  %v15001_v17 = vld [vmem:[%s24020_s1 + $0x96c] ss:$28 sps:$4 sm:$0xff]  }
  0x7c   :  { %2327 = vmatpush1.bf16.msra.mxu0 %v14921_v18  ;;  %2491 = vmatpush1.bf16.msra.mxu1 %v14924_v19  ;;  %v15004_v18 = vld [vmem:[%s24020_s1 + $0x974] ss:$28 sps:$4 sm:$0xff]   ;;  %v14999_v19 = vld [vmem:[%s24020_s1 + $0x968] ss:$28 sps:$4 sm:$0xff]  }
  0x7d   :  { %2328 = vmatprep.subr.bf16.mxu0 %v14929_v21  ;;  %2492 = vmatprep.subr.bf16.mxu1 %v14932_v23  ;;  %v15007_v21 = vld [vmem:[%s24020_s1 + $0x9a4] ss:$28 sps:$4 sm:$0xff]  }
  0x7e   :  { %v59_v23 = vld [vmem:[%s24247_s25 + $0x20] sm:$0xff] }
  0x7f   :  { %v66_v26 = vmul.f32 255.0, %v59_v23  ;;  %v15102_v23 = vld [vmem:[%s24020_s1 + $0x168] ss:$28 sps:$4 sm:$0xff]  }
  0x80   :  { %2329 = vmatpush1.bf16.msra.mxu0 %v14927_v24  ;;  %2493 = vmatpush1.bf16.msra.mxu1 %v14930_v25  ;;  %v15010_v24 = vld [vmem:[%s24020_s1 + $0x9ac] ss:$28 sps:$4 sm:$0xff]   ;;  %v15005_v25 = vld [vmem:[%s24020_s1 + $0x9a0] ss:$28 sps:$4 sm:$0xff]  }
  0x81   :  { %2339 = vmatprep.subr.bf16.mxu0 %v14935_v27  ;;  %2503 = vmatprep.subr.bf16.mxu1 %v14938_v28  ;;  %v15008_v27 = vld [vmem:[%s24020_s1 + $0x9a8] ss:$28 sps:$4 sm:$0xff]   ;;  %v15013_v28 = vld [vmem:[%s24020_s1 + $0x9dc] ss:$28 sps:$4 sm:$0xff]  }
  0x83   :  { %2331 = vmatmul.mubr.bf16.vlgmr.msra.gmra.mrb[0].mxu0 %v15768_v30  ;;  %2495 = vmatmul.mubr.bf16.vlgmr.msra.gmra.mrb[0].mxu1 %v15768_v30 }
  0x84   :  { %2340 = vmatpush1.bf16.msra.mxu0 %v14933_v29  ;;  %2504 = vmatpush1.bf16.msra.mxu1 %v14936_v31  ;;  %v15016_v29 = vld [vmem:[%s24020_s1 + $0x9e4] ss:$28 sps:$4 sm:$0xff]   ;;  %v15011_v31 = vld [vmem:[%s24020_s1 + $0x9d8] ss:$28 sps:$4 sm:$0xff]  }
  0x85   :  { %2341 = vmatprep.subr.bf16.mxu0 %v14941_v32  ;;  %2505 = vmatprep.subr.bf16.mxu1 %v14944_v33  ;;  %v15014_v32 = vld [vmem:[%s24020_s1 + $0x9e0] ss:$28 sps:$4 sm:$0xff]   ;;  %v14667_v33 = vround.rtne.f32 %v66_v26 }
  0x86   :  { %2371 = vmatprep.mubr.bf16.mxu0 %v15808_v47  ;;  %2535 = vmatprep.mubr.bf16.mxu1 %v15808_v47  ;;  %v15107_v26 = vld [vmem:[%s24020_s1 + $0x1a0] ss:$28 sps:$4 sm:$0xff]  }
  0x88   :  { %2342 = vmatpush1.bf16.msra.mxu0 %v14939_v36  ;;  %2506 = vmatpush1.bf16.msra.mxu1 %v14942_v37  ;;  %v15017_v36 = vld [vmem:[%s24020_s1 + $0xa10] ss:$28 sps:$4 sm:$0xff]   ;;  %v15020_v37 = vld [vmem:[%s24020_s1 + $0xa18] ss:$28 sps:$4 sm:$0xff]  }
  0x89   :  { %2343 = vmatprep.subr.bf16.mxu0 %v14947_v39  ;;  %2507 = vmatprep.subr.bf16.mxu1 %v14950_v40  ;;  %v80_v39 = vmax.f32 %v14667_v33, 0.0  ;;  %v61_v40 = vld [vmem:[%s24247_s25 + $0x30] sm:$0xff] }
  0x8a   :  { %v68_v44 = vmul.f32 255.0, %v61_v40  ;;  %v15113_v33 = vld [vmem:[%s24020_s1 + $0x590] ss:$28 sps:$4 sm:$0xff]   ;;  %v15071_v40 = vld [vmem:[%s24020_s1 + $0x27c] ss:$28 sps:$4 sm:$0xff]  }
  0x8c   :  { %2344 = vmatpush1.bf16.msra.mxu0 %v14945_v42  ;;  %2508 = vmatpush1.bf16.msra.mxu1 %v14948_v43  ;;  %v15023_v42 = vld [vmem:[%s24020_s1 + $0xa48] ss:$28 sps:$4 sm:$0xff]   ;;  %v87_v43 = vmin.f32 %v80_v39, 255.0 }
  0x8d   :  { %2345 = vmatprep.subr.bf16.mxu0 %v14953_v45  ;;  %2509 = vmatprep.subr.bf16.mxu1 %v14956_v46  ;;  %v15026_v45 = vld [vmem:[%s24020_s1 + $0xa50] ss:$28 sps:$4 sm:$0xff]   ;;  %v15031_v46 = vld [vmem:[%s24020_s1 + $0xa84] ss:$28 sps:$4 sm:$0xff]  }
  0x8e   :  { %v15122_v39 = vld [vmem:[%s24020_s1 + $0x408] ss:$28 sps:$4 sm:$0xff]  }
  0x90   :  { %2346 = vmatpush1.bf16.msra.mxu0 %v14951_v48  ;;  %2510 = vmatpush1.bf16.msra.mxu1 %v14954_v49  ;;  %v15034_v48 = vld [vmem:[%s24020_s1 + $0xa8c] ss:$28 sps:$4 sm:$0xff]   ;;  %v15974_v49 = vpack.c.bf16 %v87_v43, %v87_v43  ;;  %v15076_v43 = vld [vmem:[%s24020_s1 + $0x2b4] ss:$28 sps:$4 sm:$0xff]  }
  0x91   :  { %2347 = vmatprep.subr.bf16.mxu0 %v14959_v50  ;;  %2511 = vmatprep.subr.bf16.mxu1 %v14962_v51  ;;  %v15029_v50 = vld [vmem:[%s24020_s1 + $0xa80] ss:$28 sps:$4 sm:$0xff]   ;;  %v14669_v51 = vround.rtne.f32 %v68_v44 }
  0x92   :  { %v15127_v44 = vld [vmem:[%s24020_s1 + $0x440] ss:$28 sps:$4 sm:$0xff]  }
  0x94   :  { %2348 = vmatpush1.bf16.msra.mxu0 %v14957_v52  ;;  %2512 = vmatpush1.bf16.msra.mxu1 %v14960_v53  ;;  %v15032_v52 = vld [vmem:[%s24020_s1 + $0xa88] ss:$28 sps:$4 sm:$0xff]   ;;  %v15037_v53 = vld [vmem:[%s24020_s1 + $0x14] ss:$28 sps:$4 sm:$0xff]  }
  0x95   :  { %2349 = vmatprep.subr.bf16.mxu0 %v14965_v55  ;;  %2513 = vmatprep.subr.bf16.mxu1 %v14968_v56  ;;  %v15068_v55 = vld [vmem:[%s24020_s1 + $0x1d8] ss:$28 sps:$4 sm:$0xff]   ;;  %v82_v56 = vmax.f32 %v14669_v51, 0.0  ;;  %v15133_v51 = vld [vmem:[%s24020_s1 + $0x670] ss:$28 sps:$4 sm:$0xff]  }
  0x98   :  { %2350 = vmatpush1.bf16.msra.mxu0 %v14963_v57  ;;  %2514 = vmatpush1.bf16.msra.mxu1 %v14966_v58  ;;  %v89_v57 = vmin.f32 %v82_v56, 255.0  ;;  %v15035_v58 = vld [vmem:[%s24020_s1 + $0x10] ss:$28 sps:$4 sm:$0xff]  }
  0x99   :  { %2351 = vmatprep.subr.bf16.mxu0 %v14971_v59  ;;  %2515 = vmatprep.subr.bf16.mxu1 %v14974_v60  ;;  %v15040_v60 = vld [vmem:[%s24020_s1 + $0x4c] ss:$28 sps:$4 sm:$0xff]  }
  0x9a   :  { %v15995_v59 = vpack.c.bf16 %v89_v57, %v89_v57 }
  0x9c   :  { %2352 = vmatpush1.bf16.msra.mxu0 %v14969_v62  ;;  %2516 = vmatpush1.bf16.msra.mxu1 %v14972_v63  ;;  %v15072_v62 = vld [vmem:[%s24020_s1 + $0x18] ss:$28 sps:$4 sm:$0xff]   ;;  %v15073_v63 = vld [vmem:[%s24020_s1 + $0x210] ss:$28 sps:$4 sm:$0xff]  }
  0x9d   :  { %2353 = vmatprep.subr.bf16.mxu0 %v14977_v0  ;;  %2517 = vmatprep.subr.bf16.mxu1 %v14980_v1  ;;  %v15038_v0 = vld [vmem:[%s24020_s1 + $0x48] ss:$28 sps:$4 sm:$0xff]   ;;  %v15077_v1 = vld [vmem:[%s24020_s1 + $0x50] ss:$28 sps:$4 sm:$0xff]  }
  0xa0   :  { %2354 = vmatpush1.bf16.msra.mxu0 %v14975_v2  ;;  %2518 = vmatpush1.bf16.msra.mxu1 %v14978_v3  ;;  %v15043_v2 = vld [vmem:[%s24020_s1 + $0x84] ss:$28 sps:$4 sm:$0xff]  }
  0xa1   :  { %2355 = vmatprep.subr.bf16.mxu0 %v14983_v4  ;;  %2519 = vmatprep.subr.bf16.mxu1 %v14986_v5  ;;  %v15078_v3 = vld [vmem:[%s24020_s1 + $0x248] ss:$28 sps:$4 sm:$0xff]   ;;  %v15041_v4 = vld [vmem:[%s24020_s1 + $0x80] ss:$28 sps:$4 sm:$0xff]  }
  0xa2   :  { %v15046_v5 = vld [vmem:[%s24020_s1 + $0xbc] ss:$28 sps:$4 sm:$0xff]  }
  0xa4   :  { %2356 = vmatpush1.bf16.msra.mxu0 %v14981_v6  ;;  %2520 = vmatpush1.bf16.msra.mxu1 %v14984_v7  ;;  %v15082_v6 = vld [vmem:[%s24020_s1 + $0x88] ss:$28 sps:$4 sm:$0xff]   ;;  %v15083_v7 = vld [vmem:[%s24020_s1 + $0x280] ss:$28 sps:$4 sm:$0xff]  }
  0xa5   :  { %2357 = vmatprep.subr.bf16.mxu0 %v14989_v8  ;;  %2521 = vmatprep.subr.bf16.mxu1 %v14992_v9  ;;  %v15049_v8 = vld [vmem:[%s24020_s1 + $0xf4] ss:$28 sps:$4 sm:$0xff]   ;;  %v15087_v9 = vld [vmem:[%s24020_s1 + $0xc0] ss:$28 sps:$4 sm:$0xff]  }
  0xa8   :  { %2358 = vmatpush1.bf16.msra.mxu0 %v14987_v10  ;;  %2522 = vmatpush1.bf16.msra.mxu1 %v14990_v11  ;;  %v15088_v10 = vld [vmem:[%s24020_s1 + $0x2b8] ss:$28 sps:$4 sm:$0xff]   ;;  %v15047_v11 = vld [vmem:[%s24020_s1 + $0xf0] ss:$28 sps:$4 sm:$0xff]  }
  0xa9   :  { %2359 = vmatprep.subr.bf16.mxu0 %v14995_v12  ;;  %2523 = vmatprep.subr.bf16.mxu1 %v14998_v14  ;;  %v15052_v12 = vld [vmem:[%s24020_s1 + $0x12c] ss:$28 sps:$4 sm:$0xff]   ;;  %v15092_v14 = vld [vmem:[%s24020_s1 + $0xf8] ss:$28 sps:$4 sm:$0xff]  }
  0xac   :  { %2360 = vmatpush1.bf16.msra.mxu0 %v14993_v15  ;;  %2524 = vmatpush1.bf16.msra.mxu1 %v14996_v16  ;;  %v15093_v15 = vld [vmem:[%s24020_s1 + $0x2f0] ss:$28 sps:$4 sm:$0xff]   ;;  %v15050_v16 = vld [vmem:[%s24020_s1 + $0x128] ss:$28 sps:$4 sm:$0xff]  }
  0xad   :  { %2361 = vmatprep.subr.bf16.mxu0 %v15001_v17  ;;  %2525 = vmatprep.subr.bf16.mxu1 %v15004_v18  ;;  %v15055_v17 = vld [vmem:[%s24020_s1 + $0x164] ss:$28 sps:$4 sm:$0xff]   ;;  %v15097_v18 = vld [vmem:[%s24020_s1 + $0x130] ss:$28 sps:$4 sm:$0xff]  }
  0xb0   :  { %2362 = vmatpush1.bf16.msra.mxu0 %v14999_v19  ;;  %2526 = vmatpush1.bf16.msra.mxu1 %v15002_v20  ;;  %v15098_v19 = vld [vmem:[%s24020_s1 + $0x328] ss:$28 sps:$4 sm:$0xff]   ;;  %v15053_v20 = vld [vmem:[%s24020_s1 + $0x160] ss:$28 sps:$4 sm:$0xff]  }
  0xb1   :  { %2363 = vmatprep.subr.bf16.mxu0 %v15007_v21  ;;  %2527 = vmatprep.subr.bf16.mxu1 %v15010_v24  ;;  %v15058_v21 = vld [vmem:[%s24020_s1 + $0x19c] ss:$28 sps:$4 sm:$0xff]  }
  0xb2   :  { %v15103_v24 = vld [vmem:[%s24020_s1 + $0x360] ss:$28 sps:$4 sm:$0xff]  }
  0xb4   :  { %2364 = vmatpush1.bf16.msra.mxu0 %v15005_v25  ;;  %2528 = vmatpush1.bf16.msra.mxu1 %v15008_v27  ;;  %v15056_v25 = vld [vmem:[%s24020_s1 + $0x198] ss:$28 sps:$4 sm:$0xff]  }
  0xb5   :  { %2365 = vmatprep.subr.bf16.mxu0 %v15013_v28  ;;  %2529 = vmatprep.subr.bf16.mxu1 %v15016_v29  ;;  %v15061_v27 = vld [vmem:[%s24020_s1 + $0x1d4] ss:$28 sps:$4 sm:$0xff]  }
  0xb6   :  { %v15108_v28 = vld [vmem:[%s24020_s1 + $0x558] ss:$28 sps:$4 sm:$0xff]   ;;  %v15059_v29 = vld [vmem:[%s24020_s1 + $0x1d0] ss:$28 sps:$4 sm:$0xff]  }
  0xb8   :  { %2366 = vmatpush1.bf16.msra.mxu0 %v15011_v31  ;;  %2530 = vmatpush1.bf16.msra.mxu1 %v15014_v32  ;;  %v15112_v31 = vld [vmem:[%s24020_s1 + $0x398] ss:$28 sps:$4 sm:$0xff]   ;;  %v15064_v32 = vld [vmem:[%s24020_s1 + $0x20c] ss:$28 sps:$4 sm:$0xff]  }
  0xb9   :  { %2367 = vmatprep.subr.bf16.mxu0 %v15019_v34  ;;  %2531 = vmatprep.subr.bf16.mxu1 %v15022_v35  ;;  %v15062_v34 = vld [vmem:[%s24020_s1 + $0x208] ss:$28 sps:$4 sm:$0xff]   ;;  %v15117_v35 = vld [vmem:[%s24020_s1 + $0x3d0] ss:$28 sps:$4 sm:$0xff]  }
  0xbc   :  { %2368 = vmatpush1.bf16.msra.mxu0 %v15017_v36  ;;  %2532 = vmatpush1.bf16.msra.mxu1 %v15020_v37  ;;  %v15067_v36 = vld [vmem:[%s24020_s1 + $0x244] ss:$28 sps:$4 sm:$0xff]  }
  0xbd   :  { %2369 = vmatprep.subr.bf16.mxu0 %v15025_v38  ;;  %2533 = vmatprep.subr.bf16.mxu1 %v15028_v41  ;;  %v15118_v37 = vld [vmem:[%s24020_s1 + $0x5c8] ss:$28 sps:$4 sm:$0xff]   ;;  %v15065_v38 = vld [vmem:[%s24020_s1 + $0x240] ss:$28 sps:$4 sm:$0xff]  }
  0xbe   :  { %v15123_v41 = vld [vmem:[%s24020_s1 + $0x600] ss:$28 sps:$4 sm:$0xff]  }
  0xc0   :  { %2370 = vmatpush1.bf16.msra.mxu0 %v15023_v42  ;;  %2534 = vmatpush1.bf16.msra.mxu1 %v15026_v45  ;;  %v15069_v42 = vld [vmem:[%s24020_s1 + $0x278] ss:$28 sps:$4 sm:$0xff]  }
  0xc1   :  { %2380 = vmatprep.subr.bf16.mxu0 %v15031_v46  ;;  %2544 = vmatprep.subr.bf16.mxu1 %v15034_v48  ;;  %v15128_v45 = vld [vmem:[%s24020_s1 + $0x638] ss:$28 sps:$4 sm:$0xff]   ;;  %v15074_v46 = vld [vmem:[%s24020_s1 + $0x2b0] ss:$28 sps:$4 sm:$0xff]  }
  0xc2   :  { %v15081_v48 = vld [vmem:[%s24020_s1 + $0x2ec] ss:$28 sps:$4 sm:$0xff]  }
  0xc3   :  { %2372 = vmatmul.mubr.bf16.vlgmr.msra.gmra.mrb[0].mxu0 %v15974_v49  ;;  %2536 = vmatmul.mubr.bf16.vlgmr.msra.gmra.mrb[0].mxu1 %v15974_v49 }
  0xc4   :  { %2381 = vmatpush1.bf16.msra.mxu0 %v15029_v50  ;;  %2545 = vmatpush1.bf16.msra.mxu1 %v15032_v52  ;;  %v15132_v50 = vld [vmem:[%s24020_s1 + $0x478] ss:$28 sps:$4 sm:$0xff]  }
  0xc5   :  { %2412 = vmatprep.mubr.bf16.mxu0 %v15259_v22  ;;  %2576 = vmatprep.mubr.bf16.mxu1 %v15259_v22 }
  0xc6   :  { %2585 = vmatprep.subr.bf16.mxu0 %v15037_v53  ;;  %12277 = vmatprep.subr.bf16.mxu1 %v15068_v55 }
  0xcf   :  { %11417 = vmatmul.mubr.msk.bf16.vlgmr.msra.gmra.mrb[0].mxu0 %vm2253_vm0, %v15995_v59  ;;  %11418 = vmatmul.mubr.msk.bf16.vlgmr.msra.gmra.mrb[0].mxu1 %vm2253_vm0, %v15995_v59 }
  0xd0   :  { %2586 = vmatpush1.bf16.msra.mxu0 %v15035_v58  ;;  %12278 = vmatpush3.bf16.msra.mxu1 %v15072_v62 }
  0xd1   :  { %2587 = vmatprep.subr.bf16.mxu0 %v15040_v60  ;;  %12279 = vmatprep.subr.bf16.mxu1 %v15073_v63 }
  0xd2   :  { %2617 = vmatprep.mubr.bf16.mxu0 %v15517_v61  ;;  %2781 = vmatprep.mubr.bf16.mxu1 %v15517_v61  ;;  %v15044_v61 = vld [vmem:[%s24020_s1 + $0xb8] ss:$28 sps:$4 sm:$0xff]  }
  0xd4   :  { %2588 = vmatpush1.bf16.msra.mxu0 %v15038_v0  ;;  %12280 = vmatpush3.bf16.msra.mxu1 %v15077_v1 }
  0xd5   :  { %2589 = vmatprep.subr.bf16.mxu0 %v15043_v2  ;;  %12281 = vmatprep.subr.bf16.mxu1 %v15078_v3 }
  0xd8   :  { %2590 = vmatpush1.bf16.msra.mxu0 %v15041_v4  ;;  %12282 = vmatpush3.bf16.msra.mxu1 %v15082_v6 }
  0xd9   :  { %2591 = vmatprep.subr.bf16.mxu0 %v15046_v5  ;;  %12283 = vmatprep.subr.bf16.mxu1 %v15083_v7 }
  0xdc   :  { %2592 = vmatpush1.bf16.msra.mxu0 %v15044_v61  ;;  %12284 = vmatpush3.bf16.msra.mxu1 %v15087_v9 }
  0xdd   :  { %2593 = vmatprep.subr.bf16.mxu0 %v15049_v8  ;;  %12285 = vmatprep.subr.bf16.mxu1 %v15088_v10 }
  0xe0   :  { %2594 = vmatpush1.bf16.msra.mxu0 %v15047_v11  ;;  %12286 = vmatpush3.bf16.msra.mxu1 %v15092_v14 }
  0xe1   :  { %2595 = vmatprep.subr.bf16.mxu0 %v15052_v12  ;;  %12287 = vmatprep.subr.bf16.mxu1 %v15093_v15 }
  0xe4   :  { %2596 = vmatpush1.bf16.msra.mxu0 %v15050_v16  ;;  %12288 = vmatpush3.bf16.msra.mxu1 %v15097_v18 }
  0xe5   :  { %2597 = vmatprep.subr.bf16.mxu0 %v15055_v17  ;;  %12289 = vmatprep.subr.bf16.mxu1 %v15098_v19 }
  0xe8   :  { %2598 = vmatpush1.bf16.msra.mxu0 %v15053_v20  ;;  %12290 = vmatpush3.bf16.msra.mxu1 %v15102_v23 }
  0xe9   :  { %2599 = vmatprep.subr.bf16.mxu0 %v15058_v21  ;;  %12291 = vmatprep.subr.bf16.mxu1 %v15103_v24 }
  0xec   :  { %2600 = vmatpush1.bf16.msra.mxu0 %v15056_v25  ;;  %12292 = vmatpush3.bf16.msra.mxu1 %v15107_v26 }
  0xed   :  { %2601 = vmatprep.subr.bf16.mxu0 %v15061_v27  ;;  %12299 = vmatprep.subr.bf16.mxu1 %v15108_v28 }
  0xef   :  { %2782 = vmatmul.mubr.bf16.vlgmr.msra.gmra.mrb[4].mxu1 %v15557_v13 }
  0xf0   :  { %2602 = vmatpush1.bf16.msra.mxu0 %v15059_v29  ;;  %12300 = vmatpush3.bf16.msra.mxu1 %v15112_v31 }
  0xf1   :  { %2603 = vmatprep.subr.bf16.mxu0 %v15064_v32  ;;  %12301 = vmatprep.subr.bf16.mxu1 %v15113_v33 }
  0xf2   :  { %2821 = vmatprep.mubr.bf16.mxu1 %v15668_v54 }
  0xf4   :  { %2604 = vmatpush1.bf16.msra.mxu0 %v15062_v34  ;;  %12302 = vmatpush3.bf16.msra.mxu1 %v15117_v35 }
  0xf5   :  { %2605 = vmatprep.subr.bf16.mxu0 %v15067_v36  ;;  %12303 = vmatprep.subr.bf16.mxu1 %v15118_v37 }
  0xf8   :  { %2606 = vmatpush1.bf16.msra.mxu0 %v15065_v38  ;;  %12304 = vmatpush3.bf16.msra.mxu1 %v15122_v39 }
  0xf9   :  { %2607 = vmatprep.subr.bf16.mxu0 %v15071_v40  ;;  %12305 = vmatprep.subr.bf16.mxu1 %v15123_v41 }
  0xfc   :  { %2608 = vmatpush1.bf16.msra.mxu0 %v15069_v42  ;;  %12306 = vmatpush3.bf16.msra.mxu1 %v15127_v44 }
  0xfd   :  { %2609 = vmatprep.subr.bf16.mxu0 %v15076_v43  ;;  %12307 = vmatprep.subr.bf16.mxu1 %v15128_v45 }
  0xfe   :  { %21 = vsyncpa [#allocation3], 0  ;;  %v15079_v52 = vld [vmem:[%s24020_s1 + $0x2e8] ss:$28 sps:$4 sm:$0xff]   ;;  %v15137_v53 = vld [vmem:[%s24020_s1 + $0x4b0] ss:$28 sps:$4 sm:$0xff]  }
  0xff   :  { %v15086_v55 = vld [vmem:[%s24020_s1 + $0x324] ss:$28 sps:$4 sm:$0xff]   ;;  %v15091_v60 = vld [vmem:[%s24020_s1 + $0x35c] ss:$28 sps:$4 sm:$0xff]   ;;  %v15096_v1 = vld [vmem:[%s24020_s1 + $0x394] ss:$28 sps:$4 sm:$0xff]  }
 0x100   :  { %2610 = vmatpush1.bf16.msra.mxu0 %v15074_v46  ;;  %12308 = vmatpush3.bf16.msra.mxu1 %v15132_v50  ;;  %v15138_v56 = vld [vmem:[%s24020_s1 + $0x6a8] ss:$28 sps:$4 sm:$0xff]   ;;  %v15084_v57 = vld [vmem:[%s24020_s1 + $0x320] ss:$28 sps:$4 sm:$0xff]   ;;  %v15089_v63 = vld [vmem:[%s24020_s1 + $0x358] ss:$28 sps:$4 sm:$0xff]  }
 0x101   :  { %2611 = vmatprep.subr.bf16.mxu0 %v15081_v48  ;;  %12309 = vmatprep.subr.bf16.mxu1 %v15133_v51  ;;  %v15142_v58 = vld [vmem:[%s24020_s1 + $0x4e8] ss:$28 sps:$4 sm:$0xff]   ;;  %v15143_v62 = vld [vmem:[%s24020_s1 + $0x6e0] ss:$28 sps:$4 sm:$0xff]   ;;  %v15148_v2 = vld [vmem:[%s24020_s1 + $0x8d8] ss:$28 sps:$4 sm:$0xff]  }
 0x102   :  { %v15147_v0 = vld [vmem:[%s24020_s1 + $0x520] ss:$28 sps:$4 sm:$0xff]   ;;  %v15094_v3 = vld [vmem:[%s24020_s1 + $0x390] ss:$28 sps:$4 sm:$0xff]   ;;  %v15152_v4 = vld [vmem:[%s24020_s1 + $0x718] ss:$28 sps:$4 sm:$0xff]  }
 0x103   :  { %v15101_v5 = vld [vmem:[%s24020_s1 + $0x3cc] ss:$28 sps:$4 sm:$0xff]   ;;  %v15106_v8 = vld [vmem:[%s24020_s1 + $0x404] ss:$28 sps:$4 sm:$0xff]   ;;  %v15111_v11 = vld [vmem:[%s24020_s1 + $0x43c] ss:$28 sps:$4 sm:$0xff]  }
 0x104   :  { %2612 = vmatpush1.bf16.msra.mxu0 %v15079_v52  ;;  %12310 = vmatpush3.bf16.msra.mxu1 %v15137_v53  ;;  %v15153_v6 = vld [vmem:[%s24020_s1 + $0x910] ss:$28 sps:$4 sm:$0xff]   ;;  %v15099_v7 = vld [vmem:[%s24020_s1 + $0x3c8] ss:$28 sps:$4 sm:$0xff]   ;;  %v15104_v9 = vld [vmem:[%s24020_s1 + $0x400] ss:$28 sps:$4 sm:$0xff]  }
 0x105   :  { %2613 = vmatprep.subr.bf16.mxu0 %v15086_v55  ;;  %12311 = vmatprep.subr.bf16.mxu1 %v15138_v56  ;;  %v15157_v61 = vld [vmem:[%s24020_s1 + $0x750] ss:$28 sps:$4 sm:$0xff]   ;;  %v15162_v10 = vld [vmem:[%s24020_s1 + $0x788] ss:$28 sps:$4 sm:$0xff]   ;;  %v15109_v12 = vld [vmem:[%s24020_s1 + $0x438] ss:$28 sps:$4 sm:$0xff]  }
 0x106   :  { %v15167_v14 = vld [vmem:[%s24020_s1 + $0x7c0] ss:$28 sps:$4 sm:$0xff]   ;;  %v15116_v15 = vld [vmem:[%s24020_s1 + $0x474] ss:$28 sps:$4 sm:$0xff]   ;;  %v15121_v19 = vld [vmem:[%s24020_s1 + $0x4ac] ss:$28 sps:$4 sm:$0xff]  }
 0x107   :  { %v15168_v16 = vld [vmem:[%s24020_s1 + $0x9b8] ss:$28 sps:$4 sm:$0xff]   ;;  %v15114_v17 = vld [vmem:[%s24020_s1 + $0x470] ss:$28 sps:$4 sm:$0xff]   ;;  %v15119_v21 = vld [vmem:[%s24020_s1 + $0x4a8] ss:$28 sps:$4 sm:$0xff]  }
 0x108   :  { %2614 = vmatpush1.bf16.msra.mxu0 %v15084_v57  ;;  %12312 = vmatpush3.bf16.msra.mxu1 %v15142_v58  ;;  %v15172_v18 = vld [vmem:[%s24020_s1 + $0x7f8] ss:$28 sps:$4 sm:$0xff]   ;;  %v15173_v20 = vld [vmem:[%s24020_s1 + $0x9f0] ss:$28 sps:$4 sm:$0xff]   ;;  %v15126_v24 = vld [vmem:[%s24020_s1 + $0x4e4] ss:$28 sps:$4 sm:$0xff]  }
 0x109   :  { %2615 = vmatprep.subr.bf16.mxu0 %v15091_v60  ;;  %12313 = vmatprep.subr.bf16.mxu1 %v15143_v62  ;;  %v15177_v23 = vld [vmem:[%s24020_s1 + $0x830] ss:$28 sps:$4 sm:$0xff]   ;;  %v15178_v25 = vld [vmem:[%s24020_s1 + $0xa28] ss:$28 sps:$4 sm:$0xff]   ;;  %v15124_v26 = vld [vmem:[%s24020_s1 + $0x4e0] ss:$28 sps:$4 sm:$0xff]  }
 0x10a   :  { %v15182_v27 = vld [vmem:[%s24020_s1 + $0x868] ss:$28 sps:$4 sm:$0xff]   ;;  %v15131_v28 = vld [vmem:[%s24020_s1 + $0x51c] ss:$28 sps:$4 sm:$0xff]   ;;  %v15136_v33 = vld [vmem:[%s24020_s1 + $0x554] ss:$28 sps:$4 sm:$0xff]  }
 0x10b   :  { %v15183_v29 = vld [vmem:[%s24020_s1 + $0xa60] ss:$28 sps:$4 sm:$0xff]   ;;  %v15129_v31 = vld [vmem:[%s24020_s1 + $0x518] ss:$28 sps:$4 sm:$0xff]   ;;  %v2910_v34 = vld [vmem:[%s24021_s2 + $0x8] sm:$0xff]  ;;  %v24037_v39 = vmov 0.0  }
 0x10c   :  { %2616 = vmatpush1.bf16.msra.mxu0 %v15089_v63  ;;  %12314 = vmatpush3.bf16.msra.mxu1 %v15147_v0  ;;  %v15187_v32 = vld [vmem:[%s24020_s1 + $0x8a0] ss:$28 sps:$4 sm:$0xff]   ;;  %v15134_v36 = vld [vmem:[%s24020_s1 + $0x550] ss:$28 sps:$4 sm:$0xff]   ;;  %v15194_v37 = vld [vmem:[%s24020_s1 + $0xa98] ss:$28 sps:$4 sm:$0xff]  }
 0x10d   :  { %2626 = vmatprep.subr.bf16.mxu0 %v15096_v1  ;;  %12321 = vmatprep.subr.bf16.mxu1 %v15148_v2  ;;  %v2912_v35 = vld [vmem:[%s24021_s2 + $0x18] sm:$0xff]  ;;  %v15141_v38 = vld [vmem:[%s24020_s1 + $0x58c] ss:$28 sps:$4 sm:$0xff]   ;;  %v15146_v42 = vld [vmem:[%s24020_s1 + $0x5c4] ss:$28 sps:$4 sm:$0xff]   ;;  %vm15261_vm1 = vmmov 0  }
 0x10e   :  { %v12901_v40 = vpack.c.bf16 %v2912_v35, %v2910_v34  ;;  %v15139_v41 = vld [vmem:[%s24020_s1 + $0x588] ss:$28 sps:$4 sm:$0xff]   ;;  %v2911_v44 = vld [vmem:[%s24021_s2 + $0x10] sm:$0xff]  ;;  %v2916_v46 = vld [vmem:[%s24021_s2 + $0x38] sm:$0xff]  ;;  %vm6414_vm2 = vcmask 556032   ;;  %vm6531_vm3 = vcmask 1043456  }
 0x10f   :  { %2618 = vmatmul.mubr.bf16.vlgmr.msra.gmra.mrb[4].mxu0 %v15557_v13  ;;  %2822 = vmatmul.mubr.bf16.vlgmr.msra.gmra.mrb[8].mxu1 %v15768_v30  ;;  %v15158_v13 = vld [vmem:[%s24020_s1 + $0x948] ss:$28 sps:$4 sm:$0xff]   ;;  %v15144_v48 = vld [vmem:[%s24020_s1 + $0x5c0] ss:$28 sps:$4 sm:$0xff]   ;;  %v2915_v55 = vld [vmem:[%s24021_s2 + $0x30] sm:$0xff]  ;;  %vm7192_vm4 = vcmask 1040384  }
 0x110   :  { %2627 = vmatpush1.bf16.msra.mxu0 %v15094_v3  ;;  %12322 = vmatpush3.bf16.msra.mxu1 %v15152_v4  ;;  %v2909_v43 = vld [vmem:[%s24021_s2] sm:$0xff]  ;;  %v2914_v45 = vld [vmem:[%s24021_s2 + $0x28] sm:$0xff]  ;;  %v15151_v51 = vld [vmem:[%s24020_s1 + $0x5fc] ss:$28 sps:$4 sm:$0xff]   ;;  %vm7188_vm5 = vcmask 400384   ;;  %vm10038_vm6 = vcmask 523264  }
 0x111   :  { %2628 = vmatprep.subr.bf16.mxu0 %v15101_v5  ;;  %12323 = vmatprep.subr.bf16.mxu1 %v15153_v6  ;;  %v12903_v50 = vpack.c.bf16 %v2911_v44, %v2909_v43  ;;  %v12905_v52 = vpack.c.bf16 %v2916_v46, %v2914_v45  ;;  %v2913_v53 = vld [vmem:[%s24021_s2 + $0x20] sm:$0xff]  ;;  %v2918_v56 = vld [vmem:[%s24021_s2 + $0x48] sm:$0xff]  ;;  %v2920_v57 = vld [vmem:[%s24021_s2 + $0x58] sm:$0xff]  ;;  %vm11046_vm7 = vcmask 80896  }
 0x112   :  { %2658 = vmatprep.mubr.bf16.mxu0 %v15668_v54  ;;  %2861 = vmatprep.mubr.bf16.mxu1 %v15808_v47  ;;  %v15163_v54 = vld [vmem:[%s24020_s1 + $0x980] ss:$28 sps:$4 sm:$0xff]   ;;  %v15149_v58 = vld [vmem:[%s24020_s1 + $0x5f8] ss:$28 sps:$4 sm:$0xff]   ;;  %v12907_v60 = vpack.c.bf16 %v2915_v55, %v2913_v53  ;;  %v12909_v63 = vpack.c.bf16 %v2920_v57, %v2918_v56  ;;  %v2922_v2 = vld [vmem:[%s24021_s2 + $0x68] sm:$0xff] }
 0x113   :  { %v15156_v62 = vld [vmem:[%s24020_s1 + $0x634] ss:$28 sps:$4 sm:$0xff]   ;;  %v2917_v0 = vld [vmem:[%s24021_s2 + $0x40] sm:$0xff]  ;;  %v2924_v3 = vld [vmem:[%s24021_s2 + $0x78] sm:$0xff] }
 0x114   :  { %2629 = vmatpush1.bf16.msra.mxu0 %v15099_v7  ;;  %12324 = vmatpush3.bf16.msra.mxu1 %v15157_v61  ;;  %v2919_v1 = vld [vmem:[%s24021_s2 + $0x50] sm:$0xff]  ;;  %v15161_v6 = vld [vmem:[%s24020_s1 + $0x66c] ss:$28 sps:$4 sm:$0xff]   ;;  %v12913_v7 = vpack.c.bf16 %v2924_v3, %v2922_v2  ;;  %v2921_v61 = vld [vmem:[%s24021_s2 + $0x60] sm:$0xff] }
 0x115   :  { %2630 = vmatprep.subr.bf16.mxu0 %v15106_v8  ;;  %12325 = vmatprep.subr.bf16.mxu1 %v15158_v13  ;;  %v15154_v4 = vld [vmem:[%s24020_s1 + $0x630] ss:$28 sps:$4 sm:$0xff]   ;;  %v12911_v5 = vpack.c.bf16 %v2919_v1, %v2917_v0  ;;  %v2940_v35 = vld [vmem:[%s24021_s2 + $0xf8] sm:$0xff]  ;;  %v15179_v45 = vld [vmem:[%s24020_s1 + $0x748] ss:$28 sps:$4 sm:$0xff]  }
 0x116   :  { %v2923_v8 = vld [vmem:[%s24021_s2 + $0x70] sm:$0xff]  ;;  %v2926_v13 = vld [vmem:[%s24021_s2 + $0x88] sm:$0xff]  ;;  %v2944_v44 = vld [vmem:[%s24021_s2 + $0x118] sm:$0xff] }
 0x117   :  { %v2938_v34 = vld [vmem:[%s24021_s2 + $0xe8] sm:$0xff]  ;;  %v2948_v53 = vld [vmem:[%s24021_s2 + $0x138] sm:$0xff]  ;;  %v15193_v2 = vld [vmem:[%s24020_s1 + $0x7f4] ss:$28 sps:$4 sm:$0xff]  }
 0x118   :  { %2631 = vmatpush1.bf16.msra.mxu0 %v15104_v9  ;;  %12326 = vmatpush3.bf16.msra.mxu1 %v15162_v10  ;;  %v2928_v9 = vld [vmem:[%s24021_s2 + $0x98] sm:$0xff]  ;;  %v15159_v10 = vld [vmem:[%s24020_s1 + $0x668] ss:$28 sps:$4 sm:$0xff]  }
 0x119   :  { %2632 = vmatprep.subr.bf16.mxu0 %v15111_v11  ;;  %12327 = vmatprep.subr.bf16.mxu1 %v15163_v54  ;;  %v12915_v11 = vpack.c.bf16 %v2923_v8, %v2921_v61  ;;  %v15166_v54 = vld [vmem:[%s24020_s1 + $0x6a4] ss:$28 sps:$4 sm:$0xff]   ;;  %v2942_v43 = vld [vmem:[%s24021_s2 + $0x108] sm:$0xff]  ;;  %v15190_v57 = vld [vmem:[%s24020_s1 + $0x7bc] ss:$28 sps:$4 sm:$0xff]  }
 0x11a   :  { %v15184_v55 = vld [vmem:[%s24020_s1 + $0x780] ss:$28 sps:$4 sm:$0xff]   ;;  %v15188_v0 = vld [vmem:[%s24020_s1 + $0x7b8] ss:$28 sps:$4 sm:$0xff]   ;;  %v15191_v61 = vld [vmem:[%s24020_s1 + $0x7f0] ss:$28 sps:$4 sm:$0xff]  }
 0x11c   :  { %2633 = vmatpush1.bf16.msra.mxu0 %v15109_v12  ;;  %12328 = vmatpush3.bf16.msra.mxu1 %v15167_v14  ;;  %v12917_v12 = vpack.c.bf16 %v2928_v9, %v2926_v13  ;;  %v2925_v14 = vld [vmem:[%s24021_s2 + $0x80] sm:$0xff]  ;;  %v15197_v13 = vld [vmem:[%s24020_s1 + $0x82c] ss:$28 sps:$4 sm:$0xff]  }
 0x11d   :  { %2634 = vmatprep.subr.bf16.mxu0 %v15116_v15  ;;  %12329 = vmatprep.subr.bf16.mxu1 %v15168_v16  ;;  %v2927_v15 = vld [vmem:[%s24021_s2 + $0x90] sm:$0xff]  ;;  %v2930_v16 = vld [vmem:[%s24021_s2 + $0xa8] sm:$0xff] }
 0x120   :  { %2635 = vmatpush1.bf16.msra.mxu0 %v15114_v17  ;;  %12330 = vmatpush3.bf16.msra.mxu1 %v15172_v18  ;;  %v2932_v17 = vld [vmem:[%s24021_s2 + $0xb8] sm:$0xff] }
 0x121   :  { %2636 = vmatprep.subr.bf16.mxu0 %v15121_v19  ;;  %12331 = vmatprep.subr.bf16.mxu1 %v15173_v20  ;;  %v15164_v18 = vld [vmem:[%s24020_s1 + $0x6a0] ss:$28 sps:$4 sm:$0xff]   ;;  %v12919_v19 = vpack.c.bf16 %v2927_v15, %v2925_v14  ;;  %v15195_v14 = vld [vmem:[%s24020_s1 + $0x828] ss:$28 sps:$4 sm:$0xff]  }
 0x122   :  { %v15171_v20 = vld [vmem:[%s24020_s1 + $0x6dc] ss:$28 sps:$4 sm:$0xff]  }
 0x124   :  { %2637 = vmatpush1.bf16.msra.mxu0 %v15119_v21  ;;  %12332 = vmatpush3.bf16.msra.mxu1 %v15177_v23  ;;  %v12921_v21 = vpack.c.bf16 %v2932_v17, %v2930_v16  ;;  %v2929_v23 = vld [vmem:[%s24021_s2 + $0xa0] sm:$0xff] }
 0x125   :  { %2638 = vmatprep.subr.bf16.mxu0 %v15126_v24  ;;  %12333 = vmatprep.subr.bf16.mxu1 %v15178_v25  ;;  %v2931_v24 = vld [vmem:[%s24021_s2 + $0xb0] sm:$0xff]  ;;  %v2934_v25 = vld [vmem:[%s24021_s2 + $0xc8] sm:$0xff]  ;;  %v15200_v16 = vld [vmem:[%s24020_s1 + $0x864] ss:$28 sps:$4 sm:$0xff]  }
 0x128   :  { %2639 = vmatpush1.bf16.msra.mxu0 %v15124_v26  ;;  %12334 = vmatpush3.bf16.msra.mxu1 %v15182_v27  ;;  %v2936_v26 = vld [vmem:[%s24021_s2 + $0xd8] sm:$0xff] }
 0x129   :  { %2640 = vmatprep.subr.bf16.mxu0 %v15131_v28  ;;  %12335 = vmatprep.subr.bf16.mxu1 %v15183_v29  ;;  %v15169_v27 = vld [vmem:[%s24020_s1 + $0x6d8] ss:$28 sps:$4 sm:$0xff]   ;;  %v12923_v28 = vpack.c.bf16 %v2931_v24, %v2929_v23  ;;  %v15198_v23 = vld [vmem:[%s24020_s1 + $0x860] ss:$28 sps:$4 sm:$0xff]  }
 0x12a   :  { %v15176_v29 = vld [vmem:[%s24020_s1 + $0x714] ss:$28 sps:$4 sm:$0xff]  }
 0x12c   :  { %2641 = vmatpush1.bf16.msra.mxu0 %v15129_v31  ;;  %12336 = vmatpush3.bf16.msra.mxu1 %v15187_v32  ;;  %v12925_v31 = vpack.c.bf16 %v2936_v26, %v2934_v25  ;;  %v2933_v32 = vld [vmem:[%s24021_s2 + $0xc0] sm:$0xff]  ;;  %v15203_v25 = vld [vmem:[%s24020_s1 + $0x89c] ss:$28 sps:$4 sm:$0xff]  }
 0x12d   :  { %2642 = vmatprep.subr.bf16.mxu0 %v15136_v33  ;;  %12807 = vmatprep.subr.bf16.mxu1 %v24037_v39  ;;  %v2935_v33 = vld [vmem:[%s24021_s2 + $0xd0] sm:$0xff] }
 0x12f   :  { %2862 = vmatmul.mubr.bf16.vlgmr.msra.gmra.mrb[12].mxu1 %v15974_v49 }
 0x130   :  { %2643 = vmatpush1.bf16.msra.mxu0 %v15134_v36  ;;  %12808 = vmatpush3.bf16.msra.mxu1 %v15194_v37  ;;  %v15174_v36 = vld [vmem:[%s24020_s1 + $0x710] ss:$28 sps:$4 sm:$0xff]   ;;  %v12927_v37 = vpack.c.bf16 %v2935_v33, %v2933_v32  ;;  %v15201_v32 = vld [vmem:[%s24020_s1 + $0x898] ss:$28 sps:$4 sm:$0xff]  }
 0x131   :  { %2644 = vmatprep.subr.bf16.mxu0 %v15141_v38  ;;  %12809 = vmatprep.mubr.msk.bf16.mxu1 %vm15261_vm1, %v24037_v39  ;;  %v15181_v38 = vld [vmem:[%s24020_s1 + $0x74c] ss:$28 sps:$4 sm:$0xff]  }
 0x132   :  { %12902 = vmatprep.subr.bf16.mxu1 %v12901_v40  ;;  %v12929_v40 = vpack.c.bf16 %v2940_v35, %v2938_v34  ;;  %v15206_v34 = vld [vmem:[%s24020_s1 + $0x8d4] ss:$28 sps:$4 sm:$0xff]  }
 0x134   :  { %2645 = vmatpush1.bf16.msra.mxu0 %v15139_v41  ;;  %v2937_v41 = vld [vmem:[%s24021_s2 + $0xe0] sm:$0xff] }
 0x135   :  { %2646 = vmatprep.subr.bf16.mxu0 %v15146_v42  ;;  %v2939_v42 = vld [vmem:[%s24021_s2 + $0xf0] sm:$0xff] }
 0x136   :  { %v12931_v46 = vpack.c.bf16 %v2939_v42, %v2937_v41  ;;  %v15204_v41 = vld [vmem:[%s24020_s1 + $0x8d0] ss:$28 sps:$4 sm:$0xff]  }
 0x137   :  { %12810 = vmatmul.mubr.msk.bf16.vlgmr.msra.gmra.mrb[16].mxu1 %vm2253_vm0, %v15995_v59 }
 0x138   :  { %2647 = vmatpush1.bf16.msra.mxu0 %v15144_v48  ;;  %12904 = vmatpush1.bf16.msra.mxu1 %v12903_v50  ;;  %v15186_v48 = vld [vmem:[%s24020_s1 + $0x784] ss:$28 sps:$4 sm:$0xff]   ;;  %v12933_v50 = vpack.c.bf16 %v2944_v44, %v2942_v43  ;;  %v15209_v43 = vld [vmem:[%s24020_s1 + $0x90c] ss:$28 sps:$4 sm:$0xff]  }
 0x139   :  { %2648 = vmatprep.subr.bf16.mxu0 %v15151_v51  ;;  %12906 = vmatprep.subr.bf16.mxu1 %v12905_v52  ;;  %v2941_v51 = vld [vmem:[%s24021_s2 + $0x100] sm:$0xff]  ;;  %v2946_v52 = vld [vmem:[%s24021_s2 + $0x128] sm:$0xff] }
 0x13c   :  { %2649 = vmatpush1.bf16.msra.mxu0 %v15149_v58  ;;  %12908 = vmatpush1.bf16.msra.mxu1 %v12907_v60  ;;  %v12937_v58 = vpack.c.bf16 %v2948_v53, %v2946_v52  ;;  %v2945_v60 = vld [vmem:[%s24021_s2 + $0x120] sm:$0xff] }
 0x13d   :  { %2650 = vmatprep.subr.bf16.mxu0 %v15156_v62  ;;  %12910 = vmatprep.subr.bf16.mxu1 %v12909_v63  ;;  %v2950_v62 = vld [vmem:[%s24021_s2 + $0x148] sm:$0xff]  ;;  %v2952_v63 = vld [vmem:[%s24021_s2 + $0x158] sm:$0xff]  ;;  %v15212_v52 = vld [vmem:[%s24020_s1 + $0x944] ss:$28 sps:$4 sm:$0xff]  }
 0x13e   :  { %v12941_v3 = vpack.c.bf16 %v2952_v63, %v2950_v62  ;;  %v15219_v62 = vld [vmem:[%s24020_s1 + $0x9e8] ss:$28 sps:$4 sm:$0xff]  }
 0x13f   :  { %v15224_v63 = vld [vmem:[%s24020_s1 + $0xa24] ss:$28 sps:$4 sm:$0xff]  }
 0x140   :  { %2651 = vmatpush1.bf16.msra.mxu0 %v15154_v4  ;;  %12912 = vmatpush1.bf16.msra.mxu1 %v12911_v5  ;;  %v2949_v4 = vld [vmem:[%s24021_s2 + $0x140] sm:$0xff]  ;;  %v2951_v5 = vld [vmem:[%s24021_s2 + $0x150] sm:$0xff] }
 0x141   :  { %2652 = vmatprep.subr.bf16.mxu0 %v15161_v6  ;;  %12914 = vmatprep.subr.bf16.mxu1 %v12913_v7  ;;  %v2954_v6 = vld [vmem:[%s24021_s2 + $0x168] sm:$0xff]  ;;  %v2956_v7 = vld [vmem:[%s24021_s2 + $0x178] sm:$0xff]  ;;  %v12943_v8 = vpack.c.bf16 %v2951_v5, %v2949_v4 }
 0x142   :  { %v12945_v9 = vpack.c.bf16 %v2956_v7, %v2954_v6  ;;  %v11423_v4 = vld [vmem:[%s24021_s2 + $0x628] sm:$0xff]  ;;  %v11425_v5 = vld [vmem:[%s24021_s2 + $0x638] sm:$0xff] }
 0x143   :  { %v15228_v6 = vld [vmem:[%s24020_s1 + $0xa90] ss:$28 sps:$4 sm:$0xff]   ;;  %v13097_v7 = vpack.c.bf16 %v11425_v5, %v11423_v4  ;;  %v2985_v5 = vld [vmem:[%s24021_s2 + $0x260] sm:$0xff] }
 0x144   :  { %2653 = vmatpush1.bf16.msra.mxu0 %v15159_v10  ;;  %12916 = vmatpush1.bf16.msra.mxu1 %v12915_v11  ;;  %v2953_v10 = vld [vmem:[%s24021_s2 + $0x160] sm:$0xff]  ;;  %v2955_v11 = vld [vmem:[%s24021_s2 + $0x170] sm:$0xff] }
 0x145   :  { %2654 = vmatprep.subr.bf16.mxu0 %v15166_v54  ;;  %12918 = vmatprep.subr.bf16.mxu1 %v12917_v12  ;;  %v2958_v54 = vld [vmem:[%s24021_s2 + $0x188] sm:$0xff]  ;;  %v2960_v12 = vld [vmem:[%s24021_s2 + $0x198] sm:$0xff]  ;;  %v12947_v15 = vpack.c.bf16 %v2955_v11, %v2953_v10  ;;  %v11428_v11 = vld [vmem:[%s24021_s2 + $0x650] sm:$0xff] }
 0x146   :  { %v12949_v17 = vpack.c.bf16 %v2960_v12, %v2958_v54  ;;  %v11431_v54 = vld [vmem:[%s24021_s2 + $0x668] sm:$0xff]  ;;  %v11433_v12 = vld [vmem:[%s24021_s2 + $0x678] sm:$0xff] }
 0x148   :  { %2655 = vmatpush1.bf16.msra.mxu0 %v15164_v18  ;;  %12920 = vmatpush1.bf16.msra.mxu1 %v12919_v19  ;;  %v2957_v18 = vld [vmem:[%s24021_s2 + $0x180] sm:$0xff]  ;;  %v2959_v19 = vld [vmem:[%s24021_s2 + $0x190] sm:$0xff] }
 0x149   :  { %2656 = vmatprep.subr.bf16.mxu0 %v15171_v20  ;;  %12922 = vmatprep.subr.bf16.mxu1 %v12921_v21  ;;  %v2962_v20 = vld [vmem:[%s24021_s2 + $0x1a8] sm:$0xff]  ;;  %v2964_v21 = vld [vmem:[%s24021_s2 + $0x1b8] sm:$0xff]  ;;  %v12951_v24 = vpack.c.bf16 %v2959_v19, %v2957_v18  ;;  %v2973_v18 = vld [vmem:[%s24021_s2 + $0x200] sm:$0xff] }
 0x14a   :  { %v12953_v26 = vpack.c.bf16 %v2964_v21, %v2962_v20  ;;  %v11435_v19 = vld [vmem:[%s24021_s2 + $0x688] sm:$0xff]  ;;  %v11437_v20 = vld [vmem:[%s24021_s2 + $0x698] sm:$0xff] }
 0x14c   :  { %2657 = vmatpush1.bf16.msra.mxu0 %v15169_v27  ;;  %12924 = vmatpush1.bf16.msra.mxu1 %v12923_v28  ;;  %v2961_v27 = vld [vmem:[%s24021_s2 + $0x1a0] sm:$0xff]  ;;  %v2963_v28 = vld [vmem:[%s24021_s2 + $0x1b0] sm:$0xff] }
 0x14d   :  { %2667 = vmatprep.subr.bf16.mxu0 %v15176_v29  ;;  %12926 = vmatprep.subr.bf16.mxu1 %v12925_v31  ;;  %v2966_v29 = vld [vmem:[%s24021_s2 + $0x1c8] sm:$0xff]  ;;  %v2968_v31 = vld [vmem:[%s24021_s2 + $0x1d8] sm:$0xff]  ;;  %v12955_v33 = vpack.c.bf16 %v2963_v28, %v2961_v27 }
 0x14e   :  { %v12957_v35 = vpack.c.bf16 %v2968_v31, %v2966_v29  ;;  %v13109_v31 = vpack.c.bf16 %v11437_v20, %v11435_v19  ;;  %v11452_v19 = vld [vmem:[%s24021_s2 + $0x710] sm:$0xff] }
 0x14f   :  { %2659 = vmatmul.mubr.bf16.vlgmr.msra.gmra.mrb[4].mxu0 %v15768_v30  ;;  %v2943_v30 = vld [vmem:[%s24021_s2 + $0x110] sm:$0xff] }
 0x150   :  { %2668 = vmatpush1.bf16.msra.mxu0 %v15174_v36  ;;  %12928 = vmatpush1.bf16.msra.mxu1 %v12927_v37  ;;  %v12935_v56 = vpack.c.bf16 %v2943_v30, %v2941_v51  ;;  %v2965_v36 = vld [vmem:[%s24021_s2 + $0x1c0] sm:$0xff]  ;;  %v2967_v37 = vld [vmem:[%s24021_s2 + $0x1d0] sm:$0xff] }
 0x151   :  { %2669 = vmatprep.subr.bf16.mxu0 %v15181_v38  ;;  %12930 = vmatprep.subr.bf16.mxu1 %v12929_v40  ;;  %v2970_v38 = vld [vmem:[%s24021_s2 + $0x1e8] sm:$0xff]  ;;  %v2972_v40 = vld [vmem:[%s24021_s2 + $0x1f8] sm:$0xff]  ;;  %v12959_v42 = vpack.c.bf16 %v2967_v37, %v2965_v36  ;;  %v2977_v37 = vld [vmem:[%s24021_s2 + $0x220] sm:$0xff] }
 0x152   :  { %2699 = vmatprep.mubr.bf16.mxu0 %v15808_v47  ;;  %v2947_v47 = vld [vmem:[%s24021_s2 + $0x130] sm:$0xff]  ;;  %v12961_v44 = vpack.c.bf16 %v2972_v40, %v2970_v38  ;;  %v15207_v51 = vld [vmem:[%s24020_s1 + $0x908] ss:$28 sps:$4 sm:$0xff]  }
 0x153   :  { %v12939_v1 = vpack.c.bf16 %v2947_v47, %v2945_v60  ;;  %v15216_v60 = vld [vmem:[%s24020_s1 + $0x9b0] ss:$28 sps:$4 sm:$0xff]  }
 0x154   :  { %2670 = vmatpush1.bf16.msra.mxu0 %v15179_v45  ;;  %12932 = vmatpush1.bf16.msra.mxu1 %v12931_v46  ;;  %v2969_v45 = vld [vmem:[%s24021_s2 + $0x1e0] sm:$0xff]  ;;  %v2971_v46 = vld [vmem:[%s24021_s2 + $0x1f0] sm:$0xff]  ;;  %v15221_v47 = vld [vmem:[%s24020_s1 + $0x9ec] ss:$28 sps:$4 sm:$0xff]  }
 0x155   :  { %2671 = vmatprep.subr.bf16.mxu0 %v15186_v48  ;;  %12934 = vmatprep.subr.bf16.mxu1 %v12933_v50  ;;  %v2974_v48 = vld [vmem:[%s24021_s2 + $0x208] sm:$0xff]  ;;  %v2976_v50 = vld [vmem:[%s24021_s2 + $0x218] sm:$0xff]  ;;  %v12963_v30 = vpack.c.bf16 %v2971_v46, %v2969_v45  ;;  %v2979_v38 = vld [vmem:[%s24021_s2 + $0x230] sm:$0xff] }
 0x156   :  { %v12965_v53 = vpack.c.bf16 %v2976_v50, %v2974_v48  ;;  %v11438_v50 = vld [vmem:[%s24021_s2 + $0x6a0] sm:$0xff] }
 0x158   :  { %2672 = vmatpush1.bf16.msra.mxu0 %v15184_v55  ;;  %12936 = vmatpush1.bf16.msra.mxu1 %v12935_v56  ;;  %v15210_v55 = vld [vmem:[%s24020_s1 + $0x940] ss:$28 sps:$4 sm:$0xff]  }
 0x159   :  { %2673 = vmatprep.subr.bf16.mxu0 %v15190_v57  ;;  %12938 = vmatprep.subr.bf16.mxu1 %v12937_v58  ;;  %v15215_v56 = vld [vmem:[%s24020_s1 + $0x97c] ss:$28 sps:$4 sm:$0xff]   ;;  %v15218_v58 = vld [vmem:[%s24020_s1 + $0x9b4] ss:$28 sps:$4 sm:$0xff]  }
 0x15a   :  { %v15213_v57 = vld [vmem:[%s24020_s1 + $0x978] ss:$28 sps:$4 sm:$0xff]  }
 0x15c   :  { %2674 = vmatpush1.bf16.msra.mxu0 %v15188_v0  ;;  %12940 = vmatpush1.bf16.msra.mxu1 %v12939_v1  ;;  %v15222_v0 = vld [vmem:[%s24020_s1 + $0xa20] ss:$28 sps:$4 sm:$0xff]  }
 0x15d   :  { %2675 = vmatprep.subr.bf16.mxu0 %v15193_v2  ;;  %12942 = vmatprep.subr.bf16.mxu1 %v12941_v3  ;;  %v15227_v1 = vld [vmem:[%s24020_s1 + $0xa5c] ss:$28 sps:$4 sm:$0xff]   ;;  %v15230_v3 = vld [vmem:[%s24020_s1 + $0xa94] ss:$28 sps:$4 sm:$0xff]  }
 0x15e   :  { %v15225_v2 = vld [vmem:[%s24020_s1 + $0xa58] ss:$28 sps:$4 sm:$0xff]  }
 0x160   :  { %2676 = vmatpush1.bf16.msra.mxu0 %v15191_v61  ;;  %12944 = vmatpush1.bf16.msra.mxu1 %v12943_v8  ;;  %v11422_v61 = vld [vmem:[%s24021_s2 + $0x620] sm:$0xff]  ;;  %v11424_v8 = vld [vmem:[%s24021_s2 + $0x630] sm:$0xff] }
 0x161   :  { %2677 = vmatprep.subr.bf16.mxu0 %v15197_v13  ;;  %12946 = vmatprep.subr.bf16.mxu1 %v12945_v9  ;;  %v11427_v13 = vld [vmem:[%s24021_s2 + $0x648] sm:$0xff]  ;;  %v13099_v9 = vpack.c.bf16 %v11424_v8, %v11422_v61  ;;  %v2992_v8 = vld [vmem:[%s24021_s2 + $0x298] sm:$0xff] }
 0x162   :  { %v2990_v61 = vld [vmem:[%s24021_s2 + $0x288] sm:$0xff] }
 0x164   :  { %2678 = vmatpush1.bf16.msra.mxu0 %v15195_v14  ;;  %12948 = vmatpush1.bf16.msra.mxu1 %v12947_v15  ;;  %v13105_v15 = vpack.c.bf16 %v11433_v12, %v11431_v54  ;;  %v12981_v54 = vpack.c.bf16 %v2992_v8, %v2990_v61  ;;  %v2989_v12 = vld [vmem:[%s24021_s2 + $0x280] sm:$0xff]  ;;  %v3010_v8 = vld [vmem:[%s24021_s2 + $0x328] sm:$0xff] }
 0x165   :  { %2679 = vmatprep.subr.bf16.mxu0 %v15200_v16  ;;  %12950 = vmatprep.subr.bf16.mxu1 %v12949_v17  ;;  %v11430_v16 = vld [vmem:[%s24021_s2 + $0x660] sm:$0xff]  ;;  %v11432_v17 = vld [vmem:[%s24021_s2 + $0x670] sm:$0xff] }
 0x166   :  { %v13107_v21 = vpack.c.bf16 %v11432_v17, %v11430_v16  ;;  %v2994_v16 = vld [vmem:[%s24021_s2 + $0x2a8] sm:$0xff]  ;;  %v2996_v17 = vld [vmem:[%s24021_s2 + $0x2b8] sm:$0xff] }
 0x168   :  { %2680 = vmatpush1.bf16.msra.mxu0 %v15198_v23  ;;  %12952 = vmatpush1.bf16.msra.mxu1 %v12951_v24  ;;  %v2978_v23 = vld [vmem:[%s24021_s2 + $0x228] sm:$0xff]  ;;  %v2980_v24 = vld [vmem:[%s24021_s2 + $0x238] sm:$0xff] }
 0x169   :  { %2681 = vmatprep.subr.bf16.mxu0 %v15203_v25  ;;  %12954 = vmatprep.subr.bf16.mxu1 %v12953_v26  ;;  %v11434_v25 = vld [vmem:[%s24021_s2 + $0x680] sm:$0xff]  ;;  %v11436_v26 = vld [vmem:[%s24021_s2 + $0x690] sm:$0xff]  ;;  %v12969_v36 = vpack.c.bf16 %v2980_v24, %v2978_v23  ;;  %v11457_v23 = vld [vmem:[%s24021_s2 + $0x738] sm:$0xff]  ;;  %v12985_v24 = vpack.c.bf16 %v2996_v17, %v2994_v16 }
 0x16a   :  { %v3011_v16 = vld [vmem:[%s24021_s2 + $0x330] sm:$0xff] }
 0x16c   :  { %2682 = vmatpush1.bf16.msra.mxu0 %v15201_v32  ;;  %12956 = vmatpush1.bf16.msra.mxu1 %v12955_v33  ;;  %v11439_v32 = vld [vmem:[%s24021_s2 + $0x6a8] sm:$0xff]  ;;  %v11441_v33 = vld [vmem:[%s24021_s2 + $0x6b8] sm:$0xff] }
 0x16d   :  { %2683 = vmatprep.subr.bf16.mxu0 %v15206_v34  ;;  %12958 = vmatprep.subr.bf16.mxu1 %v12957_v35  ;;  %v13113_v48 = vpack.c.bf16 %v11441_v33, %v11439_v32  ;;  %v3000_v32 = vld [vmem:[%s24021_s2 + $0x2d8] sm:$0xff] }
 0x170   :  { %2684 = vmatpush1.bf16.msra.mxu0 %v15204_v41  ;;  %12960 = vmatpush1.bf16.msra.mxu1 %v12959_v42  ;;  %v13111_v42 = vpack.c.bf16 %v11436_v26, %v11434_v25  ;;  %v2993_v25 = vld [vmem:[%s24021_s2 + $0x2a0] sm:$0xff]  ;;  %v2995_v26 = vld [vmem:[%s24021_s2 + $0x2b0] sm:$0xff] }
 0x171   :  { %2685 = vmatprep.subr.bf16.mxu0 %v15209_v43  ;;  %12962 = vmatprep.subr.bf16.mxu1 %v12961_v44  ;;  %v2982_v43 = vld [vmem:[%s24021_s2 + $0x248] sm:$0xff]  ;;  %v2984_v44 = vld [vmem:[%s24021_s2 + $0x258] sm:$0xff] }
 0x174   :  { %2686 = vmatpush1.bf16.msra.mxu0 %v15207_v51  ;;  %12964 = vmatpush1.bf16.msra.mxu1 %v12963_v30  ;;  %v11440_v51 = vld [vmem:[%s24021_s2 + $0x6b0] sm:$0xff]  ;;  %v12971_v30 = vpack.c.bf16 %v2979_v38, %v2977_v37  ;;  %v12987_v38 = vpack.c.bf16 %v2995_v26, %v2993_v25 }
 0x175   :  { %2687 = vmatprep.subr.bf16.mxu0 %v15212_v52  ;;  %12966 = vmatprep.subr.bf16.mxu1 %v12965_v53  ;;  %v11443_v52 = vld [vmem:[%s24021_s2 + $0x6c8] sm:$0xff]  ;;  %v11445_v53 = vld [vmem:[%s24021_s2 + $0x6d8] sm:$0xff]  ;;  %v11456_v37 = vld [vmem:[%s24021_s2 + $0x730] sm:$0xff] }
 0x176   :  { %v11472_v25 = vld [vmem:[%s24021_s2 + $0x7b0] sm:$0xff] }
 0x178   :  { %2688 = vmatpush1.bf16.msra.mxu0 %v15210_v55  ;;  %v12973_v55 = vpack.c.bf16 %v2984_v44, %v2982_v43  ;;  %v2997_v43 = vld [vmem:[%s24021_s2 + $0x2c0] sm:$0xff]  ;;  %v2999_v44 = vld [vmem:[%s24021_s2 + $0x2d0] sm:$0xff] }
 0x179   :  { %2689 = vmatprep.subr.bf16.mxu0 %v15215_v56  ;;  %v2981_v56 = vld [vmem:[%s24021_s2 + $0x240] sm:$0xff] }
 0x17c   :  { %2690 = vmatpush1.bf16.msra.mxu0 %v15213_v57  ;;  %v2983_v57 = vld [vmem:[%s24021_s2 + $0x250] sm:$0xff] }
 0x17d   :  { %2691 = vmatprep.subr.bf16.mxu0 %v15218_v58  ;;  %v13115_v58 = vpack.c.bf16 %v11440_v51, %v11438_v50  ;;  %v11458_v51 = vld [vmem:[%s24021_s2 + $0x740] sm:$0xff] }
 0x180   :  { %2692 = vmatpush1.bf16.msra.mxu0 %v15216_v60  ;;  %v2986_v60 = vld [vmem:[%s24021_s2 + $0x268] sm:$0xff] }
 0x181   :  { %2693 = vmatprep.subr.bf16.mxu0 %v15221_v47  ;;  %v2988_v47 = vld [vmem:[%s24021_s2 + $0x278] sm:$0xff] }
 0x182   :  { %v12977_v4 = vpack.c.bf16 %v2988_v47, %v2986_v60  ;;  %v3006_v47 = vld [vmem:[%s24021_s2 + $0x308] sm:$0xff] }
 0x184   :  { %2694 = vmatpush1.bf16.msra.mxu0 %v15219_v62  ;;  %v13117_v62 = vpack.c.bf16 %v11445_v53, %v11443_v52  ;;  %v12991_v52 = vpack.c.bf16 %v2999_v44, %v2997_v43  ;;  %v11463_v53 = vld [vmem:[%s24021_s2 + $0x768] sm:$0xff]  ;;  %v11474_v44 = vld [vmem:[%s24021_s2 + $0x7c0] sm:$0xff] }
 0x185   :  { %2695 = vmatprep.subr.bf16.mxu0 %v15224_v63  ;;  %v11442_v63 = vld [vmem:[%s24021_s2 + $0x6c0] sm:$0xff] }
 0x188   :  { %2696 = vmatpush1.bf16.msra.mxu0 %v15222_v0  ;;  %v11444_v0 = vld [vmem:[%s24021_s2 + $0x6d0] sm:$0xff] }
 0x189   :  { %2697 = vmatprep.subr.bf16.mxu0 %v15227_v1  ;;  %v12975_v1 = vpack.c.bf16 %v2983_v57, %v2981_v56  ;;  %v3001_v57 = vld [vmem:[%s24021_s2 + $0x2e0] sm:$0xff] }
 0x18c   :  { %2698 = vmatpush1.bf16.msra.mxu0 %v15225_v2  ;;  %v11447_v2 = vld [vmem:[%s24021_s2 + $0x6e8] sm:$0xff] }
 0x18d   :  { %2708 = vmatprep.subr.bf16.mxu0 %v15230_v3  ;;  %v11449_v3 = vld [vmem:[%s24021_s2 + $0x6f8] sm:$0xff] }
 0x18f   :  { %2700 = vmatmul.mubr.bf16.vlgmr.msra.gmra.mrb[4].mxu0 %v15974_v49  ;;  %v11429_v49 = vld [vmem:[%s24021_s2 + $0x658] sm:$0xff] }
 0x190   :  { %2709 = vmatpush1.bf16.msra.mxu0 %v15228_v6  ;;  %2740 = vmatprep.mubr.bf16.mxu0 %v15259_v22  ;;  %v13101_v10 = vpack.c.bf16 %v11429_v49, %v11427_v13  ;;  %v11426_v22 = vld [vmem:[%s24021_s2 + $0x640] sm:$0xff]  ;;  %v2987_v6 = vld [vmem:[%s24021_s2 + $0x270] sm:$0xff]  ;;  %v13121_v13 = vpack.c.bf16 %v11449_v3, %v11447_v2  ;;  %v11467_v3 = vld [vmem:[%s24021_s2 + $0x788] sm:$0xff] }
 0x191   :  { %13098 = vmatprep.subr.bf16.mxu0 %v13097_v7  ;;  %v13103_v14 = vpack.c.bf16 %v11428_v11, %v11426_v22  ;;  %v13119_v7 = vpack.c.bf16 %v11444_v0, %v11442_v63  ;;  %v11446_v49 = vld [vmem:[%s24021_s2 + $0x6e0] sm:$0xff]  ;;  %v11451_v22 = vld [vmem:[%s24021_s2 + $0x708] sm:$0xff]  ;;  %v11453_v11 = vld [vmem:[%s24021_s2 + $0x718] sm:$0xff] }
 0x192   :  { %v11462_v0 = vld [vmem:[%s24021_s2 + $0x760] sm:$0xff] }
 0x19b   :  { %11419 = vmatmul.mubr.msk.bf16.vlgmr.msra.gmra.mrb[4].mxu0 %vm2253_vm0, %v15995_v59  ;;  %v2975_v59 = vld [vmem:[%s24021_s2 + $0x210] sm:$0xff] }
 0x19c   :  { %13100 = vmatpush1.bf16.msra.mxu0 %v13099_v9  ;;  %v12967_v29 = vpack.c.bf16 %v2975_v59, %v2973_v18  ;;  %v11448_v9 = vld [vmem:[%s24021_s2 + $0x6f0] sm:$0xff]  ;;  %v13125_v18 = vpack.c.bf16 %v11453_v11, %v11451_v22  ;;  %v11450_v59 = vld [vmem:[%s24021_s2 + $0x700] sm:$0xff]  ;;  %v11471_v11 = vld [vmem:[%s24021_s2 + $0x7a8] sm:$0xff] }
 0x19d   :  { %13102 = vmatprep.subr.bf16.mxu0 %v13101_v10  ;;  %v12979_v10 = vpack.c.bf16 %v2987_v6, %v2985_v5  ;;  %v3005_v6 = vld [vmem:[%s24021_s2 + $0x300] sm:$0xff] }
 0x1a0   :  { %13104 = vmatpush1.bf16.msra.mxu0 %v13103_v14  ;;  %v2991_v14 = vld [vmem:[%s24021_s2 + $0x290] sm:$0xff] }
 0x1a1   :  { %13106 = vmatprep.subr.bf16.mxu0 %v13105_v15  ;;  %v13123_v15 = vpack.c.bf16 %v11448_v9, %v11446_v49  ;;  %v12983_v20 = vpack.c.bf16 %v2991_v14, %v2989_v12  ;;  %v11466_v9 = vld [vmem:[%s24021_s2 + $0x780] sm:$0xff] }
 0x1a2   :  { %v16711_v27 = vpop.f32.mrb[0].mxu0  ;;  %v16713_v28 = vpop.f32.mrb[0].mxu1 }
 0x1a3   :  { %v16721_v34 = vpop.f32.mrb[1].mxu0  ;;  %v16723_v35 = vpop.f32.mrb[1].mxu1 }
 0x1a4   :  { %13108 = vmatpush1.bf16.msra.mxu0 %v13107_v21  ;;  %v2418_v40 = vpop.f32.mrb[2].mxu0  ;;  %v2582_v41 = vpop.f32.mrb[2].mxu1  ;;  %3172 = vmatprep.mubr.f32.mxu1 %v16721_v34  ;;  %v11455_v21 = vld [vmem:[%s24021_s2 + $0x728] sm:$0xff] }
 0x1a5   :  { %3653 = vmatprep.mubr.f32.mxu0 %v16721_v34  ;;  %v2419_v45 = vpop.f32.mrb[3].mxu0  ;;  %v2583_v46 = vpop.f32.mrb[3].mxu1  ;;  %3173 = vmatmul.mubr.f32.vlgmr.msra.gmra.mrb[20].mxu1 %v16711_v27  ;;  %v13129_v33 = vpack.c.bf16 %v11457_v23, %v11455_v21  ;;  %v11459_v40 = vld [vmem:[%s24021_s2 + $0x748] sm:$0xff]  ;;  %v11461_v41 = vld [vmem:[%s24021_s2 + $0x758] sm:$0xff] }
 0x1a6   :  { %12968 = vmatpush1.bf16.msra.mxu1 %v12967_v29  ;;  %13110 = vmatprep.subr.bf16.mxu0 %v13109_v31  ;;  %v13127_v29 = vpack.c.bf16 %v11452_v19, %v11450_v59  ;;  %v2998_v31 = vld [vmem:[%s24021_s2 + $0x2c8] sm:$0xff]  ;;  %v13133_v50 = vpack.c.bf16 %v11461_v41, %v11459_v40  ;;  %v3016_v19 = vld [vmem:[%s24021_s2 + $0x358] sm:$0xff] }
 0x1a7   :  { %3243 = vmatprep.mubr.f32.mxu1 %v16723_v35  ;;  %12970 = vmatprep.subr.bf16.mxu1 %v12969_v36  ;;  %v11454_v36 = vld [vmem:[%s24021_s2 + $0x720] sm:$0xff]  ;;  %v3002_v46 = vld [vmem:[%s24021_s2 + $0x2e8] sm:$0xff]  ;;  %v3020_v41 = vld [vmem:[%s24021_s2 + $0x378] sm:$0xff] }
 0x1a8   :  { %13112 = vmatpush1.bf16.msra.mxu0 %v13111_v42  ;;  %v12989_v42 = vpack.c.bf16 %v3000_v32, %v2998_v31  ;;  %v13131_v45 = vpack.c.bf16 %v11456_v37, %v11454_v36  ;;  %v3014_v59 = vld [vmem:[%s24021_s2 + $0x348] sm:$0xff]  ;;  %v11477_v32 = vld [vmem:[%s24021_s2 + $0x7d8] sm:$0xff]  ;;  %v3013_v36 = vld [vmem:[%s24021_s2 + $0x340] sm:$0xff] }
 0x1a9   :  { %13114 = vmatprep.subr.bf16.mxu0 %v13113_v48  ;;  %v3004_v48 = vld [vmem:[%s24021_s2 + $0x2f8] sm:$0xff]  ;;  %v11475_v31 = vld [vmem:[%s24021_s2 + $0x7c8] sm:$0xff]  ;;  %v3015_v37 = vld [vmem:[%s24021_s2 + $0x350] sm:$0xff] }
 0x1aa   :  { %12972 = vmatpush1.bf16.msra.mxu1 %v12971_v30  ;;  %v11460_v30 = vld [vmem:[%s24021_s2 + $0x750] sm:$0xff]  ;;  %v12993_v56 = vpack.c.bf16 %v3004_v48, %v3002_v46  ;;  %v3018_v40 = vld [vmem:[%s24021_s2 + $0x368] sm:$0xff]  ;;  %v13149_v43 = vpack.c.bf16 %v11477_v32, %v11475_v31  ;;  %v12045_v46 = vld [vmem:[%s24023_s4] ss:$0 sm:$0xff]  ;;  %v13007_v48 = vpack.c.bf16 %v3015_v37, %v3013_v36 }
 0x1ab   :  { %12974 = vmatprep.subr.bf16.mxu1 %v12973_v55  ;;  %v11465_v55 = vld [vmem:[%s24021_s2 + $0x778] sm:$0xff]  ;;  %v13135_v60 = vpack.c.bf16 %v11460_v30, %v11458_v51  ;;  %5424 = vperm.xlu1 %14740, %v12045_v46   ;;  %v13009_v30 = vpack.c.bf16 %v3020_v41, %v3018_v40  ;;  %v3029_v32 = vld [vmem:[%s24021_s2 + $0x3c0] sm:$0xff]  ;;  %v3034_v37 = vld [vmem:[%s24021_s2 + $0x3e8] sm:$0xff] }
 0x1ac   :  { %13116 = vmatpush1.bf16.msra.mxu0 %v13115_v58  ;;  %v3003_v58 = vld [vmem:[%s24021_s2 + $0x2f0] sm:$0xff]  ;;  %v13137_v63 = vpack.c.bf16 %v11465_v55, %v11463_v53  ;;  %v11481_v51 = vld [vmem:[%s24021_s2 + $0x7f8] sm:$0xff]  ;;  %v11490_v41 = vld [vmem:[%s24021_s2 + $0x840] sm:$0xff] }
 0x1ad   :  { %13118 = vmatprep.subr.bf16.mxu0 %v13117_v62  ;;  %v3008_v62 = vld [vmem:[%s24021_s2 + $0x318] sm:$0xff]  ;;  %v12995_v2 = vpack.c.bf16 %v3003_v58, %v3001_v57  ;;  %v3019_v53 = vld [vmem:[%s24021_s2 + $0x370] sm:$0xff]  ;;  %v12014_v58 = vld [vmem:[%s24022_s3 + $0x1] ss:$0 sm:$0xff] }
 0x1ae   :  { %12976 = vmatpush1.bf16.msra.mxu1 %v12975_v1  ;;  %v11464_v1 = vld [vmem:[%s24021_s2 + $0x770] sm:$0xff]  ;;  %v12997_v5 = vpack.c.bf16 %v3008_v62, %v3006_v47  ;;  %v3024_v57 = vld [vmem:[%s24021_s2 + $0x398] sm:$0xff]  ;;  %v11478_v47 = vld [vmem:[%s24021_s2 + $0x7e0] sm:$0xff] }
 0x1af   :  { %12978 = vmatprep.subr.bf16.mxu1 %v12977_v4  ;;  %v11469_v4 = vld [vmem:[%s24021_s2 + $0x798] sm:$0xff]  ;;  %v13139_v61 = vpack.c.bf16 %v11464_v1, %v11462_v0  ;;  %v11480_v62 = vld [vmem:[%s24021_s2 + $0x7f0] sm:$0xff]  ;;  %v11483_v1 = vld [vmem:[%s24021_s2 + $0x808] sm:$0xff] }
 0x1b0   :  { %13120 = vmatpush1.bf16.msra.mxu0 %v13119_v7  ;;  %v3007_v7 = vld [vmem:[%s24021_s2 + $0x310] sm:$0xff]  ;;  %v13141_v49 = vpack.c.bf16 %v11469_v4, %v11467_v3  ;;  %v3021_v4 = vld [vmem:[%s24021_s2 + $0x380] sm:$0xff] }
 0x1b1   :  { %13122 = vmatprep.subr.bf16.mxu0 %v13121_v13  ;;  %v3012_v13 = vld [vmem:[%s24021_s2 + $0x338] sm:$0xff]  ;;  %v12999_v22 = vpack.c.bf16 %v3007_v7, %v3005_v6  ;;  %v13155_v6 = vpack.c.bf16 %v11480_v62, %v11478_v47  ;;  %v3026_v7 = vld [vmem:[%s24021_s2 + $0x3a8] sm:$0xff]  ;;  %v3037_v62 = vld [vmem:[%s24021_s2 + $0x400] sm:$0xff] }
 0x1b2   :  { %12980 = vmatpush1.bf16.msra.mxu1 %v12979_v10  ;;  %v11468_v10 = vld [vmem:[%s24021_s2 + $0x790] sm:$0xff]  ;;  %v13001_v14 = vpack.c.bf16 %v3012_v13, %v3010_v8  ;;  %v12015_v8 = vld [vmem:[%s24022_s3 + $0x2] ss:$0 sm:$0xff] }
 0x1b3   :  { %12982 = vmatprep.subr.bf16.mxu1 %v12981_v54  ;;  %v11473_v54 = vld [vmem:[%s24021_s2 + $0x7b8] sm:$0xff] }
 0x1b4   :  { %13124 = vmatpush1.bf16.msra.mxu0 %v13123_v15  ;;  %v3009_v15 = vld [vmem:[%s24021_s2 + $0x320] sm:$0xff]  ;;  %v13145_v23 = vpack.c.bf16 %v11473_v54, %v11471_v11  ;;  %v11487_v11 = vld [vmem:[%s24021_s2 + $0x828] sm:$0xff]  ;;  %v11489_v54 = vld [vmem:[%s24021_s2 + $0x838] sm:$0xff] }
 0x1b5   :  { %13126 = vmatprep.subr.bf16.mxu0 %v13125_v18  ;;  %v13143_v18 = vpack.c.bf16 %v11468_v10, %v11466_v9  ;;  %v11484_v9 = vld [vmem:[%s24021_s2 + $0x810] sm:$0xff]  ;;  %v12047_v10 = vld [vmem:[%s24023_s4 + $0x2] ss:$0 sm:$0xff] }
 0x1b6   :  { %12984 = vmatpush1.bf16.msra.mxu1 %v12983_v20 }
 0x1b7   :  { %12986 = vmatprep.subr.bf16.mxu1 %v12985_v24  ;;  %v11470_v24 = vld [vmem:[%s24021_s2 + $0x7a0] sm:$0xff] }
 0x1b8   :  { %13128 = vmatpush1.bf16.msra.mxu0 %v13127_v29  ;;  %v13003_v29 = vpack.c.bf16 %v3011_v16, %v3009_v15  ;;  %v3027_v15 = vld [vmem:[%s24021_s2 + $0x3b0] sm:$0xff] }
 0x1b9   :  { %13130 = vmatprep.subr.bf16.mxu0 %v13129_v33  ;;  %v13005_v33 = vpack.c.bf16 %v3016_v19, %v3014_v59  ;;  %v12016_v59 = vld [vmem:[%s24022_s3 + $0x3] ss:$0 sm:$0xff]  ;;  %v13161_v19 = vpack.c.bf16 %v11489_v54, %v11487_v11 }
 0x1ba   :  { %12988 = vmatpush1.bf16.msra.mxu1 %v12987_v38  ;;  %v13147_v38 = vpack.c.bf16 %v11472_v25, %v11470_v24  ;;  %v12048_v24 = vld [vmem:[%s24023_s4 + $0x3] ss:$0 sm:$0xff] }
 0x1bb   :  { %12990 = vmatprep.subr.bf16.mxu1 %v12989_v42  ;;  %v12013_v42 = vld [vmem:[%s24022_s3] ss:$0 sm:$0xff] }
 0x1bc   :  { %13132 = vmatpush1.bf16.msra.mxu0 %v13131_v45  ;;  %v11476_v45 = vld [vmem:[%s24021_s2 + $0x7d0] sm:$0xff]  ;;  %5040 = vperm.xlu0 %14739, %v12013_v42  }
 0x1bd   :  { %13134 = vmatprep.subr.bf16.mxu0 %v13133_v50  ;;  %v11479_v50 = vld [vmem:[%s24021_s2 + $0x7e8] sm:$0xff]  ;;  %v13151_v55 = vpack.c.bf16 %v11476_v45, %v11474_v44  ;;  %v11492_v42 = vld [vmem:[%s24021_s2 + $0x850] sm:$0xff]  ;;  %v11497_v45 = vld [vmem:[%s24021_s2 + $0x878] sm:$0xff] }
 0x1be   :  { %12992 = vmatpush1.bf16.msra.mxu1 %v12991_v52  ;;  %v3017_v52 = vld [vmem:[%s24021_s2 + $0x360] sm:$0xff]  ;;  %v11495_v44 = vld [vmem:[%s24021_s2 + $0x868] sm:$0xff] }
 0x1bf   :  { %12994 = vmatprep.subr.bf16.mxu1 %v12993_v56  ;;  %v3022_v56 = vld [vmem:[%s24021_s2 + $0x388] sm:$0xff]  ;;  %v13011_v0 = vpack.c.bf16 %v3019_v53, %v3017_v52  ;;  %v3040_v52 = vld [vmem:[%s24021_s2 + $0x418] sm:$0xff]  ;;  %v13169_v53 = vpack.c.bf16 %v11497_v45, %v11495_v44 }
 0x1c0   :  { %13136 = vmatpush1.bf16.msra.mxu0 %v13135_v60  ;;  %v13153_v60 = vpack.c.bf16 %v11481_v51, %v11479_v50  ;;  %5044 = vperm.xlu0 %14739, %v12014_v58   ;;  %v13013_v3 = vpack.c.bf16 %v3024_v57, %v3022_v56  ;;  %v3035_v50 = vld [vmem:[%s24021_s2 + $0x3f0] sm:$0xff]  ;;  %v13167_v51 = vpack.c.bf16 %v11492_v42, %v11490_v41  ;;  %v11499_v58 = vld [vmem:[%s24021_s2 + $0x888] sm:$0xff]  ;;  %v3049_v42 = vld [vmem:[%s24021_s2 + $0x460] sm:$0xff] }
 0x1c1   :  { %13138 = vmatprep.subr.bf16.mxu0 %v13137_v63  ;;  %v12046_v63 = vld [vmem:[%s24023_s4 + $0x1] ss:$0 sm:$0xff]  ;;  %v11496_v56 = vld [vmem:[%s24021_s2 + $0x870] sm:$0xff]  ;;  %v3054_v45 = vld [vmem:[%s24021_s2 + $0x488] sm:$0xff] }
 0x1c2   :  { %12996 = vmatpush1.bf16.msra.mxu1 %v12995_v2  ;;  %v12293_v12 = vpop.f32.mrb[4].mxu1  ;;  %v11485_v2 = vld [vmem:[%s24021_s2 + $0x818] sm:$0xff]  ;;  %5428 = vperm.xlu1 %14740, %v12046_v63   ;;  %v3039_v63 = vld [vmem:[%s24021_s2 + $0x410] sm:$0xff] }
 0x1c3   :  { %12998 = vmatprep.subr.bf16.mxu1 %v12997_v5  ;;  %v12294_v17 = vpop.f32.mrb[5].mxu1  ;;  %v3023_v5 = vld [vmem:[%s24021_s2 + $0x390] sm:$0xff]  ;;  %v13157_v13 = vpack.c.bf16 %v11485_v2, %v11483_v1  ;;  %v3042_v1 = vld [vmem:[%s24021_s2 + $0x428] sm:$0xff]  ;;  %v3044_v2 = vld [vmem:[%s24021_s2 + $0x438] sm:$0xff] }
 0x1c4   :  { %13140 = vmatpush1.bf16.msra.mxu0 %v13139_v61  ;;  %v16933_v20 = vadd.f32 %v12294_v17, %v12293_v12  ;;  %v12296_v21 = vpop.f32.mrb[6].mxu1  ;;  %v3028_v61 = vld [vmem:[%s24021_s2 + $0x3b8] sm:$0xff]  ;;  %5048 = vperm.xlu0 %14739, %v12015_v8   ;;  %v3030_v17 = vld [vmem:[%s24021_s2 + $0x3c8] sm:$0xff]  ;;  %v13031_v8 = vpack.c.bf16 %v3039_v63, %v3037_v62 }
 0x1c5   :  { %13142 = vmatprep.subr.bf16.mxu0 %v13141_v49  ;;  %v12297_v26 = vpop.f32.mrb[7].mxu1  ;;  %v11482_v49 = vld [vmem:[%s24021_s2 + $0x800] sm:$0xff]  ;;  %v13017_v12 = vpack.c.bf16 %v3028_v61, %v3026_v7  ;;  %v11505_v7 = vld [vmem:[%s24021_s2 + $0x8b8] sm:$0xff] }
 0x1c6   :  { %13000 = vmatpush1.bf16.msra.mxu1 %v12999_v22  ;;  %v13015_v22 = vpack.c.bf16 %v3023_v5, %v3021_v4  ;;  %5432 = vperm.xlu1 %14740, %v12047_v10   ;;  %v13159_v16 = vpack.c.bf16 %v11484_v9, %v11482_v49  ;;  %v11486_v21 = vld [vmem:[%s24021_s2 + $0x820] sm:$0xff]  ;;  %v11491_v26 = vld [vmem:[%s24021_s2 + $0x848] sm:$0xff]  ;;  %v11500_v5 = vld [vmem:[%s24021_s2 + $0x890] sm:$0xff]  ;;  %v13033_v49 = vpack.c.bf16 %v3044_v2, %v3042_v1 }
 0x1c7   :  { %13002 = vmatprep.subr.bf16.mxu1 %v13001_v14  ;;  %v3025_v14 = vld [vmem:[%s24021_s2 + $0x3a0] sm:$0xff]  ;;  %v3043_v10 = vld [vmem:[%s24021_s2 + $0x430] sm:$0xff]  ;;  %v3060_v62 = vld [vmem:[%s24021_s2 + $0x4b8] sm:$0xff] }
 0x1c8   :  { %13144 = vmatpush1.bf16.msra.mxu0 %v13143_v18  ;;  %v3032_v18 = vld [vmem:[%s24021_s2 + $0x3d8] sm:$0xff]  ;;  %5052 = vperm.xlu0 %14739, %v12016_v59   ;;  %v13019_v25 = vpack.c.bf16 %v3027_v15, %v3025_v14  ;;  %v11498_v4 = vld [vmem:[%s24021_s2 + $0x880] sm:$0xff]  ;;  %v11507_v59 = vld [vmem:[%s24021_s2 + $0x8c8] sm:$0xff] }
 0x1c9   :  { %13146 = vmatprep.subr.bf16.mxu0 %v13145_v23  ;;  %v11488_v23 = vld [vmem:[%s24021_s2 + $0x830] sm:$0xff]  ;;  %v13021_v31 = vpack.c.bf16 %v3032_v18, %v3030_v17  ;;  %v3041_v9 = vld [vmem:[%s24021_s2 + $0x420] sm:$0xff]  ;;  %v3048_v14 = vld [vmem:[%s24021_s2 + $0x458] sm:$0xff] }
 0x1ca   :  { %13004 = vmatpush1.bf16.msra.mxu1 %v13003_v29  ;;  %v11493_v29 = vld [vmem:[%s24021_s2 + $0x858] sm:$0xff]  ;;  %5436 = vperm.xlu1 %14740, %v12048_v24   ;;  %v13163_v36 = vpack.c.bf16 %v11488_v23, %v11486_v21  ;;  %v11504_v17 = vld [vmem:[%s24021_s2 + $0x8b0] sm:$0xff]  ;;  %v13035_v23 = vpack.c.bf16 %v3043_v10, %v3041_v9  ;;  %v11519_v2 = vld [vmem:[%s24021_s2 + $0x928] sm:$0xff] }
 0x1cb   :  { %13006 = vmatprep.subr.bf16.mxu1 %v13005_v33  ;;  %v3031_v33 = vld [vmem:[%s24021_s2 + $0x3d0] sm:$0xff]  ;;  %v13165_v40 = vpack.c.bf16 %v11493_v29, %v11491_v26  ;;  %v12017_v9 = vld [vmem:[%s24022_s3 + $0x4] ss:$0 sm:$0xff] }
 0x1cc   :  { %13148 = vmatpush1.bf16.msra.mxu0 %v13147_v38  ;;  %v3036_v38 = vld [vmem:[%s24021_s2 + $0x3f8] sm:$0xff]  ;;  %v3047_v26 = vld [vmem:[%s24021_s2 + $0x450] sm:$0xff]  ;;  %v12049_v10 = vld [vmem:[%s24023_s4 + $0x4] ss:$0 sm:$0xff] }
 0x1cd   :  { %13150 = vmatprep.subr.bf16.mxu0 %v13149_v43  ;;  %v13023_v43 = vpack.c.bf16 %v3031_v33, %v3029_v32  ;;  %v13025_v46 = vpack.c.bf16 %v3036_v38, %v3034_v37  ;;  %v11506_v33 = vld [vmem:[%s24021_s2 + $0x8c0] sm:$0xff]  ;;  %v11511_v37 = vld [vmem:[%s24021_s2 + $0x8e8] sm:$0xff]  ;;  %v11513_v38 = vld [vmem:[%s24021_s2 + $0x8f8] sm:$0xff] }
 0x1ce   :  { %13008 = vmatpush1.bf16.msra.mxu1 %v13007_v48  ;;  %v3033_v48 = vld [vmem:[%s24021_s2 + $0x3e0] sm:$0xff]  ;;  %v11516_v1 = vld [vmem:[%s24021_s2 + $0x910] sm:$0xff] }
 0x1cf   :  { %13010 = vmatprep.subr.bf16.mxu1 %v13009_v30  ;;  %v3038_v30 = vld [vmem:[%s24021_s2 + $0x408] sm:$0xff]  ;;  %v13027_v57 = vpack.c.bf16 %v3035_v50, %v3033_v48  ;;  %v13185_v48 = vpack.c.bf16 %v11513_v38, %v11511_v37  ;;  %v11510_v50 = vld [vmem:[%s24021_s2 + $0x8e0] sm:$0xff]  ;;  %v3067_v38 = vld [vmem:[%s24021_s2 + $0x4f0] sm:$0xff] }
 0x1d0   :  { %13152 = vmatpush1.bf16.msra.mxu0 %v13151_v55  ;;  %v11494_v55 = vld [vmem:[%s24021_s2 + $0x860] sm:$0xff]  ;;  %v13029_v47 = vpack.c.bf16 %v3040_v52, %v3038_v30  ;;  %v11515_v30 = vld [vmem:[%s24021_s2 + $0x908] sm:$0xff]  ;;  %v11517_v52 = vld [vmem:[%s24021_s2 + $0x918] sm:$0xff] }
 0x1d1   :  { %13154 = vmatprep.subr.bf16.mxu0 %v13153_v60  ;;  %v11501_v60 = vld [vmem:[%s24021_s2 + $0x898] sm:$0xff]  ;;  %v13189_v63 = vpack.c.bf16 %v11517_v52, %v11515_v30  ;;  %v3065_v37 = vld [vmem:[%s24021_s2 + $0x4e0] sm:$0xff] }
 0x1d2   :  { %13012 = vmatpush1.bf16.msra.mxu1 %v13011_v0  ;;  %v13171_v0 = vpack.c.bf16 %v11496_v56, %v11494_v55  ;;  %v3053_v56 = vld [vmem:[%s24021_s2 + $0x480] sm:$0xff]  ;;  %v13059_v30 = vpack.c.bf16 %v3067_v38, %v3065_v37  ;;  %v11545_v37 = vld [vmem:[%s24021_s2 + $0x9f8] sm:$0xff] }
 0x1d3   :  { %13014 = vmatprep.subr.bf16.mxu1 %v13013_v3  ;;  %v13173_v3 = vpack.c.bf16 %v11501_v60, %v11499_v58  ;;  %v12077_v58 = vld [vmem:[%s24024_s5] ss:$0 sm:$0xff]  ;;  %v12019_v52 = vld [vmem:[%s24022_s3 + $0x6] ss:$0 sm:$0xff] }
 0x1d4   :  { %13156 = vmatpush1.bf16.msra.mxu0 %v13155_v6  ;;  %v11503_v6 = vld [vmem:[%s24021_s2 + $0x8a8] sm:$0xff]  ;;  %5872 = vperm.xlu0 %14739, %v12077_v58  }
 0x1d5   :  { %13158 = vmatprep.subr.bf16.mxu0 %v13157_v13  ;;  %v13177_v15 = vpack.c.bf16 %v11505_v7, %v11503_v6  ;;  %v3057_v7 = vld [vmem:[%s24021_s2 + $0x4a0] sm:$0xff]  ;;  %v3074_v58 = vld [vmem:[%s24021_s2 + $0x528] sm:$0xff] }
 0x1d6   :  { %13016 = vmatpush1.bf16.msra.mxu1 %v13015_v22  ;;  %v13175_v22 = vpack.c.bf16 %v11500_v5, %v11498_v4  ;;  %v12078_v5 = vld [vmem:[%s24024_s5 + $0x1] ss:$0 sm:$0xff] }
 0x1d7   :  { %13018 = vmatprep.subr.bf16.mxu1 %v13017_v12  ;;  %v3046_v12 = vld [vmem:[%s24021_s2 + $0x448] sm:$0xff]  ;;  %5876 = vperm.xlu1 %14740, %v12078_v5   ;;  %v12081_v5 = vld [vmem:[%s24024_s5 + $0x4] ss:$0 sm:$0xff] }
 0x1d8   :  { %13160 = vmatpush1.bf16.msra.mxu0 %v13159_v16  ;;  %v11502_v16 = vld [vmem:[%s24021_s2 + $0x8a0] sm:$0xff]  ;;  %v13037_v24 = vpack.c.bf16 %v3048_v14, %v3046_v12  ;;  %5056 = vperm.xlu0 %14739, %v12017_v9   ;;  %v11523_v12 = vld [vmem:[%s24021_s2 + $0x948] sm:$0xff]  ;;  %v11525_v14 = vld [vmem:[%s24021_s2 + $0x958] sm:$0xff] }
 0x1d9   :  { %13162 = vmatprep.subr.bf16.mxu0 %v13161_v19  ;;  %v11509_v19 = vld [vmem:[%s24021_s2 + $0x8d8] sm:$0xff]  ;;  %v13179_v29 = vpack.c.bf16 %v11504_v17, %v11502_v16  ;;  %v12079_v16 = vld [vmem:[%s24024_s5 + $0x2] ss:$0 sm:$0xff] }
 0x1da   :  { %13020 = vmatpush1.bf16.msra.mxu1 %v13019_v25  ;;  %v3045_v25 = vld [vmem:[%s24021_s2 + $0x440] sm:$0xff]  ;;  %v13181_v32 = vpack.c.bf16 %v11509_v19, %v11507_v59  ;;  %v3063_v59 = vld [vmem:[%s24021_s2 + $0x4d0] sm:$0xff] }
 0x1db   :  { %3654 = vmatmul.mubr.f32.vlgmr.msra.gmra.mrb[8].mxu0 %v16711_v27  ;;  %13022 = vmatprep.subr.bf16.mxu1 %v13021_v31  ;;  %v3050_v31 = vld [vmem:[%s24021_s2 + $0x468] sm:$0xff] }
 0x1dc   :  { %13164 = vmatpush1.bf16.msra.mxu0 %v13163_v36  ;;  %3724 = vmatprep.mubr.f32.mxu0 %v16723_v35  ;;  %v11508_v36 = vld [vmem:[%s24021_s2 + $0x8d0] sm:$0xff] }
 0x1dd   :  { %13166 = vmatprep.subr.bf16.mxu0 %v13165_v40  ;;  %v13039_v40 = vpack.c.bf16 %v3047_v26, %v3045_v25  ;;  %v13183_v44 = vpack.c.bf16 %v11508_v36, %v11506_v33  ;;  %5440 = vperm.xlu1 %14740, %v12049_v10   ;;  %v13197_v25 = vpack.c.bf16 %v11525_v14, %v11523_v12  ;;  %v11522_v26 = vld [vmem:[%s24021_s2 + $0x940] sm:$0xff]  ;;  %v3078_v10 = vld [vmem:[%s24021_s2 + $0x548] sm:$0xff]  ;;  %v11536_v12 = vld [vmem:[%s24021_s2 + $0x9b0] sm:$0xff] }
 0x1de   :  { %13024 = vmatpush1.bf16.msra.mxu1 %v13023_v43  ;;  %v3051_v43 = vld [vmem:[%s24021_s2 + $0x470] sm:$0xff]  ;;  %5880 = vperm.xlu0 %14739, %v12079_v16   ;;  %v11539_v16 = vld [vmem:[%s24021_s2 + $0x9c8] sm:$0xff] }
 0x1df   :  { %13026 = vmatprep.subr.bf16.mxu1 %v13025_v46  ;;  %v3056_v46 = vld [vmem:[%s24021_s2 + $0x498] sm:$0xff] }
 0x1e0   :  { %13168 = vmatpush1.bf16.msra.mxu0 %v13167_v51  ;;  %v11512_v51 = vld [vmem:[%s24021_s2 + $0x8f0] sm:$0xff]  ;;  %v13045_v55 = vpack.c.bf16 %v3056_v46, %v3054_v45  ;;  %v11526_v45 = vld [vmem:[%s24021_s2 + $0x960] sm:$0xff] }
 0x1e1   :  { %13170 = vmatprep.subr.bf16.mxu0 %v13169_v53  ;;  %v13043_v53 = vpack.c.bf16 %v3051_v43, %v3049_v42  ;;  %v13187_v60 = vpack.c.bf16 %v11512_v51, %v11510_v50  ;;  %v3070_v42 = vld [vmem:[%s24021_s2 + $0x508] sm:$0xff]  ;;  %v3072_v43 = vld [vmem:[%s24021_s2 + $0x518] sm:$0xff]  ;;  %v11528_v46 = vld [vmem:[%s24021_s2 + $0x970] sm:$0xff] }
 0x1e2   :  { %13028 = vmatpush1.bf16.msra.mxu1 %v13027_v57  ;;  %v12315_v61 = vpop.f32.mrb[8].mxu1  ;;  %v3055_v57 = vld [vmem:[%s24021_s2 + $0x490] sm:$0xff]  ;;  %v11531_v50 = vld [vmem:[%s24021_s2 + $0x988] sm:$0xff]  ;;  %v11533_v51 = vld [vmem:[%s24021_s2 + $0x998] sm:$0xff] }
 0x1e3   :  { %v12316_v13 = vpop.f32.mrb[9].mxu1  ;;  %13030 = vmatprep.subr.bf16.mxu1 %v13029_v47  ;;  %v3058_v47 = vld [vmem:[%s24021_s2 + $0x4a8] sm:$0xff]  ;;  %v13047_v4 = vpack.c.bf16 %v3055_v57, %v3053_v56  ;;  %v3071_v56 = vld [vmem:[%s24021_s2 + $0x510] sm:$0xff]  ;;  %v13203_v57 = vpack.c.bf16 %v11528_v46, %v11526_v45 }
 0x1e4   :  { %13172 = vmatpush1.bf16.msra.mxu0 %v13171_v0  ;;  %v12317_v11 = vadd.f32 %v12316_v13, %v12315_v61  ;;  %v12318_v54 = vpop.f32.mrb[10].mxu1  ;;  %v11514_v0 = vld [vmem:[%s24021_s2 + $0x900] sm:$0xff]  ;;  %v13049_v6 = vpack.c.bf16 %v3060_v62, %v3058_v47  ;;  %v3059_v61 = vld [vmem:[%s24021_s2 + $0x4b0] sm:$0xff]  ;;  %v13205_v47 = vpack.c.bf16 %v11533_v51, %v11531_v50  ;;  %v3086_v50 = vld [vmem:[%s24021_s2 + $0x588] sm:$0xff] }
 0x1e5   :  { %3244 = vmatmul.mubr.f32.vlgmr.msra.gmra.mrb[20].mxu1 %v16713_v28  ;;  %13174 = vmatprep.subr.bf16.mxu0 %v13173_v3  ;;  %v12319_v18 = vpop.f32.mrb[11].mxu1  ;;  %v11521_v3 = vld [vmem:[%s24021_s2 + $0x938] sm:$0xff]  ;;  %v13191_v13 = vpack.c.bf16 %v11516_v1, %v11514_v0  ;;  %v11520_v54 = vld [vmem:[%s24021_s2 + $0x930] sm:$0xff]  ;;  %v11530_v62 = vld [vmem:[%s24021_s2 + $0x980] sm:$0xff] }
 0x1e6   :  { %v17167_v21 = vadd.f32 %v12317_v11, %v16933_v20  ;;  %13032 = vmatpush1.bf16.msra.mxu1 %v13031_v8  ;;  %v3052_v20 = vld [vmem:[%s24021_s2 + $0x478] sm:$0xff]  ;;  %v3062_v8 = vld [vmem:[%s24021_s2 + $0x4c8] sm:$0xff]  ;;  %v11518_v11 = vld [vmem:[%s24021_s2 + $0x920] sm:$0xff] }
 0x1e7   :  { %13034 = vmatprep.subr.bf16.mxu1 %v13033_v49  ;;  %v13041_v41 = vpack.c.bf16 %v3052_v20, %v3050_v31  ;;  %v3064_v49 = vld [vmem:[%s24021_s2 + $0x4d8] sm:$0xff]  ;;  %v3061_v18 = vld [vmem:[%s24021_s2 + $0x4c0] sm:$0xff]  ;;  %v13195_v19 = vpack.c.bf16 %v11520_v54, %v11518_v11  ;;  %v11527_v20 = vld [vmem:[%s24021_s2 + $0x968] sm:$0xff] }
 0x1e8   :  { %13176 = vmatpush1.bf16.msra.mxu0 %v13175_v22  ;;  %v13193_v22 = vpack.c.bf16 %v11521_v3, %v11519_v2  ;;  %v13053_v17 = vpack.c.bf16 %v3064_v49, %v3062_v8  ;;  %v12018_v31 = vld [vmem:[%s24022_s3 + $0x5] ss:$0 sm:$0xff]  ;;  %v13055_v33 = vpack.c.bf16 %v3063_v59, %v3061_v18  ;;  %v12051_v0 = vld [vmem:[%s24023_s4 + $0x6] ss:$0 sm:$0xff]  ;;  %v11535_v1 = vld [vmem:[%s24021_s2 + $0x9a8] sm:$0xff] }
 0x1e9   :  { %13178 = vmatprep.subr.bf16.mxu0 %v13177_v15  ;;  %v13051_v15 = vpack.c.bf16 %v3059_v61, %v3057_v7  ;;  %5060 = vperm.xlu1 %14740, %v12018_v31   ;;  %v11537_v2 = vld [vmem:[%s24021_s2 + $0x9b8] sm:$0xff]  ;;  %v3073_v61 = vld [vmem:[%s24021_s2 + $0x520] sm:$0xff]  ;;  %v3075_v8 = vld [vmem:[%s24021_s2 + $0x530] sm:$0xff] }
 0x1ea   :  { %13036 = vmatpush1.bf16.msra.mxu1 %v13035_v23  ;;  %v3066_v23 = vld [vmem:[%s24021_s2 + $0x4e8] sm:$0xff]  ;;  %v13209_v11 = vpack.c.bf16 %v11537_v2, %v11535_v1  ;;  %v11534_v54 = vld [vmem:[%s24021_s2 + $0x9a0] sm:$0xff]  ;;  %v13067_v59 = vpack.c.bf16 %v3075_v8, %v3073_v61  ;;  %v3083_v45 = vld [vmem:[%s24021_s2 + $0x570] sm:$0xff] }
 0x1eb   :  { %13038 = vmatprep.subr.bf16.mxu1 %v13037_v24  ;;  %v3068_v24 = vld [vmem:[%s24021_s2 + $0x4f8] sm:$0xff]  ;;  %v3087_v1 = vld [vmem:[%s24021_s2 + $0x590] sm:$0xff]  ;;  %v12022_v61 = vld [vmem:[%s24022_s3 + $0x9] ss:$0 sm:$0xff] }
 0x1ec   :  { %13180 = vmatpush1.bf16.msra.mxu0 %v13179_v29  ;;  %v11524_v29 = vld [vmem:[%s24021_s2 + $0x950] sm:$0xff]  ;;  %v13057_v36 = vpack.c.bf16 %v3068_v24, %v3066_v23  ;;  %v3077_v24 = vld [vmem:[%s24021_s2 + $0x540] sm:$0xff]  ;;  %v3088_v51 = vld [vmem:[%s24021_s2 + $0x598] sm:$0xff] }
 0x1ed   :  { %13182 = vmatprep.subr.bf16.mxu0 %v13181_v32  ;;  %v11529_v32 = vld [vmem:[%s24021_s2 + $0x978] sm:$0xff]  ;;  %v11551_v8 = vld [vmem:[%s24021_s2 + $0xa28] sm:$0xff] }
 0x1ee   :  { %13040 = vmatpush1.bf16.msra.mxu1 %v13039_v40  ;;  %v12050_v40 = vld [vmem:[%s24023_s4 + $0x5] ss:$0 sm:$0xff] }
 0x1ef   :  { %13042 = vmatprep.subr.bf16.mxu1 %v13041_v41  ;;  %v13199_v41 = vpack.c.bf16 %v11524_v29, %v11522_v26  ;;  %5444 = vperm.xlu0 %14739, %v12050_v40   ;;  %v13211_v26 = vpack.c.bf16 %v11536_v12, %v11534_v54  ;;  %v3084_v29 = vld [vmem:[%s24021_s2 + $0x578] sm:$0xff]  ;;  %v3094_v12 = vld [vmem:[%s24021_s2 + $0x5c8] sm:$0xff] }
 0x1f0   :  { %13184 = vmatpush1.bf16.msra.mxu0 %v13183_v44  ;;  %v13201_v44 = vpack.c.bf16 %v11529_v32, %v11527_v20  ;;  %v11538_v20 = vld [vmem:[%s24021_s2 + $0x9c0] sm:$0xff]  ;;  %v11540_v32 = vld [vmem:[%s24021_s2 + $0x9d0] sm:$0xff] }
 0x1f1   :  { %13186 = vmatprep.subr.bf16.mxu0 %v13185_v48  ;;  %v12080_v48 = vld [vmem:[%s24024_s5 + $0x3] ss:$0 sm:$0xff] }
 0x1f2   :  { %13044 = vmatpush1.bf16.msra.mxu1 %v13043_v53  ;;  %v13061_v53 = vpack.c.bf16 %v3072_v43, %v3070_v42  ;;  %5884 = vperm.xlu1 %14740, %v12080_v48   ;;  %v13215_v48 = vpack.c.bf16 %v11540_v32, %v11538_v20  ;;  %v3100_v20 = vld [vmem:[%s24021_s2 + $0x5f8] sm:$0xff] }
 0x1f3   :  { %13046 = vmatprep.subr.bf16.mxu1 %v13045_v55  ;;  %v3069_v55 = vld [vmem:[%s24021_s2 + $0x500] sm:$0xff]  ;;  %5064 = vperm.xlu0 %14739, %v12019_v52  }
 0x1f4   :  { %13188 = vmatpush1.bf16.msra.mxu0 %v13187_v60  ;;  %v3076_v60 = vld [vmem:[%s24021_s2 + $0x538] sm:$0xff] }
 0x1f5   :  { %13190 = vmatprep.subr.bf16.mxu0 %v13189_v63  ;;  %v11532_v63 = vld [vmem:[%s24021_s2 + $0x990] sm:$0xff]  ;;  %v13065_v7 = vpack.c.bf16 %v3076_v60, %v3074_v58  ;;  %v11547_v58 = vld [vmem:[%s24021_s2 + $0xa08] sm:$0xff]  ;;  %v11549_v60 = vld [vmem:[%s24021_s2 + $0xa18] sm:$0xff] }
 0x1f6   :  { %13048 = vmatpush1.bf16.msra.mxu1 %v13047_v4  ;;  %v13063_v4 = vpack.c.bf16 %v3071_v56, %v3069_v55  ;;  %5448 = vperm.xlu1 %14740, %v12051_v0   ;;  %v11544_v55 = vld [vmem:[%s24021_s2 + $0x9f0] sm:$0xff]  ;;  %v3085_v0 = vld [vmem:[%s24021_s2 + $0x580] sm:$0xff] }
 0x1f7   :  { %13050 = vmatprep.subr.bf16.mxu1 %v13049_v6  ;;  %5888 = vperm.xlu0 %14739, %v12081_v5   ;;  %v13221_v5 = vpack.c.bf16 %v11549_v60, %v11547_v58  ;;  %v12056_v60 = vld [vmem:[%s24023_s4 + $0xb] ss:$0 sm:$0xff] }
 0x1f8   :  { %13192 = vmatpush1.bf16.msra.mxu0 %v13191_v13  ;;  %v13207_v13 = vpack.c.bf16 %v11532_v63, %v11530_v62  ;;  %v12083_v62 = vld [vmem:[%s24024_s5 + $0x6] ss:$0 sm:$0xff]  ;;  %v13077_v63 = vpack.c.bf16 %v3088_v51, %v3086_v50  ;;  %v3102_v50 = vld [vmem:[%s24021_s2 + $0x608] sm:$0xff]  ;;  %v3104_v51 = vld [vmem:[%s24021_s2 + $0x618] sm:$0xff] }
 0x1f9   :  { %13194 = vmatprep.subr.bf16.mxu0 %v13193_v22  ;;  %v3080_v22 = vld [vmem:[%s24021_s2 + $0x558] sm:$0xff] }
 0x1fa   :  { %13052 = vmatpush1.bf16.msra.mxu1 %v13051_v15  ;;  %v12020_v15 = vld [vmem:[%s24022_s3 + $0x7] ss:$0 sm:$0xff]  ;;  %v13069_v23 = vpack.c.bf16 %v3080_v22, %v3078_v10 }
 0x1fb   :  { %13054 = vmatprep.subr.bf16.mxu1 %v13053_v17  ;;  %v11541_v17 = vld [vmem:[%s24021_s2 + $0x9d8] sm:$0xff]  ;;  %5068 = vperm.xlu1 %14740, %v12020_v15   ;;  %v3089_v22 = vld [vmem:[%s24021_s2 + $0x5a0] sm:$0xff] }
 0x1fc   :  { %13196 = vmatpush1.bf16.msra.mxu0 %v13195_v19  ;;  %v12052_v19 = vld [vmem:[%s24023_s4 + $0x7] ss:$0 sm:$0xff]  ;;  %v13213_v31 = vpack.c.bf16 %v11541_v17, %v11539_v16  ;;  %v11552_v17 = vld [vmem:[%s24021_s2 + $0xa30] sm:$0xff] }
 0x1fd   :  { %13198 = vmatprep.subr.bf16.mxu0 %v13197_v25  ;;  %v3079_v25 = vld [vmem:[%s24021_s2 + $0x550] sm:$0xff]  ;;  %5452 = vperm.xlu0 %14739, %v12052_v19   ;;  %v11550_v16 = vld [vmem:[%s24021_s2 + $0xa20] sm:$0xff]  ;;  %v11557_v19 = vld [vmem:[%s24021_s2 + $0xa58] sm:$0xff] }
 0x1fe   :  { %13056 = vmatpush1.bf16.msra.mxu1 %v13055_v33  ;;  %v12082_v33 = vld [vmem:[%s24024_s5 + $0x5] ss:$0 sm:$0xff]  ;;  %v13071_v40 = vpack.c.bf16 %v3079_v25, %v3077_v24  ;;  %v12023_v24 = vld [vmem:[%s24022_s3 + $0xa] ss:$0 sm:$0xff] }
 0x1ff   :  { %13058 = vmatprep.subr.bf16.mxu1 %v13057_v36  ;;  %v11543_v36 = vld [vmem:[%s24021_s2 + $0x9e8] sm:$0xff]  ;;  %5892 = vperm.xlu1 %14740, %v12082_v33   ;;  %v11554_v33 = vld [vmem:[%s24021_s2 + $0xa40] sm:$0xff] }
 0x200   :  { %13200 = vmatpush1.bf16.msra.mxu0 %v13199_v41  ;;  %v12021_v41 = vld [vmem:[%s24022_s3 + $0x8] ss:$0 sm:$0xff]  ;;  %v13217_v52 = vpack.c.bf16 %v11545_v37, %v11543_v36  ;;  %v11556_v36 = vld [vmem:[%s24021_s2 + $0xa50] sm:$0xff]  ;;  %v12055_v37 = vld [vmem:[%s24023_s4 + $0xa] ss:$0 sm:$0xff] }
 0x201   :  { %13202 = vmatprep.subr.bf16.mxu0 %v13201_v44  ;;  %v3081_v44 = vld [vmem:[%s24021_s2 + $0x560] sm:$0xff]  ;;  %5072 = vperm.xlu0 %14739, %v12021_v41  }
 0x202   :  { %v12337_v3 = vpop.f32.mrb[12].mxu1  ;;  %13060 = vmatpush1.bf16.msra.mxu1 %v13059_v30 }
 0x203   :  { %v12338_v6 = vpop.f32.mrb[13].mxu1  ;;  %13062 = vmatprep.subr.bf16.mxu1 %v13061_v53  ;;  %v11542_v53 = vld [vmem:[%s24021_s2 + $0x9e0] sm:$0xff] }
 0x204   :  { %13204 = vmatpush1.bf16.msra.mxu0 %v13203_v57  ;;  %v12339_v49 = vadd.f32 %v12338_v6, %v12337_v3  ;;  %v12340_v9 = vpop.f32.mrb[14].mxu1  ;;  %v12053_v57 = vld [vmem:[%s24023_s4 + $0x8] ss:$0 sm:$0xff]  ;;  %v13219_v2 = vpack.c.bf16 %v11544_v55, %v11542_v53  ;;  %v11546_v6 = vld [vmem:[%s24021_s2 + $0xa00] sm:$0xff]  ;;  %v11560_v53 = vld [vmem:[%s24021_s2 + $0xa70] sm:$0xff] }
 0x205   :  { %13206 = vmatprep.subr.bf16.mxu0 %v13205_v47  ;;  %v12341_v14 = vpop.f32.mrb[15].mxu1  ;;  %v13075_v47 = vpack.c.bf16 %v3083_v45, %v3081_v44  ;;  %5456 = vperm.xlu1 %14740, %v12053_v57   ;;  %v3090_v3 = vld [vmem:[%s24021_s2 + $0x5a8] sm:$0xff]  ;;  %v3097_v45 = vld [vmem:[%s24021_s2 + $0x5e0] sm:$0xff]  ;;  %v11565_v57 = vld [vmem:[%s24021_s2 + $0xa98] sm:$0xff] }
 0x206   :  { %v2864_v18 = vadd.f32 %v12339_v49, %v17167_v21  ;;  %13064 = vmatpush1.bf16.msra.mxu1 %v13063_v4  ;;  %v3082_v21 = vld [vmem:[%s24021_s2 + $0x568] sm:$0xff]  ;;  %v3092_v4 = vld [vmem:[%s24021_s2 + $0x5b8] sm:$0xff]  ;;  %5896 = vperm.xlu0 %14739, %v12083_v62   ;;  %v13079_v49 = vpack.c.bf16 %v3087_v1, %v3085_v0  ;;  %v11562_v0 = vld [vmem:[%s24021_s2 + $0xa80] sm:$0xff] }
 0x207   :  { %13066 = vmatprep.subr.bf16.mxu1 %v13065_v7  ;;  %v13073_v43 = vpack.c.bf16 %v3084_v29, %v3082_v21  ;;  %v11548_v7 = vld [vmem:[%s24021_s2 + $0xa10] sm:$0xff]  ;;  %v12054_v9 = vld [vmem:[%s24023_s4 + $0x9] ss:$0 sm:$0xff]  ;;  %v13081_v10 = vpack.c.bf16 %v3092_v4, %v3090_v3  ;;  %v3096_v14 = vld [vmem:[%s24021_s2 + $0x5d8] sm:$0xff]  ;;  %v13227_v29 = vpack.c.bf16 %v11552_v17, %v11550_v16 }
 0x208   :  { %13208 = vmatpush1.bf16.msra.mxu0 %v13207_v13  ;;  %v11553_v13 = vld [vmem:[%s24021_s2 + $0xa38] sm:$0xff]  ;;  %v13223_v54 = vpack.c.bf16 %v11548_v7, %v11546_v6  ;;  %v13085_v25 = vpack.c.bf16 %v3096_v14, %v3094_v12  ;;  %v3095_v21 = vld [vmem:[%s24021_s2 + $0x5d0] sm:$0xff]  ;;  %v12024_v55 = vld [vmem:[%s24022_s3 + $0xb] ss:$0 sm:$0xff] }
 0x209   :  { %13210 = vmatprep.subr.bf16.mxu0 %v13209_v11  ;;  %v3091_v11 = vld [vmem:[%s24021_s2 + $0x5b0] sm:$0xff]  ;;  %5076 = vperm.xlu1 %14740, %v12022_v61   ;;  %v13225_v15 = vpack.c.bf16 %v11553_v13, %v11551_v8  ;;  %v11567_v3 = vld [vmem:[%s24021_s2 + $0xaa8] sm:$0xff]  ;;  %v11569_v4 = vld [vmem:[%s24021_s2 + $0xab8] sm:$0xff] }
 0x20a   :  { %v2903_v38 = vpop.f32.mrb[16].mxu1  ;;  %13068 = vmatpush1.bf16.msra.mxu1 %v13067_v59  ;;  %5460 = vperm.xlu0 %14739, %v12054_v9   ;;  %v11555_v59 = vld [vmem:[%s24021_s2 + $0xa48] sm:$0xff]  ;;  %v11564_v1 = vld [vmem:[%s24021_s2 + $0xa90] sm:$0xff]  ;;  %v13241_v7 = vpack.c.bf16 %v11569_v4, %v11567_v3  ;;  %v11566_v61 = vld [vmem:[%s24021_s2 + $0xaa0] sm:$0xff] }
 0x20b   :  { %v17431_v42 = vadd.f32 %v2903_v38, %v2864_v18  ;;  %13070 = vmatprep.subr.bf16.mxu1 %v13069_v23  ;;  %v12811_v46 = vpop.f32.mrb[17].mxu1  ;;  %v12084_v18 = vld [vmem:[%s24024_s5 + $0x7] ss:$0 sm:$0xff]  ;;  %v13083_v23 = vpack.c.bf16 %v3091_v11, %v3089_v22  ;;  %v13229_v32 = vpack.c.bf16 %v11557_v19, %v11555_v59  ;;  %v11559_v38 = vld [vmem:[%s24021_s2 + $0xa68] sm:$0xff]  ;;  %v13239_v6 = vpack.c.bf16 %v11564_v1, %v11562_v0  ;;  %v11568_v8 = vld [vmem:[%s24021_s2 + $0xab0] sm:$0xff] }
 0x20c   :  { %13212 = vmatpush1.bf16.msra.mxu0 %v13211_v26  ;;  %v2906_v30 = vpop.f32.mrb[18].mxu1  ;;  %v3093_v26 = vld [vmem:[%s24021_s2 + $0x5c0] sm:$0xff]  ;;  %v3099_v46 = vld [vmem:[%s24021_s2 + $0x5f0] sm:$0xff]  ;;  %v12057_v13 = vld [vmem:[%s24023_s4 + $0xc] ss:$0 sm:$0xff]  ;;  %v13243_v22 = vpack.c.bf16 %v11568_v8, %v11566_v61 }
 0x20d   :  { %13214 = vmatprep.subr.bf16.mxu0 %v13213_v31  ;;  %v12812_v56 = vpop.f32.mrb[19].mxu1  ;;  %5900 = vperm.xlu1 %14740, %v12084_v18   ;;  %v3098_v31 = vld [vmem:[%s24021_s2 + $0x5e8] sm:$0xff]  ;;  %v13087_v41 = vpack.c.bf16 %v3095_v21, %v3093_v26  ;;  %v13091_v58 = vpack.c.bf16 %v3099_v46, %v3097_v45  ;;  %v11573_v9 = vld [vmem:[%s24021_s2 + $0xad8] sm:$0xff]  ;;  %v11572_v12 = vld [vmem:[%s24021_s2 + $0xad0] sm:$0xff] }
 0x20e   :  { %13072 = vmatpush1.bf16.msra.mxu1 %v13071_v40  ;;  %5080 = vperm.xlu0 %14739, %v12023_v24   ;;  %v11561_v40 = vld [vmem:[%s24021_s2 + $0xa78] sm:$0xff]  ;;  %v13089_v44 = vpack.c.bf16 %v3100_v20, %v3098_v31  ;;  %v11563_v56 = vld [vmem:[%s24021_s2 + $0xa88] sm:$0xff]  ;;  %v11574_v19 = vld [vmem:[%s24021_s2 + $0xae0] sm:$0xff] }
 0x20f   :  { %13074 = vmatprep.subr.bf16.mxu1 %v13073_v43  ;;  %v12085_v43 = vld [vmem:[%s24024_s5 + $0x8] ss:$0 sm:$0xff]  ;;  %v13233_v30 = vpack.c.bf16 %v11561_v40, %v11559_v38  ;;  %v12026_v14 = vld [vmem:[%s24022_s3 + $0xd] ss:$0 sm:$0xff]  ;;  %v11577_v16 = vld [vmem:[%s24021_s2 + $0xaf8] sm:$0xff] }
 0x210   :  { %13216 = vmatpush1.bf16.msra.mxu0 %v13215_v48  ;;  %v13231_v48 = vpack.c.bf16 %v11556_v36, %v11554_v33  ;;  %v12058_v17 = vld [vmem:[%s24023_s4 + $0xd] ss:$0 sm:$0xff]  ;;  %v12088_v24 = vld [vmem:[%s24024_s5 + $0xb] ss:$0 sm:$0xff]  ;;  %v11581_v26 = vld [vmem:[%s24021_s2 + $0xb18] sm:$0xff] }
 0x211   :  { %13218 = vmatprep.subr.bf16.mxu0 %v13217_v52  ;;  %5464 = vperm.xlu1 %14740, %v12055_v37   ;;  %v11558_v52 = vld [vmem:[%s24021_s2 + $0xa60] sm:$0xff]  ;;  %v12027_v21 = vld [vmem:[%s24022_s3 + $0xe] ss:$0 sm:$0xff]  ;;  %v11585_v37 = vld [vmem:[%s24021_s2 + $0xb38] sm:$0xff] }
 0x212   :  { %13076 = vmatpush1.bf16.msra.mxu1 %v13075_v47  ;;  %5904 = vperm.xlu0 %14739, %v12085_v43   ;;  %v13093_v47 = vpack.c.bf16 %v3104_v51, %v3102_v50  ;;  %v13235_v62 = vpack.c.bf16 %v11560_v53, %v11558_v52  ;;  %v11578_v20 = vld [vmem:[%s24021_s2 + $0xb00] sm:$0xff]  ;;  %v12059_v33 = vld [vmem:[%s24023_s4 + $0xe] ss:$0 sm:$0xff]  ;;  %v12089_v38 = vld [vmem:[%s24024_s5 + $0xc] ss:$0 sm:$0xff] }
 0x213   :  { %13078 = vmatprep.subr.bf16.mxu1 %v13077_v63  ;;  %v13237_v63 = vpack.c.bf16 %v11565_v57, %v11563_v56  ;;  %v11583_v36 = vld [vmem:[%s24021_s2 + $0xb28] sm:$0xff]  ;;  %v11582_v43 = vld [vmem:[%s24021_s2 + $0xb20] sm:$0xff]  ;;  %v11588_v53 = vld [vmem:[%s24021_s2 + $0xb50] sm:$0xff] }
 0x214   :  { %13220 = vmatpush1.bf16.msra.mxu0 %v13219_v2  ;;  %v12086_v2 = vld [vmem:[%s24024_s5 + $0x9] ss:$0 sm:$0xff]  ;;  %v12028_v45 = vld [vmem:[%s24022_s3 + $0xf] ss:$0 sm:$0xff]  ;;  %v11586_v52 = vld [vmem:[%s24021_s2 + $0xb40] sm:$0xff] }
 0x215   :  { %13222 = vmatprep.subr.bf16.mxu0 %v13221_v5  ;;  %5084 = vperm.xlu1 %14740, %v12024_v55   ;;  %v12025_v5 = vld [vmem:[%s24022_s3 + $0xc] ss:$0 sm:$0xff]  ;;  %v12060_v50 = vld [vmem:[%s24023_s4 + $0xf] ss:$0 sm:$0xff]  ;;  %v11593_v56 = vld [vmem:[%s24021_s2 + $0xb78] sm:$0xff] }
 0x216   :  { %13080 = vmatpush1.bf16.msra.mxu1 %v13079_v49  ;;  %5468 = vperm.xlu0 %14739, %v12056_v60   ;;  %v11571_v49 = vld [vmem:[%s24021_s2 + $0xac8] sm:$0xff]  ;;  %v13263_v60 = vpack.c.bf16 %v11588_v53, %v11586_v52  ;;  %v11597_v1 = vld [vmem:[%s24021_s2 + $0xb98] sm:$0xff]  ;;  %v12034_v52 = vld [vmem:[%s24022_s3 + $0x15] ss:$0 sm:$0xff] }
 0x217   :  { %13082 = vmatprep.subr.bf16.mxu1 %v13081_v10  ;;  %v12087_v10 = vld [vmem:[%s24024_s5 + $0xa] ss:$0 sm:$0xff]  ;;  %v13245_v11 = vpack.c.bf16 %v11573_v9, %v11571_v49  ;;  %v12090_v57 = vld [vmem:[%s24024_s5 + $0xd] ss:$0 sm:$0xff]  ;;  %v12091_v3 = vld [vmem:[%s24024_s5 + $0xe] ss:$0 sm:$0xff] }
 0x218   :  { %13224 = vmatpush1.bf16.msra.mxu0 %v13223_v54  ;;  %v11570_v54 = vld [vmem:[%s24021_s2 + $0xac0] sm:$0xff]  ;;  %v11587_v46 = vld [vmem:[%s24021_s2 + $0xb48] sm:$0xff]  ;;  %v11601_v8 = vld [vmem:[%s24021_s2 + $0xbb8] sm:$0xff] }
 0x219   :  { %13226 = vmatprep.subr.bf16.mxu0 %v13225_v15  ;;  %5908 = vperm.xlu1 %14740, %v12086_v2   ;;  %v11575_v15 = vld [vmem:[%s24021_s2 + $0xae8] sm:$0xff]  ;;  %v13247_v18 = vpack.c.bf16 %v11572_v12, %v11570_v54  ;;  %v12061_v2 = vld [vmem:[%s24023_s4 + $0x10] ss:$0 sm:$0xff]  ;;  %v12062_v49 = vld [vmem:[%s24023_s4 + $0x11] ss:$0 sm:$0xff] }
 0x21a   :  { %13084 = vmatpush1.bf16.msra.mxu1 %v13083_v23  ;;  %5088 = vperm.xlu0 %14739, %v12025_v5   ;;  %v13249_v59 = vpack.c.bf16 %v11577_v16, %v11575_v15  ;;  %v11576_v23 = vld [vmem:[%s24021_s2 + $0xaf0] sm:$0xff]  ;;  %v11591_v55 = vld [vmem:[%s24021_s2 + $0xb68] sm:$0xff]  ;;  %v11605_v12 = vld [vmem:[%s24021_s2 + $0xbd8] sm:$0xff] }
 0x21b   :  { %3725 = vmatmul.mubr.f32.vlgmr.msra.gmra.mrb[8].mxu0 %v16713_v28  ;;  %13086 = vmatprep.subr.bf16.mxu1 %v13085_v25  ;;  %v11579_v25 = vld [vmem:[%s24021_s2 + $0xb08] sm:$0xff]  ;;  %v12031_v15 = vld [vmem:[%s24022_s3 + $0x12] ss:$0 sm:$0xff]  ;;  %v12066_v53 = vld [vmem:[%s24023_s4 + $0x15] ss:$0 sm:$0xff] }
 0x21c   :  { %13228 = vmatpush1.bf16.msra.mxu0 %v13227_v29  ;;  %v13251_v29 = vpack.c.bf16 %v11576_v23, %v11574_v19  ;;  %v13253_v31 = vpack.c.bf16 %v11581_v26, %v11579_v25  ;;  %v11595_v0 = vld [vmem:[%s24021_s2 + $0xb88] sm:$0xff]  ;;  %v11609_v23 = vld [vmem:[%s24021_s2 + $0xbf8] sm:$0xff]  ;;  %v12093_v25 = vld [vmem:[%s24024_s5 + $0x10] ss:$0 sm:$0xff] }
 0x21d   :  { %13230 = vmatprep.subr.bf16.mxu0 %v13229_v32  ;;  %5472 = vperm.xlu1 %14740, %v12057_v13   ;;  %v11580_v32 = vld [vmem:[%s24021_s2 + $0xb10] sm:$0xff]  ;;  %v13269_v5 = vpack.c.bf16 %v11597_v1, %v11595_v0  ;;  %v11599_v61 = vld [vmem:[%s24021_s2 + $0xba8] sm:$0xff]  ;;  %v11614_v1 = vld [vmem:[%s24021_s2 + $0xc20] sm:$0xff] }
 0x21e   :  { %13088 = vmatpush1.bf16.msra.mxu1 %v13087_v41  ;;  %5912 = vperm.xlu0 %14739, %v12087_v10   ;;  %v13255_v40 = vpack.c.bf16 %v11580_v32, %v11578_v20  ;;  %v13257_v41 = vpack.c.bf16 %v11585_v37, %v11583_v36  ;;  %v12030_v13 = vld [vmem:[%s24022_s3 + $0x11] ss:$0 sm:$0xff]  ;;  %v13273_v10 = vpack.c.bf16 %v11601_v8, %v11599_v61  ;;  %v11603_v54 = vld [vmem:[%s24021_s2 + $0xbc8] sm:$0xff]  ;;  %v11613_v32 = vld [vmem:[%s24021_s2 + $0xc18] sm:$0xff] }
 0x21f   :  { %13090 = vmatprep.subr.bf16.mxu1 %v13089_v44  ;;  %v11584_v44 = vld [vmem:[%s24021_s2 + $0xb30] sm:$0xff]  ;;  %v11607_v19 = vld [vmem:[%s24021_s2 + $0xbe8] sm:$0xff] }
 0x220   :  { %13232 = vmatpush1.bf16.msra.mxu0 %v13231_v48  ;;  %v11589_v48 = vld [vmem:[%s24021_s2 + $0xb58] sm:$0xff]  ;;  %v13259_v51 = vpack.c.bf16 %v11584_v44, %v11582_v43  ;;  %v11611_v20 = vld [vmem:[%s24021_s2 + $0xc08] sm:$0xff]  ;;  %v12064_v36 = vld [vmem:[%s24023_s4 + $0x13] ss:$0 sm:$0xff] }
 0x221   :  { %13234 = vmatprep.subr.bf16.mxu0 %v13233_v30  ;;  %5092 = vperm.xlu1 %14740, %v12026_v14   ;;  %v13261_v30 = vpack.c.bf16 %v11589_v48, %v11587_v46  ;;  %v12092_v14 = vld [vmem:[%s24024_s5 + $0xf] ss:$0 sm:$0xff]  ;;  %v11617_v44 = vld [vmem:[%s24021_s2 + $0xc38] sm:$0xff]  ;;  %v12033_v46 = vld [vmem:[%s24022_s3 + $0x14] ss:$0 sm:$0xff] }
 0x222   :  { %13092 = vmatpush1.bf16.msra.mxu1 %v13091_v58  ;;  %5476 = vperm.xlu0 %14739, %v12058_v17   ;;  %v12029_v58 = vld [vmem:[%s24022_s3 + $0x10] ss:$0 sm:$0xff]  ;;  %v13277_v17 = vpack.c.bf16 %v11605_v12, %v11603_v54  ;;  %v11615_v43 = vld [vmem:[%s24021_s2 + $0xc28] sm:$0xff]  ;;  %v12098_v0 = vld [vmem:[%s24024_s5 + $0x15] ss:$0 sm:$0xff] }
 0x223   :  { %13094 = vmatprep.subr.bf16.mxu1 %v13093_v47  ;;  %v13265_v47 = vpack.c.bf16 %v11593_v56, %v11591_v55  ;;  %v12096_v55 = vld [vmem:[%s24024_s5 + $0x13] ss:$0 sm:$0xff]  ;;  %v12035_v56 = vld [vmem:[%s24022_s3 + $0x16] ss:$0 sm:$0xff]  ;;  %v11619_v54 = vld [vmem:[%s24021_s2 + $0xc40] sm:$0xff] }
 0x224   :  { %13236 = vmatpush1.bf16.msra.mxu0 %v13235_v62  ;;  %v11590_v62 = vld [vmem:[%s24021_s2 + $0xb60] sm:$0xff]  ;;  %v12069_v12 = vld [vmem:[%s24023_s4 + $0x18] ss:$0 sm:$0xff] }
 0x225   :  { %13238 = vmatprep.subr.bf16.mxu0 %v13237_v63  ;;  %5916 = vperm.xlu1 %14740, %v12088_v24   ;;  %v11592_v63 = vld [vmem:[%s24021_s2 + $0xb70] sm:$0xff] }
 0x226   :  { %5096 = vperm.xlu0 %14739, %v12027_v21   ;;  %v13267_v4 = vpack.c.bf16 %v11592_v63, %v11590_v62  ;;  %v12063_v24 = vld [vmem:[%s24023_s4 + $0x12] ss:$0 sm:$0xff]  ;;  %v13281_v21 = vpack.c.bf16 %v11609_v23, %v11607_v19  ;;  %v3101_v62 = vld [vmem:[%s24021_s2 + $0x600] sm:$0xff]  ;;  %v11821_v19 = vld [vmem:[%s24021_s2 + $0x1288] sm:$0xff] }
 0x227   :  { %v3103_v63 = vld [vmem:[%s24021_s2 + $0x610] sm:$0xff]  ;;  %v11823_v23 = vld [vmem:[%s24021_s2 + $0x1298] sm:$0xff] }
 0x228   :  { %13240 = vmatpush1.bf16.msra.mxu0 %v13239_v6  ;;  %v11594_v6 = vld [vmem:[%s24021_s2 + $0xb80] sm:$0xff]  ;;  %v13095_v8 = vpack.c.bf16 %v3103_v63, %v3101_v62  ;;  %v12039_v62 = vld [vmem:[%s24022_s3 + $0x1a] ss:$0 sm:$0xff] }
 0x229   :  { %13242 = vmatprep.subr.bf16.mxu0 %v13241_v7  ;;  %5480 = vperm.xlu1 %14740, %v12059_v33   ;;  %v11596_v7 = vld [vmem:[%s24021_s2 + $0xb90] sm:$0xff] }
 0x22a   :  { %5920 = vperm.xlu0 %14739, %v12089_v38   ;;  %v13271_v9 = vpack.c.bf16 %v11596_v7, %v11594_v6  ;;  %v12032_v33 = vld [vmem:[%s24022_s3 + $0x13] ss:$0 sm:$0xff]  ;;  %v13285_v38 = vpack.c.bf16 %v11613_v32, %v11611_v20  ;;  %v11817_v6 = vld [vmem:[%s24021_s2 + $0x1268] sm:$0xff]  ;;  %v11819_v7 = vld [vmem:[%s24021_s2 + $0x1278] sm:$0xff] }
 0x22b   :  { %v11628_v20 = vld [vmem:[%s24021_s2 + $0xc88] sm:$0xff] }
 0x22c   :  { %13244 = vmatpush1.bf16.msra.mxu0 %v13243_v22  ;;  %v11598_v22 = vld [vmem:[%s24021_s2 + $0xba0] sm:$0xff] }
 0x22d   :  { %13246 = vmatprep.subr.bf16.mxu0 %v13245_v11  ;;  %5100 = vperm.xlu1 %14740, %v12028_v45   ;;  %v11600_v11 = vld [vmem:[%s24021_s2 + $0xbb0] sm:$0xff] }
 0x22e   :  { %5484 = vperm.xlu0 %14739, %v12060_v50   ;;  %v13275_v16 = vpack.c.bf16 %v11600_v11, %v11598_v22  ;;  %v12094_v45 = vld [vmem:[%s24024_s5 + $0x11] ss:$0 sm:$0xff]  ;;  %v13289_v50 = vpack.c.bf16 %v11617_v44, %v11615_v43  ;;  %v13489_v22 = vpack.c.bf16 %v11819_v7, %v11817_v6  ;;  %v11835_v6 = vld [vmem:[%s24021_s2 + $0x12f8] sm:$0xff]  ;;  %v11635_v7 = vld [vmem:[%s24021_s2 + $0xcc0] sm:$0xff] }
 0x22f   :  { %v11629_v44 = vld [vmem:[%s24021_s2 + $0xc90] sm:$0xff] }
 0x230   :  { %13248 = vmatpush1.bf16.msra.mxu0 %v13247_v18  ;;  %v11602_v18 = vld [vmem:[%s24021_s2 + $0xbc0] sm:$0xff] }
 0x231   :  { %13250 = vmatprep.subr.bf16.mxu0 %v13249_v59  ;;  %5924 = vperm.xlu1 %14740, %v12090_v57   ;;  %v11604_v59 = vld [vmem:[%s24021_s2 + $0xbd0] sm:$0xff] }
 0x232   :  { %5104 = vperm.xlu0 %14739, %v12029_v58   ;;  %v13279_v26 = vpack.c.bf16 %v11604_v59, %v11602_v18  ;;  %v12067_v57 = vld [vmem:[%s24023_s4 + $0x16] ss:$0 sm:$0xff]  ;;  %v12097_v58 = vld [vmem:[%s24024_s5 + $0x14] ss:$0 sm:$0xff]  ;;  %v11624_v18 = vld [vmem:[%s24021_s2 + $0xc68] sm:$0xff] }
 0x233   :  { %v11626_v59 = vld [vmem:[%s24021_s2 + $0xc78] sm:$0xff] }
 0x234   :  { %13252 = vmatpush1.bf16.msra.mxu0 %v13251_v29  ;;  %v11606_v29 = vld [vmem:[%s24021_s2 + $0xbe0] sm:$0xff]  ;;  %v13297_v32 = vpack.c.bf16 %v11626_v59, %v11624_v18  ;;  %v11839_v18 = vld [vmem:[%s24021_s2 + $0x1318] sm:$0xff] }
 0x235   :  { %13254 = vmatprep.subr.bf16.mxu0 %v13253_v31  ;;  %5488 = vperm.xlu1 %14740, %v12061_v2   ;;  %v11608_v31 = vld [vmem:[%s24021_s2 + $0xbf0] sm:$0xff]  ;;  %v11639_v59 = vld [vmem:[%s24021_s2 + $0xce0] sm:$0xff] }
 0x236   :  { %5928 = vperm.xlu0 %14739, %v12091_v3   ;;  %v13283_v37 = vpack.c.bf16 %v11608_v31, %v11606_v29  ;;  %v11616_v2 = vld [vmem:[%s24021_s2 + $0xc30] sm:$0xff]  ;;  %v12037_v3 = vld [vmem:[%s24022_s3 + $0x18] ss:$0 sm:$0xff]  ;;  %v11820_v29 = vld [vmem:[%s24021_s2 + $0x1280] sm:$0xff] }
 0x237   :  { %v11822_v31 = vld [vmem:[%s24021_s2 + $0x1290] sm:$0xff] }
 0x238   :  { %13256 = vmatpush1.bf16.msra.mxu0 %v13255_v40  ;;  %v11610_v40 = vld [vmem:[%s24021_s2 + $0xc00] sm:$0xff]  ;;  %v13495_v43 = vpack.c.bf16 %v11822_v31, %v11820_v29 }
 0x239   :  { %13258 = vmatprep.subr.bf16.mxu0 %v13257_v41  ;;  %5108 = vperm.xlu1 %14740, %v12030_v13   ;;  %v11612_v41 = vld [vmem:[%s24021_s2 + $0xc10] sm:$0xff]  ;;  %v13291_v13 = vpack.c.bf16 %v11616_v2, %v11614_v1  ;;  %v11828_v1 = vld [vmem:[%s24021_s2 + $0x12c0] sm:$0xff] }
 0x23a   :  { %5492 = vperm.xlu0 %14739, %v12062_v49   ;;  %v13287_v48 = vpack.c.bf16 %v11612_v41, %v11610_v40  ;;  %v11627_v40 = vld [vmem:[%s24021_s2 + $0xc80] sm:$0xff]  ;;  %v11830_v2 = vld [vmem:[%s24021_s2 + $0x12d0] sm:$0xff] }
 0x23b   :  { %v11836_v31 = vld [vmem:[%s24021_s2 + $0x1300] sm:$0xff] }
 0x23c   :  { %13260 = vmatpush1.bf16.msra.mxu0 %v13259_v51  ;;  %v12065_v51 = vld [vmem:[%s24023_s4 + $0x14] ss:$0 sm:$0xff] }
 0x23d   :  { %13262 = vmatprep.subr.bf16.mxu0 %v13261_v30  ;;  %5932 = vperm.xlu1 %14740, %v12092_v14   ;;  %v12095_v30 = vld [vmem:[%s24024_s5 + $0x12] ss:$0 sm:$0xff]  ;;  %v12099_v14 = vld [vmem:[%s24024_s5 + $0x16] ss:$0 sm:$0xff] }
 0x23e   :  { %5112 = vperm.xlu0 %14739, %v12031_v15   ;;  %v11621_v15 = vld [vmem:[%s24021_s2 + $0xc50] sm:$0xff] }
 0x240   :  { %13264 = vmatpush1.bf16.msra.mxu0 %v13263_v60  ;;  %v12036_v60 = vld [vmem:[%s24022_s3 + $0x17] ss:$0 sm:$0xff] }
 0x241   :  { %13266 = vmatprep.subr.bf16.mxu0 %v13265_v47  ;;  %5496 = vperm.xlu1 %14740, %v12063_v24   ;;  %v12068_v47 = vld [vmem:[%s24023_s4 + $0x17] ss:$0 sm:$0xff]  ;;  %v13295_v24 = vpack.c.bf16 %v11621_v15, %v11619_v54  ;;  %v11640_v15 = vld [vmem:[%s24021_s2 + $0xce8] sm:$0xff] }
 0x242   :  { %5936 = vperm.xlu0 %14739, %v12093_v25  }
 0x244   :  { %13268 = vmatpush1.bf16.msra.mxu0 %v13267_v4  ;;  %v11620_v4 = vld [vmem:[%s24021_s2 + $0xc48] sm:$0xff] }
 0x245   :  { %13270 = vmatprep.subr.bf16.mxu0 %v13269_v5  ;;  %5116 = vperm.xlu1 %14740, %v12032_v33   ;;  %v11622_v5 = vld [vmem:[%s24021_s2 + $0xc58] sm:$0xff]  ;;  %v13493_v33 = vpack.c.bf16 %v11823_v23, %v11821_v19 }
 0x246   :  { %5500 = vperm.xlu0 %14739, %v12064_v36   ;;  %v11630_v36 = vld [vmem:[%s24021_s2 + $0xc98] sm:$0xff] }
 0x248   :  { %13272 = vmatpush1.bf16.msra.mxu0 %v13271_v9 }
 0x249   :  { %13274 = vmatprep.subr.bf16.mxu0 %v13273_v10  ;;  %5940 = vperm.xlu1 %14740, %v12094_v45   ;;  %v13293_v10 = vpack.c.bf16 %v11622_v5, %v11620_v4  ;;  %v12038_v45 = vld [vmem:[%s24022_s3 + $0x19] ss:$0 sm:$0xff]  ;;  %v11833_v5 = vld [vmem:[%s24021_s2 + $0x12e8] sm:$0xff] }
 0x24a   :  { %5120 = vperm.xlu0 %14739, %v12033_v46   ;;  %v12070_v46 = vld [vmem:[%s24023_s4 + $0x19] ss:$0 sm:$0xff]  ;;  %v13505_v54 = vpack.c.bf16 %v11835_v6, %v11833_v5  ;;  %v11651_v6 = vld [vmem:[%s24021_s2 + $0xd40] sm:$0xff] }
 0x24b   :  { %v11638_v4 = vld [vmem:[%s24021_s2 + $0xcd8] sm:$0xff] }
 0x24c   :  { %13276 = vmatpush1.bf16.msra.mxu0 %v13275_v16  ;;  %v11816_v16 = vld [vmem:[%s24021_s2 + $0x1260] sm:$0xff]  ;;  %v11851_v5 = vld [vmem:[%s24021_s2 + $0x1378] sm:$0xff] }
 0x24d   :  { %13278 = vmatprep.subr.bf16.mxu0 %v13277_v17  ;;  %5504 = vperm.xlu1 %14740, %v12065_v51   ;;  %v11818_v17 = vld [vmem:[%s24021_s2 + $0x1270] sm:$0xff]  ;;  %v11824_v51 = vld [vmem:[%s24021_s2 + $0x12a0] sm:$0xff] }
 0x24e   :  { %5944 = vperm.xlu0 %14739, %v12095_v30   ;;  %v13491_v25 = vpack.c.bf16 %v11818_v17, %v11816_v16  ;;  %v11826_v30 = vld [vmem:[%s24021_s2 + $0x12b0] sm:$0xff]  ;;  %v11642_v16 = vld [vmem:[%s24021_s2 + $0xcf8] sm:$0xff]  ;;  %v11837_v17 = vld [vmem:[%s24021_s2 + $0x1308] sm:$0xff] }
 0x24f   :  { %v13509_v29 = vpack.c.bf16 %v11839_v18, %v11837_v17  ;;  %v11855_v17 = vld [vmem:[%s24021_s2 + $0x1398] sm:$0xff]  ;;  %v11655_v18 = vld [vmem:[%s24021_s2 + $0xd60] sm:$0xff] }
 0x250   :  { %13280 = vmatpush1.bf16.msra.mxu0 %v13279_v26  ;;  %v11623_v26 = vld [vmem:[%s24021_s2 + $0xc60] sm:$0xff] }
 0x251   :  { %13282 = vmatprep.subr.bf16.mxu0 %v13281_v21  ;;  %5124 = vperm.xlu1 %14740, %v12034_v52   ;;  %v11625_v21 = vld [vmem:[%s24021_s2 + $0xc70] sm:$0xff]  ;;  %v11632_v52 = vld [vmem:[%s24021_s2 + $0xca8] sm:$0xff] }
 0x252   :  { %5508 = vperm.xlu0 %14739, %v12066_v53   ;;  %v13299_v41 = vpack.c.bf16 %v11625_v21, %v11623_v26  ;;  %v11829_v53 = vld [vmem:[%s24021_s2 + $0x12c8] sm:$0xff]  ;;  %v12072_v26 = vld [vmem:[%s24023_s4 + $0x1b] ss:$0 sm:$0xff]  ;;  %v13313_v21 = vpack.c.bf16 %v11642_v16, %v11640_v15 }
 0x253   :  { %v11658_v15 = vld [vmem:[%s24021_s2 + $0xd78] sm:$0xff]  ;;  %v11853_v16 = vld [vmem:[%s24021_s2 + $0x1388] sm:$0xff] }
 0x254   :  { %13284 = vmatpush1.bf16.msra.mxu0 %v13283_v37  ;;  %v11825_v37 = vld [vmem:[%s24021_s2 + $0x12a8] sm:$0xff] }
 0x255   :  { %13286 = vmatprep.subr.bf16.mxu0 %v13285_v38  ;;  %5948 = vperm.xlu1 %14740, %v12096_v55   ;;  %v11827_v38 = vld [vmem:[%s24021_s2 + $0x12b8] sm:$0xff] }
 0x256   :  { %5128 = vperm.xlu0 %14739, %v12035_v56   ;;  %v11831_v55 = vld [vmem:[%s24021_s2 + $0x12d8] sm:$0xff]  ;;  %v11631_v56 = vld [vmem:[%s24021_s2 + $0xca0] sm:$0xff] }
 0x258   :  { %13288 = vmatpush1.bf16.msra.mxu0 %v13287_v48  ;;  %v13301_v48 = vpack.c.bf16 %v11630_v36, %v11628_v20  ;;  %v11838_v20 = vld [vmem:[%s24021_s2 + $0x1310] sm:$0xff]  ;;  %v11841_v36 = vld [vmem:[%s24021_s2 + $0x1328] sm:$0xff] }
 0x259   :  { %13290 = vmatprep.subr.bf16.mxu0 %v13289_v50  ;;  %5512 = vperm.xlu1 %14740, %v12067_v57   ;;  %v13497_v50 = vpack.c.bf16 %v11827_v38, %v11825_v37  ;;  %v13303_v57 = vpack.c.bf16 %v11629_v44, %v11627_v40  ;;  %v11843_v37 = vld [vmem:[%s24021_s2 + $0x1338] sm:$0xff]  ;;  %v11643_v38 = vld [vmem:[%s24021_s2 + $0xd00] sm:$0xff] }
 0x25a   :  { %5952 = vperm.xlu0 %14739, %v12097_v58   ;;  %v13499_v58 = vpack.c.bf16 %v11826_v30, %v11824_v51  ;;  %v12102_v44 = vld [vmem:[%s24024_s5 + $0x19] ss:$0 sm:$0xff]  ;;  %v11842_v51 = vld [vmem:[%s24021_s2 + $0x1330] sm:$0xff]  ;;  %v11648_v30 = vld [vmem:[%s24021_s2 + $0xd28] sm:$0xff] }
 0x25d   :  { %5132 = vperm.xlu1 %14740, %v12036_v60   ;;  %v11633_v60 = vld [vmem:[%s24021_s2 + $0xcb0] sm:$0xff] }
 0x25e   :  { %5516 = vperm.xlu0 %14739, %v12068_v47   ;;  %v12100_v47 = vld [vmem:[%s24024_s5 + $0x17] ss:$0 sm:$0xff] }
 0x261   :  { %5956 = vperm.xlu1 %14740, %v12098_v0   ;;  %v13501_v0 = vpack.c.bf16 %v11831_v55, %v11829_v53  ;;  %v11847_v53 = vld [vmem:[%s24021_s2 + $0x1358] sm:$0xff]  ;;  %v11647_v55 = vld [vmem:[%s24021_s2 + $0xd20] sm:$0xff] }
 0x262   :  { %5136 = vperm.xlu0 %14739, %v12037_v3   ;;  %v11636_v3 = vld [vmem:[%s24021_s2 + $0xcc8] sm:$0xff] }
 0x265   :  { %5520 = vperm.xlu1 %14740, %v12069_v12   ;;  %v11832_v12 = vld [vmem:[%s24021_s2 + $0x12e0] sm:$0xff] }
 0x266   :  { %5960 = vperm.xlu0 %14739, %v12099_v14   ;;  %v11834_v14 = vld [vmem:[%s24021_s2 + $0x12f0] sm:$0xff] }
 0x267   :  { %v13507_v23 = vpack.c.bf16 %v11834_v14, %v11832_v12  ;;  %v11850_v12 = vld [vmem:[%s24021_s2 + $0x1370] sm:$0xff]  ;;  %v11656_v14 = vld [vmem:[%s24021_s2 + $0xd68] sm:$0xff] }
 0x269   :  { %5140 = vperm.xlu1 %14740, %v12038_v45   ;;  %v12041_v45 = vld [vmem:[%s24022_s3 + $0x1c] ss:$0 sm:$0xff] }
 0x26a   :  { %5524 = vperm.xlu0 %14739, %v12070_v46  }
 0x26d   :  { %5964 = vperm.xlu1 %14740, %v12100_v47   ;;  %v12103_v47 = vld [vmem:[%s24024_s5 + $0x1a] ss:$0 sm:$0xff] }
 0x26e   :  { %v17878_v61 = vpop.f32.mrb[4].mxu0  ;;  %5144 = vperm.xlu0 %14739, %v12039_v62  }
 0x26f   :  { %v17880_v49 = vpop.f32.mrb[5].mxu0 }
 0x270   :  { %v2746_v9 = vpop.f32.mrb[6].mxu0  ;;  %3314 = vmatprep.mubr.f32.mxu1 %v17880_v49  ;;  %3795 = vmatprep.mubr.f32.mxu0 %v17880_v49 }
 0x271   :  { %v2747_v11 = vpop.f32.mrb[7].mxu0  ;;  %3315 = vmatmul.mubr.f32.vlgmr.msra.gmra.mrb[20].mxu1 %v17878_v61  ;;  %3796 = vmatmul.mubr.f32.vlgmr.msra.gmra.mrb[8].mxu0 %v17878_v61  ;;  %v11637_v9 = vld [vmem:[%s24021_s2 + $0xcd0] sm:$0xff] }
 0x272   :  { %13096 = vmatpush1.bf16.msra.mxu1 %v13095_v8  ;;  %13292 = vmatpush1.bf16.msra.mxu0 %v13291_v13  ;;  %v13307_v8 = vpack.c.bf16 %v11633_v60, %v11631_v56  ;;  %v13503_v13 = vpack.c.bf16 %v11830_v2, %v11828_v1  ;;  %v13309_v11 = vpack.c.bf16 %v11638_v4, %v11636_v3  ;;  %v12073_v60 = vld [vmem:[%s24023_s4 + $0x1c] ss:$0 sm:$0xff]  ;;  %v11846_v1 = vld [vmem:[%s24021_s2 + $0x1350] sm:$0xff]  ;;  %v11652_v2 = vld [vmem:[%s24021_s2 + $0xd48] sm:$0xff] }
 0x273   :  { %3385 = vmatprep.mubr.f32.mxu1 %v24037_v39  ;;  %3866 = vmatprep.mubr.f32.mxu0 %v24037_v39  ;;  %v13311_v19 = vpack.c.bf16 %v11637_v9, %v11635_v7  ;;  %v11654_v3 = vld [vmem:[%s24021_s2 + $0xd58] sm:$0xff]  ;;  %v11849_v4 = vld [vmem:[%s24021_s2 + $0x1368] sm:$0xff] }
 0x274   :  { %13294 = vmatprep.subr.bf16.mxu1 %v13293_v10  ;;  %13490 = vmatprep.subr.bf16.mxu0 %v13489_v22  ;;  %v12071_v10 = vld [vmem:[%s24023_s4 + $0x1a] ss:$0 sm:$0xff]  ;;  %v12101_v22 = vld [vmem:[%s24024_s5 + $0x18] ss:$0 sm:$0xff]  ;;  %v12042_v9 = vld [vmem:[%s24022_s3 + $0x1d] ss:$0 sm:$0xff] }
 0x275   :  { %5528 = vperm.xlu1 %14740, %v12071_v10   ;;  %5968 = vperm.xlu0 %14739, %v12101_v22   ;;  %v12074_v10 = vld [vmem:[%s24023_s4 + $0x1d] ss:$0 sm:$0xff]  ;;  %v13325_v22 = vpack.c.bf16 %v11654_v3, %v11652_v2  ;;  %v11865_v3 = vld [vmem:[%s24021_s2 + $0x13e8] sm:$0xff] }
 0x276   :  { %v11670_v2 = vld [vmem:[%s24021_s2 + $0xdd8] sm:$0xff] }
 0x279   :  { %11421 = vmatmul.mubr.msk.f32.vlgmr.msra.gmra.mrb[20].mxu1 %vm2253_vm0, %v17431_v42  ;;  %11618 = vmatmul.mubr.msk.f32.vlgmr.msra.gmra.mrb[8].mxu0 %vm2253_vm0, %v17431_v42 }
 0x27a   :  { %13296 = vmatpush1.bf16.msra.mxu1 %v13295_v24  ;;  %13492 = vmatpush1.bf16.msra.mxu0 %v13491_v25  ;;  %v11641_v24 = vld [vmem:[%s24021_s2 + $0xcf0] sm:$0xff]  ;;  %v12040_v25 = vld [vmem:[%s24022_s3 + $0x1b] ss:$0 sm:$0xff] }
 0x27b   :  { %4134 = vmatprep.mubr.f32.mxu1 %v16721_v34  ;;  %4615 = vmatprep.mubr.f32.mxu0 %v16721_v34  ;;  %v11634_v34 = vld [vmem:[%s24021_s2 + $0xcb8] sm:$0xff]  ;;  %v13315_v40 = vpack.c.bf16 %v11641_v24, %v11639_v59 }
 0x27c   :  { %13298 = vmatprep.subr.bf16.mxu1 %v13297_v32  ;;  %13494 = vmatprep.subr.bf16.mxu0 %v13493_v33  ;;  %v13305_v63 = vpack.c.bf16 %v11634_v34, %v11632_v52  ;;  %v11644_v32 = vld [vmem:[%s24021_s2 + $0xd08] sm:$0xff]  ;;  %v11646_v33 = vld [vmem:[%s24021_s2 + $0xd18] sm:$0xff] }
 0x27d   :  { %5148 = vperm.xlu1 %14740, %v12040_v25   ;;  %5532 = vperm.xlu0 %14739, %v12072_v26   ;;  %v13317_v46 = vpack.c.bf16 %v11646_v33, %v11644_v32  ;;  %v11650_v52 = vld [vmem:[%s24021_s2 + $0xd38] sm:$0xff]  ;;  %v11845_v34 = vld [vmem:[%s24021_s2 + $0x1348] sm:$0xff]  ;;  %v13329_v26 = vpack.c.bf16 %v11658_v15, %v11656_v14 }
 0x27e   :  { %13300 = vmatpush1.bf16.msra.mxu1 %v13299_v41  ;;  %13496 = vmatpush1.bf16.msra.mxu0 %v13495_v43  ;;  %v13511_v41 = vpack.c.bf16 %v11838_v20, %v11836_v31  ;;  %v11645_v43 = vld [vmem:[%s24021_s2 + $0xd10] sm:$0xff]  ;;  %v13321_v62 = vpack.c.bf16 %v11650_v52, %v11648_v30  ;;  %v12104_v24 = vld [vmem:[%s24024_s5 + $0x1b] ss:$0 sm:$0xff]  ;;  %v12043_v25 = vld [vmem:[%s24022_s3 + $0x1e] ss:$0 sm:$0xff] }
 0x27f   :  { %13302 = vmatprep.subr.bf16.mxu1 %v13301_v48  ;;  %13498 = vmatprep.subr.bf16.mxu0 %v13497_v50  ;;  %v13513_v48 = vpack.c.bf16 %v11843_v37, %v11841_v36  ;;  %v11840_v50 = vld [vmem:[%s24021_s2 + $0x1320] sm:$0xff]  ;;  %v13319_v56 = vpack.c.bf16 %v11645_v43, %v11643_v38  ;;  %v11854_v31 = vld [vmem:[%s24021_s2 + $0x1390] sm:$0xff]  ;;  %v11660_v20 = vld [vmem:[%s24021_s2 + $0xd88] sm:$0xff] }
 0x280   :  { %v11662_v32 = vld [vmem:[%s24021_s2 + $0xd98] sm:$0xff]  ;;  %v11857_v33 = vld [vmem:[%s24021_s2 + $0x13a8] sm:$0xff]  ;;  %v11659_v37 = vld [vmem:[%s24021_s2 + $0xd80] sm:$0xff] }
 0x281   :  { %5972 = vperm.xlu1 %14740, %v12102_v44   ;;  %5152 = vperm.xlu0 %14739, %v12041_v45   ;;  %v11859_v36 = vld [vmem:[%s24021_s2 + $0x13b8] sm:$0xff]  ;;  %v13333_v45 = vpack.c.bf16 %v11662_v32, %v11660_v20  ;;  %v11861_v52 = vld [vmem:[%s24021_s2 + $0x13c8] sm:$0xff] }
 0x282   :  { %13304 = vmatpush1.bf16.msra.mxu1 %v13303_v57  ;;  %13500 = vmatpush1.bf16.msra.mxu0 %v13499_v58  ;;  %v13515_v57 = vpack.c.bf16 %v11842_v51, %v11840_v50  ;;  %v11649_v58 = vld [vmem:[%s24021_s2 + $0xd30] sm:$0xff]  ;;  %v12075_v43 = vld [vmem:[%s24023_s4 + $0x1e] ss:$0 sm:$0xff]  ;;  %v12105_v44 = vld [vmem:[%s24024_s5 + $0x1c] ss:$0 sm:$0xff] }
 0x283   :  { %13306 = vmatprep.subr.bf16.mxu1 %v13305_v63  ;;  %13502 = vmatprep.subr.bf16.mxu0 %v13501_v0  ;;  %v13517_v63 = vpack.c.bf16 %v11847_v53, %v11845_v34  ;;  %v11844_v0 = vld [vmem:[%s24021_s2 + $0x1340] sm:$0xff]  ;;  %v13323_v7 = vpack.c.bf16 %v11649_v58, %v11647_v55  ;;  %v11858_v50 = vld [vmem:[%s24021_s2 + $0x13b0] sm:$0xff]  ;;  %v11664_v51 = vld [vmem:[%s24021_s2 + $0xda8] sm:$0xff] }
 0x284   :  { %v11666_v30 = vld [vmem:[%s24021_s2 + $0xdb8] sm:$0xff]  ;;  %v11663_v53 = vld [vmem:[%s24021_s2 + $0xda0] sm:$0xff]  ;;  %v11869_v15 = vld [vmem:[%s24021_s2 + $0x1408] sm:$0xff] }
 0x285   :  { %5536 = vperm.xlu1 %14740, %v12073_v60   ;;  %5976 = vperm.xlu0 %14739, %v12103_v47   ;;  %v11863_v34 = vld [vmem:[%s24021_s2 + $0x13d8] sm:$0xff]  ;;  %v13337_v47 = vpack.c.bf16 %v11666_v30, %v11664_v51  ;;  %v11873_v20 = vld [vmem:[%s24021_s2 + $0x1428] sm:$0xff] }
 0x286   :  { %13308 = vmatpush1.bf16.msra.mxu1 %v13307_v8  ;;  %13504 = vmatpush1.bf16.msra.mxu0 %v13503_v13  ;;  %v13519_v8 = vpack.c.bf16 %v11846_v1, %v11844_v0  ;;  %v11653_v13 = vld [vmem:[%s24021_s2 + $0xd50] sm:$0xff]  ;;  %v12044_v58 = vld [vmem:[%s24022_s3 + $0x1f] ss:$0 sm:$0xff]  ;;  %v11668_v1 = vld [vmem:[%s24021_s2 + $0xdc8] sm:$0xff] }
 0x287   :  { %13310 = vmatprep.subr.bf16.mxu1 %v13309_v11  ;;  %13506 = vmatprep.subr.bf16.mxu0 %v13505_v54  ;;  %v13521_v11 = vpack.c.bf16 %v11851_v5, %v11849_v4  ;;  %v11848_v54 = vld [vmem:[%s24021_s2 + $0x1360] sm:$0xff]  ;;  %v13327_v59 = vpack.c.bf16 %v11653_v13, %v11651_v6  ;;  %v12076_v60 = vld [vmem:[%s24023_s4 + $0x1f] ss:$0 sm:$0xff]  ;;  %v11862_v0 = vld [vmem:[%s24021_s2 + $0x13d0] sm:$0xff] }
 0x288   :  { %v11867_v4 = vld [vmem:[%s24021_s2 + $0x13f8] sm:$0xff]  ;;  %v11667_v5 = vld [vmem:[%s24021_s2 + $0xdc0] sm:$0xff] }
 0x289   :  { %5156 = vperm.xlu1 %14740, %v12042_v9   ;;  %5540 = vperm.xlu0 %14739, %v12074_v10   ;;  %v12106_v13 = vld [vmem:[%s24024_s5 + $0x1d] ss:$0 sm:$0xff]  ;;  %v12107_v9 = vld [vmem:[%s24024_s5 + $0x1e] ss:$0 sm:$0xff]  ;;  %v13341_v10 = vpack.c.bf16 %v11670_v2, %v11668_v1 }
 0x28a   :  { %13312 = vmatpush1.bf16.msra.mxu1 %v13311_v19  ;;  %13508 = vmatpush1.bf16.msra.mxu0 %v13507_v23  ;;  %v13523_v19 = vpack.c.bf16 %v11850_v12, %v11848_v54  ;;  %v11657_v23 = vld [vmem:[%s24021_s2 + $0xd70] sm:$0xff]  ;;  %v11672_v12 = vld [vmem:[%s24021_s2 + $0xde8] sm:$0xff]  ;;  %v11674_v14 = vld [vmem:[%s24021_s2 + $0xdf8] sm:$0xff] }
 0x28b   :  { %13314 = vmatprep.subr.bf16.mxu1 %v13313_v21  ;;  %13510 = vmatprep.subr.bf16.mxu0 %v13509_v29  ;;  %v13525_v21 = vpack.c.bf16 %v11855_v17, %v11853_v16  ;;  %v11852_v29 = vld [vmem:[%s24021_s2 + $0x1380] sm:$0xff]  ;;  %v13331_v38 = vpack.c.bf16 %v11657_v23, %v11655_v18  ;;  %v11866_v54 = vld [vmem:[%s24021_s2 + $0x13f0] sm:$0xff]  ;;  %v11871_v16 = vld [vmem:[%s24021_s2 + $0x1418] sm:$0xff] }
 0x28c   :  { %v12108_v23 = vld [vmem:[%s24024_s5 + $0x1f] ss:$0 sm:$0xff] }
 0x28d   :  { %5980 = vperm.xlu1 %14740, %v12104_v24   ;;  %5160 = vperm.xlu0 %14739, %v12043_v25   ;;  %v13345_v24 = vpack.c.bf16 %v11674_v14, %v11672_v12  ;;  %v13541_v25 = vpack.c.bf16 %v11871_v16, %v11869_v15  ;;  %v11875_v32 = vld [vmem:[%s24021_s2 + $0x1438] sm:$0xff]  ;;  %v11884_v12 = vld [vmem:[%s24021_s2 + $0x1480] sm:$0xff]  ;;  %v11886_v16 = vld [vmem:[%s24021_s2 + $0x1490] sm:$0xff] }
 0x28e   :  { %13316 = vmatpush1.bf16.msra.mxu1 %v13315_v40  ;;  %13512 = vmatpush1.bf16.msra.mxu0 %v13511_v41  ;;  %v13527_v40 = vpack.c.bf16 %v11854_v31, %v11852_v29  ;;  %v11661_v41 = vld [vmem:[%s24021_s2 + $0xd90] sm:$0xff]  ;;  %v11676_v29 = vld [vmem:[%s24021_s2 + $0xe08] sm:$0xff]  ;;  %v11678_v31 = vld [vmem:[%s24021_s2 + $0xe18] sm:$0xff] }
 0x28f   :  { %13318 = vmatprep.subr.bf16.mxu1 %v13317_v46  ;;  %13514 = vmatprep.subr.bf16.mxu0 %v13513_v48  ;;  %v13529_v46 = vpack.c.bf16 %v11859_v36, %v11857_v33  ;;  %v11856_v48 = vld [vmem:[%s24021_s2 + $0x13a0] sm:$0xff]  ;;  %v13335_v55 = vpack.c.bf16 %v11661_v41, %v11659_v37  ;;  %v13545_v41 = vpack.c.bf16 %v11875_v32, %v11873_v20  ;;  %v11698_v20 = vld [vmem:[%s24021_s2 + $0xeb8] sm:$0xff]  ;;  %v11893_v32 = vld [vmem:[%s24021_s2 + $0x14c8] sm:$0xff] }
 0x290   :  { %v11675_v37 = vld [vmem:[%s24021_s2 + $0xe00] sm:$0xff] }
 0x291   :  { %5544 = vperm.xlu1 %14740, %v12075_v43   ;;  %5984 = vperm.xlu0 %14739, %v12105_v44   ;;  %v11872_v43 = vld [vmem:[%s24021_s2 + $0x1420] sm:$0xff]  ;;  %v11874_v44 = vld [vmem:[%s24021_s2 + $0x1430] sm:$0xff] }
 0x292   :  { %13320 = vmatpush1.bf16.msra.mxu1 %v13319_v56  ;;  %13516 = vmatpush1.bf16.msra.mxu0 %v13515_v57  ;;  %v13531_v56 = vpack.c.bf16 %v11858_v50, %v11856_v48  ;;  %v11665_v57 = vld [vmem:[%s24021_s2 + $0xdb0] sm:$0xff]  ;;  %v11877_v48 = vld [vmem:[%s24021_s2 + $0x1448] sm:$0xff]  ;;  %v11879_v50 = vld [vmem:[%s24021_s2 + $0x1458] sm:$0xff]  ;;  %v13547_v30 = vpack.c.bf16 %v11874_v44, %v11872_v43 }
 0x293   :  { %13322 = vmatprep.subr.bf16.mxu1 %v13321_v62  ;;  %13518 = vmatprep.subr.bf16.mxu0 %v13517_v63  ;;  %v13533_v62 = vpack.c.bf16 %v11863_v34, %v11861_v52  ;;  %v11860_v63 = vld [vmem:[%s24021_s2 + $0x13c0] sm:$0xff]  ;;  %v13339_v6 = vpack.c.bf16 %v11665_v57, %v11663_v53  ;;  %v11681_v34 = vld [vmem:[%s24021_s2 + $0xe30] sm:$0xff] }
 0x294   :  { %v11679_v52 = vld [vmem:[%s24021_s2 + $0xe20] sm:$0xff]  ;;  %v11878_v57 = vld [vmem:[%s24021_s2 + $0x1450] sm:$0xff] }
 0x295   :  { %5164 = vperm.xlu1 %14740, %v12044_v58   ;;  %5548 = vperm.xlu0 %14739, %v12076_v60   ;;  %v11684_v58 = vld [vmem:[%s24021_s2 + $0xe48] sm:$0xff]  ;;  %v11686_v60 = vld [vmem:[%s24021_s2 + $0xe58] sm:$0xff]  ;;  %v11892_v43 = vld [vmem:[%s24021_s2 + $0x14c0] sm:$0xff] }
 0x296   :  { %13324 = vmatpush1.bf16.msra.mxu1 %v13323_v7  ;;  %13520 = vmatpush1.bf16.msra.mxu0 %v13519_v8  ;;  %v13535_v7 = vpack.c.bf16 %v11862_v0, %v11860_v63  ;;  %v11669_v8 = vld [vmem:[%s24021_s2 + $0xdd0] sm:$0xff]  ;;  %v13355_v63 = vpack.c.bf16 %v11681_v34, %v11679_v52  ;;  %v13357_v1 = vpack.c.bf16 %v11686_v60, %v11684_v58  ;;  %v11704_v60 = vld [vmem:[%s24021_s2 + $0xee8] sm:$0xff] }
 0x297   :  { %13326 = vmatprep.subr.bf16.mxu1 %v13325_v22  ;;  %13522 = vmatprep.subr.bf16.mxu0 %v13521_v11  ;;  %v13537_v22 = vpack.c.bf16 %v11867_v4, %v11865_v3  ;;  %v11864_v11 = vld [vmem:[%s24021_s2 + $0x13e0] sm:$0xff]  ;;  %v13343_v17 = vpack.c.bf16 %v11669_v8, %v11667_v5  ;;  %v11685_v4 = vld [vmem:[%s24021_s2 + $0xe50] sm:$0xff]  ;;  %v11690_v8 = vld [vmem:[%s24021_s2 + $0xe78] sm:$0xff] }
 0x298   :  { %v13539_v18 = vpack.c.bf16 %v11866_v54, %v11864_v11  ;;  %v11683_v3 = vld [vmem:[%s24021_s2 + $0xe40] sm:$0xff]  ;;  %v11689_v54 = vld [vmem:[%s24021_s2 + $0xe70] sm:$0xff] }
 0x299   :  { %5988 = vperm.xlu1 %14740, %v12106_v13   ;;  %5992 = vperm.xlu0 %14739, %v12107_v9   ;;  %v11880_v5 = vld [vmem:[%s24021_s2 + $0x1460] sm:$0xff]  ;;  %v11885_v13 = vld [vmem:[%s24021_s2 + $0x1488] sm:$0xff]  ;;  %v11887_v9 = vld [vmem:[%s24021_s2 + $0x1498] sm:$0xff] }
 0x29a   :  { %13328 = vmatpush1.bf16.msra.mxu1 %v13327_v59  ;;  %13524 = vmatpush1.bf16.msra.mxu0 %v13523_v19  ;;  %v11671_v59 = vld [vmem:[%s24021_s2 + $0xde0] sm:$0xff]  ;;  %v11673_v19 = vld [vmem:[%s24021_s2 + $0xdf0] sm:$0xff]  ;;  %v13557_v15 = vpack.c.bf16 %v11887_v9, %v11885_v13  ;;  %v11710_v13 = vld [vmem:[%s24021_s2 + $0xf18] sm:$0xff] }
 0x29b   :  { %13330 = vmatprep.subr.bf16.mxu1 %v13329_v26  ;;  %13526 = vmatprep.subr.bf16.mxu0 %v13525_v21  ;;  %v11868_v26 = vld [vmem:[%s24021_s2 + $0x1400] sm:$0xff]  ;;  %v11870_v21 = vld [vmem:[%s24021_s2 + $0x1410] sm:$0xff]  ;;  %v13347_v33 = vpack.c.bf16 %v11673_v19, %v11671_v59  ;;  %v11889_v59 = vld [vmem:[%s24021_s2 + $0x14a8] sm:$0xff] }
 0x29c   :  { %v13543_v36 = vpack.c.bf16 %v11870_v21, %v11868_v26  ;;  %v11687_v11 = vld [vmem:[%s24021_s2 + $0xe60] sm:$0xff]  ;;  %v11891_v19 = vld [vmem:[%s24021_s2 + $0x14b8] sm:$0xff]  ;;  %v11693_v26 = vld [vmem:[%s24021_s2 + $0xe90] sm:$0xff] }
 0x29d   :  { %5996 = vperm.xlu1 %14740, %v12108_v23   ;;  %v13363_v23 = vpack.c.bf16 %v11689_v54, %v11687_v11  ;;  %v11888_v21 = vld [vmem:[%s24021_s2 + $0x14a0] sm:$0xff]  ;;  %v11898_v58 = vld [vmem:[%s24021_s2 + $0x14f0] sm:$0xff]  ;;  %v11905_v9 = vld [vmem:[%s24021_s2 + $0x1528] sm:$0xff] }
 0x29e   :  { %13332 = vmatpush1.bf16.msra.mxu1 %v13331_v38  ;;  %13528 = vmatpush1.bf16.msra.mxu0 %v13527_v40  ;;  %v11677_v38 = vld [vmem:[%s24021_s2 + $0xe10] sm:$0xff]  ;;  %v13349_v40 = vpack.c.bf16 %v11678_v31, %v11676_v29  ;;  %v13561_v29 = vpack.c.bf16 %v11891_v19, %v11889_v59  ;;  %v11696_v31 = vld [vmem:[%s24021_s2 + $0xea8] sm:$0xff]  ;;  %v11714_v59 = vld [vmem:[%s24021_s2 + $0xf38] sm:$0xff] }
 0x29f   :  { %13334 = vmatprep.subr.bf16.mxu1 %v13333_v45  ;;  %13530 = vmatprep.subr.bf16.mxu0 %v13529_v46  ;;  %v11680_v45 = vld [vmem:[%s24021_s2 + $0xe28] sm:$0xff]  ;;  %v11682_v46 = vld [vmem:[%s24021_s2 + $0xe38] sm:$0xff]  ;;  %v13351_v51 = vpack.c.bf16 %v11677_v38, %v11675_v37  ;;  %v13369_v38 = vpack.c.bf16 %v11698_v20, %v11696_v31  ;;  %v11910_v31 = vld [vmem:[%s24021_s2 + $0x1550] sm:$0xff] }
 0x2a0   :  { %v13353_v53 = vpack.c.bf16 %v11682_v46, %v11680_v45  ;;  %v11894_v45 = vld [vmem:[%s24021_s2 + $0x14d0] sm:$0xff]  ;;  %v11700_v46 = vld [vmem:[%s24021_s2 + $0xec8] sm:$0xff] }
 0x2a1   :  { %v13567_v52 = vpack.c.bf16 %v11894_v45, %v11892_v43  ;;  %v11909_v19 = vld [vmem:[%s24021_s2 + $0x1548] sm:$0xff]  ;;  %v11717_v43 = vld [vmem:[%s24021_s2 + $0xf50] sm:$0xff] }
 0x2a2   :  { %13336 = vmatpush1.bf16.msra.mxu1 %v13335_v55  ;;  %13532 = vmatpush1.bf16.msra.mxu0 %v13531_v56  ;;  %v13549_v55 = vpack.c.bf16 %v11879_v50, %v11877_v48  ;;  %v11876_v56 = vld [vmem:[%s24021_s2 + $0x1440] sm:$0xff]  ;;  %v11702_v48 = vld [vmem:[%s24021_s2 + $0xed8] sm:$0xff]  ;;  %v11897_v50 = vld [vmem:[%s24021_s2 + $0x14e8] sm:$0xff] }
 0x2a3   :  { %13338 = vmatprep.subr.bf16.mxu1 %v13337_v47  ;;  %13534 = vmatprep.subr.bf16.mxu0 %v13533_v62  ;;  %v11881_v47 = vld [vmem:[%s24021_s2 + $0x1468] sm:$0xff]  ;;  %v11883_v62 = vld [vmem:[%s24021_s2 + $0x1478] sm:$0xff]  ;;  %v13551_v0 = vpack.c.bf16 %v11878_v57, %v11876_v56  ;;  %v13373_v34 = vpack.c.bf16 %v11702_v48, %v11700_v46  ;;  %v11896_v56 = vld [vmem:[%s24021_s2 + $0x14e0] sm:$0xff] }
 0x2a4   :  { %v13553_v2 = vpack.c.bf16 %v11883_v62, %v11881_v47  ;;  %v11706_v47 = vld [vmem:[%s24021_s2 + $0xef8] sm:$0xff]  ;;  %v11901_v62 = vld [vmem:[%s24021_s2 + $0x1508] sm:$0xff]  ;;  %v11914_v46 = vld [vmem:[%s24021_s2 + $0x1570] sm:$0xff] }
 0x2a5   :  { %v11716_v20 = vld [vmem:[%s24021_s2 + $0xf48] sm:$0xff] }
 0x2a6   :  { %13340 = vmatpush1.bf16.msra.mxu1 %v13339_v6  ;;  %13536 = vmatpush1.bf16.msra.mxu0 %v13535_v7  ;;  %v11882_v6 = vld [vmem:[%s24021_s2 + $0x1470] sm:$0xff]  ;;  %v11688_v7 = vld [vmem:[%s24021_s2 + $0xe68] sm:$0xff] }
 0x2a7   :  { %13342 = vmatprep.subr.bf16.mxu1 %v13341_v10  ;;  %13538 = vmatprep.subr.bf16.mxu0 %v13537_v22  ;;  %v13359_v10 = vpack.c.bf16 %v11685_v4, %v11683_v3  ;;  %v13555_v22 = vpack.c.bf16 %v11882_v6, %v11880_v5  ;;  %v13361_v14 = vpack.c.bf16 %v11690_v8, %v11688_v7  ;;  %v11703_v3 = vld [vmem:[%s24021_s2 + $0xee0] sm:$0xff]  ;;  %v11705_v4 = vld [vmem:[%s24021_s2 + $0xef0] sm:$0xff]  ;;  %v11708_v8 = vld [vmem:[%s24021_s2 + $0xf08] sm:$0xff] }
 0x2a8   :  { %v11900_v5 = vld [vmem:[%s24021_s2 + $0x1500] sm:$0xff]  ;;  %v11902_v7 = vld [vmem:[%s24021_s2 + $0x1510] sm:$0xff]  ;;  %v13381_v54 = vpack.c.bf16 %v11710_v13, %v11708_v8  ;;  %v11720_v48 = vld [vmem:[%s24021_s2 + $0xf68] sm:$0xff] }
 0x2a9   :  { %v13575_v11 = vpack.c.bf16 %v11902_v7, %v11900_v5  ;;  %v11725_v5 = vld [vmem:[%s24021_s2 + $0xf90] sm:$0xff]  ;;  %v11728_v13 = vld [vmem:[%s24021_s2 + $0xfa8] sm:$0xff] }
 0x2aa   :  { %13344 = vmatpush1.bf16.msra.mxu1 %v13343_v17  ;;  %13540 = vmatpush1.bf16.msra.mxu0 %v13539_v18  ;;  %v11692_v17 = vld [vmem:[%s24021_s2 + $0xe88] sm:$0xff]  ;;  %v11694_v18 = vld [vmem:[%s24021_s2 + $0xe98] sm:$0xff]  ;;  %v11922_v8 = vld [vmem:[%s24021_s2 + $0x15b0] sm:$0xff] }
 0x2ab   :  { %13346 = vmatprep.subr.bf16.mxu1 %v13345_v24  ;;  %13542 = vmatprep.subr.bf16.mxu0 %v13541_v25  ;;  %v13559_v24 = vpack.c.bf16 %v11886_v16, %v11884_v12  ;;  %v13365_v25 = vpack.c.bf16 %v11694_v18, %v11692_v17  ;;  %v11707_v12 = vld [vmem:[%s24021_s2 + $0xf00] sm:$0xff]  ;;  %v11906_v17 = vld [vmem:[%s24021_s2 + $0x1530] sm:$0xff]  ;;  %v11712_v18 = vld [vmem:[%s24021_s2 + $0xf28] sm:$0xff] }
 0x2ae   :  { %13348 = vmatpush1.bf16.msra.mxu1 %v13347_v33  ;;  %13544 = vmatpush1.bf16.msra.mxu0 %v13543_v36  ;;  %v11895_v33 = vld [vmem:[%s24021_s2 + $0x14d8] sm:$0xff] }
 0x2af   :  { %13350 = vmatprep.subr.bf16.mxu1 %v13349_v40  ;;  %13546 = vmatprep.subr.bf16.mxu0 %v13545_v41  ;;  %v11695_v40 = vld [vmem:[%s24021_s2 + $0xea0] sm:$0xff]  ;;  %v11697_v41 = vld [vmem:[%s24021_s2 + $0xeb0] sm:$0xff]  ;;  %v13565_v44 = vpack.c.bf16 %v11895_v33, %v11893_v32  ;;  %v11718_v32 = vld [vmem:[%s24021_s2 + $0xf58] sm:$0xff] }
 0x2b0   :  { %v11913_v33 = vld [vmem:[%s24021_s2 + $0x1568] sm:$0xff] }
 0x2b2   :  { %13352 = vmatpush1.bf16.msra.mxu1 %v13351_v51  ;;  %13548 = vmatpush1.bf16.msra.mxu0 %v13547_v30  ;;  %v11899_v51 = vld [vmem:[%s24021_s2 + $0x14f8] sm:$0xff]  ;;  %v13371_v30 = vpack.c.bf16 %v11697_v41, %v11695_v40  ;;  %v13389_v40 = vpack.c.bf16 %v11718_v32, %v11716_v20  ;;  %v11715_v41 = vld [vmem:[%s24021_s2 + $0xf40] sm:$0xff]  ;;  %v11930_v20 = vld [vmem:[%s24021_s2 + $0x15f0] sm:$0xff] }
 0x2b3   :  { %13354 = vmatprep.subr.bf16.mxu1 %v13353_v53  ;;  %13550 = vmatprep.subr.bf16.mxu0 %v13549_v55  ;;  %v11699_v53 = vld [vmem:[%s24021_s2 + $0xec0] sm:$0xff]  ;;  %v11701_v55 = vld [vmem:[%s24021_s2 + $0xed0] sm:$0xff]  ;;  %v13569_v57 = vpack.c.bf16 %v11899_v51, %v11897_v50  ;;  %v11722_v50 = vld [vmem:[%s24021_s2 + $0xf78] sm:$0xff] }
 0x2b4   :  { %v11917_v51 = vld [vmem:[%s24021_s2 + $0x1588] sm:$0xff] }
 0x2b5   :  { %v11736_v32 = vld [vmem:[%s24021_s2 + $0xfe8] sm:$0xff] }
 0x2b6   :  { %13356 = vmatpush1.bf16.msra.mxu1 %v13355_v63  ;;  %13552 = vmatpush1.bf16.msra.mxu0 %v13551_v0  ;;  %v11903_v63 = vld [vmem:[%s24021_s2 + $0x1518] sm:$0xff]  ;;  %v13375_v0 = vpack.c.bf16 %v11701_v55, %v11699_v53  ;;  %v13393_v53 = vpack.c.bf16 %v11722_v50, %v11720_v48  ;;  %v11719_v55 = vld [vmem:[%s24021_s2 + $0xf60] sm:$0xff]  ;;  %v11934_v48 = vld [vmem:[%s24021_s2 + $0x1610] sm:$0xff] }
 0x2b7   :  { %13358 = vmatprep.subr.bf16.mxu1 %v13357_v1  ;;  %13554 = vmatprep.subr.bf16.mxu0 %v13553_v2  ;;  %v13571_v1 = vpack.c.bf16 %v11898_v58, %v11896_v56  ;;  %v13377_v2 = vpack.c.bf16 %v11706_v47, %v11704_v60  ;;  %v13573_v6 = vpack.c.bf16 %v11903_v63, %v11901_v62  ;;  %v11721_v56 = vld [vmem:[%s24021_s2 + $0xf70] sm:$0xff]  ;;  %v11724_v47 = vld [vmem:[%s24021_s2 + $0xf88] sm:$0xff]  ;;  %v11726_v62 = vld [vmem:[%s24021_s2 + $0xf98] sm:$0xff] }
 0x2b8   :  { %v11918_v60 = vld [vmem:[%s24021_s2 + $0x1590] sm:$0xff]  ;;  %v11921_v63 = vld [vmem:[%s24021_s2 + $0x15a8] sm:$0xff] }
 0x2b9   :  { %4135 = vmatmul.mubr.f32.vlgmr.msra.gmra.mrb[22].mxu1 %v16711_v27  ;;  %4616 = vmatmul.mubr.f32.vlgmr.msra.gmra.mrb[10].mxu0 %v16711_v27  ;;  %v11691_v27 = vld [vmem:[%s24021_s2 + $0xe80] sm:$0xff]  ;;  %v11740_v50 = vld [vmem:[%s24021_s2 + $0x1008] sm:$0xff] }
 0x2ba   :  { %13360 = vmatpush1.bf16.msra.mxu1 %v13359_v10  ;;  %4205 = vmatprep.mubr.f32.mxu1 %v16723_v35  ;;  %v13367_v36 = vpack.c.bf16 %v11693_v26, %v11691_v27  ;;  %v11907_v10 = vld [vmem:[%s24021_s2 + $0x1538] sm:$0xff]  ;;  %v13385_v27 = vpack.c.bf16 %v11714_v59, %v11712_v18  ;;  %v11711_v26 = vld [vmem:[%s24021_s2 + $0xf20] sm:$0xff]  ;;  %v11926_v18 = vld [vmem:[%s24021_s2 + $0x15d0] sm:$0xff] }
 0x2bb   :  { %13556 = vmatpush1.bf16.msra.mxu0 %v13555_v22  ;;  %4686 = vmatprep.mubr.f32.mxu0 %v16723_v35  ;;  %v11890_v35 = vld [vmem:[%s24021_s2 + $0x14b0] sm:$0xff]  ;;  %v13379_v22 = vpack.c.bf16 %v11705_v4, %v11703_v3  ;;  %v13577_v16 = vpack.c.bf16 %v11907_v10, %v11905_v9  ;;  %v13397_v3 = vpack.c.bf16 %v11726_v62, %v11724_v47  ;;  %v11723_v4 = vld [vmem:[%s24021_s2 + $0xf80] sm:$0xff]  ;;  %v11730_v9 = vld [vmem:[%s24021_s2 + $0xfb8] sm:$0xff] }
 0x2bc   :  { %13362 = vmatprep.subr.bf16.mxu1 %v13361_v14  ;;  %13558 = vmatprep.subr.bf16.mxu0 %v13557_v15  ;;  %v13563_v37 = vpack.c.bf16 %v11890_v35, %v11888_v21  ;;  %v11709_v14 = vld [vmem:[%s24021_s2 + $0xf10] sm:$0xff]  ;;  %v11904_v15 = vld [vmem:[%s24021_s2 + $0x1520] sm:$0xff]  ;;  %v11925_v10 = vld [vmem:[%s24021_s2 + $0x15c8] sm:$0xff] }
 0x2bd   :  { %v11713_v21 = vld [vmem:[%s24021_s2 + $0xf30] sm:$0xff]  ;;  %v11732_v59 = vld [vmem:[%s24021_s2 + $0xfc8] sm:$0xff] }
 0x2be   :  { %13364 = vmatpush1.bf16.msra.mxu1 %v13363_v23  ;;  %v11911_v23 = vld [vmem:[%s24021_s2 + $0x1558] sm:$0xff]  ;;  %v11938_v47 = vld [vmem:[%s24021_s2 + $0x1630] sm:$0xff]  ;;  %v11744_v62 = vld [vmem:[%s24021_s2 + $0x1028] sm:$0xff] }
 0x2bf   :  { %13560 = vmatpush1.bf16.msra.mxu0 %v13559_v24  ;;  %13366 = vmatprep.subr.bf16.mxu1 %v13365_v25  ;;  %v13383_v24 = vpack.c.bf16 %v11709_v14, %v11707_v12  ;;  %v13579_v25 = vpack.c.bf16 %v11906_v17, %v11904_v15  ;;  %v13581_v35 = vpack.c.bf16 %v11911_v23, %v11909_v19  ;;  %v11727_v14 = vld [vmem:[%s24021_s2 + $0xfa0] sm:$0xff]  ;;  %v11729_v15 = vld [vmem:[%s24021_s2 + $0xfb0] sm:$0xff]  ;;  %v11734_v19 = vld [vmem:[%s24021_s2 + $0xfd8] sm:$0xff] }
 0x2c0   :  { %13562 = vmatprep.subr.bf16.mxu0 %v13561_v29  ;;  %v11908_v29 = vld [vmem:[%s24021_s2 + $0x1540] sm:$0xff]  ;;  %v13401_v12 = vpack.c.bf16 %v11730_v9, %v11728_v13  ;;  %v11929_v23 = vld [vmem:[%s24021_s2 + $0x15e8] sm:$0xff]  ;;  %v11942_v13 = vld [vmem:[%s24021_s2 + $0x1650] sm:$0xff] }
 0x2c1   :  { %v11748_v9 = vld [vmem:[%s24021_s2 + $0x1048] sm:$0xff] }
 0x2c2   :  { %13368 = vmatpush1.bf16.msra.mxu1 %v13367_v36  ;;  %v11915_v36 = vld [vmem:[%s24021_s2 + $0x1578] sm:$0xff] }
 0x2c3   :  { %13564 = vmatpush1.bf16.msra.mxu0 %v13563_v37  ;;  %13370 = vmatprep.subr.bf16.mxu1 %v13369_v38  ;;  %v13387_v37 = vpack.c.bf16 %v11713_v21, %v11711_v26  ;;  %v13583_v38 = vpack.c.bf16 %v11910_v31, %v11908_v29  ;;  %v13585_v45 = vpack.c.bf16 %v11915_v36, %v11913_v33  ;;  %v11731_v21 = vld [vmem:[%s24021_s2 + $0xfc0] sm:$0xff]  ;;  %v11733_v29 = vld [vmem:[%s24021_s2 + $0xfd0] sm:$0xff]  ;;  %v11738_v33 = vld [vmem:[%s24021_s2 + $0xff8] sm:$0xff] }
 0x2c4   :  { %13566 = vmatprep.subr.bf16.mxu0 %v13565_v44  ;;  %v11912_v44 = vld [vmem:[%s24021_s2 + $0x1560] sm:$0xff]  ;;  %v13405_v26 = vpack.c.bf16 %v11734_v19, %v11732_v59  ;;  %v11933_v36 = vld [vmem:[%s24021_s2 + $0x1608] sm:$0xff]  ;;  %v11946_v59 = vld [vmem:[%s24021_s2 + $0x1670] sm:$0xff] }
 0x2c5   :  { %v11752_v19 = vld [vmem:[%s24021_s2 + $0x1068] sm:$0xff] }
 0x2c6   :  { %13372 = vmatpush1.bf16.msra.mxu1 %v13371_v30  ;;  %v11919_v30 = vld [vmem:[%s24021_s2 + $0x1598] sm:$0xff] }
 0x2c7   :  { %13568 = vmatpush1.bf16.msra.mxu0 %v13567_v52  ;;  %13374 = vmatprep.subr.bf16.mxu1 %v13373_v34  ;;  %v13391_v52 = vpack.c.bf16 %v11717_v43, %v11715_v41  ;;  %v13587_v34 = vpack.c.bf16 %v11914_v46, %v11912_v44  ;;  %v13589_v58 = vpack.c.bf16 %v11919_v30, %v11917_v51  ;;  %v11735_v43 = vld [vmem:[%s24021_s2 + $0xfe0] sm:$0xff]  ;;  %v11737_v44 = vld [vmem:[%s24021_s2 + $0xff0] sm:$0xff]  ;;  %v11742_v51 = vld [vmem:[%s24021_s2 + $0x1018] sm:$0xff] }
 0x2c8   :  { %13570 = vmatprep.subr.bf16.mxu0 %v13569_v57  ;;  %v11916_v57 = vld [vmem:[%s24021_s2 + $0x1580] sm:$0xff]  ;;  %v13409_v41 = vpack.c.bf16 %v11738_v33, %v11736_v32  ;;  %v11937_v30 = vld [vmem:[%s24021_s2 + $0x1628] sm:$0xff]  ;;  %v11758_v33 = vld [vmem:[%s24021_s2 + $0x1098] sm:$0xff] }
 0x2c9   :  { %v11756_v32 = vld [vmem:[%s24021_s2 + $0x1088] sm:$0xff] }
 0x2ca   :  { %13376 = vmatpush1.bf16.msra.mxu1 %v13375_v0  ;;  %v11923_v0 = vld [vmem:[%s24021_s2 + $0x15b8] sm:$0xff] }
 0x2cb   :  { %13572 = vmatpush1.bf16.msra.mxu0 %v13571_v1  ;;  %13378 = vmatprep.subr.bf16.mxu1 %v13377_v2  ;;  %v13395_v1 = vpack.c.bf16 %v11721_v56, %v11719_v55  ;;  %v13591_v2 = vpack.c.bf16 %v11918_v60, %v11916_v57  ;;  %v13593_v7 = vpack.c.bf16 %v11923_v0, %v11921_v63  ;;  %v11739_v56 = vld [vmem:[%s24021_s2 + $0x1000] sm:$0xff]  ;;  %v11741_v57 = vld [vmem:[%s24021_s2 + $0x1010] sm:$0xff]  ;;  %v11746_v63 = vld [vmem:[%s24021_s2 + $0x1038] sm:$0xff] }
 0x2cc   :  { %13574 = vmatprep.subr.bf16.mxu0 %v13573_v6  ;;  %v11920_v6 = vld [vmem:[%s24021_s2 + $0x15a0] sm:$0xff]  ;;  %v13413_v55 = vpack.c.bf16 %v11742_v51, %v11740_v50  ;;  %v11941_v0 = vld [vmem:[%s24021_s2 + $0x1648] sm:$0xff]  ;;  %v11762_v51 = vld [vmem:[%s24021_s2 + $0x10b8] sm:$0xff] }
 0x2cd   :  { %v11760_v50 = vld [vmem:[%s24021_s2 + $0x10a8] sm:$0xff] }
 0x2ce   :  { %13380 = vmatpush1.bf16.msra.mxu1 %v13379_v22  ;;  %v11927_v22 = vld [vmem:[%s24021_s2 + $0x15d8] sm:$0xff] }
 0x2cf   :  { %13576 = vmatpush1.bf16.msra.mxu0 %v13575_v11  ;;  %13382 = vmatprep.subr.bf16.mxu1 %v13381_v54  ;;  %v13399_v11 = vpack.c.bf16 %v11725_v5, %v11723_v4  ;;  %v13595_v54 = vpack.c.bf16 %v11922_v8, %v11920_v6  ;;  %v13597_v17 = vpack.c.bf16 %v11927_v22, %v11925_v10  ;;  %v11743_v5 = vld [vmem:[%s24021_s2 + $0x1020] sm:$0xff]  ;;  %v11745_v6 = vld [vmem:[%s24021_s2 + $0x1030] sm:$0xff]  ;;  %v11750_v10 = vld [vmem:[%s24021_s2 + $0x1058] sm:$0xff] }
 0x2d0   :  { %13578 = vmatprep.subr.bf16.mxu0 %v13577_v16  ;;  %v11924_v16 = vld [vmem:[%s24021_s2 + $0x15c0] sm:$0xff]  ;;  %v13417_v4 = vpack.c.bf16 %v11746_v63, %v11744_v62  ;;  %v11945_v22 = vld [vmem:[%s24021_s2 + $0x1668] sm:$0xff]  ;;  %v11766_v62 = vld [vmem:[%s24021_s2 + $0x10d8] sm:$0xff] }
 0x2d1   :  { %v11961_v63 = vld [vmem:[%s24021_s2 + $0x16e8] sm:$0xff] }
 0x2d2   :  { %13384 = vmatpush1.bf16.msra.mxu1 %v13383_v24  ;;  %v11931_v24 = vld [vmem:[%s24021_s2 + $0x15f8] sm:$0xff] }
 0x2d3   :  { %13580 = vmatpush1.bf16.msra.mxu0 %v13579_v25  ;;  %13386 = vmatprep.subr.bf16.mxu1 %v13385_v27  ;;  %v13403_v25 = vpack.c.bf16 %v11729_v15, %v11727_v14  ;;  %v13599_v27 = vpack.c.bf16 %v11926_v18, %v11924_v16  ;;  %v13601_v31 = vpack.c.bf16 %v11931_v24, %v11929_v23  ;;  %v11747_v15 = vld [vmem:[%s24021_s2 + $0x1040] sm:$0xff]  ;;  %v11749_v16 = vld [vmem:[%s24021_s2 + $0x1050] sm:$0xff]  ;;  %v11754_v23 = vld [vmem:[%s24021_s2 + $0x1078] sm:$0xff] }
 0x2d4   :  { %13582 = vmatprep.subr.bf16.mxu0 %v13581_v35  ;;  %v11928_v35 = vld [vmem:[%s24021_s2 + $0x15e0] sm:$0xff]  ;;  %v13421_v14 = vpack.c.bf16 %v11750_v10, %v11748_v9  ;;  %v13423_v24 = vpack.c.bf16 %v11749_v16, %v11747_v15  ;;  %v11770_v9 = vld [vmem:[%s24021_s2 + $0x10f8] sm:$0xff]  ;;  %v11965_v10 = vld [vmem:[%s24021_s2 + $0x1708] sm:$0xff] }
 0x2d5   :  { %v11944_v18 = vld [vmem:[%s24021_s2 + $0x1660] sm:$0xff]  ;;  %v11769_v15 = vld [vmem:[%s24021_s2 + $0x10f0] sm:$0xff] }
 0x2d6   :  { %13388 = vmatpush1.bf16.msra.mxu1 %v13387_v37  ;;  %v11935_v37 = vld [vmem:[%s24021_s2 + $0x1618] sm:$0xff]  ;;  %v11964_v16 = vld [vmem:[%s24021_s2 + $0x1700] sm:$0xff] }
 0x2d7   :  { %13584 = vmatpush1.bf16.msra.mxu0 %v13583_v38  ;;  %13390 = vmatprep.subr.bf16.mxu1 %v13389_v40  ;;  %v13407_v38 = vpack.c.bf16 %v11733_v29, %v11731_v21  ;;  %v13603_v40 = vpack.c.bf16 %v11930_v20, %v11928_v35  ;;  %v13605_v46 = vpack.c.bf16 %v11935_v37, %v11933_v36  ;;  %v11751_v21 = vld [vmem:[%s24021_s2 + $0x1060] sm:$0xff]  ;;  %v11753_v29 = vld [vmem:[%s24021_s2 + $0x1070] sm:$0xff]  ;;  %v11953_v37 = vld [vmem:[%s24021_s2 + $0x16a8] sm:$0xff] }
 0x2d8   :  { %13586 = vmatprep.subr.bf16.mxu0 %v13585_v45  ;;  %v11932_v45 = vld [vmem:[%s24021_s2 + $0x1600] sm:$0xff]  ;;  %v11950_v20 = vld [vmem:[%s24021_s2 + $0x1690] sm:$0xff] }
 0x2d9   :  { %v11948_v35 = vld [vmem:[%s24021_s2 + $0x1680] sm:$0xff] }
 0x2da   :  { %13392 = vmatpush1.bf16.msra.mxu1 %v13391_v52  ;;  %v11939_v52 = vld [vmem:[%s24021_s2 + $0x1638] sm:$0xff] }
 0x2db   :  { %13588 = vmatpush1.bf16.msra.mxu0 %v13587_v34  ;;  %13394 = vmatprep.subr.bf16.mxu1 %v13393_v53  ;;  %v13411_v34 = vpack.c.bf16 %v11737_v44, %v11735_v43  ;;  %v13607_v53 = vpack.c.bf16 %v11934_v48, %v11932_v45  ;;  %v13609_v60 = vpack.c.bf16 %v11939_v52, %v11937_v30  ;;  %v11755_v44 = vld [vmem:[%s24021_s2 + $0x1080] sm:$0xff]  ;;  %v11757_v45 = vld [vmem:[%s24021_s2 + $0x1090] sm:$0xff]  ;;  %v11957_v30 = vld [vmem:[%s24021_s2 + $0x16c8] sm:$0xff] }
 0x2dc   :  { %13590 = vmatprep.subr.bf16.mxu0 %v13589_v58  ;;  %v11936_v58 = vld [vmem:[%s24021_s2 + $0x1620] sm:$0xff]  ;;  %v13429_v43 = vpack.c.bf16 %v11758_v33, %v11756_v32  ;;  %v11954_v48 = vld [vmem:[%s24021_s2 + $0x16b0] sm:$0xff]  ;;  %v13431_v52 = vpack.c.bf16 %v11757_v45, %v11755_v44  ;;  %v11776_v32 = vld [vmem:[%s24021_s2 + $0x1128] sm:$0xff] }
 0x2dd   :  { %v11778_v33 = vld [vmem:[%s24021_s2 + $0x1138] sm:$0xff]  ;;  %v11777_v44 = vld [vmem:[%s24021_s2 + $0x1130] sm:$0xff]  ;;  %v11972_v45 = vld [vmem:[%s24021_s2 + $0x1740] sm:$0xff] }
 0x2de   :  { %13396 = vmatpush1.bf16.msra.mxu1 %v13395_v1  ;;  %v11943_v1 = vld [vmem:[%s24021_s2 + $0x1658] sm:$0xff] }
 0x2df   :  { %13592 = vmatpush1.bf16.msra.mxu0 %v13591_v2  ;;  %13398 = vmatprep.subr.bf16.mxu1 %v13397_v3  ;;  %v13415_v2 = vpack.c.bf16 %v11741_v57, %v11739_v56  ;;  %v13611_v3 = vpack.c.bf16 %v11938_v47, %v11936_v58  ;;  %v13613_v8 = vpack.c.bf16 %v11943_v1, %v11941_v0  ;;  %v11761_v56 = vld [vmem:[%s24021_s2 + $0x10b0] sm:$0xff]  ;;  %v11956_v57 = vld [vmem:[%s24021_s2 + $0x16c0] sm:$0xff]  ;;  %v11764_v47 = vld [vmem:[%s24021_s2 + $0x10c8] sm:$0xff] }
 0x2e0   :  { %13594 = vmatprep.subr.bf16.mxu0 %v13593_v7  ;;  %v11940_v7 = vld [vmem:[%s24021_s2 + $0x1640] sm:$0xff]  ;;  %v11963_v0 = vld [vmem:[%s24021_s2 + $0x16f8] sm:$0xff] }
 0x2e2   :  { %13400 = vmatpush1.bf16.msra.mxu1 %v13399_v11  ;;  %v11947_v11 = vld [vmem:[%s24021_s2 + $0x1678] sm:$0xff] }
 0x2e3   :  { %13596 = vmatpush1.bf16.msra.mxu0 %v13595_v54  ;;  %13402 = vmatprep.subr.bf16.mxu1 %v13401_v12  ;;  %v13419_v54 = vpack.c.bf16 %v11745_v6, %v11743_v5  ;;  %v13615_v12 = vpack.c.bf16 %v11942_v13, %v11940_v7  ;;  %v11765_v5 = vld [vmem:[%s24021_s2 + $0x10d0] sm:$0xff]  ;;  %v11960_v6 = vld [vmem:[%s24021_s2 + $0x16e0] sm:$0xff]  ;;  %v13633_v7 = vpack.c.bf16 %v11963_v0, %v11961_v63  ;;  %v11768_v13 = vld [vmem:[%s24021_s2 + $0x10e8] sm:$0xff] }
 0x2e4   :  { %13598 = vmatprep.subr.bf16.mxu0 %v13597_v17  ;;  %v13617_v17 = vpack.c.bf16 %v11947_v11, %v11945_v22  ;;  %v11967_v22 = vld [vmem:[%s24021_s2 + $0x1718] sm:$0xff]  ;;  %v11981_v0 = vld [vmem:[%s24021_s2 + $0x1788] sm:$0xff] }
 0x2e5   :  { %v11786_v63 = vld [vmem:[%s24021_s2 + $0x1178] sm:$0xff] }
 0x2e6   :  { %13404 = vmatpush1.bf16.msra.mxu1 %v13403_v25  ;;  %v11949_v25 = vld [vmem:[%s24021_s2 + $0x1688] sm:$0xff] }
 0x2e7   :  { %13600 = vmatpush1.bf16.msra.mxu0 %v13599_v27  ;;  %13406 = vmatprep.subr.bf16.mxu1 %v13405_v26  ;;  %v11951_v27 = vld [vmem:[%s24021_s2 + $0x1698] sm:$0xff]  ;;  %v13619_v26 = vpack.c.bf16 %v11946_v59, %v11944_v18  ;;  %v11966_v18 = vld [vmem:[%s24021_s2 + $0x1710] sm:$0xff]  ;;  %v11772_v59 = vld [vmem:[%s24021_s2 + $0x1108] sm:$0xff] }
 0x2e8   :  { %13602 = vmatprep.subr.bf16.mxu0 %v13601_v31  ;;  %v13425_v31 = vpack.c.bf16 %v11754_v23, %v11752_v19  ;;  %v13621_v36 = vpack.c.bf16 %v11951_v27, %v11949_v25  ;;  %v11774_v19 = vld [vmem:[%s24021_s2 + $0x1118] sm:$0xff]  ;;  %v11969_v23 = vld [vmem:[%s24021_s2 + $0x1728] sm:$0xff]  ;;  %v13639_v27 = vpack.c.bf16 %v11966_v18, %v11964_v16  ;;  %v11789_v18 = vld [vmem:[%s24021_s2 + $0x1190] sm:$0xff] }
 0x2ea   :  { %13408 = vmatpush1.bf16.msra.mxu1 %v13407_v38  ;;  %v11955_v38 = vld [vmem:[%s24021_s2 + $0x16b8] sm:$0xff] }
 0x2eb   :  { %13604 = vmatpush1.bf16.msra.mxu0 %v13603_v40  ;;  %13410 = vmatprep.subr.bf16.mxu1 %v13409_v41  ;;  %v13427_v40 = vpack.c.bf16 %v11753_v29, %v11751_v21  ;;  %v13623_v41 = vpack.c.bf16 %v11950_v20, %v11948_v35  ;;  %v11771_v21 = vld [vmem:[%s24021_s2 + $0x1100] sm:$0xff]  ;;  %v11773_v29 = vld [vmem:[%s24021_s2 + $0x1110] sm:$0xff] }
 0x2ec   :  { %13606 = vmatprep.subr.bf16.mxu0 %v13605_v46  ;;  %v11952_v46 = vld [vmem:[%s24021_s2 + $0x16a0] sm:$0xff]  ;;  %v11970_v20 = vld [vmem:[%s24021_s2 + $0x1730] sm:$0xff] }
 0x2ed   :  { %v11968_v35 = vld [vmem:[%s24021_s2 + $0x1720] sm:$0xff] }
 0x2ee   :  { %13412 = vmatpush1.bf16.msra.mxu1 %v13411_v34  ;;  %v13627_v34 = vpack.c.bf16 %v11954_v48, %v11952_v46  ;;  %v11780_v48 = vld [vmem:[%s24021_s2 + $0x1148] sm:$0xff] }
 0x2ef   :  { %13608 = vmatpush1.bf16.msra.mxu0 %v13607_v53  ;;  %13414 = vmatprep.subr.bf16.mxu1 %v13413_v55  ;;  %v13433_v53 = vpack.c.bf16 %v11762_v51, %v11760_v50  ;;  %v11759_v55 = vld [vmem:[%s24021_s2 + $0x10a0] sm:$0xff]  ;;  %v11782_v50 = vld [vmem:[%s24021_s2 + $0x1158] sm:$0xff]  ;;  %v11977_v51 = vld [vmem:[%s24021_s2 + $0x1768] sm:$0xff] }
 0x2f0   :  { %13610 = vmatprep.subr.bf16.mxu0 %v13609_v60  ;;  %v11958_v60 = vld [vmem:[%s24021_s2 + $0x16d0] sm:$0xff]  ;;  %v13435_v1 = vpack.c.bf16 %v11761_v56, %v11759_v55  ;;  %v11779_v55 = vld [vmem:[%s24021_s2 + $0x1140] sm:$0xff] }
 0x2f1   :  { %v11781_v56 = vld [vmem:[%s24021_s2 + $0x1150] sm:$0xff] }
 0x2f2   :  { %13416 = vmatpush1.bf16.msra.mxu1 %v13415_v2  ;;  %v13631_v2 = vpack.c.bf16 %v11958_v60, %v11956_v57  ;;  %v11976_v57 = vld [vmem:[%s24021_s2 + $0x1760] sm:$0xff] }
 0x2f3   :  { %13612 = vmatpush1.bf16.msra.mxu0 %v13611_v3  ;;  %13418 = vmatprep.subr.bf16.mxu1 %v13417_v4  ;;  %v13437_v3 = vpack.c.bf16 %v11766_v62, %v11764_v47  ;;  %v11763_v4 = vld [vmem:[%s24021_s2 + $0x10c0] sm:$0xff]  ;;  %v11978_v47 = vld [vmem:[%s24021_s2 + $0x1770] sm:$0xff]  ;;  %v11784_v62 = vld [vmem:[%s24021_s2 + $0x1168] sm:$0xff] }
 0x2f4   :  { %13614 = vmatprep.subr.bf16.mxu0 %v13613_v8  ;;  %v11962_v8 = vld [vmem:[%s24021_s2 + $0x16f0] sm:$0xff]  ;;  %v13439_v11 = vpack.c.bf16 %v11765_v5, %v11763_v4  ;;  %v13457_v4 = vpack.c.bf16 %v11786_v63, %v11784_v62  ;;  %v11783_v5 = vld [vmem:[%s24021_s2 + $0x1160] sm:$0xff] }
 0x2f6   :  { %13420 = vmatpush1.bf16.msra.mxu1 %v13419_v54  ;;  %v13635_v54 = vpack.c.bf16 %v11962_v8, %v11960_v6  ;;  %v11785_v6 = vld [vmem:[%s24021_s2 + $0x1170] sm:$0xff] }
 0x2f7   :  { %13616 = vmatpush1.bf16.msra.mxu0 %v13615_v12  ;;  %13422 = vmatprep.subr.bf16.mxu1 %v13421_v14  ;;  %v13441_v12 = vpack.c.bf16 %v11770_v9, %v11768_v13  ;;  %v11767_v14 = vld [vmem:[%s24021_s2 + $0x10e0] sm:$0xff]  ;;  %v11982_v9 = vld [vmem:[%s24021_s2 + $0x1790] sm:$0xff] }
 0x2f8   :  { %13618 = vmatprep.subr.bf16.mxu0 %v13617_v17  ;;  %v13637_v17 = vpack.c.bf16 %v11967_v22, %v11965_v10  ;;  %v13443_v25 = vpack.c.bf16 %v11769_v15, %v11767_v14  ;;  %v11788_v10 = vld [vmem:[%s24021_s2 + $0x1188] sm:$0xff]  ;;  %v11790_v22 = vld [vmem:[%s24021_s2 + $0x1198] sm:$0xff]  ;;  %v13459_v14 = vpack.c.bf16 %v11785_v6, %v11783_v5 }
 0x2f9   :  { %4206 = vmatmul.mubr.f32.vlgmr.msra.gmra.mrb[22].mxu1 %v16713_v28  ;;  %v13461_v16 = vpack.c.bf16 %v11790_v22, %v11788_v10  ;;  %v11804_v5 = vld [vmem:[%s24021_s2 + $0x1208] sm:$0xff]  ;;  %v11806_v6 = vld [vmem:[%s24021_s2 + $0x1218] sm:$0xff] }
 0x2fa   :  { %4687 = vmatmul.mubr.f32.vlgmr.msra.gmra.mrb[10].mxu0 %v16713_v28  ;;  %13424 = vmatpush1.bf16.msra.mxu1 %v13423_v24  ;;  %v13625_v28 = vpack.c.bf16 %v11955_v38, %v11953_v37  ;;  %v11971_v24 = vld [vmem:[%s24021_s2 + $0x1738] sm:$0xff]  ;;  %v13447_v38 = vpack.c.bf16 %v11773_v29, %v11771_v21 }
 0x2fb   :  { %4276 = vmatprep.mubr.f32.mxu1 %v17880_v49  ;;  %13620 = vmatpush1.bf16.msra.mxu0 %v13619_v26  ;;  %v13445_v26 = vpack.c.bf16 %v11774_v19, %v11772_v59  ;;  %v11975_v37 = vld [vmem:[%s24021_s2 + $0x1758] sm:$0xff]  ;;  %v11984_v59 = vld [vmem:[%s24021_s2 + $0x17a0] sm:$0xff] }
 0x2fc   :  { %4757 = vmatprep.mubr.f32.mxu0 %v17880_v49  ;;  %13426 = vmatprep.subr.bf16.mxu1 %v13425_v31  ;;  %v11959_v49 = vld [vmem:[%s24021_s2 + $0x16d8] sm:$0xff]  ;;  %v13641_v31 = vpack.c.bf16 %v11971_v24, %v11969_v23  ;;  %v11986_v23 = vld [vmem:[%s24021_s2 + $0x17b0] sm:$0xff]  ;;  %v11792_v24 = vld [vmem:[%s24021_s2 + $0x11a8] sm:$0xff] }
 0x2fd   :  { %13622 = vmatprep.subr.bf16.mxu0 %v13621_v36  ;;  %v13629_v58 = vpack.c.bf16 %v11959_v49, %v11957_v30  ;;  %v11973_v36 = vld [vmem:[%s24021_s2 + $0x1748] sm:$0xff]  ;;  %v11979_v30 = vld [vmem:[%s24021_s2 + $0x1778] sm:$0xff]  ;;  %v18937_v49 = vpop.permute.xlu1 %5424 }
 0x2fe   :  { %13428 = vmatpush1.bf16.msra.mxu1 %v13427_v40  ;;  %v13643_v40 = vpack.c.bf16 %v11970_v20, %v11968_v35  ;;  %v13645_v46 = vpack.c.bf16 %v11975_v37, %v11973_v36  ;;  %24248 = vst [vmem:[#allocation5_spill] sm:$0xff] %v18937_v49  ;;  %v13649_v60 = vpack.c.bf16 %v11979_v30, %v11977_v51  ;;  %v11791_v20 = vld [vmem:[%s24021_s2 + $0x11a0] sm:$0xff] }
 0x2ff   :  { %13624 = vmatpush1.bf16.msra.mxu0 %v13623_v41  ;;  %13430 = vmatprep.subr.bf16.mxu1 %v13429_v43  ;;  %v13449_v41 = vpack.c.bf16 %v11778_v33, %v11776_v32  ;;  %v11775_v43 = vld [vmem:[%s24021_s2 + $0x1120] sm:$0xff]  ;;  %v13659_v35 = vpack.c.bf16 %v11986_v23, %v11984_v59  ;;  %v11793_v32 = vld [vmem:[%s24021_s2 + $0x11b0] sm:$0xff]  ;;  %v11808_v59 = vld [vmem:[%s24021_s2 + $0x1228] sm:$0xff] }
 0x300   :  { %13626 = vmatprep.subr.bf16.mxu0 %v13625_v28  ;;  %v11974_v28 = vld [vmem:[%s24021_s2 + $0x1750] sm:$0xff]  ;;  %v11988_v33 = vld [vmem:[%s24021_s2 + $0x17c0] sm:$0xff]  ;;  %v12005_v23 = vld [vmem:[%s24021_s2 + $0x1848] sm:$0xff] }
 0x301   :  { %v18974_v8 = vpop.permute.xlu1 %5428  ;;  %v11992_v51 = vld [vmem:[%s24021_s2 + $0x17e0] sm:$0xff] }
 0x302   :  { %13432 = vmatpush1.bf16.msra.mxu1 %v13431_v52  ;;  %v13451_v52 = vpack.c.bf16 %v11777_v44, %v11775_v43  ;;  %24250 = vst [vmem:[#allocation7_spill] sm:$0xff] %v18974_v8  ;;  %v11993_v43 = vld [vmem:[%s24021_s2 + $0x17e8] sm:$0xff]  ;;  %v11995_v44 = vld [vmem:[%s24021_s2 + $0x17f8] sm:$0xff] }
 0x303   :  { %13628 = vmatpush1.bf16.msra.mxu0 %v13627_v34  ;;  %13434 = vmatprep.subr.bf16.mxu1 %v13433_v53  ;;  %v13647_v34 = vpack.c.bf16 %v11974_v28, %v11972_v45  ;;  %v13453_v53 = vpack.c.bf16 %v11782_v50, %v11780_v48  ;;  %v13467_v45 = vpack.c.bf16 %v11793_v32, %v11791_v20  ;;  %v11795_v48 = vld [vmem:[%s24021_s2 + $0x11c0] sm:$0xff]  ;;  %v11797_v50 = vld [vmem:[%s24021_s2 + $0x11d0] sm:$0xff] }
 0x304   :  { %13630 = vmatprep.subr.bf16.mxu0 %v13629_v58  ;;  %v18948_v58 = vpop.permute.xlu0 %5040 }
 0x305   :  { %24249 = vst [vmem:[#allocation6_spill] sm:$0xff] %v18948_v58  ;;  %v19017_v21 = vpop.permute.xlu1 %5432 }
 0x306   :  { %13436 = vmatpush1.bf16.msra.mxu1 %v13435_v1  ;;  %v11983_v1 = vld [vmem:[%s24021_s2 + $0x1798] sm:$0xff]  ;;  %24252 = vst [vmem:[#allocation9_spill] sm:$0xff] %v19017_v21 }
 0x307   :  { %13632 = vmatpush1.bf16.msra.mxu0 %v13631_v2  ;;  %13438 = vmatprep.subr.bf16.mxu1 %v13437_v3  ;;  %v13455_v2 = vpack.c.bf16 %v11781_v56, %v11779_v55  ;;  %v13651_v3 = vpack.c.bf16 %v11978_v47, %v11976_v57  ;;  %v13653_v13 = vpack.c.bf16 %v11983_v1, %v11981_v0  ;;  %v11802_v55 = vld [vmem:[%s24021_s2 + $0x11f8] sm:$0xff]  ;;  %v11997_v56 = vld [vmem:[%s24021_s2 + $0x1808] sm:$0xff]  ;;  %v11799_v0 = vld [vmem:[%s24021_s2 + $0x11e0] sm:$0xff] }
 0x308   :  { %13634 = vmatprep.subr.bf16.mxu0 %v13633_v7  ;;  %v11980_v7 = vld [vmem:[%s24021_s2 + $0x1780] sm:$0xff]  ;;  %v11999_v57 = vld [vmem:[%s24021_s2 + $0x1818] sm:$0xff]  ;;  %v13471_v47 = vpack.c.bf16 %v11797_v50, %v11795_v48  ;;  %v11801_v1 = vld [vmem:[%s24021_s2 + $0x11f0] sm:$0xff] }
 0x309   :  { %v13655_v15 = vpack.c.bf16 %v11982_v9, %v11980_v7  ;;  %v19054_v30 = vpop.permute.xlu1 %5436  ;;  %v12001_v7 = vld [vmem:[%s24021_s2 + $0x1828] sm:$0xff]  ;;  %v13475_v10 = vpack.c.bf16 %v11801_v1, %v11799_v0  ;;  %v11813_v48 = vld [vmem:[%s24021_s2 + $0x1250] sm:$0xff] }
 0x30a   :  { %13440 = vmatpush1.bf16.msra.mxu1 %v13439_v11  ;;  %v11985_v11 = vld [vmem:[%s24021_s2 + $0x17a8] sm:$0xff]  ;;  %24254 = vst [vmem:[#allocation11_spill] sm:$0xff] %v19054_v30 }
 0x30b   :  { %13636 = vmatpush1.bf16.msra.mxu0 %v13635_v54  ;;  %13442 = vmatprep.subr.bf16.mxu1 %v13441_v12  ;;  %v11987_v54 = vld [vmem:[%s24021_s2 + $0x17b8] sm:$0xff]  ;;  %v18991_v12 = vpop.permute.xlu0 %5044 }
 0x30c   :  { %13638 = vmatprep.subr.bf16.mxu0 %v13637_v17  ;;  %24251 = vst [vmem:[#allocation8_spill] sm:$0xff] %v18991_v12  ;;  %v11787_v17 = vld [vmem:[%s24021_s2 + $0x1180] sm:$0xff]  ;;  %v13657_v19 = vpack.c.bf16 %v11987_v54, %v11985_v11  ;;  %v13477_v11 = vpack.c.bf16 %v11806_v6, %v11804_v5 }
 0x30d   :  { %v13463_v29 = vpack.c.bf16 %v11789_v18, %v11787_v17  ;;  %v19097_v9 = vpop.permute.xlu1 %5876  ;;  %v11803_v54 = vld [vmem:[%s24021_s2 + $0x1200] sm:$0xff]  ;;  %v12002_v18 = vld [vmem:[%s24021_s2 + $0x1830] sm:$0xff] }
 0x30e   :  { %13444 = vmatpush1.bf16.msra.mxu1 %v13443_v25  ;;  %v11794_v25 = vld [vmem:[%s24021_s2 + $0x11b8] sm:$0xff]  ;;  %24256 = vst [vmem:[#allocation13_spill] sm:$0xff] %v19097_v9 }
 0x30f   :  { %13640 = vmatpush1.bf16.msra.mxu0 %v13639_v27  ;;  %13446 = vmatprep.subr.bf16.mxu1 %v13445_v26  ;;  %v11989_v27 = vld [vmem:[%s24021_s2 + $0x17c8] sm:$0xff]  ;;  %v11991_v26 = vld [vmem:[%s24021_s2 + $0x17d8] sm:$0xff]  ;;  %v19028_v36 = vpop.permute.xlu0 %5048 }
 0x310   :  { %13642 = vmatprep.subr.bf16.mxu0 %v13641_v31  ;;  %v13465_v31 = vpack.c.bf16 %v11794_v25, %v11792_v24  ;;  %24253 = vst [vmem:[#allocation10_spill] sm:$0xff] %v19028_v36  ;;  %v13661_v37 = vpack.c.bf16 %v11991_v26, %v11989_v27  ;;  %v12007_v24 = vld [vmem:[%s24021_s2 + $0x1858] sm:$0xff] }
 0x311   :  { %v19134_v20 = vpop.permute.xlu1 %5440  ;;  %v13677_v32 = vpack.c.bf16 %v12007_v24, %v12005_v23 }
 0x312   :  { %13448 = vmatpush1.bf16.msra.mxu1 %v13447_v38  ;;  %v11990_v38 = vld [vmem:[%s24021_s2 + $0x17d0] sm:$0xff]  ;;  %24258 = vst [vmem:[#allocation15_spill] sm:$0xff] %v19134_v20 }
 0x313   :  { %13644 = vmatpush1.bf16.msra.mxu0 %v13643_v40  ;;  %13450 = vmatprep.subr.bf16.mxu1 %v13449_v41  ;;  %v11796_v40 = vld [vmem:[%s24021_s2 + $0x11c8] sm:$0xff]  ;;  %v11798_v41 = vld [vmem:[%s24021_s2 + $0x11d8] sm:$0xff] }
 0x314   :  { %13646 = vmatprep.subr.bf16.mxu0 %v13645_v46  ;;  %v13663_v46 = vpack.c.bf16 %v11990_v38, %v11988_v33  ;;  %v13469_v28 = vpack.c.bf16 %v11798_v41, %v11796_v40  ;;  %v12006_v33 = vld [vmem:[%s24021_s2 + $0x1850] sm:$0xff]  ;;  %v11814_v38 = vld [vmem:[%s24021_s2 + $0x1258] sm:$0xff]  ;;  %v12009_v40 = vld [vmem:[%s24021_s2 + $0x1868] sm:$0xff] }
 0x315   :  { %v12011_v41 = vld [vmem:[%s24021_s2 + $0x1878] sm:$0xff] }
 0x316   :  { %13452 = vmatpush1.bf16.msra.mxu1 %v13451_v52  ;;  %v13665_v52 = vpack.c.bf16 %v11995_v44, %v11993_v43  ;;  %v13681_v50 = vpack.c.bf16 %v12011_v41, %v12009_v40 }
 0x317   :  { %13648 = vmatpush1.bf16.msra.mxu0 %v13647_v34  ;;  %13454 = vmatprep.subr.bf16.mxu1 %v13453_v53  ;;  %v11994_v34 = vld [vmem:[%s24021_s2 + $0x17f0] sm:$0xff]  ;;  %v11800_v53 = vld [vmem:[%s24021_s2 + $0x11e8] sm:$0xff] }
 0x318   :  { %13650 = vmatprep.subr.bf16.mxu0 %v13649_v60  ;;  %v19071_v60 = vpop.permute.xlu0 %5052  ;;  %v13667_v62 = vpack.c.bf16 %v11994_v34, %v11992_v51  ;;  %v13473_v63 = vpack.c.bf16 %v11802_v55, %v11800_v53  ;;  %v12008_v51 = vld [vmem:[%s24021_s2 + $0x1860] sm:$0xff]  ;;  %v19165_v34 = vpop.permute.xlu1 %5060 }
 0x319   :  { %24255 = vst [vmem:[#allocation12_spill] sm:$0xff] %v19071_v60  ;;  %24260 = vst [vmem:[#allocation17_spill] sm:$0xff] %v19165_v34 }
 0x31a   :  { %13456 = vmatpush1.bf16.msra.mxu1 %v13455_v2  ;;  %v11996_v2 = vld [vmem:[%s24021_s2 + $0x1800] sm:$0xff] }
 0x31b   :  { %13652 = vmatpush1.bf16.msra.mxu0 %v13651_v3  ;;  %13458 = vmatprep.subr.bf16.mxu1 %v13457_v4  ;;  %v13669_v3 = vpack.c.bf16 %v11999_v57, %v11997_v56  ;;  %v11998_v4 = vld [vmem:[%s24021_s2 + $0x1810] sm:$0xff] }
 0x31c   :  { %13654 = vmatprep.subr.bf16.mxu0 %v13653_v13  ;;  %v12003_v13 = vld [vmem:[%s24021_s2 + $0x1838] sm:$0xff]  ;;  %v13671_v22 = vpack.c.bf16 %v11998_v4, %v11996_v2  ;;  %v19172_v57 = vpop.permute.xlu1 %5884 }
 0x31d   :  { %v13673_v17 = vpack.c.bf16 %v12003_v13, %v12001_v7  ;;  %24262 = vst [vmem:[#allocation19_spill] sm:$0xff] %v19172_v57 }
 0x31e   :  { %13460 = vmatpush1.bf16.msra.mxu1 %v13459_v14  ;;  %v11805_v14 = vld [vmem:[%s24021_s2 + $0x1210] sm:$0xff] }
 0x31f   :  { %13656 = vmatpush1.bf16.msra.mxu0 %v13655_v15  ;;  %13462 = vmatprep.subr.bf16.mxu1 %v13461_v16  ;;  %v12000_v15 = vld [vmem:[%s24021_s2 + $0x1820] sm:$0xff]  ;;  %v19108_v16 = vpop.permute.xlu0 %5872  ;;  %v13479_v25 = vpack.c.bf16 %v11805_v14, %v11803_v54 }
 0x320   :  { %13658 = vmatprep.subr.bf16.mxu0 %v13657_v19  ;;  %24257 = vst [vmem:[#allocation14_spill] sm:$0xff] %v19108_v16  ;;  %v11810_v19 = vld [vmem:[%s24021_s2 + $0x1238] sm:$0xff]  ;;  %v13675_v27 = vpack.c.bf16 %v12002_v18, %v12000_v15 }
 0x321   :  { %v13481_v26 = vpack.c.bf16 %v11810_v19, %v11808_v59 }
 0x322   :  { %13464 = vmatpush1.bf16.msra.mxu1 %v13463_v29  ;;  %v11807_v29 = vld [vmem:[%s24021_s2 + $0x1220] sm:$0xff] }
 0x323   :  { %13660 = vmatpush1.bf16.msra.mxu0 %v13659_v35  ;;  %13466 = vmatprep.subr.bf16.mxu1 %v13465_v31  ;;  %v11809_v35 = vld [vmem:[%s24021_s2 + $0x1230] sm:$0xff]  ;;  %v12004_v31 = vld [vmem:[%s24021_s2 + $0x1840] sm:$0xff]  ;;  %v19151_v43 = vpop.permute.xlu0 %5056 }
 0x324   :  { %13662 = vmatprep.subr.bf16.mxu0 %v13661_v37  ;;  %v11812_v37 = vld [vmem:[%s24021_s2 + $0x1248] sm:$0xff]  ;;  %24259 = vst [vmem:[#allocation16_spill] sm:$0xff] %v19151_v43  ;;  %v13483_v44 = vpack.c.bf16 %v11809_v35, %v11807_v29 }
 0x326   :  { %13468 = vmatpush1.bf16.msra.mxu1 %v13467_v45  ;;  %v13679_v45 = vpack.c.bf16 %v12006_v33, %v12004_v31 }
 0x327   :  { %13664 = vmatpush1.bf16.msra.mxu0 %v13663_v46  ;;  %13470 = vmatprep.subr.bf16.mxu1 %v13469_v28  ;;  %v13485_v46 = vpack.c.bf16 %v11814_v38, %v11812_v37  ;;  %v11811_v28 = vld [vmem:[%s24021_s2 + $0x1240] sm:$0xff]  ;;  %v19167_v56 = vpop.permute.xlu0 %5880 }
 0x328   :  { %13666 = vmatprep.subr.bf16.mxu0 %v13665_v52  ;;  %v12010_v52 = vld [vmem:[%s24021_s2 + $0x1870] sm:$0xff]  ;;  %v13487_v53 = vpack.c.bf16 %v11813_v48, %v11811_v28  ;;  %24261 = vst [vmem:[#allocation18_spill] sm:$0xff] %v19167_v56 }
 0x329   :  { %v13683_v55 = vpack.c.bf16 %v12010_v52, %v12008_v51 }
 0x32a   :  { %13472 = vmatpush1.bf16.msra.mxu1 %v13471_v47 }
 0x32b   :  { %13668 = vmatpush1.bf16.msra.mxu0 %v13667_v62  ;;  %13474 = vmatprep.subr.bf16.mxu1 %v13473_v63  ;;  %v19175_v47 = vpop.permute.xlu0 %5444  ;;  %v19179_v62 = vpop.permute.xlu1 %5448 }
 0x32c   :  { %13670 = vmatprep.subr.bf16.mxu0 %v13669_v3  ;;  %24263 = vst [vmem:[#allocation20_spill] sm:$0xff] %v19175_v47  ;;  %24264 = vst [vmem:[#allocation21_spill] sm:$0xff] %v19179_v62 }
 0x32e   :  { %13476 = vmatpush1.bf16.msra.mxu1 %v13475_v10 }
 0x32f   :  { %13672 = vmatpush1.bf16.msra.mxu0 %v13671_v22  ;;  %13478 = vmatprep.subr.bf16.mxu1 %v13477_v11  ;;  %v19183_v63 = vpop.permute.xlu0 %5064 }
 0x330   :  { %13674 = vmatprep.subr.bf16.mxu0 %v13673_v17  ;;  %24265 = vst [vmem:[#allocation22_spill] sm:$0xff] %v19183_v63 }
 0x332   :  { %13480 = vmatpush1.bf16.msra.mxu1 %v13479_v25 }
 0x333   :  { %13676 = vmatpush1.bf16.msra.mxu0 %v13675_v27  ;;  %13482 = vmatprep.subr.bf16.mxu1 %v13481_v26  ;;  %v19187_v0 = vpop.permute.xlu0 %5888 }
 0x334   :  { %13678 = vmatprep.subr.bf16.mxu0 %v13677_v32  ;;  %24267 = vst [vmem:[#allocation24_spill] sm:$0xff] %v19187_v0 }
 0x336   :  { %13484 = vmatpush1.bf16.msra.mxu1 %v13483_v44 }
 0x337   :  { %13680 = vmatpush1.bf16.msra.mxu0 %v13679_v45  ;;  %13486 = vmatprep.subr.bf16.mxu1 %v13485_v46  ;;  %v19207_v10 = vpop.permute.xlu0 %5452 }
 0x338   :  { %13682 = vmatprep.subr.bf16.mxu0 %v13681_v50  ;;  %24269 = vst [vmem:[#allocation26_spill] sm:$0xff] %v19207_v10 }
 0x339   :  { %4277 = vmatmul.mubr.f32.vlgmr.msra.gmra.mrb[22].mxu1 %v17878_v61 }
 0x33a   :  { %4758 = vmatmul.mubr.f32.vlgmr.msra.gmra.mrb[10].mxu0 %v17878_v61  ;;  %13488 = vmatpush1.bf16.msra.mxu1 %v13487_v53  ;;  %v19185_v61 = vpop.permute.xlu1 %5068 }
 0x33b   :  { %13684 = vmatpush1.bf16.msra.mxu0 %v13683_v55  ;;  %4347 = vmatprep.mubr.f32.mxu1 %v24037_v39  ;;  %24266 = vst [vmem:[#allocation23_spill] sm:$0xff] %v19185_v61  ;;  %v19211_v11 = vpop.permute.xlu0 %5072 }
 0x33c   :  { %4828 = vmatprep.mubr.f32.mxu0 %v24037_v39  ;;  %24271 = vst [vmem:[#allocation28_spill] sm:$0xff] %v19211_v11 }
 0x33f   :  { %v19215_v14 = vpop.permute.xlu0 %5896 }
 0x340   :  { %24273 = vst [vmem:[#allocation30_spill] sm:$0xff] %v19215_v14 }
 0x341   :  { %11815 = vmatmul.mubr.msk.f32.vlgmr.msra.gmra.mrb[22].mxu1 %vm2253_vm0, %v17431_v42 }
 0x342   :  { %12012 = vmatmul.mubr.msk.f32.vlgmr.msra.gmra.mrb[10].mxu0 %vm2253_vm0, %v17431_v42  ;;  %v19201_v42 = vpop.permute.xlu1 %5892 }
 0x343   :  { %24268 = vst [vmem:[#allocation25_spill] sm:$0xff] %v19201_v42  ;;  %v19219_v17 = vpop.permute.xlu0 %5460 }
 0x344   :  { %24275 = vst [vmem:[#allocation32_spill] sm:$0xff] %v19219_v17 }
 0x346   :  { %v19209_v22 = vpop.permute.xlu1 %5456 }
 0x347   :  { %24270 = vst [vmem:[#allocation27_spill] sm:$0xff] %v19209_v22  ;;  %v19223_v59 = vpop.permute.xlu0 %5080 }
 0x348   :  { %24277 = vst [vmem:[#allocation34_spill] sm:$0xff] %v19223_v59 }
 0x34a   :  { %v19213_v54 = vpop.permute.xlu1 %5076 }
 0x34b   :  { %24272 = vst [vmem:[#allocation29_spill] sm:$0xff] %v19213_v54  ;;  %v19227_v23 = vpop.permute.xlu0 %5904 }
 0x34c   :  { %v19189_v1 = vpop.f32.mrb[20].mxu1  ;;  %v19191_v2 = vpop.f32.mrb[8].mxu0  ;;  %24279 = vst [vmem:[#allocation36_spill] sm:$0xff] %v19227_v23 }
 0x34d   :  { %v19197_v5 = vpop.f32.mrb[21].mxu1  ;;  %v19199_v6 = vpop.f32.mrb[9].mxu0 }
 0x34e   :  { %v19217_v15 = vpop.permute.xlu1 %5900 }
 0x34f   :  { %24274 = vst [vmem:[#allocation31_spill] sm:$0xff] %v19217_v15  ;;  %v19231_v25 = vpop.permute.xlu0 %5468 }
 0x350   :  { %24281 = vst [vmem:[#allocation38_spill] sm:$0xff] %v19231_v25 }
 0x352   :  { %v19221_v18 = vpop.permute.xlu1 %5464 }
 0x353   :  { %24276 = vst [vmem:[#allocation33_spill] sm:$0xff] %v19221_v18  ;;  %v19235_v26 = vpop.permute.xlu0 %5088 }
 0x354   :  { %24283 = vst [vmem:[#allocation40_spill] sm:$0xff] %v19235_v26 }
 0x356   :  { %v19225_v19 = vpop.permute.xlu1 %5084 }
 0x357   :  { %24278 = vst [vmem:[#allocation35_spill] sm:$0xff] %v19225_v19  ;;  %v19239_v35 = vpop.permute.xlu0 %5912 }
 0x358   :  { %24285 = vst [vmem:[#allocation42_spill] sm:$0xff] %v19239_v35 }
 0x35a   :  { %v19229_v24 = vpop.permute.xlu1 %5908 }
 0x35b   :  { %24280 = vst [vmem:[#allocation37_spill] sm:$0xff] %v19229_v24  ;;  %v19243_v32 = vpop.permute.xlu0 %5476 }
 0x35c   :  { %24287 = vst [vmem:[#allocation44_spill] sm:$0xff] %v19243_v32 }
 0x35e   :  { %v19233_v27 = vpop.permute.xlu1 %5472 }
 0x35f   :  { %24282 = vst [vmem:[#allocation39_spill] sm:$0xff] %v19233_v27  ;;  %v19247_v37 = vpop.permute.xlu0 %5096 }
 0x360   :  { %24289 = vst [vmem:[#allocation46_spill] sm:$0xff] %v19247_v37 }
 0x362   :  { %v19237_v29 = vpop.permute.xlu1 %5092 }
 0x363   :  { %24284 = vst [vmem:[#allocation41_spill] sm:$0xff] %v19237_v29  ;;  %v19251_v40 = vpop.permute.xlu0 %5920 }
 0x364   :  { %24291 = vst [vmem:[#allocation48_spill] sm:$0xff] %v19251_v40 }
 0x366   :  { %v19241_v31 = vpop.permute.xlu1 %5916 }
 0x367   :  { %24286 = vst [vmem:[#allocation43_spill] sm:$0xff] %v19241_v31  ;;  %v19255_v44 = vpop.permute.xlu0 %5484 }
 0x368   :  { %24293 = vst [vmem:[#allocation50_spill] sm:$0xff] %v19255_v44 }
 0x36a   :  { %v19245_v33 = vpop.permute.xlu1 %5480 }
 0x36b   :  { %24288 = vst [vmem:[#allocation45_spill] sm:$0xff] %v19245_v33  ;;  %v19259_v46 = vpop.permute.xlu0 %5104 }
 0x36c   :  { %24295 = vst [vmem:[#allocation52_spill] sm:$0xff] %v19259_v46 }
 0x36e   :  { %v19249_v38 = vpop.permute.xlu1 %5100 }
 0x36f   :  { %24290 = vst [vmem:[#allocation47_spill] sm:$0xff] %v19249_v38  ;;  %v19263_v48 = vpop.permute.xlu0 %5928 }
 0x370   :  { %24297 = vst [vmem:[#allocation54_spill] sm:$0xff] %v19263_v48 }
 0x372   :  { %v19253_v41 = vpop.permute.xlu1 %5924 }
 0x373   :  { %24292 = vst [vmem:[#allocation49_spill] sm:$0xff] %v19253_v41  ;;  %v19267_v51 = vpop.permute.xlu0 %5492 }
 0x374   :  { %24299 = vst [vmem:[#allocation56_spill] sm:$0xff] %v19267_v51 }
 0x376   :  { %v19257_v45 = vpop.permute.xlu1 %5488 }
 0x377   :  { %24294 = vst [vmem:[#allocation51_spill] sm:$0xff] %v19257_v45  ;;  %v19271_v53 = vpop.permute.xlu0 %5112  ;;  %v24337_v45 = vmin.f32 %v19189_v1, %v19191_v2 }
 0x378   :  { %24301 = vst [vmem:[#allocation58_spill] sm:$0xff] %v19271_v53 }
 0x37a   :  { %v19261_v28 = vpop.permute.xlu1 %5108 }
 0x37b   :  { %24296 = vst [vmem:[#allocation53_spill] sm:$0xff] %v19261_v28  ;;  %v19275_v39 = vpop.permute.xlu0 %5936 }
 0x37c   :  { %24303 = vst [vmem:[#allocation60_spill] sm:$0xff] %v19275_v39 }
 0x37e   :  { %v19265_v50 = vpop.permute.xlu1 %5932 }
 0x37f   :  { %24298 = vst [vmem:[#allocation55_spill] sm:$0xff] %v19265_v50  ;;  %v19279_v7 = vpop.permute.xlu0 %5500 }
 0x380   :  { %24305 = vst [vmem:[#allocation62_spill] sm:$0xff] %v19279_v7 }
 0x382   :  { %v19269_v52 = vpop.permute.xlu1 %5496 }
 0x383   :  { %24300 = vst [vmem:[#allocation57_spill] sm:$0xff] %v19269_v52  ;;  %v19283_v3 = vpop.permute.xlu0 %5120 }
 0x384   :  { %24307 = vst [vmem:[#allocation64_spill] sm:$0xff] %v19283_v3 }
 0x386   :  { %v19273_v55 = vpop.permute.xlu1 %5116 }
 0x387   :  { %24302 = vst [vmem:[#allocation59_spill] sm:$0xff] %v19273_v55  ;;  %v19287_v50 = vpop.permute.xlu0 %5944 }
 0x388   :  { %24309 = vst [vmem:[#allocation66_spill] sm:$0xff] %v19287_v50 }
 0x38a   :  { %v19277_v13 = vpop.permute.xlu1 %5940 }
 0x38b   :  { %24304 = vst [vmem:[#allocation61_spill] sm:$0xff] %v19277_v13  ;;  %v19291_v31 = vpop.permute.xlu0 %5508 }
 0x38c   :  { %24311 = vst [vmem:[#allocation68_spill] sm:$0xff] %v19291_v31 }
 0x38e   :  { %v19281_v4 = vpop.permute.xlu1 %5504 }
 0x38f   :  { %24306 = vst [vmem:[#allocation63_spill] sm:$0xff] %v19281_v4  ;;  %v19295_v24 = vpop.permute.xlu0 %5128 }
 0x390   :  { %24313 = vst [vmem:[#allocation70_spill] sm:$0xff] %v19295_v24 }
 0x392   :  { %v19285_v48 = vpop.permute.xlu1 %5124 }
 0x393   :  { %24308 = vst [vmem:[#allocation65_spill] sm:$0xff] %v19285_v48  ;;  %v19299_v13 = vpop.permute.xlu0 %5952 }
 0x394   :  { %24315 = vst [vmem:[#allocation72_spill] sm:$0xff] %v19299_v13 }
 0x396   :  { %v19289_v40 = vpop.permute.xlu1 %5948 }
 0x397   :  { %24310 = vst [vmem:[#allocation67_spill] sm:$0xff] %v19289_v40  ;;  %v19303_v15 = vpop.permute.xlu0 %5516 }
 0x398   :  { %24317 = vst [vmem:[#allocation74_spill] sm:$0xff] %v19303_v15 }
 0x39a   :  { %v19293_v35 = vpop.permute.xlu1 %5512 }
 0x39b   :  { %24312 = vst [vmem:[#allocation69_spill] sm:$0xff] %v19293_v35  ;;  %v19307_v42 = vpop.permute.xlu0 %5136 }
 0x39c   :  { %24319 = vst [vmem:[#allocation76_spill] sm:$0xff] %v19307_v42 }
 0x39e   :  { %v19297_v39 = vpop.permute.xlu1 %5132 }
 0x39f   :  { %24314 = vst [vmem:[#allocation71_spill] sm:$0xff] %v19297_v39  ;;  %v19311_v40 = vpop.permute.xlu0 %5960 }
 0x3a0   :  { %24321 = vst [vmem:[#allocation78_spill] sm:$0xff] %v19311_v40 }
 0x3a2   :  { %v19301_v23 = vpop.permute.xlu1 %5956 }
 0x3a3   :  { %24316 = vst [vmem:[#allocation73_spill] sm:$0xff] %v19301_v23  ;;  %v19315_v57 = vpop.permute.xlu0 %5524 }
 0x3a4   :  { %24323 = vst [vmem:[#allocation80_spill] sm:$0xff] %v19315_v57 }
 0x3a6   :  { %v19305_v14 = vpop.permute.xlu1 %5520 }
 0x3a7   :  { %24318 = vst [vmem:[#allocation75_spill] sm:$0xff] %v19305_v14  ;;  %v19319_v9 = vpop.permute.xlu0 %5144 }
 0x3a8   :  { %24325 = vst [vmem:[#allocation82_spill] sm:$0xff] %v19319_v9 }
 0x3aa   :  { %v19309_v50 = vpop.permute.xlu1 %5140 }
 0x3ab   :  { %24320 = vst [vmem:[#allocation77_spill] sm:$0xff] %v19309_v50  ;;  %v19323_v23 = vpop.permute.xlu0 %5968 }
 0x3ac   :  { %24327 = vst [vmem:[#allocation84_spill] sm:$0xff] %v19323_v23 }
 0x3ae   :  { %v19313_v0 = vpop.permute.xlu1 %5964 }
 0x3af   :  { %24322 = vst [vmem:[#allocation79_spill] sm:$0xff] %v19313_v0  ;;  %v19327_v41 = vpop.permute.xlu0 %5532 }
 0x3b0   :  { %24329 = vst [vmem:[#allocation86_spill] sm:$0xff] %v19327_v41 }
 0x3b2   :  { %v19317_v56 = vpop.permute.xlu1 %5528 }
 0x3b3   :  { %24324 = vst [vmem:[#allocation81_spill] sm:$0xff] %v19317_v56  ;;  %v19331_v15 = vpop.permute.xlu0 %5152 }
 0x3b4   :  { %24331 = vst [vmem:[#allocation88_spill] sm:$0xff] %v19331_v15 }
 0x3b6   :  { %v19321_v13 = vpop.permute.xlu1 %5148 }
 0x3b7   :  { %24326 = vst [vmem:[#allocation83_spill] sm:$0xff] %v19321_v13  ;;  %v19335_v0 = vpop.permute.xlu0 %5976 }
 0x3b8   :  { %24333 = vst [vmem:[#allocation90_spill] sm:$0xff] %v19335_v0 }
 0x3ba   :  { %v19325_v16 = vpop.permute.xlu1 %5972 }
 0x3bb   :  { %24328 = vst [vmem:[#allocation85_spill] sm:$0xff] %v19325_v16  ;;  %v19339_v4 = vpop.permute.xlu0 %5540 }
 0x3bc   :  { %24335 = vst [vmem:[#allocation92_spill] sm:$0xff] %v19339_v4 }
 0x3be   :  { %v19329_v14 = vpop.permute.xlu1 %5536 }
 0x3bf   :  { %24330 = vst [vmem:[#allocation87_spill] sm:$0xff] %v19329_v14  ;;  %v24336_v14 = vmax.f32 %v19189_v1, %v19191_v2 }
 0x3c2   :  { %v19333_v40 = vpop.permute.xlu1 %5156 }
 0x3c3   :  { %24332 = vst [vmem:[#allocation89_spill] sm:$0xff] %v19333_v40 }
 0x3c6   :  { %v19337_v57 = vpop.permute.xlu1 %5980 }
 0x3c7   :  { %24334 = vst [vmem:[#allocation91_spill] sm:$0xff] %v19337_v57  ;;  %v24338_v57 = vmax.f32 %v19197_v5, %v19199_v6 }
 0x414   :  { %v4349_v56 = vpop.f32.mrb[22].mxu1 }
 0x415   :  { %v4830_v35 = vpop.f32.mrb[10].mxu0  ;;  %v4351_v31 = vpop.f32.mrb[23].mxu1 }
 0x416   :  { %v4837_v23 = vmax.f32 %v4349_v56, %v4830_v35  ;;  %v4843_v7 = vmin.f32 %v4349_v56, %v4830_v35  ;;  %v4832_v16 = vpop.f32.mrb[11].mxu0  ;;  %v24340_v56 = vmin.f32 %v19197_v5, %v19199_v6 }
 0x417   :  { %v4838_v52 = vmax.f32 %v4351_v31, %v4832_v16  ;;  %v4844_v41 = vmin.f32 %v4351_v31, %v4832_v16  ;;  %v19359_v16 = vpop.permute.xlu1 %5544 }
 0x418   :  { %v4839_v51 = vmax.f32 %v24336_v14, %v4837_v23  ;;  %v19347_v0 = vmin.f32 %v24337_v45, %v4843_v7  ;;  %24342 = vst [vmem:[#allocation95_spill] sm:$0xff] %v19359_v16  ;;  %v19385_v23 = vpop.permute.xlu0 %5160 }
 0x419   :  { %v19352_v44 = vmax.f32 %v24338_v57, %v4838_v52  ;;  %v19357_v35 = vmin.f32 %v24340_v56, %v4844_v41  ;;  %24343 = vst [vmem:[#allocation96_spill] sm:$0xff] %v19385_v23 }
 0x41a   :  { %v19362_v31 = vmul.f32 %v18948_v58, %v4839_v51  ;;  %v19365_v14 = vmul.f32 %v18991_v12, %v4839_v51  ;;  %v19368_v1 = vmul.f32 %v19028_v36, %v4839_v51  ;;  %v19371_v2 = vmul.f32 %v19071_v60, %v4839_v51 }
 0x41b   :  { %24339 = vst [vmem:[#allocation93_spill] sm:$0xff] %v19352_v44  ;;  %24341 = vst [vmem:[#allocation94_spill] sm:$0xff] %v19357_v35  ;;  %v19374_v57 = vmul.f32 %v19151_v43, %v4839_v51  ;;  %v19377_v5 = vmul.f32 %v19165_v34, %v4839_v51  ;;  %v19380_v6 = vmul.f32 %v19183_v63, %v4839_v51 }
 0x41c   :  { %v19383_v7 = vmul.f32 %v19185_v61, %v4839_v51  ;;  %v19388_v41 = vmul.f32 %v19211_v11, %v4839_v51  ;;  %v19391_v45 = vmul.f32 %v19213_v54, %v4839_v51  ;;  %v19394_v52 = vmul.f32 %v19223_v59, %v4839_v51 }
 0x41d   :  { %v19397_v56 = vmul.f32 %v19225_v19, %v4839_v51  ;;  %v19400_v35 = vmul.f32 %v19235_v26, %v4839_v51  ;;  %v19403_v61 = vmul.f32 %v19237_v29, %v4839_v51  ;;  %v19406_v63 = vmul.f32 %v19247_v37, %v4839_v51 }
 0x41e   :  { %v19409_v11 = vmul.f32 %v19249_v38, %v4839_v51  ;;  %v19412_v54 = vmul.f32 %v19259_v46, %v4839_v51  ;;  %v19415_v59 = vmul.f32 %v19261_v28, %v4839_v51  ;;  %v19418_v19 = vmul.f32 %v19271_v53, %v4839_v51  ;;  %v19435_v28 = vpop.permute.xlu1 %5164 }
 0x41f   :  { %v19421_v26 = vmul.f32 %v19273_v55, %v4839_v51  ;;  %v19424_v29 = vmul.f32 %v19283_v3, %v4839_v51  ;;  %v19427_v37 = vmul.f32 %v19285_v48, %v4839_v51  ;;  %v19430_v38 = vmul.f32 %v19295_v24, %v4839_v51  ;;  %24344 = vst [vmem:[#allocation97_spill] sm:$0xff] %v19435_v28 }
 0x420   :  { %v19433_v34 = vmul.f32 %v19297_v39, %v4839_v51  ;;  %v19438_v53 = vmul.f32 %v19307_v42, %v4839_v51  ;;  %v19441_v55 = vmul.f32 %v19309_v50, %v4839_v51  ;;  %v19444_v3 = vmul.f32 %v19319_v9, %v4839_v51  ;;  %v19461_v50 = vpop.permute.xlu0 %5984 }
 0x421   :  { %v19447_v48 = vmul.f32 %v19321_v13, %v4839_v51  ;;  %v19450_v24 = vmul.f32 %v19331_v15, %v4839_v51  ;;  %v19453_v39 = vmul.f32 %v19333_v40, %v4839_v51  ;;  %v19456_v43 = vmul.f32 %v19385_v23, %v4839_v51  ;;  %24353 = vst [vmem:[#allocation106_spill] sm:$0xff] %v19461_v50 }
 0x422   :  { %24345 = vst [vmem:[#allocation98_spill] sm:$0xff] %v19438_v53  ;;  %24346 = vst [vmem:[#allocation99_spill] sm:$0xff] %v19441_v55  ;;  %v19459_v42 = vmul.f32 %v19435_v28, %v4839_v51  ;;  %v5551_v9 = vmul.f32 %v18937_v49, %v19347_v0  ;;  %v5553_v13 = vmul.f32 %v18974_v8, %v19347_v0  ;;  %v24367_v55 = vld [vmem:[#allocation87_spill] sm:$0xff] }
 0x423   :  { %24347 = vst [vmem:[#allocation100_spill] sm:$0xff] %v19444_v3  ;;  %24348 = vst [vmem:[#allocation101_spill] sm:$0xff] %v19447_v48  ;;  %v5555_v15 = vmul.f32 %v19017_v21, %v19347_v0  ;;  %v5557_v40 = vmul.f32 %v19054_v30, %v19347_v0  ;;  %v5559_v23 = vmul.f32 %v19134_v20, %v19347_v0  ;;  %v24365_v48 = vld [vmem:[#allocation81_spill] sm:$0xff]  ;;  %v24366_v3 = vld [vmem:[#allocation86_spill] sm:$0xff] }
 0x424   :  { %24349 = vst [vmem:[#allocation102_spill] sm:$0xff] %v19450_v24  ;;  %24350 = vst [vmem:[#allocation103_spill] sm:$0xff] %v19453_v39  ;;  %v5561_v51 = vmul.f32 %v19175_v47, %v19347_v0  ;;  %v5563_v50 = vmul.f32 %v19179_v62, %v19347_v0  ;;  %v5565_v49 = vmul.f32 %v19207_v10, %v19347_v0  ;;  %v19511_v39 = vpop.permute.xlu0 %5548  ;;  %v24364_v24 = vld [vmem:[#allocation80_spill] sm:$0xff] }
 0x425   :  { %24351 = vst [vmem:[#allocation104_spill] sm:$0xff] %v19456_v43  ;;  %24352 = vst [vmem:[#allocation105_spill] sm:$0xff] %v19459_v42  ;;  %v5567_v8 = vmul.f32 %v19209_v22, %v19347_v0  ;;  %v5569_v21 = vmul.f32 %v19219_v17, %v19347_v0  ;;  %v5571_v30 = vmul.f32 %v19221_v18, %v19347_v0  ;;  %v24354_v22 = vld [vmem:[#allocation50_spill] sm:$0xff]  ;;  %v24355_v17 = vld [vmem:[#allocation51_spill] sm:$0xff] }
 0x426   :  { %v5573_v20 = vmul.f32 %v19231_v25, %v19347_v0  ;;  %v5575_v47 = vmul.f32 %v19233_v27, %v19347_v0  ;;  %v5577_v62 = vmul.f32 %v19243_v32, %v19347_v0  ;;  %v5579_v10 = vmul.f32 %v19245_v33, %v19347_v0  ;;  %v24356_v18 = vld [vmem:[#allocation56_spill] sm:$0xff]  ;;  %v24357_v25 = vld [vmem:[#allocation57_spill] sm:$0xff]  ;;  %v24358_v27 = vld [vmem:[#allocation62_spill] sm:$0xff] }
 0x427   :  { %v5581_v28 = vmul.f32 %v24354_v22, %v19347_v0  ;;  %v5583_v60 = vmul.f32 %v24355_v17, %v19347_v0  ;;  %v5585_v36 = vmul.f32 %v24356_v18, %v19347_v0  ;;  %v5587_v12 = vmul.f32 %v24357_v25, %v19347_v0  ;;  %v24359_v32 = vld [vmem:[#allocation63_spill] sm:$0xff]  ;;  %v24360_v33 = vld [vmem:[#allocation68_spill] sm:$0xff]  ;;  %v24361_v22 = vld [vmem:[#allocation69_spill] sm:$0xff] }
 0x428   :  { %v5589_v58 = vmul.f32 %v24358_v27, %v19347_v0  ;;  %v5591_v46 = vmul.f32 %v24359_v32, %v19347_v0  ;;  %v5593_v44 = vmul.f32 %v24360_v33, %v19347_v0  ;;  %v5595_v42 = vmul.f32 %v24361_v22, %v19347_v0  ;;  %v24362_v17 = vld [vmem:[#allocation74_spill] sm:$0xff]  ;;  %v24363_v18 = vld [vmem:[#allocation75_spill] sm:$0xff] }
 0x429   :  { %v5597_v43 = vmul.f32 %v24362_v17, %v19347_v0  ;;  %v5599_v25 = vmul.f32 %v24363_v18, %v19347_v0  ;;  %v5601_v27 = vmul.f32 %v24364_v24, %v19347_v0  ;;  %v5603_v32 = vmul.f32 %v24365_v48, %v19347_v0 }
 0x42a   :  { %v5605_v33 = vmul.f32 %v24366_v3, %v19347_v0  ;;  %v5607_v22 = vmul.f32 %v24367_v55, %v19347_v0  ;;  %v5609_v17 = vmul.f32 %v19339_v4, %v19347_v0  ;;  %v5611_v53 = vmul.f32 %v19359_v16, %v19347_v0 }
 0x42b   :  { %v5613_v18 = vmul.f32 %v19511_v39, %v19347_v0  ;;  %v19530_v24 = vadd.f32 %v5551_v9, %v19362_v31  ;;  %v19533_v48 = vadd.f32 %v5553_v13, %v19365_v14  ;;  %v19536_v3 = vadd.f32 %v5555_v15, %v19368_v1  ;;  %v24413_v1 = vld [vmem:[#allocation16_spill] sm:$0xff] }
 0x42c   :  { %v19539_v55 = vadd.f32 %v5557_v40, %v19371_v2  ;;  %v19542_v4 = vadd.f32 %v5559_v23, %v19374_v57  ;;  %v19545_v16 = vadd.f32 %v5561_v51, %v19377_v5  ;;  %v19548_v0 = vadd.f32 %v5563_v50, %v19380_v6  ;;  %v24414_v57 = vld [vmem:[#allocation17_spill] sm:$0xff]  ;;  %v24415_v6 = vld [vmem:[#allocation22_spill] sm:$0xff]  ;;  %v24416_v23 = vld [vmem:[#allocation23_spill] sm:$0xff] }
 0x42d   :  { %24368 = vst [vmem:[#allocation107_spill] sm:$0xff] %v19530_v24  ;;  %24369 = vst [vmem:[#allocation108_spill] sm:$0xff] %v19533_v48  ;;  %v19551_v9 = vadd.f32 %v5565_v49, %v19383_v7  ;;  %v19554_v13 = vadd.f32 %v5567_v8, %v19388_v41  ;;  %v19557_v15 = vadd.f32 %v5569_v21, %v19391_v45  ;;  %v24417_v45 = vld [vmem:[#allocation28_spill] sm:$0xff] }
 0x42e   :  { %24370 = vst [vmem:[#allocation109_spill] sm:$0xff] %v19536_v3  ;;  %24371 = vst [vmem:[#allocation110_spill] sm:$0xff] %v19539_v55  ;;  %v19560_v40 = vadd.f32 %v5571_v30, %v19394_v52  ;;  %v19563_v31 = vadd.f32 %v5573_v20, %v19397_v56  ;;  %v19566_v14 = vadd.f32 %v5575_v47, %v19400_v35  ;;  %v24418_v56 = vld [vmem:[#allocation29_spill] sm:$0xff] }
 0x42f   :  { %24372 = vst [vmem:[#allocation111_spill] sm:$0xff] %v19542_v4  ;;  %24373 = vst [vmem:[#allocation112_spill] sm:$0xff] %v19545_v16  ;;  %v19569_v50 = vadd.f32 %v5577_v62, %v19403_v61  ;;  %v19572_v49 = vadd.f32 %v5579_v10, %v19406_v63  ;;  %v19575_v8 = vadd.f32 %v5581_v28, %v19409_v11 }
 0x430   :  { %24374 = vst [vmem:[#allocation113_spill] sm:$0xff] %v19548_v0  ;;  %24375 = vst [vmem:[#allocation114_spill] sm:$0xff] %v19551_v9  ;;  %v19578_v21 = vadd.f32 %v5583_v60, %v19412_v54  ;;  %v19581_v30 = vadd.f32 %v5585_v36, %v19415_v59  ;;  %v19584_v20 = vadd.f32 %v5587_v12, %v19418_v19  ;;  %v24391_v36 = vld [vmem:[#allocation98_spill] sm:$0xff]  ;;  %v24393_v12 = vld [vmem:[#allocation99_spill] sm:$0xff] }
 0x431   :  { %24376 = vst [vmem:[#allocation115_spill] sm:$0xff] %v19554_v13  ;;  %24377 = vst [vmem:[#allocation116_spill] sm:$0xff] %v19557_v15  ;;  %v19587_v47 = vadd.f32 %v5589_v58, %v19421_v26  ;;  %v19590_v62 = vadd.f32 %v5591_v46, %v19424_v29  ;;  %v19593_v63 = vadd.f32 %v5593_v44, %v19427_v37  ;;  %v24395_v58 = vld [vmem:[#allocation100_spill] sm:$0xff]  ;;  %v24397_v59 = vld [vmem:[#allocation101_spill] sm:$0xff] }
 0x432   :  { %24378 = vst [vmem:[#allocation117_spill] sm:$0xff] %v19560_v40  ;;  %24379 = vst [vmem:[#allocation118_spill] sm:$0xff] %v19563_v31  ;;  %v19596_v61 = vadd.f32 %v5595_v42, %v19430_v38  ;;  %v19599_v60 = vadd.f32 %v5597_v43, %v19433_v34  ;;  %v19602_v10 = vadd.f32 %v5599_v25, %v24391_v36  ;;  %v24399_v26 = vld [vmem:[#allocation102_spill] sm:$0xff]  ;;  %v24401_v42 = vld [vmem:[#allocation103_spill] sm:$0xff] }
 0x433   :  { %24380 = vst [vmem:[#allocation119_spill] sm:$0xff] %v19566_v14  ;;  %24381 = vst [vmem:[#allocation120_spill] sm:$0xff] %v19572_v49  ;;  %v19605_v11 = vadd.f32 %v5601_v27, %v24393_v12  ;;  %v19608_v54 = vadd.f32 %v5603_v32, %v24395_v58  ;;  %v19611_v19 = vadd.f32 %v5605_v33, %v24397_v59  ;;  %v24403_v43 = vld [vmem:[#allocation104_spill] sm:$0xff]  ;;  %v24405_v25 = vld [vmem:[#allocation105_spill] sm:$0xff] }
 0x434   :  { %24382 = vst [vmem:[#allocation121_spill] sm:$0xff] %v19575_v8  ;;  %24383 = vst [vmem:[#allocation122_spill] sm:$0xff] %v19578_v21  ;;  %v19614_v29 = vadd.f32 %v5607_v22, %v24399_v26  ;;  %v19617_v37 = vadd.f32 %v5609_v17, %v24401_v42  ;;  %v19620_v34 = vadd.f32 %v5611_v53, %v24403_v43  ;;  %v24407_v27 = vld [vmem:[#allocation93_spill] sm:$0xff]  ;;  %v24408_v44 = vld [vmem:[#allocation52_spill] sm:$0xff] }
 0x435   :  { %24384 = vst [vmem:[#allocation123_spill] sm:$0xff] %v19581_v30  ;;  %24385 = vst [vmem:[#allocation124_spill] sm:$0xff] %v19584_v20  ;;  %v19623_v38 = vadd.f32 %v5613_v18, %v24405_v25  ;;  %v19627_v46 = vmul.f32 %v24408_v44, %v24407_v27  ;;  %v24409_v32 = vld [vmem:[#allocation6_spill] sm:$0xff]  ;;  %v24410_v22 = vld [vmem:[#allocation8_spill] sm:$0xff]  ;;  %v19647_v2 = vmul.f32 %v24413_v1, %v24407_v27 }
 0x436   :  { %24386 = vst [vmem:[#allocation125_spill] sm:$0xff] %v19587_v47  ;;  %24387 = vst [vmem:[#allocation126_spill] sm:$0xff] %v19590_v62  ;;  %v19631_v33 = vmul.f32 %v24409_v32, %v24407_v27  ;;  %v19635_v28 = vmul.f32 %v24410_v22, %v24407_v27  ;;  %v24411_v17 = vld [vmem:[#allocation10_spill] sm:$0xff]  ;;  %v24412_v53 = vld [vmem:[#allocation12_spill] sm:$0xff]  ;;  %v19651_v5 = vmul.f32 %v24414_v57, %v24407_v27 }
 0x437   :  { %24388 = vst [vmem:[#allocation127_spill] sm:$0xff] %v19593_v63  ;;  %24389 = vst [vmem:[#allocation128_spill] sm:$0xff] %v19596_v61  ;;  %v19639_v35 = vmul.f32 %v24411_v17, %v24407_v27  ;;  %v19643_v18 = vmul.f32 %v24412_v53, %v24407_v27  ;;  %v19655_v7 = vmul.f32 %v24415_v6, %v24407_v27  ;;  %v24419_v36 = vld [vmem:[#allocation34_spill] sm:$0xff]  ;;  %v24420_v58 = vld [vmem:[#allocation35_spill] sm:$0xff] }
 0x438   :  { %24390 = vst [vmem:[#allocation129_spill] sm:$0xff] %v19599_v60  ;;  %24392 = vst [vmem:[#allocation98_spill] sm:$0xff] %v19602_v10  ;;  %v19659_v41 = vmul.f32 %v24416_v23, %v24407_v27  ;;  %v19663_v52 = vmul.f32 %v24417_v45, %v24407_v27  ;;  %v19667_v51 = vmul.f32 %v24418_v56, %v24407_v27  ;;  %v24421_v26 = vld [vmem:[#allocation40_spill] sm:$0xff]  ;;  %v24422_v43 = vld [vmem:[#allocation41_spill] sm:$0xff] }
 0x439   :  { %24394 = vst [vmem:[#allocation99_spill] sm:$0xff] %v19605_v11  ;;  %24396 = vst [vmem:[#allocation100_spill] sm:$0xff] %v19608_v54  ;;  %v19671_v12 = vmul.f32 %v24419_v36, %v24407_v27  ;;  %v19675_v59 = vmul.f32 %v24420_v58, %v24407_v27  ;;  %v19679_v42 = vmul.f32 %v24421_v26, %v24407_v27  ;;  %v24423_v44 = vld [vmem:[#allocation46_spill] sm:$0xff]  ;;  %v24424_v22 = vld [vmem:[#allocation47_spill] sm:$0xff] }
 0x43a   :  { %24398 = vst [vmem:[#allocation101_spill] sm:$0xff] %v19611_v19  ;;  %24400 = vst [vmem:[#allocation102_spill] sm:$0xff] %v19614_v29  ;;  %v19683_v25 = vmul.f32 %v24422_v43, %v24407_v27  ;;  %v19687_v32 = vmul.f32 %v24423_v44, %v24407_v27  ;;  %v19691_v17 = vmul.f32 %v24424_v22, %v24407_v27  ;;  %v24425_v53 = vld [vmem:[#allocation53_spill] sm:$0xff]  ;;  %v24426_v57 = vld [vmem:[#allocation58_spill] sm:$0xff] }
 0x43b   :  { %24402 = vst [vmem:[#allocation103_spill] sm:$0xff] %v19617_v37  ;;  %24404 = vst [vmem:[#allocation104_spill] sm:$0xff] %v19620_v34  ;;  %v19695_v1 = vmul.f32 %v24425_v53, %v24407_v27  ;;  %v19699_v6 = vmul.f32 %v24426_v57, %v24407_v27  ;;  %v24427_v23 = vld [vmem:[#allocation59_spill] sm:$0xff]  ;;  %v24428_v56 = vld [vmem:[#allocation64_spill] sm:$0xff] }
 0x43c   :  { %24406 = vst [vmem:[#allocation105_spill] sm:$0xff] %v19623_v38  ;;  %v19703_v45 = vmul.f32 %v24427_v23, %v24407_v27  ;;  %v19707_v36 = vmul.f32 %v24428_v56, %v24407_v27  ;;  %v24429_v58 = vld [vmem:[#allocation65_spill] sm:$0xff]  ;;  %v24430_v43 = vld [vmem:[#allocation70_spill] sm:$0xff]  ;;  %v24431_v22 = vld [vmem:[#allocation71_spill] sm:$0xff] }
 0x43d   :  { %v19711_v26 = vmul.f32 %v24429_v58, %v24407_v27  ;;  %v19715_v44 = vmul.f32 %v24430_v43, %v24407_v27  ;;  %v19719_v53 = vmul.f32 %v24431_v22, %v24407_v27  ;;  %v24432_v57 = vld [vmem:[#allocation76_spill] sm:$0xff]  ;;  %v24434_v38 = vld [vmem:[#allocation77_spill] sm:$0xff]  ;;  %v24436_v34 = vld [vmem:[#allocation82_spill] sm:$0xff] }
 0x43e   :  { %v19723_v23 = vmul.f32 %v24432_v57, %v24407_v27  ;;  %v19727_v56 = vmul.f32 %v24434_v38, %v24407_v27  ;;  %v19731_v58 = vmul.f32 %v24436_v34, %v24407_v27  ;;  %v24438_v37 = vld [vmem:[#allocation83_spill] sm:$0xff]  ;;  %v24440_v29 = vld [vmem:[#allocation88_spill] sm:$0xff]  ;;  %v24442_v19 = vld [vmem:[#allocation89_spill] sm:$0xff] }
 0x43f   :  { %v19735_v43 = vmul.f32 %v24438_v37, %v24407_v27  ;;  %v19739_v22 = vmul.f32 %v24440_v29, %v24407_v27  ;;  %v19743_v57 = vmul.f32 %v24442_v19, %v24407_v27  ;;  %v24444_v54 = vld [vmem:[#allocation96_spill] sm:$0xff]  ;;  %v24446_v11 = vld [vmem:[#allocation97_spill] sm:$0xff]  ;;  %v24448_v10 = vld [vmem:[#allocation94_spill] sm:$0xff] }
 0x440   :  { %24433 = vst [vmem:[#allocation93_spill] sm:$0xff] %v19723_v23  ;;  %24435 = vst [vmem:[#allocation52_spill] sm:$0xff] %v19727_v56  ;;  %v19747_v38 = vmul.f32 %v24444_v54, %v24407_v27  ;;  %v19751_v34 = vmul.f32 %v24446_v11, %v24407_v27  ;;  %v24449_v60 = vld [vmem:[#allocation5_spill] sm:$0xff]  ;;  %v24450_v61 = vld [vmem:[#allocation7_spill] sm:$0xff] }
 0x441   :  { %24437 = vst [vmem:[#allocation6_spill] sm:$0xff] %v19731_v58  ;;  %24439 = vst [vmem:[#allocation8_spill] sm:$0xff] %v19735_v43  ;;  %v5552_v37 = vmul.f32 %v24449_v60, %v24448_v10  ;;  %v5554_v63 = vmul.f32 %v24450_v61, %v24448_v10  ;;  %v24451_v29 = vld [vmem:[#allocation9_spill] sm:$0xff]  ;;  %v24452_v19 = vld [vmem:[#allocation11_spill] sm:$0xff] }
 0x442   :  { %24441 = vst [vmem:[#allocation10_spill] sm:$0xff] %v19739_v22  ;;  %24443 = vst [vmem:[#allocation12_spill] sm:$0xff] %v19743_v57  ;;  %v5556_v62 = vmul.f32 %v24451_v29, %v24448_v10  ;;  %v5558_v47 = vmul.f32 %v24452_v19, %v24448_v10  ;;  %v24453_v20 = vld [vmem:[#allocation15_spill] sm:$0xff]  ;;  %v24454_v30 = vld [vmem:[#allocation20_spill] sm:$0xff] }
 0x443   :  { %24445 = vst [vmem:[#allocation16_spill] sm:$0xff] %v19747_v38  ;;  %24447 = vst [vmem:[#allocation17_spill] sm:$0xff] %v19751_v34  ;;  %v5560_v54 = vmul.f32 %v24453_v20, %v24448_v10  ;;  %v5562_v21 = vmul.f32 %v24454_v30, %v24448_v10  ;;  %v24455_v11 = vld [vmem:[#allocation21_spill] sm:$0xff]  ;;  %v24456_v60 = vld [vmem:[#allocation26_spill] sm:$0xff] }
 0x444   :  { %v5564_v27 = vmul.f32 %v24455_v11, %v24448_v10  ;;  %v5566_v8 = vmul.f32 %v24456_v60, %v24448_v10  ;;  %v24457_v61 = vld [vmem:[#allocation27_spill] sm:$0xff]  ;;  %v24458_v29 = vld [vmem:[#allocation32_spill] sm:$0xff]  ;;  %v24459_v19 = vld [vmem:[#allocation33_spill] sm:$0xff] }
 0x445   :  { %v5568_v49 = vmul.f32 %v24457_v61, %v24448_v10  ;;  %v5570_v14 = vmul.f32 %v24458_v29, %v24448_v10  ;;  %v5572_v31 = vmul.f32 %v24459_v19, %v24448_v10  ;;  %v24460_v20 = vld [vmem:[#allocation38_spill] sm:$0xff]  ;;  %v24461_v30 = vld [vmem:[#allocation39_spill] sm:$0xff]  ;;  %v24462_v11 = vld [vmem:[#allocation44_spill] sm:$0xff] }
 0x446   :  { %v5574_v40 = vmul.f32 %v24460_v20, %v24448_v10  ;;  %v5576_v15 = vmul.f32 %v24461_v30, %v24448_v10  ;;  %v5578_v13 = vmul.f32 %v24462_v11, %v24448_v10  ;;  %v24463_v60 = vld [vmem:[#allocation45_spill] sm:$0xff]  ;;  %v24464_v61 = vld [vmem:[#allocation50_spill] sm:$0xff]  ;;  %v24467_v19 = vld [vmem:[#allocation51_spill] sm:$0xff] }
 0x447   :  { %v5580_v9 = vmul.f32 %v24463_v60, %v24448_v10  ;;  %v5582_v0 = vmul.f32 %v24464_v61, %v24448_v10  ;;  %v24465_v29 = vld [vmem:[#allocation49_spill] sm:$0xff]  ;;  %v5584_v4 = vmul.f32 %v24467_v19, %v24448_v10  ;;  %v24468_v20 = vld [vmem:[#allocation56_spill] sm:$0xff]  ;;  %v24470_v11 = vld [vmem:[#allocation62_spill] sm:$0xff] }
 0x448   :  { %v19787_v16 = vadd.f32 %v24465_v29, %v19569_v50  ;;  %v5586_v55 = vmul.f32 %v24468_v20, %v24448_v10  ;;  %v24469_v30 = vld [vmem:[#allocation57_spill] sm:$0xff]  ;;  %v5590_v48 = vmul.f32 %v24470_v11, %v24448_v10  ;;  %v24471_v60 = vld [vmem:[#allocation63_spill] sm:$0xff]  ;;  %v24472_v61 = vld [vmem:[#allocation68_spill] sm:$0xff] }
 0x449   :  { %v5588_v3 = vmul.f32 %v24469_v30, %v24448_v10  ;;  %v5592_v24 = vmul.f32 %v24471_v60, %v24448_v10  ;;  %v5594_v34 = vmul.f32 %v24472_v61, %v24448_v10  ;;  %v24473_v50 = vld [vmem:[#allocation69_spill] sm:$0xff]  ;;  %v24474_v19 = vld [vmem:[#allocation74_spill] sm:$0xff]  ;;  %v24475_v20 = vld [vmem:[#allocation75_spill] sm:$0xff] }
 0x44a   :  { %24466 = vst [vmem:[#allocation22_spill] sm:$0xff] %v19787_v16  ;;  %v5596_v16 = vmul.f32 %v24473_v50, %v24448_v10  ;;  %v5598_v29 = vmul.f32 %v24474_v19, %v24448_v10  ;;  %v5600_v38 = vmul.f32 %v24475_v20, %v24448_v10  ;;  %v24476_v30 = vld [vmem:[#allocation80_spill] sm:$0xff]  ;;  %v24477_v11 = vld [vmem:[#allocation81_spill] sm:$0xff]  ;;  %v24478_v60 = vld [vmem:[#allocation86_spill] sm:$0xff]  ;;  %v5614_v20 = vmul.f32 %v19511_v39, %v24448_v10 }
 0x44b   :  { %v5602_v57 = vmul.f32 %v24476_v30, %v24448_v10  ;;  %v5604_v22 = vmul.f32 %v24477_v11, %v24448_v10  ;;  %v5606_v43 = vmul.f32 %v24478_v60, %v24448_v10  ;;  %v24479_v61 = vld [vmem:[#allocation87_spill] sm:$0xff]  ;;  %v24480_v50 = vld [vmem:[#allocation92_spill] sm:$0xff]  ;;  %v19822_v30 = vadd.f32 %v5552_v37, %v19631_v33  ;;  %v24517_v37 = vld [vmem:[#allocation25_spill] sm:$0xff] }
 0x44c   :  { %v5608_v58 = vmul.f32 %v24479_v61, %v24448_v10  ;;  %v5610_v56 = vmul.f32 %v24480_v50, %v24448_v10  ;;  %v24481_v19 = vld [vmem:[#allocation95_spill] sm:$0xff]  ;;  %v19825_v11 = vadd.f32 %v5554_v63, %v19635_v28  ;;  %v19828_v60 = vadd.f32 %v5556_v62, %v19639_v35 }
 0x44d   :  { %v5612_v23 = vmul.f32 %v24481_v19, %v24448_v10  ;;  %v19831_v61 = vadd.f32 %v5558_v47, %v19643_v18  ;;  %v19834_v50 = vadd.f32 %v5560_v54, %v19647_v2  ;;  %v19837_v19 = vadd.f32 %v5562_v21, %v19651_v5  ;;  %v24491_v5 = vld [vmem:[#allocation10_spill] sm:$0xff] }
 0x44e   :  { %v19840_v39 = vadd.f32 %v5564_v27, %v19655_v7  ;;  %v19843_v10 = vadd.f32 %v5566_v8, %v19659_v41  ;;  %v19846_v63 = vadd.f32 %v5568_v49, %v19663_v52  ;;  %v19849_v62 = vadd.f32 %v5570_v14, %v19667_v51  ;;  %v24495_v52 = vld [vmem:[#allocation16_spill] sm:$0xff]  ;;  %v24519_v27 = vld [vmem:[#allocation113_spill] sm:$0xff] }
 0x44f   :  { %v19852_v47 = vadd.f32 %v5572_v31, %v19671_v12  ;;  %v19855_v33 = vadd.f32 %v5574_v40, %v19675_v59  ;;  %v19858_v21 = vadd.f32 %v5576_v15, %v19679_v42  ;;  %v5642_v28 = vadd.f32 %v5578_v13, %v19683_v25  ;;  %v24497_v12 = vld [vmem:[#allocation17_spill] sm:$0xff] }
 0x450   :  { %v19862_v8 = vadd.f32 %v5580_v9, %v19687_v32  ;;  %v19865_v49 = vadd.f32 %v5582_v0, %v19691_v17  ;;  %v19868_v14 = vadd.f32 %v5584_v4, %v19627_v46  ;;  %v19871_v31 = vadd.f32 %v5586_v55, %v19695_v1  ;;  %v24483_v55 = vld [vmem:[#allocation93_spill] sm:$0xff]  ;;  %v5989_v32 = vpop.permute.xlu1 %5988  ;;  %v24501_v17 = vld [vmem:[#allocation107_spill] sm:$0xff]  ;;  %v24502_v1 = vld [vmem:[#allocation14_spill] sm:$0xff] }
 0x451   :  { %v19874_v40 = vadd.f32 %v5588_v3, %v19699_v6  ;;  %v19877_v15 = vadd.f32 %v5590_v48, %v19703_v45  ;;  %v19880_v13 = vadd.f32 %v5592_v24, %v19707_v36  ;;  %v19883_v9 = vadd.f32 %v5594_v34, %v19711_v26  ;;  %v24485_v3 = vld [vmem:[#allocation52_spill] sm:$0xff]  ;;  %v24487_v48 = vld [vmem:[#allocation6_spill] sm:$0xff]  ;;  %v24499_v42 = vld [vmem:[#allocation49_spill] sm:$0xff] }
 0x452   :  { %v19886_v0 = vadd.f32 %v5596_v16, %v19715_v44  ;;  %v19889_v4 = vadd.f32 %v5598_v29, %v19719_v53  ;;  %v19892_v46 = vadd.f32 %v5600_v38, %v24483_v55  ;;  %v19895_v35 = vadd.f32 %v5602_v57, %v24485_v3  ;;  %v24489_v24 = vld [vmem:[#allocation8_spill] sm:$0xff]  ;;  %v24505_v36 = vld [vmem:[#allocation13_spill] sm:$0xff]  ;;  %v24508_v53 = vld [vmem:[#allocation18_spill] sm:$0xff] }
 0x453   :  { %v19898_v18 = vadd.f32 %v5604_v22, %v24487_v48  ;;  %v19901_v2 = vadd.f32 %v5606_v43, %v24489_v24  ;;  %v19904_v7 = vadd.f32 %v5608_v58, %v24491_v5  ;;  %v24493_v16 = vld [vmem:[#allocation12_spill] sm:$0xff]  ;;  %v19910_v51 = vadd.f32 %v5612_v23, %v24495_v52  ;;  %v24507_v44 = vld [vmem:[#allocation109_spill] sm:$0xff]  ;;  %v24510_v23 = vld [vmem:[#allocation110_spill] sm:$0xff] }
 0x454   :  { %24482 = vst [vmem:[#allocation23_spill] sm:$0xff] %v19889_v4  ;;  %24484 = vst [vmem:[#allocation28_spill] sm:$0xff] %v19892_v46  ;;  %v19907_v41 = vadd.f32 %v5610_v56, %v24493_v16  ;;  %v19913_v59 = vadd.f32 %v5614_v20, %v24497_v12  ;;  %v19916_v25 = vadd.f32 %v24499_v42, %v5642_v28  ;;  %v24504_v45 = vld [vmem:[#allocation108_spill] sm:$0xff]  ;;  %v24511_v58 = vld [vmem:[#allocation19_spill] sm:$0xff] }
 0x455   :  { %24486 = vst [vmem:[#allocation29_spill] sm:$0xff] %v19895_v35  ;;  %24488 = vst [vmem:[#allocation34_spill] sm:$0xff] %v19898_v18  ;;  %v19920_v6 = vadd.f32 %v24502_v1, %v24501_v17  ;;  %v19924_v26 = vadd.f32 %v24505_v36, %v24504_v45  ;;  %v19928_v56 = vadd.f32 %v24508_v53, %v24507_v44  ;;  %v24513_v22 = vld [vmem:[#allocation111_spill] sm:$0xff]  ;;  %v24514_v57 = vld [vmem:[#allocation24_spill] sm:$0xff] }
 0x456   :  { %24490 = vst [vmem:[#allocation35_spill] sm:$0xff] %v19901_v2  ;;  %24492 = vst [vmem:[#allocation40_spill] sm:$0xff] %v19904_v7  ;;  %v19932_v43 = vadd.f32 %v24511_v58, %v24510_v23  ;;  %v19936_v38 = vadd.f32 %v24514_v57, %v24513_v22  ;;  %v24516_v34 = vld [vmem:[#allocation112_spill] sm:$0xff]  ;;  %v24520_v29 = vld [vmem:[#allocation30_spill] sm:$0xff] }
 0x457   :  { %24494 = vst [vmem:[#allocation41_spill] sm:$0xff] %v19907_v41  ;;  %24496 = vst [vmem:[#allocation46_spill] sm:$0xff] %v19910_v51  ;;  %v19940_v54 = vadd.f32 %v24517_v37, %v24516_v34  ;;  %v19944_v20 = vadd.f32 %v24520_v29, %v24519_v27  ;;  %v24522_v28 = vld [vmem:[#allocation114_spill] sm:$0xff]  ;;  %v24523_v55 = vld [vmem:[#allocation31_spill] sm:$0xff]  ;;  %v5997_v41 = vpop.permute.xlu1 %5996 }
 0x458   :  { %24498 = vst [vmem:[#allocation47_spill] sm:$0xff] %v19913_v59  ;;  %24500 = vst [vmem:[#allocation53_spill] sm:$0xff] %v19916_v25  ;;  %v19948_v3 = vadd.f32 %v24523_v55, %v24522_v28  ;;  %v24525_v48 = vld [vmem:[#allocation115_spill] sm:$0xff]  ;;  %v24526_v24 = vld [vmem:[#allocation36_spill] sm:$0xff] }
 0x459   :  { %24503 = vst [vmem:[#allocation58_spill] sm:$0xff] %v19920_v6  ;;  %24506 = vst [vmem:[#allocation59_spill] sm:$0xff] %v19924_v26  ;;  %v19952_v5 = vadd.f32 %v24526_v24, %v24525_v48  ;;  %v24528_v16 = vld [vmem:[#allocation116_spill] sm:$0xff]  ;;  %v24529_v52 = vld [vmem:[#allocation37_spill] sm:$0xff] }
 0x45a   :  { %24509 = vst [vmem:[#allocation64_spill] sm:$0xff] %v19928_v56  ;;  %24512 = vst [vmem:[#allocation65_spill] sm:$0xff] %v19932_v43  ;;  %v19956_v12 = vadd.f32 %v24529_v52, %v24528_v16  ;;  %v24531_v42 = vld [vmem:[#allocation117_spill] sm:$0xff]  ;;  %v24532_v17 = vld [vmem:[#allocation42_spill] sm:$0xff] }
 0x45b   :  { %24515 = vst [vmem:[#allocation70_spill] sm:$0xff] %v19936_v38  ;;  %24518 = vst [vmem:[#allocation71_spill] sm:$0xff] %v19940_v54  ;;  %v19960_v45 = vadd.f32 %v24532_v17, %v24531_v42  ;;  %v24534_v44 = vld [vmem:[#allocation118_spill] sm:$0xff]  ;;  %v24535_v23 = vld [vmem:[#allocation43_spill] sm:$0xff] }
 0x45c   :  { %24521 = vst [vmem:[#allocation76_spill] sm:$0xff] %v19944_v20  ;;  %24524 = vst [vmem:[#allocation77_spill] sm:$0xff] %v19948_v3  ;;  %v19964_v22 = vadd.f32 %v24535_v23, %v24534_v44  ;;  %v24537_v34 = vld [vmem:[#allocation119_spill] sm:$0xff]  ;;  %v24538_v27 = vld [vmem:[#allocation48_spill] sm:$0xff] }
 0x45d   :  { %24527 = vst [vmem:[#allocation82_spill] sm:$0xff] %v19952_v5  ;;  %24530 = vst [vmem:[#allocation83_spill] sm:$0xff] %v19956_v12  ;;  %v19968_v28 = vadd.f32 %v24538_v27, %v24537_v34  ;;  %v24540_v25 = vld [vmem:[#allocation120_spill] sm:$0xff]  ;;  %v24541_v3 = vld [vmem:[#allocation54_spill] sm:$0xff] }
 0x45e   :  { %24533 = vst [vmem:[#allocation88_spill] sm:$0xff] %v19960_v45  ;;  %24536 = vst [vmem:[#allocation89_spill] sm:$0xff] %v19964_v22  ;;  %v19972_v48 = vadd.f32 %v24541_v3, %v24540_v25  ;;  %v24543_v5 = vld [vmem:[#allocation121_spill] sm:$0xff]  ;;  %v24544_v20 = vld [vmem:[#allocation55_spill] sm:$0xff] }
 0x45f   :  { %24539 = vst [vmem:[#allocation96_spill] sm:$0xff] %v19968_v28  ;;  %v19976_v16 = vadd.f32 %v24544_v20, %v24543_v5  ;;  %v24546_v12 = vld [vmem:[#allocation122_spill] sm:$0xff]  ;;  %v24547_v54 = vld [vmem:[#allocation60_spill] sm:$0xff]  ;;  %v24549_v45 = vld [vmem:[#allocation123_spill] sm:$0xff] }
 0x460   :  { %24542 = vst [vmem:[#allocation97_spill] sm:$0xff] %v19972_v48  ;;  %v19980_v42 = vadd.f32 %v24547_v54, %v24546_v12  ;;  %v24550_v38 = vld [vmem:[#allocation61_spill] sm:$0xff]  ;;  %v24552_v22 = vld [vmem:[#allocation124_spill] sm:$0xff]  ;;  %v24553_v43 = vld [vmem:[#allocation66_spill] sm:$0xff] }
 0x461   :  { %24545 = vst [vmem:[#allocation94_spill] sm:$0xff] %v19976_v16  ;;  %v19984_v44 = vadd.f32 %v24550_v38, %v24549_v45  ;;  %v19988_v34 = vadd.f32 %v24553_v43, %v24552_v22  ;;  %v24555_v28 = vld [vmem:[#allocation125_spill] sm:$0xff]  ;;  %v24556_v56 = vld [vmem:[#allocation67_spill] sm:$0xff]  ;;  %v24558_v48 = vld [vmem:[#allocation126_spill] sm:$0xff] }
 0x462   :  { %24548 = vst [vmem:[#allocation5_spill] sm:$0xff] %v19980_v42  ;;  %v19992_v25 = vadd.f32 %v24556_v56, %v24555_v28  ;;  %v24559_v26 = vld [vmem:[#allocation72_spill] sm:$0xff]  ;;  %v24561_v16 = vld [vmem:[#allocation127_spill] sm:$0xff]  ;;  %v24562_v6 = vld [vmem:[#allocation73_spill] sm:$0xff] }
 0x463   :  { %24551 = vst [vmem:[#allocation7_spill] sm:$0xff] %v19984_v44  ;;  %24554 = vst [vmem:[#allocation9_spill] sm:$0xff] %v19988_v34  ;;  %v19996_v5 = vadd.f32 %v24559_v26, %v24558_v48  ;;  %v20000_v12 = vadd.f32 %v24562_v6, %v24561_v16  ;;  %v24564_v42 = vld [vmem:[#allocation128_spill] sm:$0xff]  ;;  %v24565_v59 = vld [vmem:[#allocation78_spill] sm:$0xff]  ;;  %v5993_v34 = vpop.permute.xlu0 %5992 }
 0x464   :  { %24557 = vst [vmem:[#allocation11_spill] sm:$0xff] %v19992_v25  ;;  %v20004_v45 = vadd.f32 %v24565_v59, %v24564_v42  ;;  %v24567_v44 = vld [vmem:[#allocation129_spill] sm:$0xff]  ;;  %v24568_v51 = vld [vmem:[#allocation79_spill] sm:$0xff]  ;;  %v24570_v28 = vld [vmem:[#allocation98_spill] sm:$0xff] }
 0x465   :  { %24560 = vst [vmem:[#allocation15_spill] sm:$0xff] %v19996_v5  ;;  %24563 = vst [vmem:[#allocation20_spill] sm:$0xff] %v20000_v12  ;;  %v20008_v22 = vadd.f32 %v24568_v51, %v24567_v44  ;;  %v24571_v25 = vld [vmem:[#allocation84_spill] sm:$0xff]  ;;  %v24573_v48 = vld [vmem:[#allocation99_spill] sm:$0xff] }
 0x466   :  { %24566 = vst [vmem:[#allocation21_spill] sm:$0xff] %v20004_v45  ;;  %v20012_v7 = vadd.f32 %v24571_v25, %v24570_v28  ;;  %v24574_v5 = vld [vmem:[#allocation85_spill] sm:$0xff]  ;;  %v24576_v16 = vld [vmem:[#allocation100_spill] sm:$0xff]  ;;  %v24577_v12 = vld [vmem:[#allocation90_spill] sm:$0xff] }
 0x467   :  { %24569 = vst [vmem:[#allocation26_spill] sm:$0xff] %v20008_v22  ;;  %v20016_v2 = vadd.f32 %v24574_v5, %v24573_v48  ;;  %v20020_v18 = vadd.f32 %v24577_v12, %v24576_v16  ;;  %v24578_v42 = vld [vmem:[#allocation101_spill] sm:$0xff]  ;;  %v24579_v45 = vld [vmem:[#allocation91_spill] sm:$0xff]  ;;  %v24581_v44 = vld [vmem:[#allocation102_spill] sm:$0xff]  ;;  %v20041_v16 = vadd.f32 %v24502_v1, %v19822_v30  ;;  %v20061_v30 = vadd.f32 %v24517_v37, %v19837_v19 }
 0x468   :  { %24572 = vst [vmem:[#allocation27_spill] sm:$0xff] %v20012_v7  ;;  %v20024_v35 = vadd.f32 %v24579_v45, %v24578_v42  ;;  %v24582_v22 = vld [vmem:[#allocation106_spill] sm:$0xff]  ;;  %v24583_v51 = vld [vmem:[#allocation103_spill] sm:$0xff]  ;;  %v24584_v28 = vld [vmem:[#allocation104_spill] sm:$0xff]  ;;  %v20045_v42 = vadd.f32 %v24505_v36, %v19825_v11  ;;  %v20065_v11 = vadd.f32 %v24520_v29, %v19840_v39  ;;  %v20081_v19 = vadd.f32 %v24532_v17, %v19852_v47 }
 0x469   :  { %24575 = vst [vmem:[#allocation32_spill] sm:$0xff] %v20016_v2  ;;  %v20028_v46 = vadd.f32 %v24582_v22, %v24581_v44  ;;  %v20031_v4 = vadd.f32 %v5989_v32, %v24583_v51  ;;  %v20034_v7 = vadd.f32 %v5993_v34, %v24584_v28  ;;  %v24585_v48 = vld [vmem:[#allocation105_spill] sm:$0xff]  ;;  %v20049_v44 = vadd.f32 %v24508_v53, %v19828_v60  ;;  %v24595_v1 = vld [vmem:[#allocation23_spill] sm:$0xff]  ;;  %v24597_v53 = vld [vmem:[#allocation28_spill] sm:$0xff] }
 0x46a   :  { %24580 = vst [vmem:[#allocation33_spill] sm:$0xff] %v20024_v35  ;;  %v20037_v2 = vadd.f32 %v5997_v41, %v24585_v48  ;;  %v20053_v51 = vadd.f32 %v24511_v58, %v19831_v61  ;;  %v20057_v28 = vadd.f32 %v24514_v57, %v19834_v50  ;;  %v20069_v60 = vadd.f32 %v24523_v55, %v19843_v10  ;;  %v24596_v36 = vld [vmem:[#allocation79_spill] sm:$0xff]  ;;  %v24618_v17 = vld [vmem:[#allocation22_spill] sm:$0xff] }
 0x46b   :  { %v20073_v61 = vadd.f32 %v24526_v24, %v19846_v63  ;;  %v20077_v50 = vadd.f32 %v24529_v52, %v19849_v62  ;;  %24586 = vst [vmem:[#allocation38_spill] sm:$0xff] %v20081_v19  ;;  %v20085_v39 = vadd.f32 %v24535_v23, %v19855_v33  ;;  %v20089_v10 = vadd.f32 %v24538_v27, %v19858_v21  ;;  %v24606_v24 = vld [vmem:[#allocation59_spill] sm:$0xff]  ;;  %v24607_v23 = vld [vmem:[#allocation64_spill] sm:$0xff]  ;;  %v24621_v55 = vld [vmem:[#allocation94_spill] sm:$0xff] }
 0x46c   :  { %v20093_v63 = vadd.f32 %v24541_v3, %v19862_v8  ;;  %v20097_v62 = vadd.f32 %v24544_v20, %v19865_v49  ;;  %v20101_v47 = vadd.f32 %v24547_v54, %v19868_v14  ;;  %v20105_v33 = vadd.f32 %v24550_v38, %v19871_v31  ;;  %v24603_v38 = vld [vmem:[#allocation46_spill] sm:$0xff]  ;;  %v24604_v54 = vld [vmem:[#allocation47_spill] sm:$0xff]  ;;  %v24617_v27 = vld [vmem:[#allocation96_spill] sm:$0xff] }
 0x46d   :  { %24587 = vst [vmem:[#allocation39_spill] sm:$0xff] %v20085_v39  ;;  %24588 = vst [vmem:[#allocation44_spill] sm:$0xff] %v20089_v10  ;;  %v20109_v21 = vadd.f32 %v24553_v43, %v19874_v40  ;;  %v20113_v8 = vadd.f32 %v24556_v56, %v19877_v15  ;;  %v20117_v49 = vadd.f32 %v24559_v26, %v19880_v13  ;;  %v24598_v56 = vld [vmem:[#allocation29_spill] sm:$0xff]  ;;  %v24599_v26 = vld [vmem:[#allocation34_spill] sm:$0xff]  ;;  %v24635_v48 = vmax.f32 %v20045_v42, 0.0 }
 0x46e   :  { %24589 = vst [vmem:[#allocation45_spill] sm:$0xff] %v20093_v63  ;;  %24590 = vst [vmem:[#allocation50_spill] sm:$0xff] %v20097_v62  ;;  %v20121_v14 = vadd.f32 %v24562_v6, %v19883_v9  ;;  %v20125_v31 = vadd.f32 %v24565_v59, %v19886_v0  ;;  %v20129_v40 = vadd.f32 %v24596_v36, %v24595_v1  ;;  %v24600_v6 = vld [vmem:[#allocation35_spill] sm:$0xff]  ;;  %v24601_v59 = vld [vmem:[#allocation40_spill] sm:$0xff] }
 0x46f   :  { %24591 = vst [vmem:[#allocation51_spill] sm:$0xff] %v20101_v47  ;;  %24592 = vst [vmem:[#allocation56_spill] sm:$0xff] %v20105_v33  ;;  %v20133_v15 = vadd.f32 %v24571_v25, %v24597_v53  ;;  %v20137_v13 = vadd.f32 %v24574_v5, %v24598_v56  ;;  %v20141_v9 = vadd.f32 %v24577_v12, %v24599_v26  ;;  %v24602_v43 = vld [vmem:[#allocation41_spill] sm:$0xff]  ;;  %v24605_v20 = vld [vmem:[#allocation58_spill] sm:$0xff]  ;;  %v24636_v53 = vmax.f32 %v24607_v23, 0.0 }
 0x470   :  { %24593 = vst [vmem:[#allocation57_spill] sm:$0xff] %v20109_v21  ;;  %24594 = vst [vmem:[#allocation62_spill] sm:$0xff] %v20113_v8  ;;  %v20145_v0 = vadd.f32 %v24579_v45, %v24600_v6  ;;  %v20149_v58 = vadd.f32 %v24582_v22, %v24601_v59  ;;  %v20152_v57 = vadd.f32 %v5989_v32, %v24602_v43  ;;  %v24608_v32 = vld [vmem:[#allocation65_spill] sm:$0xff]  ;;  %v24609_v12 = vld [vmem:[#allocation70_spill] sm:$0xff]  ;;  %v24632_v6 = vmax.f32 %v24605_v20, 0.0 }
 0x471   :  { %v20155_v37 = vadd.f32 %v5993_v34, %v24603_v38  ;;  %v20158_v29 = vadd.f32 %v5997_v41, %v24604_v54  ;;  %v24610_v22 = vld [vmem:[#allocation71_spill] sm:$0xff]  ;;  %v24611_v36 = vld [vmem:[#allocation76_spill] sm:$0xff]  ;;  %v24612_v26 = vld [vmem:[#allocation77_spill] sm:$0xff]  ;;  %v24633_v38 = vmax.f32 %v20041_v16, 0.0  ;;  %v24634_v45 = vmax.f32 %v24606_v24, 0.0 }
 0x472   :  { %v24613_v43 = vld [vmem:[#allocation82_spill] sm:$0xff]  ;;  %v24614_v34 = vld [vmem:[#allocation83_spill] sm:$0xff]  ;;  %v24615_v5 = vld [vmem:[#allocation88_spill] sm:$0xff]  ;;  %v20226_v35 = vmul.f32 255.0, %v24632_v6  ;;  %v20238_v41 = vmul.f32 255.0, %v24635_v48  ;;  %v20242_v1 = vmul.f32 255.0, %v24636_v53 }
 0x473   :  { %v24616_v25 = vld [vmem:[#allocation89_spill] sm:$0xff]  ;;  %v24623_v39 = vld [vmem:[#allocation7_spill] sm:$0xff]  ;;  %v24627_v62 = vld [vmem:[#allocation20_spill] sm:$0xff]  ;;  %v20230_v59 = vmul.f32 255.0, %v24633_v38  ;;  %v20234_v54 = vmul.f32 255.0, %v24634_v45  ;;  %v24637_v20 = vmax.f32 %v20049_v44, 0.0 }
 0x474   :  { %v24620_v3 = vld [vmem:[#allocation97_spill] sm:$0xff]  ;;  %v24625_v52 = vld [vmem:[#allocation11_spill] sm:$0xff]  ;;  %v24629_v33 = vld [vmem:[#allocation26_spill] sm:$0xff]  ;;  %v24638_v16 = vmax.f32 %v24608_v32, 0.0  ;;  %v24640_v24 = vmax.f32 %v20053_v51, 0.0  ;;  %v24641_v42 = vmax.f32 %v24609_v12, 0.0 }
 0x475   :  { %v24622_v19 = vld [vmem:[#allocation5_spill] sm:$0xff]  ;;  %v24626_v63 = vld [vmem:[#allocation15_spill] sm:$0xff]  ;;  %v24631_v8 = vld [vmem:[#allocation32_spill] sm:$0xff]  ;;  %v20246_v6 = vmul.f32 255.0, %v24637_v20  ;;  %v24643_v23 = vmax.f32 %v20057_v28, 0.0  ;;  %v24644_v44 = vmax.f32 %v24610_v22, 0.0 }
 0x476   :  { %v24624_v10 = vld [vmem:[#allocation9_spill] sm:$0xff]  ;;  %v24630_v21 = vld [vmem:[#allocation27_spill] sm:$0xff]  ;;  %v20250_v38 = vmul.f32 255.0, %v24638_v16  ;;  %v20254_v45 = vmul.f32 255.0, %v24640_v24  ;;  %v20258_v48 = vmul.f32 255.0, %v24641_v42  ;;  %v24646_v32 = vmax.f32 %v20061_v30, 0.0 }
 0x477   :  { %v24628_v47 = vld [vmem:[#allocation21_spill] sm:$0xff]  ;;  %v20262_v53 = vmul.f32 255.0, %v24643_v23  ;;  %v20266_v20 = vmul.f32 255.0, %v24644_v44  ;;  %v24647_v51 = vmax.f32 %v24611_v36, 0.0  ;;  %v24649_v12 = vmax.f32 %v20065_v11, 0.0  ;;  %v24663_v56 = vld [vmem:[#allocation38_spill] sm:$0xff] }
 0x478   :  { %24639 = vst [vmem:[#allocation63_spill] sm:$0xff] %v20250_v38  ;;  %24642 = vst [vmem:[#allocation68_spill] sm:$0xff] %v20258_v48  ;;  %v20270_v16 = vmul.f32 255.0, %v24646_v32  ;;  %v24650_v28 = vmax.f32 %v24612_v26, 0.0  ;;  %v24652_v22 = vmax.f32 %v20069_v60, 0.0  ;;  %v24653_v30 = vmax.f32 %v24613_v43, 0.0 }
 0x479   :  { %24645 = vst [vmem:[#allocation69_spill] sm:$0xff] %v20266_v20  ;;  %v20274_v24 = vmul.f32 255.0, %v24647_v51  ;;  %v20278_v42 = vmul.f32 255.0, %v24649_v12  ;;  %v24655_v36 = vmax.f32 %v20073_v61, 0.0  ;;  %v24657_v11 = vmax.f32 %v24614_v34, 0.0 }
 0x47a   :  { %v20282_v23 = vmul.f32 255.0, %v24650_v28  ;;  %v20286_v44 = vmul.f32 255.0, %v24652_v22  ;;  %v20290_v32 = vmul.f32 255.0, %v24653_v30  ;;  %v24659_v26 = vmax.f32 %v20077_v50, 0.0 }
 0x47b   :  { %24648 = vst [vmem:[#allocation74_spill] sm:$0xff] %v20274_v24  ;;  %v20294_v51 = vmul.f32 255.0, %v24655_v36  ;;  %v20298_v12 = vmul.f32 255.0, %v24657_v11  ;;  %v24661_v60 = vmax.f32 %v24615_v5, 0.0  ;;  %v24664_v43 = vmax.f32 %v24663_v56, 0.0 }
 0x47c   :  { %24651 = vst [vmem:[#allocation75_spill] sm:$0xff] %v20282_v23  ;;  %24654 = vst [vmem:[#allocation80_spill] sm:$0xff] %v20290_v32  ;;  %v20302_v28 = vmul.f32 255.0, %v24659_v26  ;;  %v24666_v61 = vmax.f32 %v24616_v25, 0.0  ;;  %v24671_v50 = vmax.f32 %v24617_v27, 0.0  ;;  %v24675_v56 = vmax.f32 %v24618_v17, 0.0 }
 0x47d   :  { %24656 = vst [vmem:[#allocation81_spill] sm:$0xff] %v20294_v51  ;;  %24658 = vst [vmem:[#allocation86_spill] sm:$0xff] %v20298_v12  ;;  %v20306_v22 = vmul.f32 255.0, %v24661_v60  ;;  %v20310_v30 = vmul.f32 255.0, %v24664_v43  ;;  %v24668_v51 = vld [vmem:[#allocation39_spill] sm:$0xff] }
 0x47e   :  { %24660 = vst [vmem:[#allocation87_spill] sm:$0xff] %v20302_v28  ;;  %v20314_v36 = vmul.f32 255.0, %v24666_v61  ;;  %v24669_v34 = vmax.f32 %v24668_v51, 0.0  ;;  %v20322_v26 = vmul.f32 255.0, %v24671_v50  ;;  %v24672_v28 = vld [vmem:[#allocation44_spill] sm:$0xff]  ;;  %v20330_v43 = vmul.f32 255.0, %v24675_v56 }
 0x47f   :  { %24662 = vst [vmem:[#allocation92_spill] sm:$0xff] %v20306_v22  ;;  %24665 = vst [vmem:[#allocation95_spill] sm:$0xff] %v20310_v30  ;;  %v24673_v5 = vmax.f32 %v24672_v28, 0.0  ;;  %v24676_v30 = vld [vmem:[#allocation53_spill] sm:$0xff]  ;;  %v24679_v51 = vmax.f32 %v24620_v3, 0.0  ;;  %v24683_v28 = vmax.f32 %v24621_v55, 0.0 }
 0x480   :  { %24667 = vst [vmem:[#allocation93_spill] sm:$0xff] %v20314_v36  ;;  %v20318_v11 = vmul.f32 255.0, %v24669_v34  ;;  %v24677_v25 = vmax.f32 %v24676_v30, 0.0  ;;  %v24687_v30 = vmax.f32 %v24622_v19, 0.0 }
 0x481   :  { %v20326_v60 = vmul.f32 255.0, %v24673_v5  ;;  %v20338_v34 = vmul.f32 255.0, %v24679_v51  ;;  %v20346_v5 = vmul.f32 255.0, %v24683_v28 }
 0x482   :  { %24670 = vst [vmem:[#allocation52_spill] sm:$0xff] %v20318_v11  ;;  %v20334_v61 = vmul.f32 255.0, %v24677_v25  ;;  %v24680_v11 = vld [vmem:[#allocation45_spill] sm:$0xff]  ;;  %v20354_v25 = vmul.f32 255.0, %v24687_v30 }
 0x483   :  { %24674 = vst [vmem:[#allocation6_spill] sm:$0xff] %v20326_v60  ;;  %v24681_v27 = vmax.f32 %v24680_v11, 0.0  ;;  %v24684_v60 = vld [vmem:[#allocation50_spill] sm:$0xff]  ;;  %v24691_v11 = vmax.f32 %v24623_v39, 0.0 }
 0x484   :  { %24678 = vst [vmem:[#allocation8_spill] sm:$0xff] %v20334_v61  ;;  %v24685_v17 = vmax.f32 %v24684_v60, 0.0  ;;  %v24688_v61 = vld [vmem:[#allocation51_spill] sm:$0xff]  ;;  %v24694_v60 = vmax.f32 %v24624_v10, 0.0  ;;  %v24702_v10 = vmax.f32 %v20117_v49, 0.0  ;;  %v24707_v49 = vmax.f32 %v24629_v33, 0.0 }
 0x485   :  { %v20342_v50 = vmul.f32 255.0, %v24681_v27  ;;  %v24689_v3 = vmax.f32 %v24688_v61, 0.0  ;;  %v20362_v27 = vmul.f32 255.0, %v24691_v11  ;;  %v24697_v61 = vmax.f32 %v24625_v52, 0.0  ;;  %v24738_v38 = vld [vmem:[#allocation81_spill] sm:$0xff]  ;;  %v24739_v48 = vld [vmem:[#allocation87_spill] sm:$0xff] }
 0x486   :  { %v20350_v56 = vmul.f32 255.0, %v24685_v17  ;;  %v20370_v17 = vmul.f32 255.0, %v24694_v60  ;;  %v20390_v60 = vmul.f32 255.0, %v24702_v10  ;;  %v24704_v52 = vmax.f32 %v20121_v14, 0.0  ;;  %v24740_v20 = vld [vmem:[#allocation95_spill] sm:$0xff] }
 0x487   :  { %24682 = vst [vmem:[#allocation10_spill] sm:$0xff] %v20342_v50  ;;  %v20358_v51 = vmul.f32 255.0, %v24689_v3  ;;  %v24692_v50 = vld [vmem:[#allocation56_spill] sm:$0xff]  ;;  %v20378_v3 = vmul.f32 255.0, %v24697_v61  ;;  %v20410_v10 = vmul.f32 255.0, %v24707_v49  ;;  %v24711_v14 = vmax.f32 %v24630_v21, 0.0 }
 0x488   :  { %24686 = vst [vmem:[#allocation12_spill] sm:$0xff] %v20350_v56  ;;  %v24693_v55 = vmax.f32 %v24692_v50, 0.0  ;;  %v24695_v56 = vld [vmem:[#allocation57_spill] sm:$0xff]  ;;  %v24701_v50 = vmax.f32 %v24626_v63, 0.0  ;;  %v20398_v61 = vmul.f32 255.0, %v24704_v52  ;;  %v24706_v63 = vmax.f32 %v20125_v31, 0.0 }
 0x489   :  { %24690 = vst [vmem:[#allocation16_spill] sm:$0xff] %v20358_v51  ;;  %v24696_v19 = vmax.f32 %v24695_v56, 0.0  ;;  %24698 = vst [vmem:[#allocation17_spill] sm:$0xff] %v20378_v3  ;;  %v24699_v51 = vld [vmem:[#allocation62_spill] sm:$0xff]  ;;  %v24703_v56 = vmax.f32 %v24627_v62, 0.0  ;;  %v24709_v62 = vmax.f32 %v20129_v40, 0.0 }
 0x48a   :  { %v20366_v28 = vmul.f32 255.0, %v24693_v55  ;;  %v24700_v39 = vmax.f32 %v24699_v51, 0.0  ;;  %v20386_v55 = vmul.f32 255.0, %v24701_v50  ;;  %v24705_v51 = vmax.f32 %v24628_v47, 0.0  ;;  %24708 = vst [vmem:[#allocation49_spill] sm:$0xff] %v20410_v10  ;;  %v24741_v24 = vld [vmem:[#allocation52_spill] sm:$0xff] }
 0x48b   :  { %v20374_v30 = vmul.f32 255.0, %v24696_v19  ;;  %v20394_v19 = vmul.f32 255.0, %v24703_v56  ;;  %v20406_v50 = vmul.f32 255.0, %v24706_v63  ;;  %v20414_v56 = vmul.f32 255.0, %v24709_v62  ;;  %v24742_v23 = vld [vmem:[#allocation6_spill] sm:$0xff]  ;;  %v24743_v32 = vld [vmem:[#allocation8_spill] sm:$0xff] }
 0x48c   :  { %v20382_v11 = vmul.f32 255.0, %v24700_v39  ;;  %v20402_v39 = vmul.f32 255.0, %v24705_v51  ;;  %v20418_v52 = vmul.f32 255.0, %v24711_v14  ;;  %v24713_v47 = vmax.f32 %v20133_v15, 0.0 }
 0x48d   :  { %24710 = vst [vmem:[#allocation107_spill] sm:$0xff] %v20414_v56  ;;  %v24714_v31 = vmax.f32 %v24631_v8, 0.0  ;;  %v24715_v33 = vmax.f32 %v20137_v13, 0.0  ;;  %v24716_v40 = vmax.f32 %v20020_v18, 0.0  ;;  %v24717_v21 = vmax.f32 %v20141_v9, 0.0 }
 0x48e   :  { %24712 = vst [vmem:[#allocation14_spill] sm:$0xff] %v20418_v52  ;;  %v20422_v51 = vmul.f32 255.0, %v24713_v47  ;;  %v24718_v52 = vld [vmem:[#allocation33_spill] sm:$0xff]  ;;  %v24720_v8 = vmax.f32 %v20145_v0, 0.0  ;;  %v24722_v13 = vmax.f32 %v20028_v46, 0.0  ;;  %v24724_v18 = vmax.f32 %v20149_v58, 0.0 }
 0x48f   :  { %v20426_v63 = vmul.f32 255.0, %v24714_v31  ;;  %v20430_v49 = vmul.f32 255.0, %v24715_v33  ;;  %v20434_v62 = vmul.f32 255.0, %v24716_v40  ;;  %v20438_v14 = vmul.f32 255.0, %v24717_v21  ;;  %v24744_v12 = vld [vmem:[#allocation10_spill] sm:$0xff]  ;;  %v24745_v22 = vld [vmem:[#allocation12_spill] sm:$0xff] }
 0x490   :  { %v24719_v15 = vmax.f32 %v24718_v52, 0.0  ;;  %v20446_v31 = vmul.f32 255.0, %v24720_v8  ;;  %v20450_v33 = vmul.f32 255.0, %v24722_v13  ;;  %v20454_v40 = vmul.f32 255.0, %v24724_v18  ;;  %v24746_v36 = vld [vmem:[#allocation16_spill] sm:$0xff] }
 0x491   :  { %v24726_v9 = vmax.f32 %v20031_v4, 0.0  ;;  %v24728_v52 = vmax.f32 %v20152_v57, 0.0  ;;  %v24730_v0 = vmax.f32 %v20034_v7, 0.0  ;;  %v24732_v46 = vmax.f32 %v20155_v37, 0.0 }
 0x492   :  { %v20442_v47 = vmul.f32 255.0, %v24719_v15  ;;  %24721 = vst [vmem:[#allocation108_spill] sm:$0xff] %v20446_v31  ;;  %24723 = vst [vmem:[#allocation13_spill] sm:$0xff] %v20450_v33  ;;  %v24734_v58 = vmax.f32 %v20037_v2, 0.0  ;;  %v24736_v4 = vmax.f32 %v20158_v29, 0.0  ;;  %v14670_v57 = vround.rtne.f32 %v20226_v35 }
 0x493   :  { %24725 = vst [vmem:[#allocation109_spill] sm:$0xff] %v20454_v40  ;;  %v20458_v21 = vmul.f32 255.0, %v24726_v9  ;;  %v20462_v15 = vmul.f32 255.0, %v24728_v52  ;;  %v20466_v8 = vmul.f32 255.0, %v24730_v0  ;;  %v20470_v13 = vmul.f32 255.0, %v24732_v46 }
 0x494   :  { %v20474_v18 = vmul.f32 255.0, %v24734_v58  ;;  %v20478_v9 = vmul.f32 255.0, %v24736_v4  ;;  %v14671_v52 = vround.rtne.f32 %v20230_v59  ;;  %v14672_v7 = vround.rtne.f32 %v20234_v54 }
 0x495   :  { %24727 = vst [vmem:[#allocation18_spill] sm:$0xff] %v20458_v21  ;;  %24729 = vst [vmem:[#allocation110_spill] sm:$0xff] %v20462_v15  ;;  %v14673_v0 = vround.rtne.f32 %v20238_v41  ;;  %v24747_v29 = vld [vmem:[#allocation14_spill] sm:$0xff]  ;;  %v6255_v10 = vmax.f32 %v14670_v57, 0.0  ;;  %v24748_v2 = vround.rtne.f32 %v20246_v6  ;;  %v24752_v35 = vround.rtne.f32 %v20254_v45  ;;  %v24753_v15 = vld [vmem:[#allocation68_spill] sm:$0xff] }
 0x496   :  { %24731 = vst [vmem:[#allocation19_spill] sm:$0xff] %v20466_v8  ;;  %24733 = vst [vmem:[#allocation111_spill] sm:$0xff] %v20470_v13  ;;  %v6256_v58 = vmax.f32 %v14671_v52, 0.0  ;;  %v6257_v56 = vmax.f32 %v14672_v7, 0.0  ;;  %v24749_v52 = vround.rtne.f32 %v20242_v1  ;;  %v24754_v54 = vround.rtne.f32 %v24753_v15 }
 0x497   :  { %24735 = vst [vmem:[#allocation24_spill] sm:$0xff] %v20474_v18  ;;  %24737 = vst [vmem:[#allocation112_spill] sm:$0xff] %v20478_v9  ;;  %v6258_v3 = vmax.f32 %v14673_v0, 0.0  ;;  %v6260_v57 = vmax.f32 %v24748_v2, 0.0  ;;  %v24750_v0 = vld [vmem:[#allocation63_spill] sm:$0xff]  ;;  %v6262_v59 = vmax.f32 %v24752_v35, 0.0  ;;  %v24755_v46 = vround.rtne.f32 %v20262_v53 }
 0x498   :  { %v6259_v7 = vmax.f32 %v24749_v52, 0.0  ;;  %v24751_v4 = vround.rtne.f32 %v24750_v0  ;;  %v6263_v8 = vmax.f32 %v24754_v54, 0.0  ;;  %v6319_v41 = vmin.f32 %v6255_v10, 255.0  ;;  %v24756_v2 = vld [vmem:[#allocation69_spill] sm:$0xff]  ;;  %v24762_v54 = vld [vmem:[#allocation75_spill] sm:$0xff] }
 0x499   :  { %v6320_v13 = vmin.f32 %v6256_v58, 255.0  ;;  %v6321_v37 = vmin.f32 %v6257_v56, 255.0  ;;  %v6322_v18 = vmin.f32 %v6258_v3, 255.0  ;;  %v6264_v6 = vmax.f32 %v24755_v46, 0.0  ;;  %v24765_v46 = vld [vmem:[#allocation80_spill] sm:$0xff] }
 0x49a   :  { %v6261_v40 = vmax.f32 %v24751_v4, 0.0  ;;  %v24757_v9 = vround.rtne.f32 %v24756_v2  ;;  %v24758_v52 = vround.rtne.f32 %v20270_v16  ;;  %v24759_v4 = vld [vmem:[#allocation74_spill] sm:$0xff]  ;;  %v24761_v35 = vround.rtne.f32 %v20278_v42 }
 0x49b   :  { %v24760_v21 = vround.rtne.f32 %v24759_v4  ;;  %v24763_v10 = vround.rtne.f32 %v24762_v54  ;;  %v24764_v3 = vround.rtne.f32 %v20286_v44  ;;  %v6324_v56 = vmin.f32 %v6260_v57, 255.0 }
 0x49c   :  { %v6265_v1 = vmax.f32 %v24757_v9, 0.0  ;;  %v6266_v0 = vmax.f32 %v24758_v52, 0.0  ;;  %v6268_v15 = vmax.f32 %v24761_v35, 0.0  ;;  %v24766_v9 = vround.rtne.f32 %v24765_v46 }
 0x49d   :  { %v6267_v45 = vmax.f32 %v24760_v21, 0.0  ;;  %v20566_v58 = vmax.f32 %v24763_v10, 0.0  ;;  %v20570_v53 = vmax.f32 %v24764_v3, 0.0  ;;  %v24767_v16 = vround.rtne.f32 %v24738_v38  ;;  %v24768_v21 = vld [vmem:[#allocation86_spill] sm:$0xff] }
 0x49e   :  { %v20574_v2 = vmax.f32 %v24766_v9, 0.0  ;;  %v24769_v42 = vround.rtne.f32 %v24768_v21  ;;  %v6323_v35 = vmin.f32 %v6259_v7, 255.0  ;;  %v6326_v54 = vmin.f32 %v6262_v59, 255.0  ;;  %v24771_v9 = vld [vmem:[#allocation92_spill] sm:$0xff] }
 0x49f   :  { %v20578_v52 = vmax.f32 %v24767_v16, 0.0  ;;  %v6383_v10 = vadd.f32 %v6321_v37, %v6319_v41  ;;  %v6415_v44 = vsel %vm6414_vm2, %v6320_v13, 0.0  ;;  %v6416_v3 = vsel %vm6414_vm2, %v6322_v18, 0.0  ;;  %v24774_v41 = vld [vmem:[#allocation93_spill] sm:$0xff] }
 0x4a0   :  { %v20582_v4 = vmax.f32 %v24769_v42, 0.0  ;;  %v24770_v57 = vround.rtne.f32 %v24739_v48  ;;  %v24772_v33 = vround.rtne.f32 %v24771_v9  ;;  %v24773_v16 = vround.rtne.f32 %v24740_v20 }
 0x4a1   :  { %v6417_v42 = vadd.f32 %v6416_v3, %v6415_v44  ;;  %v6325_v7 = vmin.f32 %v6261_v40, 255.0  ;;  %v6328_v59 = vmin.f32 %v6264_v6, 255.0  ;;  %v6384_v37 = vadd.f32 %v6383_v10, %v6323_v35 }
 0x4a2   :  { %v20588_v46 = vmax.f32 %v24770_v57, 0.0  ;;  %v20592_v38 = vmax.f32 %v24772_v33, 0.0  ;;  %v20596_v21 = vmax.f32 %v24773_v16, 0.0  ;;  %v6418_v13 = vsel %vm6414_vm2, %v6324_v56, 0.0 }
 0x4a3   :  { %v24775_v18 = vround.rtne.f32 %v24774_v41  ;;  %v24776_v48 = vround.rtne.f32 %v24741_v24  ;;  %v24777_v33 = vround.rtne.f32 %v20322_v26  ;;  %v6419_v20 = vadd.f32 %v6418_v13, %v6417_v42 }
 0x4a4   :  { %v6327_v16 = vmin.f32 %v6263_v8, 255.0  ;;  %v6330_v44 = vmin.f32 %v6266_v0, 255.0  ;;  %v6385_v40 = vadd.f32 %v6384_v37, %v6325_v7  ;;  %v6420_v6 = vsel %vm6414_vm2, %v6326_v54, 0.0 }
 0x4a5   :  { %v20601_v31 = vmax.f32 %v24775_v18, 0.0  ;;  %v20605_v57 = vmax.f32 %v24776_v48, 0.0  ;;  %v20609_v9 = vmax.f32 %v24777_v33, 0.0  ;;  %v24778_v56 = vround.rtne.f32 %v24742_v23  ;;  %v6480_v33 = vld [vmem:[%s24025_s6 + $0x10] sm:$0xff] }
 0x4a6   :  { %v24779_v10 = vround.rtne.f32 %v20330_v43  ;;  %v24780_v24 = vround.rtne.f32 %v24743_v32  ;;  %v6421_v26 = vadd.f32 %v6420_v6, %v6419_v20  ;;  %v6329_v18 = vmin.f32 %v6265_v1, 255.0  ;;  %v6479_v1 = vld [vmem:[%s24025_s6 + $0x8] sm:$0xff] }
 0x4a7   :  { %v20614_v35 = vmax.f32 %v24778_v56, 0.0  ;;  %v6332_v42 = vmin.f32 %v6268_v15, 255.0  ;;  %v6386_v8 = vadd.f32 %v6385_v40, %v6327_v16  ;;  %v6422_v0 = vsel %vm6414_vm2, %v6328_v59, 0.0  ;;  %v6481_v15 = vld [vmem:[%s24025_s6 + $0x18] sm:$0xff]  ;;  %v6483_v20 = vld [vmem:[%s24025_s6 + $0x28] sm:$0xff] }
 0x4a8   :  { %v20618_v3 = vmax.f32 %v24779_v10, 0.0  ;;  %v20622_v41 = vmax.f32 %v24780_v24, 0.0  ;;  %v24781_v54 = vround.rtne.f32 %v20338_v34  ;;  %v24782_v23 = vround.rtne.f32 %v24744_v12  ;;  %v6478_v34 = vld [vmem:[%s24025_s6] sm:$0xff]  ;;  %v6485_v16 = vld [vmem:[%s24025_s6 + $0x38] sm:$0xff] }
 0x4a9   :  { %v24783_v43 = vround.rtne.f32 %v20346_v5  ;;  %v6423_v32 = vadd.f32 %v6422_v0, %v6421_v26  ;;  %v6331_v12 = vmin.f32 %v6267_v45, 255.0  ;;  %v6334_v59 = vmin.f32 %v20570_v53, 255.0 }
 0x4aa   :  { %v20627_v7 = vmax.f32 %v24781_v54, 0.0  ;;  %v20631_v37 = vmax.f32 %v24782_v23, 0.0  ;;  %v6387_v48 = vadd.f32 %v6386_v8, %v6329_v18  ;;  %v6424_v5 = vsel %vm6414_vm2, %v6330_v44, 0.0  ;;  %v6482_v8 = vld [vmem:[%s24025_s6 + $0x20] sm:$0xff] }
 0x4ab   :  { %v20635_v13 = vmax.f32 %v24783_v43, 0.0  ;;  %v24784_v40 = vround.rtne.f32 %v24745_v22  ;;  %v24785_v53 = vround.rtne.f32 %v20354_v25  ;;  %v6333_v44 = vmin.f32 %v20566_v58, 255.0  ;;  %v6484_v22 = vld [vmem:[%s24025_s6 + $0x30] sm:$0xff] }
 0x4ac   :  { %v6425_v56 = vadd.f32 %v6424_v5, %v6423_v32  ;;  %v6336_v10 = vmin.f32 %v20578_v52, 255.0  ;;  %v6388_v24 = vadd.f32 %v6387_v48, %v6331_v12  ;;  %v6426_v26 = vsel %vm6414_vm2, %v6332_v42, 0.0  ;;  %v6487_v52 = vld [vmem:[%s24025_s6 + $0x48] sm:$0xff]  ;;  %v6489_v42 = vld [vmem:[%s24025_s6 + $0x58] sm:$0xff] }
 0x4ad   :  { %v20659_v45 = vmax.f32 %v24784_v40, 0.0  ;;  %v20663_v6 = vmax.f32 %v24785_v53, 0.0  ;;  %v13685_v18 = vpack.c.bf16 %v6481_v15, %v6479_v1  ;;  %v24786_v25 = vround.rtne.f32 %v24746_v36 }
 0x4ae   :  { %v6427_v58 = vadd.f32 %v6426_v26, %v6425_v56  ;;  %v13687_v54 = vpack.c.bf16 %v6480_v33, %v6478_v34  ;;  %v13689_v23 = vpack.c.bf16 %v6485_v16, %v6483_v20  ;;  %v6335_v43 = vmin.f32 %v20574_v2, 255.0 }
 0x4af   :  { %v20676_v0 = vmax.f32 %v24786_v25, 0.0  ;;  %v6338_v32 = vmin.f32 %v20588_v46, 255.0  ;;  %v6389_v1 = vadd.f32 %v6388_v24, %v6333_v44  ;;  %v6428_v36 = vsel %vm6414_vm2, %v6334_v59, 0.0  ;;  %13686 = vmatprep.subr.bf16.mxu1 %v13685_v18  ;;  %v6486_v59 = vld [vmem:[%s24025_s6 + $0x40] sm:$0xff]  ;;  %v6493_v24 = vld [vmem:[%s24025_s6 + $0x78] sm:$0xff] }
 0x4b0   :  { %v24787_v15 = vround.rtne.f32 %v20362_v27  ;;  %v6337_v12 = vmin.f32 %v20582_v4, 255.0  ;;  %v6429_v48 = vadd.f32 %v6428_v36, %v6427_v58  ;;  %13688 = vmatpush1.bf16.msra.mxu1 %v13687_v54  ;;  %v13691_v5 = vpack.c.bf16 %v6484_v22, %v6482_v8  ;;  %v6488_v27 = vld [vmem:[%s24025_s6 + $0x50] sm:$0xff]  ;;  %v24791_v22 = vld [vmem:[#allocation17_spill] sm:$0xff]  ;;  %v12117_v36 = vld [vmem:[%s24026_s7 + $0xe0] sm:$0xff] }
 0x4b1   :  { %v6340_v33 = vmin.f32 %v20596_v21, 255.0  ;;  %v6390_v20 = vadd.f32 %v6389_v1, %v6335_v43  ;;  %v6430_v2 = vsel %vm6414_vm2, %v6336_v10, 0.0  ;;  %13690 = vmatprep.subr.bf16.mxu1 %v13689_v23  ;;  %v13693_v46 = vpack.c.bf16 %v6489_v42, %v6487_v52  ;;  %v6491_v10 = vld [vmem:[%s24025_s6 + $0x68] sm:$0xff]  ;;  %v12115_v8 = vld [vmem:[%s24026_s7 + $0xd0] sm:$0xff]  ;;  %v6490_v23 = vld [vmem:[%s24025_s6 + $0x60] sm:$0xff] }
 0x4b2   :  { %v20689_v34 = vmax.f32 %v24787_v15, 0.0  ;;  %v24788_v4 = vround.rtne.f32 %v20366_v28  ;;  %v24789_v40 = vround.rtne.f32 %v20370_v17  ;;  %v24790_v53 = vround.rtne.f32 %v20374_v30  ;;  %v12114_v30 = vld [vmem:[%s24026_s7 + $0xc8] sm:$0xff]  ;;  %v6492_v1 = vld [vmem:[%s24025_s6 + $0x70] sm:$0xff] }
 0x4b3   :  { %v6431_v56 = vadd.f32 %v6430_v2, %v6429_v48  ;;  %v6339_v28 = vmin.f32 %v20592_v38, 255.0  ;;  %v6342_v26 = vmin.f32 %v20605_v57, 255.0  ;;  %v6391_v17 = vadd.f32 %v6390_v20, %v6337_v12  ;;  %v6495_v48 = vld [vmem:[%s24025_s6 + $0x88] sm:$0xff] }
 0x4b4   :  { %v20702_v16 = vmax.f32 %v24788_v4, 0.0  ;;  %v20706_v21 = vmax.f32 %v24789_v40, 0.0  ;;  %v20710_v44 = vmax.f32 %v24790_v53, 0.0  ;;  %v6432_v18 = vsel %vm6414_vm2, %v6338_v32, 0.0  ;;  %13692 = vmatpush1.bf16.msra.mxu1 %v13691_v5  ;;  %v6497_v5 = vld [vmem:[%s24025_s6 + $0x98] sm:$0xff]  ;;  %v6494_v53 = vld [vmem:[%s24025_s6 + $0x80] sm:$0xff] }
 0x4b5   :  { %v24792_v25 = vround.rtne.f32 %v24791_v22  ;;  %v6341_v54 = vmin.f32 %v20601_v31, 255.0  ;;  %v6433_v38 = vadd.f32 %v6432_v18, %v6431_v56  ;;  %v13695_v57 = vpack.c.bf16 %v6488_v27, %v6486_v59  ;;  %13694 = vmatprep.subr.bf16.mxu1 %v13693_v46  ;;  %v12116_v31 = vld [vmem:[%s24026_s7 + $0xd8] sm:$0xff] }
 0x4b6   :  { %v6344_v52 = vmin.f32 %v20614_v35, 255.0  ;;  %v6392_v42 = vadd.f32 %v6391_v17, %v6339_v28  ;;  %v6434_v43 = vsel %vm6414_vm2, %v6340_v33, 0.0  ;;  %v13697_v32 = vpack.c.bf16 %v6493_v24, %v6491_v10  ;;  %v12118_v28 = vld [vmem:[%s24026_s7 + $0xe8] sm:$0xff] }
 0x4b7   :  { %v20729_v58 = vmax.f32 %v24792_v25, 0.0  ;;  %v24793_v15 = vround.rtne.f32 %v20382_v11  ;;  %v6435_v12 = vadd.f32 %v6434_v43, %v6433_v38  ;;  %v13770_v33 = vpack.c.bf16 %v12115_v8, %v12114_v30  ;;  %v6501_v38 = vld [vmem:[%s24025_s6 + $0xb8] sm:$0xff]  ;;  %v6498_v43 = vld [vmem:[%s24025_s6 + $0xa0] sm:$0xff] }
 0x4b8   :  { %v6343_v20 = vmin.f32 %v20609_v9, 255.0  ;;  %v6346_v2 = vmin.f32 %v20622_v41, 255.0  ;;  %v6393_v46 = vadd.f32 %v6392_v42, %v6341_v54  ;;  %v6436_v59 = vsel %vm6414_vm2, %v6342_v26, 0.0  ;;  %13696 = vmatpush1.bf16.msra.mxu1 %v13695_v57  ;;  %v12119_v26 = vld [vmem:[%s24026_s7 + $0xf0] sm:$0xff]  ;;  %v6499_v54 = vld [vmem:[%s24025_s6 + $0xa8] sm:$0xff] }
 0x4b9   :  { %v20748_v35 = vmax.f32 %v24793_v15, 0.0  ;;  %v24201_v11 = vmov 0.0|0.0   ;;  %v6345_v27 = vmin.f32 %v20618_v3, 255.0  ;;  %v6437_v4 = vadd.f32 %v6436_v59, %v6435_v12  ;;  %13698 = vmatprep.subr.bf16.mxu1 %v13697_v32  ;;  %v6496_v3 = vld [vmem:[%s24025_s6 + $0x90] sm:$0xff]  ;;  %v12121_v15 = vld [vmem:[%s24026_s7 + $0x100] sm:$0xff]  ;;  %v6505_v59 = vld [vmem:[%s24025_s6 + $0xd8] sm:$0xff] }
 0x4ba   :  { %13769 = vmatprep.subr.bf16.mxu0 %v24201_v11  ;;  %v13699_v40 = vpack.c.bf16 %v6492_v1, %v6490_v23  ;;  %v13773_v56 = vpack.c.bf16 %v12117_v36, %v12116_v31  ;;  %v6348_v9 = vmin.f32 %v20631_v37, 255.0  ;;  %v6394_v41 = vadd.f32 %v6393_v46, %v6343_v20  ;;  %v12120_v36 = vld [vmem:[%s24026_s7 + $0xf8] sm:$0xff]  ;;  %v6503_v46 = vld [vmem:[%s24025_s6 + $0xc8] sm:$0xff] }
 0x4bb   :  { %13771 = vmatpush1.bf16.msra.mxu0 %v13770_v33  ;;  %v6438_v10 = vsel %vm6414_vm2, %v6344_v52, 0.0  ;;  %v13701_v24 = vpack.c.bf16 %v6497_v5, %v6495_v48  ;;  %v24794_v37 = vround.rtne.f32 %v20386_v55  ;;  %v24795_v18 = vround.rtne.f32 %v20390_v60 }
 0x4bc   :  { %13772 = vmatprep.subr.bf16.mxu0 %v24201_v11  ;;  %v24796_v8 = vround.rtne.f32 %v20394_v19  ;;  %v6439_v25 = vadd.f32 %v6438_v10, %v6437_v4  ;;  %v6347_v55 = vmin.f32 %v20627_v7, 255.0  ;;  %v6350_v57 = vmin.f32 %v20659_v45, 255.0  ;;  %13700 = vmatpush1.bf16.msra.mxu1 %v13699_v40 }
 0x4bd   :  { %v20778_v17 = vmax.f32 %v24794_v37, 0.0  ;;  %v20782_v30 = vmax.f32 %v24795_v18, 0.0  ;;  %v6395_v60 = vadd.f32 %v6394_v41, %v6345_v27  ;;  %v6440_v23 = vsel %vm6414_vm2, %v6346_v2, 0.0  ;;  %13702 = vmatprep.subr.bf16.mxu1 %v13701_v24  ;;  %v12122_v24 = vld [vmem:[%s24026_s7 + $0x108] sm:$0xff]  ;;  %v24802_v37 = vld [vmem:[#allocation107_spill] sm:$0xff] }
 0x4be   :  { %v20786_v22 = vmax.f32 %v24796_v8, 0.0  ;;  %v6349_v19 = vmin.f32 %v20635_v13, 255.0  ;;  %v6441_v52 = vadd.f32 %v6440_v23, %v6439_v25  ;;  %v13703_v42 = vpack.c.bf16 %v6496_v3, %v6494_v53  ;;  %v6500_v13 = vld [vmem:[%s24025_s6 + $0xb0] sm:$0xff] }
 0x4bf   :  { %13774 = vmatpush1.bf16.msra.mxu0 %v13773_v56  ;;  %v13776_v32 = vpack.c.bf16 %v12119_v26, %v12118_v28  ;;  %v6352_v1 = vmin.f32 %v20676_v0, 255.0  ;;  %v6396_v31 = vadd.f32 %v6395_v60, %v6347_v55  ;;  %v6442_v7 = vsel %vm6414_vm2, %v6348_v9, 0.0  ;;  %v6502_v56 = vld [vmem:[%s24025_s6 + $0xc0] sm:$0xff]  ;;  %v12123_v3 = vld [vmem:[%s24026_s7 + $0x110] sm:$0xff]  ;;  %v6507_v55 = vld [vmem:[%s24025_s6 + $0xe8] sm:$0xff] }
 0x4c0   :  { %v13705_v45 = vpack.c.bf16 %v6501_v38, %v6499_v54  ;;  %13775 = vmatprep.subr.bf16.mxu0 %v24201_v11  ;;  %v24797_v0 = vround.rtne.f32 %v20398_v61  ;;  %v24798_v48 = vround.rtne.f32 %v20402_v39  ;;  %v24799_v33 = vround.rtne.f32 %v20406_v50  ;;  %13704 = vmatpush1.bf16.msra.mxu1 %v13703_v42 }
 0x4c1   :  { %v6443_v2 = vadd.f32 %v6442_v7, %v6441_v52  ;;  %v6351_v61 = vmin.f32 %v20663_v6, 255.0  ;;  %v6354_v27 = vmin.f32 %v20702_v16, 255.0  ;;  %v6397_v39 = vadd.f32 %v6396_v31, %v6349_v19 }
 0x4c2   :  { %v20815_v12 = vmax.f32 %v24797_v0, 0.0  ;;  %v20819_v5 = vmax.f32 %v24798_v48, 0.0  ;;  %v20823_v20 = vmax.f32 %v24799_v33, 0.0  ;;  %v6444_v4 = vsel %vm6414_vm2, %v6350_v57, 0.0  ;;  %13706 = vmatprep.subr.bf16.mxu1 %v13705_v45  ;;  %v6509_v57 = vld [vmem:[%s24025_s6 + $0xf8] sm:$0xff] }
 0x4c3   :  { %v6353_v50 = vmin.f32 %v20689_v34, 255.0  ;;  %v6445_v40 = vadd.f32 %v6444_v4, %v6443_v2  ;;  %v13707_v53 = vpack.c.bf16 %v6500_v13, %v6498_v43  ;;  %13777 = vmatpush1.bf16.msra.mxu0 %v13776_v32  ;;  %v13779_v9 = vpack.c.bf16 %v12121_v15, %v12120_v36  ;;  %v6504_v34 = vld [vmem:[%s24025_s6 + $0xd0] sm:$0xff]  ;;  %v6506_v32 = vld [vmem:[%s24025_s6 + $0xe0] sm:$0xff]  ;;  %v12124_v45 = vld [vmem:[%s24026_s7 + $0x118] sm:$0xff] }
 0x4c4   :  { %v6356_v41 = vmin.f32 %v20710_v44, 255.0  ;;  %v6398_v10 = vadd.f32 %v6397_v39, %v6351_v61  ;;  %v6446_v6 = vsel %vm6414_vm2, %v6352_v1, 0.0  ;;  %v13709_v16 = vpack.c.bf16 %v6505_v59, %v6503_v46  ;;  %13778 = vmatprep.subr.bf16.mxu0 %v24201_v11  ;;  %v24800_v44 = vld [vmem:[#allocation49_spill] sm:$0xff]  ;;  %v12125_v13 = vld [vmem:[%s24026_s7 + $0x120] sm:$0xff]  ;;  %v6513_v59 = vld [vmem:[%s24025_s6 + $0x118] sm:$0xff] }
 0x4c5   :  { %v24801_v28 = vround.rtne.f32 %v24800_v44  ;;  %v24803_v18 = vround.rtne.f32 %v24802_v37  ;;  %v24804_v25 = vround.rtne.f32 %v24747_v29  ;;  %v6447_v38 = vadd.f32 %v6446_v6, %v6445_v40  ;;  %13708 = vmatpush1.bf16.msra.mxu1 %v13707_v53  ;;  %v6511_v46 = vld [vmem:[%s24025_s6 + $0x108] sm:$0xff] }
 0x4c6   :  { %v6355_v60 = vmin.f32 %v20706_v21, 255.0  ;;  %v6358_v23 = vmin.f32 %v20748_v35, 255.0  ;;  %v6399_v19 = vadd.f32 %v6398_v10, %v6353_v50  ;;  %v6448_v52 = vsel %vm6414_vm2, %v6354_v27, 0.0  ;;  %13710 = vmatprep.subr.bf16.mxu1 %v13709_v16  ;;  %v6510_v50 = vld [vmem:[%s24025_s6 + $0x100] sm:$0xff]  ;;  %v6515_v44 = vld [vmem:[%s24025_s6 + $0x128] sm:$0xff] }
 0x4c7   :  { %v20852_v26 = vmax.f32 %v24801_v28, 0.0  ;;  %v20856_v8 = vmax.f32 %v24803_v18, 0.0  ;;  %v20860_v54 = vmax.f32 %v24804_v25, 0.0  ;;  %v6357_v29 = vmin.f32 %v20729_v58, 255.0  ;;  %13780 = vmatpush1.bf16.msra.mxu0 %v13779_v9  ;;  %v6508_v58 = vld [vmem:[%s24025_s6 + $0xf0] sm:$0xff]  ;;  %v12126_v9 = vld [vmem:[%s24026_s7 + $0x128] sm:$0xff] }
 0x4c8   :  { %v6449_v42 = vadd.f32 %v6448_v52, %v6447_v38  ;;  %v13711_v43 = vpack.c.bf16 %v6504_v34, %v6502_v56  ;;  %v13782_v1 = vpack.c.bf16 %v12123_v3, %v12122_v24  ;;  %v6360_v31 = vmin.f32 %v20782_v30, 255.0  ;;  %13781 = vmatprep.subr.bf16.mxu0 %v24201_v11  ;;  %v6517_v28 = vld [vmem:[%s24025_s6 + $0x138] sm:$0xff]  ;;  %v12129_v52 = vld [vmem:[%s24026_s7 + $0x140] sm:$0xff] }
 0x4c9   :  { %v6400_v7 = vadd.f32 %v6399_v19, %v6355_v60  ;;  %v6450_v21 = vsel %vm6414_vm2, %v6356_v41, 0.0  ;;  %v13713_v35 = vpack.c.bf16 %v6509_v57, %v6507_v55  ;;  %v24805_v30 = vround.rtne.f32 %v20422_v51  ;;  %v12127_v41 = vld [vmem:[%s24026_s7 + $0x130] sm:$0xff]  ;;  %v6514_v55 = vld [vmem:[%s24025_s6 + $0x120] sm:$0xff]  ;;  %v12128_v19 = vld [vmem:[%s24026_s7 + $0x138] sm:$0xff] }
 0x4ca   :  { %v24806_v15 = vround.rtne.f32 %v20426_v63  ;;  %v24807_v48 = vround.rtne.f32 %v20430_v49  ;;  %v6451_v2 = vadd.f32 %v6450_v21, %v6449_v42  ;;  %v6359_v51 = vmin.f32 %v20778_v17, 255.0  ;;  %13712 = vmatpush1.bf16.msra.mxu1 %v13711_v43 }
 0x4cb   :  { %v20889_v36 = vmax.f32 %v24805_v30, 0.0  ;;  %v6362_v61 = vmin.f32 %v20815_v12, 255.0  ;;  %v6401_v63 = vadd.f32 %v6400_v7, %v6357_v29  ;;  %v6452_v27 = vsel %vm6414_vm2, %v6358_v23, 0.0  ;;  %13783 = vmatpush1.bf16.msra.mxu0 %v13782_v1  ;;  %13714 = vmatprep.subr.bf16.mxu1 %v13713_v35  ;;  %v24811_v29 = vld [vmem:[#allocation108_spill] sm:$0xff]  ;;  %v24815_v7 = vld [vmem:[#allocation109_spill] sm:$0xff] }
 0x4cc   :  { %v20893_v0 = vmax.f32 %v24806_v15, 0.0  ;;  %v20897_v33 = vmax.f32 %v24807_v48, 0.0  ;;  %v6361_v49 = vmin.f32 %v20786_v22, 255.0  ;;  %v6453_v39 = vadd.f32 %v6452_v27, %v6451_v2  ;;  %v6512_v22 = vld [vmem:[%s24025_s6 + $0x110] sm:$0xff]  ;;  %13784 = vmatprep.subr.bf16.mxu0 %v24201_v11 }
 0x4cd   :  { %v13715_v4 = vpack.c.bf16 %v6508_v58, %v6506_v32  ;;  %v13785_v40 = vpack.c.bf16 %v12125_v13, %v12124_v45  ;;  %v6364_v53 = vmin.f32 %v20823_v20, 255.0  ;;  %v6402_v56 = vadd.f32 %v6401_v63, %v6359_v51  ;;  %v24813_v32 = vld [vmem:[#allocation13_spill] sm:$0xff]  ;;  %v6521_v13 = vld [vmem:[%s24025_s6 + $0x158] sm:$0xff]  ;;  %v6518_v51 = vld [vmem:[%s24025_s6 + $0x140] sm:$0xff] }
 0x4ce   :  { %v6454_v17 = vsel %vm6414_vm2, %v6360_v31, 0.0  ;;  %v13717_v12 = vpack.c.bf16 %v6513_v59, %v6511_v46  ;;  %v24808_v20 = vround.rtne.f32 %v20434_v62  ;;  %v24809_v6 = vround.rtne.f32 %v20438_v14  ;;  %v6519_v45 = vld [vmem:[%s24025_s6 + $0x148] sm:$0xff] }
 0x4cf   :  { %v24810_v34 = vround.rtne.f32 %v20442_v47  ;;  %v6455_v3 = vadd.f32 %v6454_v17, %v6453_v39  ;;  %v6363_v62 = vmin.f32 %v20819_v5, 255.0  ;;  %v6366_v37 = vmin.f32 %v20856_v8, 255.0  ;;  %13716 = vmatpush1.bf16.msra.mxu1 %v13715_v4  ;;  %13786 = vmatpush1.bf16.msra.mxu0 %v13785_v40  ;;  %v12131_v39 = vld [vmem:[%s24026_s7 + $0x150] sm:$0xff] }
 0x4d0   :  { %v20926_v10 = vmax.f32 %v24808_v20, 0.0  ;;  %v20930_v16 = vmax.f32 %v24809_v6, 0.0  ;;  %v6403_v14 = vadd.f32 %v6402_v56, %v6361_v49  ;;  %v6456_v18 = vsel %vm6414_vm2, %v6362_v61, 0.0  ;;  %13718 = vmatprep.subr.bf16.mxu1 %v13717_v12  ;;  %13787 = vmatprep.subr.bf16.mxu0 %v24201_v11  ;;  %v12130_v49 = vld [vmem:[%s24026_s7 + $0x148] sm:$0xff]  ;;  %v24817_v4 = vld [vmem:[#allocation18_spill] sm:$0xff]  ;;  %v24821_v12 = vld [vmem:[#allocation111_spill] sm:$0xff] }
 0x4d1   :  { %v20934_v24 = vmax.f32 %v24810_v34, 0.0  ;;  %v6365_v47 = vmin.f32 %v20852_v26, 255.0  ;;  %v6457_v25 = vadd.f32 %v6456_v18, %v6455_v3  ;;  %v13719_v38 = vpack.c.bf16 %v6512_v22, %v6510_v50  ;;  %v6516_v26 = vld [vmem:[%s24025_s6 + $0x130] sm:$0xff]  ;;  %v6523_v20 = vld [vmem:[%s24025_s6 + $0x168] sm:$0xff]  ;;  %v6525_v6 = vld [vmem:[%s24025_s6 + $0x178] sm:$0xff] }
 0x4d2   :  { %v13788_v57 = vpack.c.bf16 %v12127_v41, %v12126_v9  ;;  %v6368_v60 = vmin.f32 %v20889_v36, 255.0  ;;  %v6404_v23 = vadd.f32 %v6403_v14, %v6363_v62  ;;  %v6458_v5 = vsel %vm6414_vm2, %v6364_v53, 0.0  ;;  %v24819_v53 = vld [vmem:[#allocation110_spill] sm:$0xff]  ;;  %v6522_v14 = vld [vmem:[%s24025_s6 + $0x160] sm:$0xff] }
 0x4d3   :  { %v13721_v8 = vpack.c.bf16 %v6517_v28, %v6515_v44  ;;  %v24812_v42 = vround.rtne.f32 %v24811_v29  ;;  %v24814_v1 = vround.rtne.f32 %v24813_v32  ;;  %v24816_v21 = vround.rtne.f32 %v24815_v7  ;;  %13720 = vmatpush1.bf16.msra.mxu1 %v13719_v38 }
 0x4d4   :  { %v6459_v58 = vadd.f32 %v6458_v5, %v6457_v25  ;;  %v6367_v30 = vmin.f32 %v20860_v54, 255.0  ;;  %v6370_v36 = vmin.f32 %v20897_v33, 255.0  ;;  %v6405_v15 = vadd.f32 %v6404_v23, %v6365_v47  ;;  %13789 = vmatpush1.bf16.msra.mxu0 %v13788_v57  ;;  %v12133_v57 = vld [vmem:[%s24026_s7 + $0x160] sm:$0xff] }
 0x4d5   :  { %v6310_v43 = vmax.f32 %v24812_v42, 0.0  ;;  %v20965_v31 = vmax.f32 %v24814_v1, 0.0  ;;  %v20969_v35 = vmax.f32 %v24816_v21, 0.0  ;;  %v6460_v48 = vsel %vm6414_vm2, %v6366_v37, 0.0  ;;  %13722 = vmatprep.subr.bf16.mxu1 %v13721_v8  ;;  %13790 = vmatprep.subr.bf16.mxu0 %v24201_v11  ;;  %v24825_v8 = vld [vmem:[#allocation112_spill] sm:$0xff] }
 0x4d6   :  { %v6369_v2 = vmin.f32 %v20893_v0, 255.0  ;;  %v6461_v46 = vadd.f32 %v6460_v48, %v6459_v58  ;;  %v13723_v59 = vpack.c.bf16 %v6516_v26, %v6514_v55  ;;  %v13791_v61 = vpack.c.bf16 %v12129_v52, %v12128_v19  ;;  %v6520_v0 = vld [vmem:[%s24025_s6 + $0x150] sm:$0xff]  ;;  %v12132_v55 = vld [vmem:[%s24026_s7 + $0x158] sm:$0xff]  ;;  %v24827_v1 = vld [vmem:[#allocation24_spill] sm:$0xff] }
 0x4d7   :  { %v6372_v63 = vmin.f32 %v20930_v16, 255.0  ;;  %v6406_v27 = vadd.f32 %v6405_v15, %v6367_v30  ;;  %v6462_v54 = vsel %vm6414_vm2, %v6368_v60, 0.0  ;;  %v13725_v33 = vpack.c.bf16 %v6521_v13, %v6519_v45  ;;  %v24823_v60 = vld [vmem:[#allocation19_spill] sm:$0xff]  ;;  %v12135_v48 = vld [vmem:[%s24026_s7 + $0x170] sm:$0xff] }
 0x4d8   :  { %v24818_v50 = vround.rtne.f32 %v24817_v4  ;;  %v24820_v56 = vround.rtne.f32 %v24819_v53  ;;  %v24822_v22 = vround.rtne.f32 %v24821_v12  ;;  %v6463_v41 = vadd.f32 %v6462_v54, %v6461_v46  ;;  %13724 = vmatpush1.bf16.msra.mxu1 %v13723_v59  ;;  %13792 = vmatpush1.bf16.msra.mxu0 %v13791_v61  ;;  %v6527_v46 = vld [vmem:[%s24025_s6 + $0x188] sm:$0xf]  ;;  %v6526_v54 = vld [vmem:[%s24025_s6 + $0x180] sm:$0xf] }
 0x4d9   :  { %v6371_v16 = vmin.f32 %v20926_v10, 255.0  ;;  %v6374_v34 = vmin.f32 %v6310_v43, 255.0  ;;  %v6407_v3 = vadd.f32 %v6406_v27, %v6369_v2  ;;  %v6464_v44 = vsel %vm6414_vm2, %v6370_v36, 0.0  ;;  %13726 = vmatprep.subr.bf16.mxu1 %v13725_v33  ;;  %13793 = vmatprep.subr.bf16.mxu0 %v24201_v11  ;;  %v6609_v33 = vld [vmem:[%s24026_s7] sm:$0xff] }
 0x4da   :  { %v6313_v40 = vmax.f32 %v24818_v50, 0.0  ;;  %v6314_v17 = vmax.f32 %v24820_v56, 0.0  ;;  %v6316_v9 = vmax.f32 %v24822_v22, 0.0  ;;  %v6373_v28 = vmin.f32 %v20934_v24, 255.0  ;;  %v6524_v24 = vld [vmem:[%s24025_s6 + $0x170] sm:$0xff]  ;;  %v6610_v50 = vld [vmem:[%s24026_s7 + $0x8] sm:$0xff] }
 0x4db   :  { %v6465_v62 = vadd.f32 %v6464_v44, %v6463_v41  ;;  %v13727_v37 = vpack.c.bf16 %v6520_v0, %v6518_v51  ;;  %v13794_v18 = vpack.c.bf16 %v12131_v39, %v12130_v49  ;;  %v6376_v47 = vmin.f32 %v20969_v35, 255.0  ;;  %v12137_v53 = vld [vmem:[%s24026_s7 + $0x180] sm:$0xff] }
 0x4dc   :  { %v6408_v25 = vadd.f32 %v6407_v3, %v6371_v16  ;;  %v6466_v10 = vsel %vm6414_vm2, %v6372_v63, 0.0  ;;  %v13729_v38 = vpack.c.bf16 %v6525_v6, %v6523_v20  ;;  %v24824_v23 = vround.rtne.f32 %v24823_v60  ;;  %v6611_v20 = vld [vmem:[%s24026_s7 + $0x10] sm:$0xff]  ;;  %v6612_v6 = vld [vmem:[%s24026_s7 + $0x18] sm:$0xff]  ;;  %v6614_v3 = vld [vmem:[%s24026_s7 + $0x28] sm:$0xff] }
 0x4dd   :  { %v24826_v26 = vround.rtne.f32 %v24825_v8  ;;  %v6467_v52 = vadd.f32 %v6466_v10, %v6465_v62  ;;  %v6375_v29 = vmin.f32 %v20965_v31, 255.0  ;;  %v6378_v42 = vmin.f32 %v6314_v17, 255.0  ;;  %13728 = vmatpush1.bf16.msra.mxu1 %v13727_v37  ;;  %13795 = vmatpush1.bf16.msra.mxu0 %v13794_v18  ;;  %v12134_v31 = vld [vmem:[%s24026_s7 + $0x168] sm:$0xff]  ;;  %v6615_v62 = vld [vmem:[%s24026_s7 + $0x30] sm:$0xff]  ;;  %v6616_v37 = vld [vmem:[%s24026_s7 + $0x38] sm:$0xff] }
 0x4de   :  { %v6315_v5 = vmax.f32 %v24824_v23, 0.0  ;;  %v6409_v43 = vadd.f32 %v6408_v25, %v6373_v28  ;;  %v6468_v32 = vsel %vm6414_vm2, %v6374_v34, 0.0  ;;  %v24828_v7 = vround.rtne.f32 %v24827_v1  ;;  %13730 = vmatprep.subr.bf16.mxu1 %v13729_v38  ;;  %13796 = vmatprep.subr.bf16.mxu0 %v24201_v11  ;;  %v6613_v34 = vld [vmem:[%s24026_s7 + $0x20] sm:$0xff]  ;;  %v6619_v10 = vld [vmem:[%s24026_s7 + $0x50] sm:$0xff]  ;;  %v6620_v38 = vld [vmem:[%s24026_s7 + $0x58] sm:$0xff] }
 0x4df   :  { %v6318_v19 = vmax.f32 %v24826_v26, 0.0  ;;  %v6469_v35 = vadd.f32 %v6468_v32, %v6467_v52  ;;  %v13731_v58 = vpack.c.bf16 %v6524_v24, %v6522_v14  ;;  %v13797_v45 = vpack.c.bf16 %v12133_v57, %v12132_v55  ;;  %v6617_v18 = vld [vmem:[%s24026_s7 + $0x40] sm:$0xff]  ;;  %v6622_v57 = vld [vmem:[%s24026_s7 + $0x68] sm:$0xff]  ;;  %v6623_v23 = vld [vmem:[%s24026_s7 + $0x70] sm:$0xff] }
 0x4e0   :  { %v6317_v21 = vmax.f32 %v24828_v7, 0.0  ;;  %v6377_v13 = vmin.f32 %v6313_v40, 255.0  ;;  %v6380_v30 = vmin.f32 %v6316_v9, 255.0  ;;  %v6410_v36 = vadd.f32 %v6409_v43, %v6375_v29  ;;  %v12136_v40 = vld [vmem:[%s24026_s7 + $0x178] sm:$0xff]  ;;  %v6621_v55 = vld [vmem:[%s24026_s7 + $0x60] sm:$0xff]  ;;  %v6627_v29 = vld [vmem:[%s24026_s7 + $0x90] sm:$0xff] }
 0x4e1   :  { %v6470_v15 = vsel %vm6414_vm2, %v6376_v47, 0.0  ;;  %v6379_v59 = vmin.f32 %v6315_v5, 255.0  ;;  %v6382_v51 = vmin.f32 %v6318_v19, 255.0  ;;  %v6472_v63 = vsel %vm6414_vm2, %v6378_v42, 0.0  ;;  %13732 = vmatpush1.bf16.msra.mxu1 %v13731_v58  ;;  %13798 = vmatpush1.bf16.msra.mxu0 %v13797_v45  ;;  %v6618_v47 = vld [vmem:[%s24026_s7 + $0x48] sm:$0xff]  ;;  %v6624_v5 = vld [vmem:[%s24026_s7 + $0x78] sm:$0xff] }
 0x4e2   :  { %v6471_v2 = vadd.f32 %v6470_v15, %v6469_v35  ;;  %v6411_v61 = vadd.f32 %v6410_v36, %v6377_v13  ;;  %v13800_v0 = vpack.c.bf16 %v12135_v48, %v12134_v31  ;;  %v6381_v49 = vmin.f32 %v6317_v21, 255.0  ;;  %12109 = vmatprep.subr.msk.mxu1 %vm6531_vm3, %v6527_v46  ;;  %13799 = vmatprep.subr.bf16.mxu0 %v24201_v11  ;;  %v6625_v26 = vld [vmem:[%s24026_s7 + $0x80] sm:$0xff]  ;;  %v6626_v19 = vld [vmem:[%s24026_s7 + $0x88] sm:$0xff]  ;;  %v6628_v42 = vld [vmem:[%s24026_s7 + $0x98] sm:$0xff] }
 0x4e3   :  { %v6474_v4 = vsel %vm6414_vm2, %v6380_v30, 0.0  ;;  %v6476_v12 = vsel %vm6414_vm2, %v6382_v51, 0.0  ;;  %v13734_v9 = vpack.c.bf16 %v6610_v50, %v6609_v33  ;;  %v13803_v41 = vpack.c.bf16 %v12137_v53, %v12136_v40  ;;  %v6629_v32 = vld [vmem:[%s24026_s7 + $0xa0] sm:$0xff]  ;;  %v6630_v1 = vld [vmem:[%s24026_s7 + $0xa8] sm:$0xff]  ;;  %v6631_v21 = vld [vmem:[%s24026_s7 + $0xb0] sm:$0xff] }
 0x4e4   :  { %v6473_v27 = vadd.f32 %v6472_v63, %v6471_v2  ;;  %v6412_v39 = vadd.f32 %v6411_v61, %v6379_v59  ;;  %v13737_v16 = vpack.c.bf16 %v6612_v6, %v6611_v20  ;;  %v24829_v44 = vmov 0.0   ;;  %v6632_v35 = vld [vmem:[%s24026_s7 + $0xb8] sm:$0xff]  ;;  %v6633_v45 = vld [vmem:[%s24026_s7 + $0xc0] sm:$0xf]  ;;  %v12138_v13 = vld [vmem:[%s24026_s7 + $0x188] sm:$0xf] }
 0x4e5   :  { %12110 = vmatpush1.msk.msra.mxu1 %vm6531_vm3, %v6526_v54  ;;  %13801 = vmatpush1.bf16.msra.mxu0 %v13800_v0  ;;  %v13740_v28 = vpack.c.bf16 %v6614_v3, %v6613_v34  ;;  %v13743_v14 = vpack.c.bf16 %v6616_v37, %v6615_v62  ;;  %v13746_v25 = vpack.c.bf16 %v6618_v47, %v6617_v18  ;;  %v12141_v30 = vld [vmem:[%s24026_s7 + $0x190] sm:$0xff]  ;;  %v12142_v36 = vld [vmem:[%s24026_s7 + $0x198] sm:$0xff]  ;;  %v12169_v31 = vld [vmem:[%s24026_s7 + $0x260] sm:$0xff] }
 0x4e6   :  { %v6475_v56 = vadd.f32 %v6474_v4, %v6473_v27  ;;  %v6413_v17 = vadd.f32 %v6412_v39, %v6381_v49  ;;  %13733 = vmatprep.subr.bf16.mxu1 %v24201_v11  ;;  %13802 = vmatprep.subr.bf16.mxu0 %v24201_v11  ;;  %v13749_v24 = vpack.c.bf16 %v6620_v38, %v6619_v10  ;;  %v12168_v15 = vld [vmem:[%s24026_s7 + $0x258] sm:$0xff]  ;;  %v12143_v59 = vld [vmem:[%s24026_s7 + $0x1a0] sm:$0xff]  ;;  %v12144_v61 = vld [vmem:[%s24026_s7 + $0x1a8] sm:$0xff] }
 0x4e7   :  { %v13752_v60 = vpack.c.bf16 %v6622_v57, %v6621_v55  ;;  %v13755_v8 = vpack.c.bf16 %v6624_v5, %v6623_v23  ;;  %v13758_v52 = vpack.c.bf16 %v6626_v19, %v6625_v26  ;;  %v13761_v43 = vpack.c.bf16 %v6628_v42, %v6627_v29  ;;  %v12170_v63 = vld [vmem:[%s24026_s7 + $0x268] sm:$0xff]  ;;  %v12171_v27 = vld [vmem:[%s24026_s7 + $0x270] sm:$0xff]  ;;  %v12146_v49 = vld [vmem:[%s24026_s7 + $0x1b8] sm:$0xff] }
 0x4e8   :  { %v6477_v22 = vadd.f32 %v6476_v12, %v6475_v56  ;;  %v13764_v7 = vpack.c.bf16 %v6630_v1, %v6629_v32  ;;  %v13767_v58 = vpack.c.bf16 %v6632_v35, %v6631_v21  ;;  %v13806_v2 = vpack.c.bf16 %v12142_v36, %v12141_v30  ;;  %v12145_v0 = vld [vmem:[%s24026_s7 + $0x1b0] sm:$0xff]  ;;  %v12172_v39 = vld [vmem:[%s24026_s7 + $0x278] sm:$0xff]  ;;  %v12173_v4 = vld [vmem:[%s24026_s7 + $0x280] sm:$0xff] }
 0x4e9   :  { %13804 = vmatpush1.bf16.msra.mxu0 %v13803_v41  ;;  %v13842_v46 = vpack.c.bf16 %v12169_v31, %v12168_v15  ;;  %v13809_v54 = vpack.c.bf16 %v12144_v61, %v12143_v59  ;;  %v13845_v33 = vpack.c.bf16 %v12171_v27, %v12170_v63  ;;  %v13812_v50 = vpack.c.bf16 %v12146_v49, %v12145_v0  ;;  %v12147_v53 = vld [vmem:[%s24026_s7 + $0x1c0] sm:$0xff]  ;;  %v12148_v56 = vld [vmem:[%s24026_s7 + $0x1c8] sm:$0xff]  ;;  %v12175_v12 = vld [vmem:[%s24026_s7 + $0x290] sm:$0xff] }
 0x4ea   :  { %12111 = vmatprep.mubr.msk.f32.mxu1 %vm6414_vm2, %v6477_v22  ;;  %6787 = vmatprep.subr.mxu0 %v24829_v44  ;;  %v13848_v40 = vpack.c.bf16 %v12173_v4, %v12172_v39  ;;  %v13815_v22 = vpack.c.bf16 %v12148_v56, %v12147_v53  ;;  %v12149_v41 = vld [vmem:[%s24026_s7 + $0x1d0] sm:$0xff]  ;;  %v12150_v20 = vld [vmem:[%s24026_s7 + $0x1d8] sm:$0xff]  ;;  %v12152_v62 = vld [vmem:[%s24026_s7 + $0x1e8] sm:$0xff] }
 0x4eb   :  { %6603 = vmatmul.mubr.f32.vlgmr.msra.gmra.mrb[24].mxu1 %v6413_v17  ;;  %v12174_v17 = vld [vmem:[%s24026_s7 + $0x288] sm:$0xff]  ;;  %v12176_v6 = vld [vmem:[%s24026_s7 + $0x298] sm:$0xff]  ;;  %v13818_v34 = vpack.c.bf16 %v12150_v20, %v12149_v41  ;;  %v12161_v30 = vld [vmem:[%s24026_s7 + $0x230] sm:$0xff] }
 0x4ec   :  { %13735 = vmatpush1.bf16.msra.mxu1 %v13734_v9  ;;  %v13851_v9 = vpack.c.bf16 %v12175_v12, %v12174_v17  ;;  %v12178_v37 = vld [vmem:[%s24026_s7 + $0x2a8] sm:$0xff]  ;;  %v12154_v10 = vld [vmem:[%s24026_s7 + $0x1f8] sm:$0xff]  ;;  %v12189_v31 = vld [vmem:[%s24026_s7 + $0x300] sm:$0xff] }
 0x4ed   :  { %13736 = vmatprep.subr.bf16.mxu1 %v24201_v11  ;;  %12139 = vmatpush1.msk.msra.mxu0 %vm6531_vm3, %v12138_v13  ;;  %v12180_v38 = vld [vmem:[%s24026_s7 + $0x2b8] sm:$0xff]  ;;  %v12156_v23 = vld [vmem:[%s24026_s7 + $0x208] sm:$0xff]  ;;  %v12163_v59 = vld [vmem:[%s24026_s7 + $0x240] sm:$0xff] }
 0x4ee   :  { %13841 = vmatprep.subr.bf16.mxu0 %v24201_v11  ;;  %v12182_v5 = vld [vmem:[%s24026_s7 + $0x2c8] sm:$0xff]  ;;  %v12158_v29 = vld [vmem:[%s24026_s7 + $0x218] sm:$0xff]  ;;  %v12191_v63 = vld [vmem:[%s24026_s7 + $0x310] sm:$0xff] }
 0x4ef   :  { %v12184_v42 = vld [vmem:[%s24026_s7 + $0x2d8] sm:$0xff]  ;;  %v12160_v21 = vld [vmem:[%s24026_s7 + $0x228] sm:$0xff]  ;;  %v7039_v39 = vld [vmem:[%s24027_s8 + $0xd0] sm:$0xff] }
 0x4f0   :  { %13738 = vmatpush1.bf16.msra.mxu1 %v13737_v16  ;;  %v12177_v16 = vld [vmem:[%s24026_s7 + $0x2a0] sm:$0xff]  ;;  %v12186_v35 = vld [vmem:[%s24026_s7 + $0x2e8] sm:$0xff]  ;;  %v12162_v36 = vld [vmem:[%s24026_s7 + $0x238] sm:$0xff] }
 0x4f1   :  { %13739 = vmatprep.subr.bf16.mxu1 %v24201_v11  ;;  %v13854_v3 = vpack.c.bf16 %v12177_v16, %v12176_v6  ;;  %v12188_v15 = vld [vmem:[%s24026_s7 + $0x2f8] sm:$0xff]  ;;  %v12190_v61 = vld [vmem:[%s24026_s7 + $0x308] sm:$0xff]  ;;  %v7015_v12 = vld [vmem:[%s24027_s8 + $0x10] sm:$0xff] }
 0x4f2   :  { %v12192_v0 = vld [vmem:[%s24026_s7 + $0x318] sm:$0xf]  ;;  %v7014_v49 = vld [vmem:[%s24027_s8 + $0x8] sm:$0xff]  ;;  %v7089_v20 = vld [vmem:[%s24027_s8 + $0x260] sm:$0xff] }
 0x4f3   :  { %v7016_v4 = vld [vmem:[%s24027_s8 + $0x18] sm:$0xff]  ;;  %v7038_v53 = vld [vmem:[%s24027_s8 + $0xc8] sm:$0xff]  ;;  %v7091_v16 = vld [vmem:[%s24027_s8 + $0x270] sm:$0xff] }
 0x4f4   :  { %13741 = vmatpush1.bf16.msra.mxu1 %v13740_v28  ;;  %v12151_v28 = vld [vmem:[%s24026_s7 + $0x1e0] sm:$0xff]  ;;  %v7066_v6 = vld [vmem:[%s24027_s8 + $0x1a8] sm:$0xff] }
 0x4f5   :  { %13742 = vmatprep.subr.bf16.mxu1 %v24201_v11  ;;  %v13821_v18 = vpack.c.bf16 %v12152_v62, %v12151_v28  ;;  %v7063_v28 = vld [vmem:[%s24027_s8 + $0x190] sm:$0xff]  ;;  %v7088_v62 = vld [vmem:[%s24027_s8 + $0x258] sm:$0xff] }
 0x4f8   :  { %13744 = vmatpush1.bf16.msra.mxu1 %v13743_v14  ;;  %v12179_v14 = vld [vmem:[%s24026_s7 + $0x2b0] sm:$0xff] }
 0x4f9   :  { %13745 = vmatprep.subr.bf16.mxu1 %v24201_v11  ;;  %v13857_v47 = vpack.c.bf16 %v12179_v14, %v12178_v37  ;;  %v7065_v37 = vld [vmem:[%s24027_s8 + $0x1a0] sm:$0xff]  ;;  %v21407_v14 = vpack.c.bf16 %v7088_v62, %v7063_v28  ;;  %v7071_v28 = vld [vmem:[%s24027_s8 + $0x1d0] sm:$0xff]  ;;  %v7096_v62 = vld [vmem:[%s24027_s8 + $0x298] sm:$0xff] }
 0x4fc   :  { %13747 = vmatpush1.bf16.msra.mxu1 %v13746_v25  ;;  %v12153_v25 = vld [vmem:[%s24026_s7 + $0x1f0] sm:$0xff] }
 0x4fd   :  { %13748 = vmatprep.subr.bf16.mxu1 %v24201_v11  ;;  %v13824_v55 = vpack.c.bf16 %v12154_v10, %v12153_v25  ;;  %v7139_v25 = vld [vmem:[%s24027_s8 + $0x3f0] sm:$0xff] }
 0x500   :  { %13750 = vmatpush1.bf16.msra.mxu1 %v13749_v24  ;;  %v12181_v24 = vld [vmem:[%s24026_s7 + $0x2c0] sm:$0xff] }
 0x501   :  { %13751 = vmatprep.subr.bf16.mxu1 %v24201_v11  ;;  %v13860_v57 = vpack.c.bf16 %v12181_v24, %v12180_v38  ;;  %v7116_v24 = vld [vmem:[%s24027_s8 + $0x338] sm:$0xff] }
 0x504   :  { %13753 = vmatpush1.bf16.msra.mxu1 %v13752_v60  ;;  %v12155_v60 = vld [vmem:[%s24026_s7 + $0x200] sm:$0xff] }
 0x505   :  { %13754 = vmatprep.subr.bf16.mxu1 %v24201_v11  ;;  %v13827_v26 = vpack.c.bf16 %v12156_v23, %v12155_v60  ;;  %v7138_v23 = vld [vmem:[%s24027_s8 + $0x3e8] sm:$0xff] }
 0x508   :  { %13756 = vmatpush1.bf16.msra.mxu1 %v13755_v8  ;;  %v12183_v8 = vld [vmem:[%s24026_s7 + $0x2d0] sm:$0xff] }
 0x509   :  { %13757 = vmatprep.subr.bf16.mxu1 %v24201_v11  ;;  %v13863_v19 = vpack.c.bf16 %v12183_v8, %v12182_v5  ;;  %v7115_v5 = vld [vmem:[%s24027_s8 + $0x330] sm:$0xff]  ;;  %v7140_v8 = vld [vmem:[%s24027_s8 + $0x3f8] sm:$0xff] }
 0x50c   :  { %13759 = vmatpush1.bf16.msra.mxu1 %v13758_v52  ;;  %v12157_v52 = vld [vmem:[%s24026_s7 + $0x210] sm:$0xff] }
 0x50d   :  { %13760 = vmatprep.subr.bf16.mxu1 %v24201_v11  ;;  %v13830_v32 = vpack.c.bf16 %v12158_v29, %v12157_v52  ;;  %v21457_v52 = vld [vmem:[%s24027_s8 + $0x4b8] sm:$0x1]  ;;  %v21462_v29 = vld [vmem:[%s24027_s8 + $0x4c8] sm:$0x1] }
 0x510   :  { %13762 = vmatpush1.bf16.msra.mxu1 %v13761_v43  ;;  %v12185_v43 = vld [vmem:[%s24026_s7 + $0x2e0] sm:$0xff] }
 0x511   :  { %13763 = vmatprep.subr.bf16.mxu1 %v24201_v11  ;;  %v13866_v1 = vpack.c.bf16 %v12185_v43, %v12184_v42  ;;  %v7018_v42 = vld [vmem:[%s24027_s8 + $0x28] sm:$0xff]  ;;  %v21474_v43 = vld [vmem:[%s24027_s8 + $0x4b0] sm:$0x1] }
 0x514   :  { %13765 = vmatpush1.bf16.msra.mxu1 %v13764_v7  ;;  %v12159_v7 = vld [vmem:[%s24026_s7 + $0x220] sm:$0xff] }
 0x515   :  { %13766 = vmatprep.subr.bf16.mxu1 %v24201_v11 }
 0x518   :  { %13768 = vmatpush1.bf16.msra.mxu1 %v13767_v58  ;;  %v12187_v58 = vld [vmem:[%s24026_s7 + $0x2f0] sm:$0xff] }
 0x519   :  { %6688 = vmatprep.subr.mxu1 %v24829_v44  ;;  %v13869_v13 = vpack.c.bf16 %v12187_v58, %v12186_v35  ;;  %v7047_v35 = vld [vmem:[%s24027_s8 + $0x110] sm:$0xff] }
 0x51c   :  { %12112 = vmatpush1.msk.msra.mxu1 %vm6531_vm3, %v6633_v45  ;;  %v13833_v45 = vpack.c.bf16 %v12160_v21, %v12159_v7  ;;  %v7022_v21 = vld [vmem:[%s24027_s8 + $0x48] sm:$0xff] }
 0x51d   :  { %13805 = vmatprep.subr.bf16.mxu1 %v24201_v11  ;;  %v21496_v58 = vpack.c.bf16 %v7047_v35, %v7022_v21 }
 0x5be   :  { %v21170_v48 = vpop.f32.mrb[24].mxu1 }
 0x5bf   :  { %v6606_v51 = vpop.f32.mrb[25].mxu1 }
 0x5c0   :  { %12113 = vmatprep.mubr.msk.f32.mxu1 %vm6414_vm2, %v6606_v51  ;;  %12140 = vmatprep.mubr.msk.f32.mxu0 %vm6414_vm2, %v6606_v51 }
 0x5c1   :  { %6705 = vmatmul.mubr.f32.vlgmr.msra.gmra.mrb[26].mxu1 %v21170_v48  ;;  %6804 = vmatmul.mubr.f32.vlgmr.msra.gmra.mrb[12].mxu0 %v21170_v48 }
 0x5c2   :  { %13807 = vmatpush1.bf16.msra.mxu1 %v13806_v2  ;;  %13843 = vmatpush1.bf16.msra.mxu0 %v13842_v46  ;;  %v13836_v2 = vpack.c.bf16 %v12162_v36, %v12161_v30  ;;  %v13872_v46 = vpack.c.bf16 %v12189_v31, %v12188_v15 }
 0x5c3   :  { %12167 = vmatprep.mubr.msk.f32.mxu1 %vm6414_vm2, %v6606_v51  ;;  %12194 = vmatprep.mubr.msk.f32.mxu0 %vm6414_vm2, %v6606_v51  ;;  %v12164_v51 = vld [vmem:[%s24026_s7 + $0x248] sm:$0xff] }
 0x5c4   :  { %13808 = vmatprep.subr.bf16.mxu1 %v24201_v11  ;;  %13844 = vmatprep.subr.bf16.mxu0 %v24201_v11  ;;  %v13839_v27 = vpack.c.bf16 %v12164_v51, %v12163_v59  ;;  %v7021_v59 = vld [vmem:[%s24027_s8 + $0x40] sm:$0xff]  ;;  %v7046_v51 = vld [vmem:[%s24027_s8 + $0x108] sm:$0xff] }
 0x5c6   :  { %13810 = vmatpush1.bf16.msra.mxu1 %v13809_v54  ;;  %13846 = vmatpush1.bf16.msra.mxu0 %v13845_v33  ;;  %v13875_v54 = vpack.c.bf16 %v12191_v63, %v12190_v61  ;;  %v12165_v33 = vld [vmem:[%s24026_s7 + $0x250] sm:$0xf]  ;;  %v7068_v61 = vld [vmem:[%s24027_s8 + $0x1b8] sm:$0xff]  ;;  %s15263_s7 = smov [#allocation2]  }
 0x5c7   :  { %13811 = vmatprep.subr.bf16.mxu1 %v24201_v11  ;;  %13847 = vmatprep.subr.bf16.mxu0 %v24201_v11 }
 0x5ca   :  { %13813 = vmatpush1.bf16.msra.mxu1 %v13812_v50  ;;  %13849 = vmatpush1.bf16.msra.mxu0 %v13848_v40  ;;  %v21355_v50 = vpack.c.bf16 %v7039_v39, %v7014_v49  ;;  %v7013_v40 = vld [vmem:[%s24027_s8] sm:$0xff] }
 0x5cb   :  { %13814 = vmatprep.subr.bf16.mxu1 %v24201_v11  ;;  %13850 = vmatprep.subr.bf16.mxu0 %v24201_v11  ;;  %v21368_v17 = vpack.c.bf16 %v7038_v53, %v7013_v40  ;;  %v21526_v53 = vpack.c.bf16 %v7046_v51, %v7021_v59  ;;  %v7019_v59 = vld [vmem:[%s24027_s8 + $0x30] sm:$0xff]  ;;  %v7044_v51 = vld [vmem:[%s24027_s8 + $0xf8] sm:$0xff] }
 0x5ce   :  { %13816 = vmatpush1.bf16.msra.mxu1 %v13815_v22  ;;  %13852 = vmatpush1.bf16.msra.mxu0 %v13851_v9  ;;  %v7040_v22 = vld [vmem:[%s24027_s8 + $0xd8] sm:$0xff] }
 0x5cf   :  { %13817 = vmatprep.subr.bf16.mxu1 %v24201_v11  ;;  %13853 = vmatprep.subr.bf16.mxu0 %v24201_v11  ;;  %v7064_v9 = vld [vmem:[%s24027_s8 + $0x198] sm:$0xff]  ;;  %v21380_v41 = vpack.c.bf16 %v7040_v22, %v7015_v12  ;;  %v7067_v12 = vld [vmem:[%s24027_s8 + $0x1b0] sm:$0xff] }
 0x5d0   :  { %v7092_v22 = vld [vmem:[%s24027_s8 + $0x278] sm:$0xff] }
 0x5d2   :  { %13819 = vmatpush1.bf16.msra.mxu1 %v13818_v34  ;;  %13855 = vmatpush1.bf16.msra.mxu0 %v13854_v3  ;;  %v21393_v34 = vpack.c.bf16 %v7089_v20, %v7064_v9  ;;  %v21395_v3 = vpack.c.bf16 %v7091_v16, %v7066_v6 }
 0x5d3   :  { %13820 = vmatprep.subr.bf16.mxu1 %v24201_v11  ;;  %13856 = vmatprep.subr.bf16.mxu0 %v24201_v11 }
 0x5d6   :  { %13822 = vmatpush1.bf16.msra.mxu1 %v13821_v18  ;;  %13858 = vmatpush1.bf16.msra.mxu0 %v13857_v47  ;;  %v7090_v18 = vld [vmem:[%s24027_s8 + $0x268] sm:$0xff] }
 0x5d7   :  { %13823 = vmatprep.subr.bf16.mxu1 %v24201_v11  ;;  %13859 = vmatprep.subr.bf16.mxu0 %v24201_v11  ;;  %v7114_v47 = vld [vmem:[%s24027_s8 + $0x328] sm:$0xff]  ;;  %v21420_v10 = vpack.c.bf16 %v7090_v18, %v7065_v37  ;;  %v7143_v18 = vld [vmem:[%s24027_s8 + $0x410] sm:$0xff] }
 0x5d8   :  { %v21422_v38 = vpack.c.bf16 %v7139_v25, %v7114_v47  ;;  %v7118_v37 = vld [vmem:[%s24027_s8 + $0x348] sm:$0xff]  ;;  %v7147_v25 = vld [vmem:[%s24027_s8 + $0x430] sm:$0xff] }
 0x5d9   :  { %v7122_v47 = vld [vmem:[%s24027_s8 + $0x368] sm:$0xff] }
 0x5da   :  { %13825 = vmatpush1.bf16.msra.mxu1 %v13824_v55  ;;  %13861 = vmatpush1.bf16.msra.mxu0 %v13860_v57  ;;  %v7141_v55 = vld [vmem:[%s24027_s8 + $0x400] sm:$0xff] }
 0x5db   :  { %13826 = vmatprep.subr.bf16.mxu1 %v24201_v11  ;;  %13862 = vmatprep.subr.bf16.mxu0 %v24201_v11  ;;  %v7113_v57 = vld [vmem:[%s24027_s8 + $0x320] sm:$0xff]  ;;  %v21433_v60 = vpack.c.bf16 %v7141_v55, %v7116_v24  ;;  %v21566_v24 = vpack.c.bf16 %v7092_v22, %v7067_v12  ;;  %v21568_v55 = vpack.c.bf16 %v7096_v62, %v7071_v28  ;;  %v7094_v22 = vld [vmem:[%s24027_s8 + $0x288] sm:$0xff] }
 0x5dc   :  { %v7069_v12 = vld [vmem:[%s24027_s8 + $0x1c0] sm:$0xff] }
 0x5dd   :  { %24831 = vst [vmem:[#allocation113_spill] sm:$0xff] %v21568_v55 }
 0x5de   :  { %13828 = vmatpush1.bf16.msra.mxu1 %v13827_v26  ;;  %13864 = vmatpush1.bf16.msra.mxu0 %v13863_v19  ;;  %v21445_v26 = vpack.c.bf16 %v7138_v23, %v7113_v57  ;;  %v21449_v19 = vpack.c.bf16 %v7140_v8, %v7115_v5  ;;  %v7117_v57 = vld [vmem:[%s24027_s8 + $0x340] sm:$0xff]  ;;  %v21575_v23 = vpack.c.bf16 %v7143_v18, %v7118_v37  ;;  %v7142_v8 = vld [vmem:[%s24027_s8 + $0x408] sm:$0xff]  ;;  %v7075_v37 = vld [vmem:[%s24027_s8 + $0x1f0] sm:$0xff] }
 0x5df   :  { %13829 = vmatprep.subr.bf16.mxu1 %v24201_v11  ;;  %13865 = vmatprep.subr.bf16.mxu0 %v24201_v11  ;;  %v21577_v5 = vpack.c.bf16 %v7147_v25, %v7122_v47  ;;  %v21592_v21 = vpack.c.bf16 %v7142_v8, %v7117_v57  ;;  %v7100_v18 = vld [vmem:[%s24027_s8 + $0x2b8] sm:$0xff]  ;;  %v7145_v25 = vld [vmem:[%s24027_s8 + $0x420] sm:$0xff]  ;;  %v7126_v57 = vld [vmem:[%s24027_s8 + $0x388] sm:$0xff] }
 0x5e0   :  { %v7120_v47 = vld [vmem:[%s24027_s8 + $0x358] sm:$0xff]  ;;  %v7151_v8 = vld [vmem:[%s24027_s8 + $0x450] sm:$0xff] }
 0x5e1   :  { %24832 = vst [vmem:[#allocation30_spill] sm:$0xff] %v21577_v5 }
 0x5e2   :  { %13831 = vmatpush1.bf16.msra.mxu1 %v13830_v32  ;;  %13867 = vmatpush1.bf16.msra.mxu0 %v13866_v1  ;;  %v21479_v32 = vld [vmem:[%s24027_s8 + $0x4c0] sm:$0x1]  ;;  %v7043_v1 = vld [vmem:[%s24027_s8 + $0xf0] sm:$0xff] }
 0x5e3   :  { %13832 = vmatprep.subr.bf16.mxu1 %v24201_v11  ;;  %13868 = vmatprep.subr.bf16.mxu0 %v24201_v11  ;;  %v21488_v7 = vpack.c.bf16 %v7043_v1, %v7018_v42  ;;  %v7121_v42 = vld [vmem:[%s24027_s8 + $0x360] sm:$0xff]  ;;  %v7146_v1 = vld [vmem:[%s24027_s8 + $0x428] sm:$0xff] }
 0x5e4   :  { %v21594_v35 = vpack.c.bf16 %v7146_v1, %v7121_v42  ;;  %v21708_v42 = vpack.c.bf16 %v7094_v22, %v7069_v12  ;;  %v21710_v1 = vpack.c.bf16 %v7100_v18, %v7075_v37  ;;  %v7030_v12 = vld [vmem:[%s24027_s8 + $0x88] sm:$0xff]  ;;  %v21762_v22 = vld [vmem:[%s24027_s8 + $0x4e0] sm:$0x1]  ;;  %v21767_v37 = vld [vmem:[%s24027_s8 + $0x510] sm:$0x1] }
 0x5e5   :  { %24843 = vst [vmem:[#allocation119_spill] sm:$0xff] %v21767_v37  ;;  %v7055_v18 = vld [vmem:[%s24027_s8 + $0x150] sm:$0xff] }
 0x5e6   :  { %13834 = vmatpush1.bf16.msra.mxu1 %v13833_v45  ;;  %13870 = vmatpush1.bf16.msra.mxu0 %v13869_v13  ;;  %24833 = vst [vmem:[#allocation114_spill] sm:$0xff] %v21594_v35  ;;  %24839 = vst [vmem:[#allocation117_spill] sm:$0xff] %v21710_v1 }
 0x5e7   :  { %13835 = vmatprep.subr.bf16.mxu1 %v24201_v11  ;;  %13871 = vmatprep.subr.bf16.mxu0 %v24201_v11 }
 0x5ea   :  { %13837 = vmatpush1.bf16.msra.mxu1 %v13836_v2  ;;  %13873 = vmatpush1.bf16.msra.mxu0 %v13872_v46  ;;  %v7017_v2 = vld [vmem:[%s24027_s8 + $0x20] sm:$0xff]  ;;  %v7042_v46 = vld [vmem:[%s24027_s8 + $0xe8] sm:$0xff] }
 0x5eb   :  { %13838 = vmatprep.subr.bf16.mxu1 %v24201_v11  ;;  %13874 = vmatprep.subr.bf16.mxu0 %v24201_v11  ;;  %v21524_v40 = vpack.c.bf16 %v7042_v46, %v7017_v2  ;;  %v21625_v2 = vld [vmem:[%s24027_s8 + $0x4f0] sm:$0x1]  ;;  %v7105_v11 = vld [vmem:[%s24027_s8 + $0x2e0] sm:$0xff] }
 0x5ec   :  { %24835 = vst [vmem:[#allocation115_spill] sm:$0xff] %v21625_v2  ;;  %v7051_v46 = vld [vmem:[%s24027_s8 + $0x130] sm:$0xff] }
 0x5ee   :  { %13840 = vmatpush1.bf16.msra.mxu1 %v13839_v27  ;;  %13876 = vmatpush1.bf16.msra.mxu0 %v13875_v54  ;;  %v7093_v54 = vld [vmem:[%s24027_s8 + $0x280] sm:$0xff] }
 0x5ef   :  { %6886 = vmatprep.subr.mxu1 %v24829_v44  ;;  %6985 = vmatprep.subr.mxu0 %v24829_v44  ;;  %v21538_v6 = vpack.c.bf16 %v7093_v54, %v7068_v61  ;;  %v7025_v61 = vld [vmem:[%s24027_s8 + $0x60] sm:$0xff] }
 0x5f2   :  { %12166 = vmatpush1.msk.msra.mxu1 %vm6531_vm3, %v12165_v33  ;;  %12193 = vmatpush1.msk.msra.mxu0 %vm6531_vm3, %v12192_v0  ;;  %v7072_v33 = vld [vmem:[%s24027_s8 + $0x1d8] sm:$0xff]  ;;  %v7097_v0 = vld [vmem:[%s24027_s8 + $0x2a0] sm:$0xff] }
 0x5f3   :  { %6903 = vmatmul.mubr.f32.vlgmr.msra.gmra.mrb[28].mxu1 %v21170_v48  ;;  %7002 = vmatmul.mubr.f32.vlgmr.msra.gmra.mrb[14].mxu0 %v21170_v48  ;;  %v7041_v48 = vld [vmem:[%s24027_s8 + $0xe0] sm:$0xff]  ;;  %v21540_v16 = vpack.c.bf16 %v7097_v0, %v7072_v33  ;;  %v7095_v33 = vld [vmem:[%s24027_s8 + $0x290] sm:$0xff]  ;;  %v7076_v0 = vld [vmem:[%s24027_s8 + $0x1f8] sm:$0xff] }
 0x5f4   :  { %7332 = vmatprep.mubr.f32.mxu0 %v24829_v44  ;;  %7403 = vmatprep.mubr.f32.mxu1 %v24829_v44  ;;  %v21366_v56 = vpack.c.bf16 %v7041_v48, %v7016_v4 }
 0x5f5   :  { %13878 = vmatprep.subr.bf16.mxu0 %v21355_v50  ;;  %24830 = vst [vmem:[#allocation25_spill] sm:$0xff] %v21540_v16 }
 0x5f6   :  { %13890 = vmatprep.subr.bf16.mxu1 %v21366_v56  ;;  %13880 = vmatpush1.bf16.msra.mxu0 %v21368_v17 }
 0x5f7   :  { %13892 = vmatpush1.bf16.msra.mxu1 %v21380_v41  ;;  %13882 = vmatprep.subr.bf16.mxu0 %v21393_v34 }
 0x5f8   :  { %13894 = vmatprep.subr.bf16.mxu1 %v21395_v3 }
 0x5fa   :  { %13884 = vmatpush1.bf16.msra.mxu0 %v21407_v14 }
 0x5fb   :  { %13896 = vmatpush1.bf16.msra.mxu1 %v21420_v10  ;;  %13886 = vmatprep.subr.bf16.mxu0 %v21422_v38 }
 0x5fc   :  { %13898 = vmatprep.subr.bf16.mxu1 %v21433_v60 }
 0x5fe   :  { %13888 = vmatpush1.bf16.msra.mxu0 %v21445_v26 }
 0x5ff   :  { %13900 = vmatpush1.bf16.msra.mxu1 %v21449_v19  ;;  %12195 = vmatprep.subr.msk.mxu0 %vm7192_vm4, %v21457_v52 }
 0x600   :  { %12198 = vmatprep.subr.msk.mxu1 %vm7192_vm4, %v21462_v29 }
 0x602   :  { %12196 = vmatpush1.msk.msra.mxu0 %vm7192_vm4, %v21474_v43 }
 0x603   :  { %12199 = vmatpush1.msk.msra.mxu1 %vm7192_vm4, %v21479_v32  ;;  %13926 = vmatprep.subr.bf16.mxu0 %v21496_v58 }
 0x604   :  { %13902 = vmatprep.subr.bf16.mxu1 %v21488_v7 }
 0x694   :  { %v6706_v45 = vpop.f32.mrb[26].mxu1  ;;  %v6805_v13 = vpop.f32.mrb[12].mxu0 }
 0x695   :  { %v7007_v30 = vmax.f32 %v6706_v45, %v6805_v13  ;;  %v7010_v36 = vmin.f32 %v6706_v45, %v6805_v13  ;;  %v6708_v15 = vpop.f32.mrb[27].mxu1  ;;  %v6807_v31 = vpop.f32.mrb[13].mxu0  ;;  %v21601_v45 = vld [vmem:[%s24027_s8 + $0x4d8] sm:$0x1] }
 0x696   :  { %v21606_v13 = vld [vmem:[%s24027_s8 + $0x4f8] sm:$0x1]  ;;  %v7026_v15 = vld [vmem:[%s24027_s8 + $0x68] sm:$0xff]  ;;  %v21620_v31 = vld [vmem:[%s24027_s8 + $0x4d0] sm:$0x1] }
 0x697   :  { %24834 = vst [vmem:[#allocation31_spill] sm:$0xff] %v21606_v13 }
 0x6c6   :  { %v6904_v63 = vpop.f32.mrb[28].mxu1  ;;  %v7003_v27 = vpop.f32.mrb[14].mxu0 }
 0x6c7   :  { %v7008_v49 = vmax.f32 %v6904_v63, %v7003_v27  ;;  %v7011_v39 = vmin.f32 %v6904_v63, %v7003_v27  ;;  %v6906_v4 = vpop.f32.mrb[29].mxu1  ;;  %v7005_v48 = vpop.f32.mrb[15].mxu0  ;;  %v7050_v63 = vld [vmem:[%s24027_s8 + $0x128] sm:$0xff] }
 0x6c8   :  { %v7070_v27 = vld [vmem:[%s24027_s8 + $0x1c8] sm:$0xff]  ;;  %v21664_v4 = vpack.c.bf16 %v7044_v51, %v7019_v59  ;;  %v21666_v48 = vpack.c.bf16 %v7050_v63, %v7025_v61  ;;  %v7125_v59 = vld [vmem:[%s24027_s8 + $0x380] sm:$0xff] }
 0x6c9   :  { %v21534_v9 = vmax.f32 %v7007_v30, %v7008_v49  ;;  %v21536_v20 = vmin.f32 %v7010_v36, %v7011_v39  ;;  %v7020_v30 = vld [vmem:[%s24027_s8 + $0x38] sm:$0xff]  ;;  %v7045_v36 = vld [vmem:[%s24027_s8 + $0x100] sm:$0xff]  ;;  %v21662_v39 = vpack.c.bf16 %v7051_v46, %v7026_v15  ;;  %v21678_v28 = vpack.c.bf16 %v7095_v33, %v7070_v27  ;;  %v7150_v51 = vld [vmem:[%s24027_s8 + $0x448] sm:$0xff] }
 0x6ca   :  { %v21651_v54 = vpack.c.bf16 %v7045_v36, %v7020_v30  ;;  %v7101_v49 = vld [vmem:[%s24027_s8 + $0x2c0] sm:$0xff]  ;;  %24837 = vst [vmem:[#allocation116_spill] sm:$0xff] %v21666_v48  ;;  %v7119_v30 = vld [vmem:[%s24027_s8 + $0x350] sm:$0xff]  ;;  %v21717_v36 = vpack.c.bf16 %v7145_v25, %v7120_v47  ;;  %v21719_v15 = vpack.c.bf16 %v7151_v8, %v7126_v57  ;;  %v7144_v46 = vld [vmem:[%s24027_s8 + $0x418] sm:$0xff]  ;;  %v21736_v63 = vpack.c.bf16 %v7150_v51, %v7125_v59 }
 0x6cb   :  { %12197 = vmatmul.mubr.msk.f32.vlgmr.msra.gmra.mrb[16].mxu0 %vm7188_vm5, %v21534_v9  ;;  %12200 = vmatmul.mubr.msk.f32.vlgmr.msra.gmra.mrb[30].mxu1 %vm7188_vm5, %v21534_v9  ;;  %24836 = vst [vmem:[#allocation36_spill] sm:$0xff] %v21662_v39  ;;  %v21680_v62 = vpack.c.bf16 %v7101_v49, %v7076_v0  ;;  %v21734_v61 = vpack.c.bf16 %v7144_v46, %v7119_v30  ;;  %v21743_v27 = vld [vmem:[%s24027_s8 + $0x4e8] sm:$0x1]  ;;  %v21748_v33 = vld [vmem:[%s24027_s8 + $0x518] sm:$0x1]  ;;  %v7049_v49 = vld [vmem:[%s24027_s8 + $0x120] sm:$0xff] }
 0x6cc   :  { %13904 = vmatpush1.bf16.msra.mxu1 %v21524_v40  ;;  %13928 = vmatpush1.bf16.msra.mxu0 %v21526_v53  ;;  %24840 = vst [vmem:[#allocation42_spill] sm:$0xff] %v21719_v15  ;;  %24841 = vst [vmem:[#allocation118_spill] sm:$0xff] %v21736_v63  ;;  %v7024_v0 = vld [vmem:[%s24027_s8 + $0x58] sm:$0xff]  ;;  %v7023_v47 = vld [vmem:[%s24027_s8 + $0x50] sm:$0xff] }
 0x6cd   :  { %13906 = vmatprep.subr.bf16.mxu1 %v21538_v6  ;;  %13930 = vmatprep.subr.bf16.mxu0 %v21540_v16  ;;  %24838 = vst [vmem:[#allocation37_spill] sm:$0xff] %v21680_v62  ;;  %24842 = vst [vmem:[#allocation43_spill] sm:$0xff] %v21748_v33  ;;  %v7048_v25 = vld [vmem:[%s24027_s8 + $0x118] sm:$0xff]  ;;  %v7029_v57 = vld [vmem:[%s24027_s8 + $0x80] sm:$0xff]  ;;  %v21793_v46 = vpack.c.bf16 %v7049_v49, %v7024_v0 }
 0x6ce   :  { %7474 = vmatprep.mubr.f32.mxu1 %v24829_v44  ;;  %7616 = vmatprep.mubr.f32.mxu0 %v24829_v44  ;;  %v7054_v8 = vld [vmem:[%s24027_s8 + $0x148] sm:$0xff]  ;;  %v7099_v59 = vld [vmem:[%s24027_s8 + $0x2b0] sm:$0xff]  ;;  %v7080_v51 = vld [vmem:[%s24027_s8 + $0x218] sm:$0xff] }
 0x6cf   :  { %v7074_v30 = vld [vmem:[%s24027_s8 + $0x1e8] sm:$0xff]  ;;  %v7073_v0 = vld [vmem:[%s24027_s8 + $0x1e0] sm:$0xff] }
 0x6d0   :  { %13908 = vmatpush1.bf16.msra.mxu1 %v21566_v24  ;;  %13932 = vmatpush1.bf16.msra.mxu0 %v21568_v55  ;;  %v7098_v49 = vld [vmem:[%s24027_s8 + $0x2a8] sm:$0xff] }
 0x6d1   :  { %13910 = vmatprep.subr.bf16.mxu1 %v21575_v23  ;;  %13934 = vmatprep.subr.bf16.mxu0 %v21577_v5 }
 0x6d4   :  { %13912 = vmatpush1.bf16.msra.mxu1 %v21592_v21  ;;  %13936 = vmatpush1.bf16.msra.mxu0 %v21594_v35 }
 0x6d5   :  { %12201 = vmatprep.subr.msk.mxu1 %vm7192_vm4, %v21601_v45  ;;  %12207 = vmatprep.subr.msk.mxu0 %vm7192_vm4, %v21606_v13  ;;  %v7109_v13 = vld [vmem:[%s24027_s8 + $0x300] sm:$0xff] }
 0x6d8   :  { %12202 = vmatpush1.msk.msra.mxu1 %vm7192_vm4, %v21620_v31  ;;  %12208 = vmatpush1.msk.msra.mxu0 %vm7192_vm4, %v21625_v2  ;;  %v7084_v2 = vld [vmem:[%s24027_s8 + $0x238] sm:$0xff] }
 0x6d9   :  { %12203 = vmatmul.mubr.msk.f32.vlgmr.msra.gmra.mrb[32].mxu1 %vm7188_vm5, %v21534_v9  ;;  %13914 = vmatprep.subr.bf16.mxu1 %v21651_v54 }
 0x6da   :  { %12209 = vmatmul.mubr.msk.f32.vlgmr.msra.gmra.mrb[18].mxu0 %vm7188_vm5, %v21534_v9  ;;  %13950 = vmatprep.subr.bf16.mxu0 %v21662_v39 }
 0x6db   :  { %13916 = vmatpush1.bf16.msra.mxu1 %v21664_v4  ;;  %13952 = vmatpush1.bf16.msra.mxu0 %v21666_v48  ;;  %v7078_v48 = vld [vmem:[%s24027_s8 + $0x208] sm:$0xff] }
 0x6dc   :  { %13918 = vmatprep.subr.bf16.mxu1 %v21678_v28  ;;  %13954 = vmatprep.subr.bf16.mxu0 %v21680_v62 }
 0x6dd   :  { %7545 = vmatprep.mubr.f32.mxu1 %v24829_v44  ;;  %7758 = vmatprep.mubr.f32.mxu0 %v24829_v44 }
 0x6df   :  { %13920 = vmatpush1.bf16.msra.mxu1 %v21708_v42  ;;  %13956 = vmatpush1.bf16.msra.mxu0 %v21710_v1  ;;  %v21808_v1 = vpack.c.bf16 %v7054_v8, %v7029_v57  ;;  %v7124_v57 = vld [vmem:[%s24027_s8 + $0x378] sm:$0xff]  ;;  %v7130_v8 = vld [vmem:[%s24027_s8 + $0x3a8] sm:$0xff] }
 0x6e0   :  { %13922 = vmatprep.subr.bf16.mxu1 %v21717_v36  ;;  %13958 = vmatprep.subr.bf16.mxu0 %v21719_v15  ;;  %v21806_v15 = vpack.c.bf16 %v7048_v25, %v7023_v47  ;;  %v7079_v47 = vld [vmem:[%s24027_s8 + $0x210] sm:$0xff]  ;;  %v7104_v25 = vld [vmem:[%s24027_s8 + $0x2d8] sm:$0xff] }
 0x6e1   :  { %24845 = vst [vmem:[#allocation120_spill] sm:$0xff] %v21808_v1 }
 0x6e3   :  { %13924 = vmatpush1.bf16.msra.mxu1 %v21734_v61  ;;  %13960 = vmatpush1.bf16.msra.mxu0 %v21736_v63  ;;  %v21804_v63 = vpack.c.bf16 %v7055_v18, %v7030_v12  ;;  %v21820_v12 = vpack.c.bf16 %v7099_v59, %v7074_v30  ;;  %v21822_v18 = vpack.c.bf16 %v7105_v11, %v7080_v51  ;;  %v7149_v11 = vld [vmem:[%s24027_s8 + $0x440] sm:$0xff]  ;;  %v7155_v30 = vld [vmem:[%s24027_s8 + $0x470] sm:$0xff] }
 0x6e4   :  { %12204 = vmatprep.subr.msk.mxu1 %vm7192_vm4, %v21743_v27  ;;  %12213 = vmatprep.subr.msk.mxu0 %vm7192_vm4, %v21748_v33  ;;  %v21850_v59 = vpack.c.bf16 %v7098_v49, %v7073_v0  ;;  %v21852_v51 = vpack.c.bf16 %v7104_v25, %v7079_v47  ;;  %v21859_v33 = vpack.c.bf16 %v7149_v11, %v7124_v57  ;;  %v7129_v0 = vld [vmem:[%s24027_s8 + $0x3a0] sm:$0xff]  ;;  %v7154_v49 = vld [vmem:[%s24027_s8 + $0x468] sm:$0xff]  ;;  %v21890_v11 = vld [vmem:[%s24027_s8 + $0x538] sm:$0x1] }
 0x6e5   :  { %24844 = vst [vmem:[#allocation48_spill] sm:$0xff] %v21804_v63  ;;  %24846 = vst [vmem:[#allocation54_spill] sm:$0xff] %v21822_v18  ;;  %v21861_v62 = vpack.c.bf16 %v7155_v30, %v7130_v8  ;;  %v21878_v25 = vpack.c.bf16 %v7154_v49, %v7129_v0  ;;  %v21885_v57 = vld [vmem:[%s24027_s8 + $0x508] sm:$0x1]  ;;  %v21904_v30 = vld [vmem:[%s24027_s8 + $0x500] sm:$0x1] }
 0x6e6   :  { %24847 = vst [vmem:[#allocation121_spill] sm:$0xff] %v21852_v51  ;;  %24850 = vst [vmem:[#allocation60_spill] sm:$0xff] %v21890_v11  ;;  %v7034_v8 = vld [vmem:[%s24027_s8 + $0xa8] sm:$0xff]  ;;  %v21909_v0 = vld [vmem:[%s24027_s8 + $0x530] sm:$0x1] }
 0x6e7   :  { %12205 = vmatpush1.msk.msra.mxu1 %vm7192_vm4, %v21762_v22  ;;  %12214 = vmatpush1.msk.msra.mxu0 %vm7192_vm4, %v21767_v37  ;;  %v7123_v37 = vld [vmem:[%s24027_s8 + $0x370] sm:$0xff]  ;;  %24848 = vst [vmem:[#allocation55_spill] sm:$0xff] %v21861_v62  ;;  %24849 = vst [vmem:[#allocation122_spill] sm:$0xff] %v21878_v25 }
 0x6e8   :  { %12206 = vmatmul.mubr.msk.f32.vlgmr.msra.gmra.mrb[34].mxu1 %vm7188_vm5, %v21534_v9  ;;  %13938 = vmatprep.subr.bf16.mxu1 %v21793_v46  ;;  %24851 = vst [vmem:[#allocation123_spill] sm:$0xff] %v21909_v0  ;;  %v7059_v49 = vld [vmem:[%s24027_s8 + $0x170] sm:$0xff] }
 0x6e9   :  { %12215 = vmatmul.mubr.msk.f32.vlgmr.msra.gmra.mrb[20].mxu0 %vm7188_vm5, %v21534_v9  ;;  %13974 = vmatprep.subr.bf16.mxu0 %v21804_v63  ;;  %v7058_v63 = vld [vmem:[%s24027_s8 + $0x168] sm:$0xff]  ;;  %v21946_v35 = vpack.c.bf16 %v7059_v49, %v7034_v8 }
 0x6ea   :  { %13940 = vmatpush1.bf16.msra.mxu1 %v21806_v15  ;;  %13976 = vmatpush1.bf16.msra.mxu0 %v21808_v1  ;;  %v7148_v1 = vld [vmem:[%s24027_s8 + $0x438] sm:$0xff] }
 0x6eb   :  { %13942 = vmatprep.subr.bf16.mxu1 %v21820_v12  ;;  %13978 = vmatprep.subr.bf16.mxu0 %v21822_v18  ;;  %v21876_v47 = vpack.c.bf16 %v7148_v1, %v7123_v37  ;;  %v7028_v1 = vld [vmem:[%s24027_s8 + $0x78] sm:$0xff]  ;;  %v7053_v37 = vld [vmem:[%s24027_s8 + $0x140] sm:$0xff]  ;;  %24852 = vst [vmem:[#allocation61_spill] sm:$0xff] %v21946_v35 }
 0x6ec   :  { %7687 = vmatprep.mubr.f32.mxu1 %v24829_v44  ;;  %7900 = vmatprep.mubr.f32.mxu0 %v24829_v44  ;;  %v7033_v18 = vld [vmem:[%s24027_s8 + $0xa0] sm:$0xff]  ;;  %v21935_v39 = vpack.c.bf16 %v7053_v37, %v7028_v1  ;;  %v7102_v37 = vld [vmem:[%s24027_s8 + $0x2c8] sm:$0xff] }
 0x6ed   :  { %v21950_v55 = vpack.c.bf16 %v7058_v63, %v7033_v18  ;;  %v7077_v1 = vld [vmem:[%s24027_s8 + $0x200] sm:$0xff]  ;;  %v7083_v63 = vld [vmem:[%s24027_s8 + $0x230] sm:$0xff]  ;;  %v7108_v18 = vld [vmem:[%s24027_s8 + $0x2f8] sm:$0xff] }
 0x6ee   :  { %13944 = vmatpush1.bf16.msra.mxu1 %v21850_v59  ;;  %13980 = vmatpush1.bf16.msra.mxu0 %v21852_v51  ;;  %v7052_v51 = vld [vmem:[%s24027_s8 + $0x138] sm:$0xff]  ;;  %v21994_v49 = vpack.c.bf16 %v7108_v18, %v7083_v63 }
 0x6ef   :  { %13946 = vmatprep.subr.bf16.mxu1 %v21859_v33  ;;  %13982 = vmatprep.subr.bf16.mxu0 %v21861_v62  ;;  %v7027_v62 = vld [vmem:[%s24027_s8 + $0x70] sm:$0xff]  ;;  %24853 = vst [vmem:[#allocation124_spill] sm:$0xff] %v21950_v55 }
 0x6f0   :  { %v21948_v5 = vpack.c.bf16 %v7052_v51, %v7027_v62  ;;  %v21964_v62 = vpack.c.bf16 %v7109_v13, %v7084_v2  ;;  %v7128_v51 = vld [vmem:[%s24027_s8 + $0x398] sm:$0xff]  ;;  %v7153_v13 = vld [vmem:[%s24027_s8 + $0x460] sm:$0xff]  ;;  %v7134_v2 = vld [vmem:[%s24027_s8 + $0x3c8] sm:$0xff]  ;;  %24855 = vst [vmem:[#allocation125_spill] sm:$0xff] %v21994_v49 }
 0x6f2   :  { %13948 = vmatpush1.bf16.msra.mxu1 %v21876_v47  ;;  %13984 = vmatpush1.bf16.msra.mxu0 %v21878_v25  ;;  %v7103_v25 = vld [vmem:[%s24027_s8 + $0x2d0] sm:$0xff]  ;;  %24854 = vst [vmem:[#allocation66_spill] sm:$0xff] %v21964_v62 }
 0x6f3   :  { %12210 = vmatprep.subr.msk.mxu1 %vm7192_vm4, %v21885_v57  ;;  %12219 = vmatprep.subr.msk.mxu0 %vm7192_vm4, %v21890_v11  ;;  %v21962_v8 = vpack.c.bf16 %v7103_v25, %v7078_v48  ;;  %v7159_v48 = vld [vmem:[%s24027_s8 + $0x490] sm:$0xff]  ;;  %v21992_v25 = vpack.c.bf16 %v7102_v37, %v7077_v1  ;;  %v22001_v11 = vpack.c.bf16 %v7153_v13, %v7128_v51  ;;  %v7133_v1 = vld [vmem:[%s24027_s8 + $0x3c0] sm:$0xff]  ;;  %v7158_v37 = vld [vmem:[%s24027_s8 + $0x488] sm:$0xff] }
 0x6f4   :  { %v22003_v16 = vpack.c.bf16 %v7159_v48, %v7134_v2  ;;  %v22020_v18 = vpack.c.bf16 %v7158_v37, %v7133_v1  ;;  %v22027_v51 = vld [vmem:[%s24027_s8 + $0x528] sm:$0x1]  ;;  %v22032_v13 = vld [vmem:[%s24027_s8 + $0x558] sm:$0x1]  ;;  %v22043_v2 = vld [vmem:[%s24027_s8 + $0x520] sm:$0x1] }
 0x6f5   :  { %24859 = vst [vmem:[#allocation127_spill] sm:$0xff] %v22027_v51  ;;  %24860 = vst [vmem:[#allocation73_spill] sm:$0xff] %v22032_v13  ;;  %v7031_v48 = vld [vmem:[%s24027_s8 + $0x90] sm:$0xff]  ;;  %v7056_v1 = vld [vmem:[%s24027_s8 + $0x158] sm:$0xff] }
 0x6f6   :  { %12211 = vmatpush1.msk.msra.mxu1 %vm7192_vm4, %v21904_v30  ;;  %12220 = vmatpush1.msk.msra.mxu0 %vm7192_vm4, %v21909_v0  ;;  %v7127_v0 = vld [vmem:[%s24027_s8 + $0x390] sm:$0xff]  ;;  %24856 = vst [vmem:[#allocation67_spill] sm:$0xff] %v22003_v16  ;;  %24858 = vst [vmem:[#allocation72_spill] sm:$0xff] %v22020_v18  ;;  %v7037_v37 = vld [vmem:[%s24027_s8 + $0xc0] sm:$0xff] }
 0x6f7   :  { %12212 = vmatmul.mubr.msk.f32.vlgmr.msra.gmra.mrb[36].mxu1 %vm7188_vm5, %v21534_v9  ;;  %13962 = vmatprep.subr.bf16.mxu1 %v21935_v39  ;;  %24861 = vst [vmem:[#allocation128_spill] sm:$0xff] %v22043_v2 }
 0x6f8   :  { %12221 = vmatmul.mubr.msk.f32.vlgmr.msra.gmra.mrb[22].mxu0 %vm7188_vm5, %v21534_v9  ;;  %13998 = vmatprep.subr.bf16.mxu0 %v21946_v35  ;;  %v7107_v35 = vld [vmem:[%s24027_s8 + $0x2f0] sm:$0xff] }
 0x6f9   :  { %13964 = vmatpush1.bf16.msra.mxu1 %v21948_v5  ;;  %14000 = vmatpush1.bf16.msra.mxu0 %v21950_v55  ;;  %v7152_v55 = vld [vmem:[%s24027_s8 + $0x458] sm:$0xff] }
 0x6fa   :  { %13966 = vmatprep.subr.bf16.mxu1 %v21962_v8  ;;  %14002 = vmatprep.subr.bf16.mxu0 %v21964_v62  ;;  %v22018_v63 = vpack.c.bf16 %v7152_v55, %v7127_v0  ;;  %v7032_v55 = vld [vmem:[%s24027_s8 + $0x98] sm:$0xff]  ;;  %v7057_v0 = vld [vmem:[%s24027_s8 + $0x160] sm:$0xff]  ;;  %v7082_v62 = vld [vmem:[%s24027_s8 + $0x228] sm:$0xff] }
 0x6fb   :  { %7829 = vmatprep.mubr.f32.mxu1 %v24829_v44  ;;  %8042 = vmatprep.mubr.f32.mxu0 %v24829_v44 }
 0x6fc   :  { %24857 = vst [vmem:[#allocation126_spill] sm:$0xff] %v22018_v63 }
 0x6fd   :  { %13968 = vmatpush1.bf16.msra.mxu1 %v21992_v25  ;;  %14004 = vmatpush1.bf16.msra.mxu0 %v21994_v49  ;;  %v22068_v49 = vpack.c.bf16 %v7057_v0, %v7032_v55  ;;  %v22087_v55 = vpack.c.bf16 %v7107_v35, %v7082_v62  ;;  %v7106_v0 = vld [vmem:[%s24027_s8 + $0x2e8] sm:$0xff]  ;;  %v7132_v35 = vld [vmem:[%s24027_s8 + $0x3b8] sm:$0xff]  ;;  %v7157_v62 = vld [vmem:[%s24027_s8 + $0x480] sm:$0xff] }
 0x6fe   :  { %13970 = vmatprep.subr.bf16.mxu1 %v22001_v11  ;;  %14006 = vmatprep.subr.bf16.mxu0 %v22003_v16  ;;  %v7062_v16 = vld [vmem:[%s24027_s8 + $0x188] sm:$0xff] }
 0x6ff   :  { %24863 = vst [vmem:[#allocation129_spill] sm:$0xff] %v22068_v49 }
 0x701   :  { %13972 = vmatpush1.bf16.msra.mxu1 %v22018_v63  ;;  %14008 = vmatpush1.bf16.msra.mxu0 %v22020_v18  ;;  %v22066_v18 = vld [vmem:[%s24027_s8 + $0x550] sm:$0x1]  ;;  %v22076_v63 = vpack.c.bf16 %v7056_v1, %v7031_v48  ;;  %v7112_v48 = vld [vmem:[%s24027_s8 + $0x318] sm:$0xff]  ;;  %v24866_v1 = vmov 0.0|0.0  }
 0x702   :  { %12216 = vmatprep.subr.msk.mxu1 %vm7192_vm4, %v22027_v51  ;;  %12225 = vmatprep.subr.msk.mxu0 %vm7192_vm4, %v22032_v13  ;;  %24862 = vst [vmem:[#allocation78_spill] sm:$0xff] %v22066_v18  ;;  %v22078_v51 = vpack.c.bf16 %v7062_v16, %v7037_v37  ;;  %v7081_v13 = vld [vmem:[%s24027_s8 + $0x220] sm:$0xff]  ;;  %v7087_v16 = vld [vmem:[%s24027_s8 + $0x250] sm:$0xff] }
 0x703   :  { %24864 = vst [vmem:[#allocation98_spill] sm:$0xff] %v22076_v63  ;;  %v22112_v37 = vpack.c.bf16 %v7106_v0, %v7081_v13  ;;  %v7137_v13 = vld [vmem:[%s24027_s8 + $0x3e0] sm:$0xff]  ;;  %v7162_v0 = vld [vmem:[%s24027_s8 + $0x4a8] sm:$0xff] }
 0x704   :  { %24865 = vst [vmem:[#allocation84_spill] sm:$0xff] %v22078_v51 }
 0x705   :  { %12217 = vmatpush1.msk.msra.mxu1 %vm7192_vm4, %v22043_v2  ;;  %12226 = vmatpush1.msk.msra.mxu0 %vm7192_vm4, %v22066_v18  ;;  %v22114_v18 = vpack.c.bf16 %v7112_v48, %v7087_v16  ;;  %v22121_v2 = vpack.c.bf16 %v7157_v62, %v7132_v35  ;;  %v22139_v48 = vpack.c.bf16 %v7162_v0, %v7137_v13  ;;  %v22146_v35 = vld [vmem:[%s24027_s8 + $0x548] sm:$0x1]  ;;  %v7036_v62 = vld [vmem:[%s24027_s8 + $0xb8] sm:$0xff]  ;;  %v7035_v13 = vld [vmem:[%s24027_s8 + $0xb0] sm:$0xff] }
 0x706   :  { %12218 = vmatmul.mubr.msk.f32.vlgmr.msra.gmra.mrb[38].mxu1 %vm7188_vm5, %v21534_v9  ;;  %13986 = vmatprep.subr.bf16.mxu1 %v22068_v49  ;;  %v7131_v49 = vld [vmem:[%s24027_s8 + $0x3b0] sm:$0xff]  ;;  %24870 = vst [vmem:[#allocation90_spill] sm:$0xff] %v22146_v35  ;;  %v7060_v0 = vld [vmem:[%s24027_s8 + $0x178] sm:$0xff] }
 0x707   :  { %12227 = vmatmul.mubr.msk.f32.vlgmr.msra.gmra.mrb[24].mxu0 %vm7188_vm5, %v21534_v9  ;;  %14021 = vmatprep.subr.bf16.mxu0 %v24866_v1  ;;  %24867 = vst [vmem:[#allocation99_spill] sm:$0xff] %v22114_v18  ;;  %24869 = vst [vmem:[#allocation100_spill] sm:$0xff] %v22139_v48 }
 0x708   :  { %13988 = vmatpush1.bf16.msra.mxu1 %v22076_v63  ;;  %14023 = vmatpush3.bf16.msra.mxu0 %v22078_v51  ;;  %v7156_v63 = vld [vmem:[%s24027_s8 + $0x478] sm:$0xff]  ;;  %v7086_v51 = vld [vmem:[%s24027_s8 + $0x248] sm:$0xff] }
 0x709   :  { %13990 = vmatprep.subr.bf16.mxu1 %v22087_v55  ;;  %14024 = vmatprep.subr.bf16.mxu0 %v24866_v1  ;;  %v22137_v16 = vpack.c.bf16 %v7156_v63, %v7131_v49  ;;  %v7061_v49 = vld [vmem:[%s24027_s8 + $0x180] sm:$0xff] }
 0x70a   :  { %7971 = vmatprep.mubr.f32.mxu1 %v24829_v44  ;;  %12827 = vmatprep.mubr.msk.f32.mxu0 %vm15261_vm1, %v24829_v44  ;;  %v22159_v63 = vld [vmem:[%s24027_s8 + $0x540] sm:$0x1] }
 0x70b   :  { %24868 = vst [vmem:[#allocation85_spill] sm:$0xff] %v22137_v16 }
 0x70c   :  { %13992 = vmatpush1.bf16.msra.mxu1 %v22112_v37  ;;  %14026 = vmatpush3.bf16.msra.mxu0 %v22114_v18  ;;  %v22175_v18 = vpack.c.bf16 %v7061_v49, %v7036_v62  ;;  %v7085_v62 = vld [vmem:[%s24027_s8 + $0x240] sm:$0xff]  ;;  %v7110_v49 = vld [vmem:[%s24027_s8 + $0x308] sm:$0xff] }
 0x70d   :  { %13994 = vmatprep.subr.bf16.mxu1 %v22121_v2  ;;  %14027 = vmatprep.subr.bf16.mxu0 %v24866_v1  ;;  %v7111_v1 = vld [vmem:[%s24027_s8 + $0x310] sm:$0xff] }
 0x710   :  { %13996 = vmatpush1.bf16.msra.mxu1 %v22137_v16  ;;  %14029 = vmatpush3.bf16.msra.mxu0 %v22139_v48  ;;  %v22173_v48 = vld [vmem:[%s24027_s8 + $0x570] sm:$0x1]  ;;  %v22183_v16 = vpack.c.bf16 %v7060_v0, %v7035_v13  ;;  %v7136_v13 = vld [vmem:[%s24027_s8 + $0x3d8] sm:$0xff] }
 0x711   :  { %12222 = vmatprep.subr.msk.mxu1 %vm7192_vm4, %v22146_v35  ;;  %12825 = vmatprep.subr.mxu0 %v24829_v44  ;;  %24871 = vst [vmem:[#allocation101_spill] sm:$0xff] %v22173_v48  ;;  %v22189_v35 = vpack.c.bf16 %v7111_v1, %v7086_v51  ;;  %v7161_v51 = vld [vmem:[%s24027_s8 + $0x4a0] sm:$0xff]  ;;  %v22211_v1 = vpack.c.bf16 %v7110_v49, %v7085_v62  ;;  %v9644_v62 = vld [vmem:[%s24031_s12 + $0x28] sm:$0xff]  ;;  %v24908_v49 = vld [vmem:[#allocation78_spill] sm:$0xff] }
 0x712   :  { %v22215_v0 = vpack.c.bf16 %v7161_v51, %v7136_v13  ;;  %v24909_v51 = vmov 0.0|0.0  }
 0x714   :  { %12223 = vmatpush1.msk.msra.mxu1 %vm7192_vm4, %v22159_v63  ;;  %12826 = vmatpush3.msk.msra.mxu0 %vm7192_vm4, %v22173_v48  ;;  %v7135_v48 = vld [vmem:[%s24027_s8 + $0x3d0] sm:$0xff] }
 0x715   :  { %12224 = vmatmul.mubr.msk.f32.vlgmr.msra.gmra.mrb[40].mxu1 %vm7188_vm5, %v21534_v9  ;;  %14010 = vmatprep.subr.bf16.mxu1 %v22175_v18 }
 0x716   :  { %12828 = vmatmul.mubr.msk.f32.vlgmr.msra.gmra.mrb[26].mxu0 %vm7188_vm5, %v21534_v9  ;;  %14043 = vmatprep.subr.bf16.mxu0 %v21366_v56  ;;  %v7160_v56 = vld [vmem:[%s24027_s8 + $0x498] sm:$0xff] }
 0x717   :  { %14012 = vmatpush1.bf16.msra.mxu1 %v22183_v16  ;;  %14045 = vmatpush1.bf16.msra.mxu0 %v21380_v41  ;;  %v22227_v41 = vpack.c.bf16 %v7160_v56, %v7135_v48  ;;  %v9660_v48 = vld [vmem:[%s24031_s12 + $0xa8] sm:$0xff]  ;;  %v9662_v56 = vld [vmem:[%s24031_s12 + $0xb8] sm:$0xff] }
 0x718   :  { %14014 = vmatprep.subr.bf16.mxu1 %v22189_v35  ;;  %14047 = vmatprep.subr.bf16.mxu0 %v21395_v3  ;;  %v22234_v3 = vld [vmem:[%s24027_s8 + $0x568] sm:$0x1] }
 0x719   :  { %8113 = vmatprep.mubr.f32.mxu1 %v24829_v44  ;;  %8328 = vmatprep.mubr.f32.mxu0 %v24829_v44 }
 0x71b   :  { %14016 = vmatpush1.bf16.msra.mxu1 %v22211_v1  ;;  %14049 = vmatpush1.bf16.msra.mxu0 %v21420_v10  ;;  %v22245_v10 = vld [vmem:[%s24027_s8 + $0x560] sm:$0x1] }
 0x71c   :  { %14018 = vmatprep.subr.bf16.mxu1 %v22215_v0  ;;  %14051 = vmatprep.subr.bf16.mxu0 %v21433_v60  ;;  %v24877_v60 = vld [vmem:[#allocation31_spill] sm:$0xff] }
 0x71f   :  { %14020 = vmatpush1.bf16.msra.mxu1 %v22227_v41  ;;  %14053 = vmatpush1.bf16.msra.mxu0 %v21449_v19  ;;  %v24879_v19 = vld [vmem:[#allocation115_spill] sm:$0xff] }
 0x720   :  { %12228 = vmatprep.subr.msk.mxu1 %vm7192_vm4, %v22234_v3  ;;  %12236 = vmatprep.subr.msk.mxu0 %vm7192_vm4, %v21462_v29  ;;  %v24881_v29 = vld [vmem:[#allocation36_spill] sm:$0xff] }
 0x723   :  { %12229 = vmatpush1.msk.msra.mxu1 %vm7192_vm4, %v22245_v10  ;;  %12237 = vmatpush1.msk.msra.mxu0 %vm7192_vm4, %v21479_v32  ;;  %v24883_v32 = vld [vmem:[#allocation116_spill] sm:$0xff] }
 0x724   :  { %12230 = vmatmul.mubr.msk.f32.vlgmr.msra.gmra.mrb[42].mxu1 %vm7188_vm5, %v21534_v9  ;;  %14031 = vmatprep.subr.bf16.mxu1 %v21355_v50  ;;  %v24872_v50 = vld [vmem:[#allocation25_spill] sm:$0xff]  ;;  %v24888_v9 = vld [vmem:[#allocation118_spill] sm:$0xff] }
 0x725   :  { %12238 = vmatmul.mubr.msk.f32.vlgmr.msra.gmra.mrb[28].mxu0 %vm7188_vm5, %v21536_v20  ;;  %14067 = vmatprep.subr.bf16.mxu0 %v21651_v54  ;;  %v24896_v54 = vld [vmem:[#allocation121_spill] sm:$0xff] }
 0x726   :  { %14033 = vmatpush1.bf16.msra.mxu1 %v21368_v17  ;;  %14069 = vmatpush1.bf16.msra.mxu0 %v21664_v4  ;;  %v24873_v17 = vld [vmem:[#allocation113_spill] sm:$0xff]  ;;  %v24898_v4 = vld [vmem:[#allocation122_spill] sm:$0xff] }
 0x727   :  { %14035 = vmatprep.subr.bf16.mxu1 %v21393_v34  ;;  %14071 = vmatprep.subr.bf16.mxu0 %v21678_v28  ;;  %v24874_v34 = vld [vmem:[#allocation30_spill] sm:$0xff]  ;;  %v24899_v28 = vld [vmem:[#allocation60_spill] sm:$0xff] }
 0x728   :  { %8257 = vmatprep.mubr.f32.mxu1 %v24829_v44  ;;  %8470 = vmatprep.mubr.f32.mxu0 %v24829_v44 }
 0x72a   :  { %14037 = vmatpush1.bf16.msra.mxu1 %v21407_v14  ;;  %14073 = vmatpush1.bf16.msra.mxu0 %v21708_v42  ;;  %v24875_v14 = vld [vmem:[#allocation114_spill] sm:$0xff]  ;;  %v9655_v42 = vld [vmem:[%s24031_s12 + $0x80] sm:$0xff] }
 0x72b   :  { %14039 = vmatprep.subr.bf16.mxu1 %v21422_v38  ;;  %14075 = vmatprep.subr.bf16.mxu0 %v21717_v36  ;;  %v24876_v38 = vld [vmem:[#allocation126_spill] sm:$0xff]  ;;  %v9656_v36 = vld [vmem:[%s24031_s12 + $0x88] sm:$0xff] }
 0x72e   :  { %14041 = vmatpush1.bf16.msra.mxu1 %v21445_v26  ;;  %14077 = vmatpush1.bf16.msra.mxu0 %v21734_v61  ;;  %v24878_v26 = vld [vmem:[#allocation127_spill] sm:$0xff]  ;;  %v9640_v61 = vld [vmem:[%s24031_s12 + $0x8] sm:$0xff] }
 0x72f   :  { %12233 = vmatprep.subr.msk.mxu1 %vm7192_vm4, %v21457_v52  ;;  %12242 = vmatprep.subr.msk.mxu0 %vm7192_vm4, %v21743_v27  ;;  %v24880_v52 = vld [vmem:[#allocation128_spill] sm:$0xff]  ;;  %v24900_v27 = vld [vmem:[#allocation123_spill] sm:$0xff] }
 0x732   :  { %12234 = vmatpush1.msk.msra.mxu1 %vm7192_vm4, %v21474_v43  ;;  %12243 = vmatpush1.msk.msra.mxu0 %vm7192_vm4, %v21762_v22  ;;  %v24882_v43 = vld [vmem:[#allocation129_spill] sm:$0xff] }
 0x733   :  { %12235 = vmatmul.mubr.msk.f32.vlgmr.msra.gmra.mrb[44].mxu1 %vm7188_vm5, %v21536_v20  ;;  %14055 = vmatprep.subr.bf16.mxu1 %v21488_v7  ;;  %v24884_v7 = vld [vmem:[#allocation98_spill] sm:$0xff]  ;;  %v24901_v22 = vld [vmem:[#allocation61_spill] sm:$0xff] }
 0x734   :  { %12244 = vmatmul.mubr.msk.f32.vlgmr.msra.gmra.mrb[30].mxu0 %vm7188_vm5, %v21536_v20  ;;  %14091 = vmatprep.subr.bf16.mxu0 %v21793_v46 }
 0x735   :  { %14057 = vmatpush1.bf16.msra.mxu1 %v21524_v40  ;;  %14093 = vmatpush1.bf16.msra.mxu0 %v21806_v15  ;;  %v24886_v40 = vld [vmem:[#allocation117_spill] sm:$0xff]  ;;  %v9639_v15 = vld [vmem:[%s24031_s12] sm:$0xff] }
 0x736   :  { %14059 = vmatprep.subr.bf16.mxu1 %v21538_v6  ;;  %14095 = vmatprep.subr.bf16.mxu0 %v21820_v12  ;;  %v24889_v6 = vld [vmem:[#allocation85_spill] sm:$0xff]  ;;  %v14185_v46 = vpack.c.bf16 %v9640_v61, %v9639_v15  ;;  %v9657_v12 = vld [vmem:[%s24031_s12 + $0x90] sm:$0xff] }
 0x737   :  { %8399 = vmatprep.mubr.f32.mxu1 %v24829_v44  ;;  %8612 = vmatprep.mubr.f32.mxu0 %v24829_v44  ;;  %v9668_v15 = vld [vmem:[%s24031_s12 + $0xe8] sm:$0xff] }
 0x739   :  { %14061 = vmatpush1.bf16.msra.mxu1 %v21566_v24  ;;  %14097 = vmatpush1.bf16.msra.mxu0 %v21850_v59  ;;  %v24890_v24 = vld [vmem:[#allocation43_spill] sm:$0xff] }
 0x73a   :  { %14063 = vmatprep.subr.bf16.mxu1 %v21575_v23  ;;  %14099 = vmatprep.subr.bf16.mxu0 %v21859_v33  ;;  %v24891_v23 = vld [vmem:[#allocation90_spill] sm:$0xff]  ;;  %v14183_v33 = vpack.c.bf16 %v9656_v36, %v9655_v42  ;;  %v9658_v59 = vld [vmem:[%s24031_s12 + $0x98] sm:$0xff]  ;;  %v9692_v42 = vld [vmem:[%s24031_s12 + $0x1a8] sm:$0xff] }
 0x73b   :  { %v9667_v36 = vld [vmem:[%s24031_s12 + $0xe0] sm:$0xff] }
 0x73c   :  { %v14207_v61 = vpack.c.bf16 %v9668_v15, %v9667_v36 }
 0x73d   :  { %14065 = vmatpush1.bf16.msra.mxu1 %v21592_v21  ;;  %14101 = vmatpush1.bf16.msra.mxu0 %v21876_v47  ;;  %v24893_v21 = vld [vmem:[#allocation48_spill] sm:$0xff] }
 0x73e   :  { %12239 = vmatprep.subr.msk.mxu1 %vm7192_vm4, %v21601_v45  ;;  %12248 = vmatprep.subr.msk.mxu0 %vm7192_vm4, %v21885_v57  ;;  %v24894_v45 = vld [vmem:[#allocation120_spill] sm:$0xff]  ;;  %v14187_v57 = vpack.c.bf16 %v9658_v59, %v9657_v12  ;;  %v9676_v59 = vld [vmem:[%s24031_s12 + $0x128] sm:$0xff] }
 0x73f   :  { %v24902_v47 = vld [vmem:[#allocation124_spill] sm:$0xff] }
 0x741   :  { %12240 = vmatpush1.msk.msra.mxu1 %vm7192_vm4, %v21620_v31  ;;  %12249 = vmatpush1.msk.msra.mxu0 %vm7192_vm4, %v21904_v30  ;;  %v24895_v31 = vld [vmem:[#allocation54_spill] sm:$0xff]  ;;  %v9642_v30 = vld [vmem:[%s24031_s12 + $0x18] sm:$0xff] }
 0x742   :  { %12241 = vmatmul.mubr.msk.f32.vlgmr.msra.gmra.mrb[46].mxu1 %vm7188_vm5, %v21536_v20  ;;  %14079 = vmatprep.subr.bf16.mxu1 %v21496_v58  ;;  %v24885_v58 = vld [vmem:[#allocation37_spill] sm:$0xff] }
 0x743   :  { %12250 = vmatmul.mubr.msk.f32.vlgmr.msra.gmra.mrb[32].mxu0 %vm7188_vm5, %v21536_v20  ;;  %14115 = vmatprep.subr.bf16.mxu0 %v21935_v39  ;;  %v24897_v39 = vld [vmem:[#allocation55_spill] sm:$0xff] }
 0x744   :  { %14081 = vmatpush1.bf16.msra.mxu1 %v21526_v53  ;;  %14117 = vmatpush1.bf16.msra.mxu0 %v21948_v5  ;;  %v24887_v53 = vld [vmem:[#allocation42_spill] sm:$0xff]  ;;  %v24892_v5 = vld [vmem:[#allocation119_spill] sm:$0xff] }
 0x745   :  { %14083 = vmatprep.subr.bf16.mxu1 %v24872_v50  ;;  %14119 = vmatprep.subr.bf16.mxu0 %v21962_v8  ;;  %v24903_v8 = vld [vmem:[#allocation66_spill] sm:$0xff] }
 0x746   :  { %8541 = vmatprep.mubr.f32.mxu1 %v24829_v44  ;;  %8754 = vmatprep.mubr.f32.mxu0 %v24829_v44 }
 0x748   :  { %14085 = vmatpush1.bf16.msra.mxu1 %v24873_v17  ;;  %14121 = vmatpush1.bf16.msra.mxu0 %v21992_v25  ;;  %v9663_v17 = vld [vmem:[%s24031_s12 + $0xc0] sm:$0xff] }
 0x749   :  { %14087 = vmatprep.subr.bf16.mxu1 %v24874_v34  ;;  %14123 = vmatprep.subr.bf16.mxu0 %v22001_v11  ;;  %v9641_v11 = vld [vmem:[%s24031_s12 + $0x10] sm:$0xff]  ;;  %v9664_v34 = vld [vmem:[%s24031_s12 + $0xc8] sm:$0xff] }
 0x74a   :  { %v14189_v25 = vpack.c.bf16 %v9642_v30, %v9641_v11  ;;  %v9669_v11 = vld [vmem:[%s24031_s12 + $0xf0] sm:$0xff]  ;;  %v9670_v30 = vld [vmem:[%s24031_s12 + $0xf8] sm:$0xff] }
 0x74c   :  { %14089 = vmatpush1.bf16.msra.mxu1 %v24875_v14  ;;  %14125 = vmatpush1.bf16.msra.mxu0 %v24876_v38  ;;  %v9647_v14 = vld [vmem:[%s24031_s12 + $0x40] sm:$0xff]  ;;  %v24911_v38 = vld [vmem:[#allocation99_spill] sm:$0xff] }
 0x74d   :  { %12245 = vmatprep.subr.msk.mxu1 %vm7192_vm4, %v24877_v60  ;;  %12254 = vmatprep.subr.msk.mxu0 %vm7192_vm4, %v24878_v26  ;;  %v14199_v60 = vpack.c.bf16 %v9664_v34, %v9663_v17  ;;  %v9648_v26 = vld [vmem:[%s24031_s12 + $0x48] sm:$0xff]  ;;  %v9681_v34 = vld [vmem:[%s24031_s12 + $0x150] sm:$0xff] }
 0x750   :  { %12246 = vmatpush1.msk.msra.mxu1 %vm7192_vm4, %v24879_v19  ;;  %12255 = vmatpush1.msk.msra.mxu0 %vm7192_vm4, %v24880_v52  ;;  %v9687_v19 = vld [vmem:[%s24031_s12 + $0x180] sm:$0xff]  ;;  %v9688_v52 = vld [vmem:[%s24031_s12 + $0x188] sm:$0xff] }
 0x751   :  { %12247 = vmatmul.mubr.msk.f32.vlgmr.msra.gmra.mrb[48].mxu1 %vm7188_vm5, %v21536_v20  ;;  %14103 = vmatprep.subr.bf16.mxu1 %v24881_v29  ;;  %v9671_v29 = vld [vmem:[%s24031_s12 + $0x100] sm:$0xff] }
 0x752   :  { %12256 = vmatmul.mubr.msk.f32.vlgmr.msra.gmra.mrb[34].mxu0 %vm7188_vm5, %v21536_v20  ;;  %14139 = vmatprep.subr.bf16.mxu0 %v24882_v43  ;;  %v14201_v43 = vpack.c.bf16 %v9648_v26, %v9647_v14  ;;  %v9682_v14 = vld [vmem:[%s24031_s12 + $0x158] sm:$0xff] }
 0x753   :  { %14105 = vmatpush1.bf16.msra.mxu1 %v24883_v32  ;;  %14141 = vmatpush1.bf16.msra.mxu0 %v24884_v7  ;;  %v9665_v32 = vld [vmem:[%s24031_s12 + $0xd0] sm:$0xff]  ;;  %v9666_v7 = vld [vmem:[%s24031_s12 + $0xd8] sm:$0xff]  ;;  %v14237_v26 = vpack.c.bf16 %v9682_v14, %v9681_v34 }
 0x754   :  { %14107 = vmatprep.subr.bf16.mxu1 %v24885_v58  ;;  %14143 = vmatprep.subr.bf16.mxu0 %v22087_v55  ;;  %v24906_v55 = vld [vmem:[#allocation72_spill] sm:$0xff]  ;;  %v9672_v58 = vld [vmem:[%s24031_s12 + $0x108] sm:$0xff] }
 0x755   :  { %8683 = vmatprep.mubr.f32.mxu1 %v24829_v44  ;;  %8896 = vmatprep.mubr.f32.mxu0 %v24829_v44 }
 0x757   :  { %14109 = vmatpush1.bf16.msra.mxu1 %v24886_v40  ;;  %14145 = vmatpush1.bf16.msra.mxu0 %v22112_v37  ;;  %v24907_v37 = vld [vmem:[#allocation73_spill] sm:$0xff]  ;;  %v14203_v40 = vpack.c.bf16 %v9666_v7, %v9665_v32  ;;  %v9701_v7 = vld [vmem:[%s24031_s12 + $0x1f0] sm:$0xff] }
 0x758   :  { %14111 = vmatprep.subr.bf16.mxu1 %v24887_v53  ;;  %14147 = vmatprep.subr.bf16.mxu0 %v22121_v2  ;;  %v24905_v2 = vld [vmem:[#allocation67_spill] sm:$0xff]  ;;  %v9649_v53 = vld [vmem:[%s24031_s12 + $0x50] sm:$0xff] }
 0x75b   :  { %14113 = vmatpush1.bf16.msra.mxu1 %v24888_v9  ;;  %14149 = vmatpush1.bf16.msra.mxu0 %v24889_v6  ;;  %v9650_v9 = vld [vmem:[%s24031_s12 + $0x58] sm:$0xff]  ;;  %v24912_v6 = vld [vmem:[#allocation100_spill] sm:$0xff] }
 0x75c   :  { %12251 = vmatprep.subr.msk.mxu1 %vm7192_vm4, %v24890_v24  ;;  %12260 = vmatprep.subr.msk.mxu0 %vm7192_vm4, %v24891_v23  ;;  %v9689_v24 = vld [vmem:[%s24031_s12 + $0x190] sm:$0xff]  ;;  %v9690_v23 = vld [vmem:[%s24031_s12 + $0x198] sm:$0xff] }
 0x75f   :  { %12252 = vmatpush1.msk.msra.mxu1 %vm7192_vm4, %v24892_v5  ;;  %12261 = vmatpush1.msk.msra.mxu0 %vm7192_vm4, %v22159_v63  ;;  %v9643_v63 = vld [vmem:[%s24031_s12 + $0x20] sm:$0xff]  ;;  %v14215_v5 = vpack.c.bf16 %v9688_v52, %v9687_v19 }
 0x760   :  { %12253 = vmatmul.mubr.msk.f32.vlgmr.msra.gmra.mrb[50].mxu1 %vm7188_vm5, %v21536_v20  ;;  %14127 = vmatprep.subr.bf16.mxu1 %v24893_v21  ;;  %v14193_v13 = vpack.c.bf16 %v9644_v62, %v9643_v63  ;;  %v14217_v21 = vpack.c.bf16 %v9672_v58, %v9671_v29  ;;  %v9720_v63 = vld [vmem:[%s24031_s12 + $0x288] sm:$0xff]  ;;  %v9695_v62 = vld [vmem:[%s24031_s12 + $0x1c0] sm:$0xff]  ;;  %v9702_v58 = vld [vmem:[%s24031_s12 + $0x1f8] sm:$0xff] }
 0x761   :  { %12262 = vmatmul.mubr.msk.f32.vlgmr.msra.gmra.mrb[36].mxu0 %vm7188_vm5, %v21536_v20  ;;  %14163 = vmatprep.subr.bf16.mxu0 %v22175_v18  ;;  %v24904_v18 = vld [vmem:[#allocation125_spill] sm:$0xff]  ;;  %v9683_v52 = vld [vmem:[%s24031_s12 + $0x160] sm:$0xff] }
 0x762   :  { %14129 = vmatpush1.bf16.msra.mxu1 %v24894_v45  ;;  %14165 = vmatpush1.bf16.msra.mxu0 %v22183_v16  ;;  %v9659_v16 = vld [vmem:[%s24031_s12 + $0xa0] sm:$0xff]  ;;  %v14205_v45 = vpack.c.bf16 %v9650_v9, %v9649_v53  ;;  %v9684_v29 = vld [vmem:[%s24031_s12 + $0x168] sm:$0xff] }
 0x763   :  { %14131 = vmatprep.subr.bf16.mxu1 %v24895_v31  ;;  %14167 = vmatprep.subr.bf16.mxu0 %v22189_v35  ;;  %v14191_v35 = vpack.c.bf16 %v9660_v48, %v9659_v16  ;;  %v14219_v31 = vpack.c.bf16 %v9690_v23, %v9689_v24  ;;  %v9677_v48 = vld [vmem:[%s24031_s12 + $0x130] sm:$0xff]  ;;  %v14241_v9 = vpack.c.bf16 %v9684_v29, %v9683_v52  ;;  %v9686_v23 = vld [vmem:[%s24031_s12 + $0x178] sm:$0xff] }
 0x764   :  { %8825 = vmatprep.mubr.f32.mxu1 %v24829_v44  ;;  %9038 = vmatprep.mubr.f32.mxu0 %v24829_v44  ;;  %v9685_v24 = vld [vmem:[%s24031_s12 + $0x170] sm:$0xff] }
 0x766   :  { %14133 = vmatpush1.bf16.msra.mxu1 %v24896_v54  ;;  %14169 = vmatpush1.bf16.msra.mxu0 %v22211_v1  ;;  %v24910_v1 = vld [vmem:[#allocation84_spill] sm:$0xff]  ;;  %v9673_v54 = vld [vmem:[%s24031_s12 + $0x110] sm:$0xff] }
 0x767   :  { %14135 = vmatprep.subr.bf16.mxu1 %v24897_v39  ;;  %14171 = vmatprep.subr.bf16.mxu0 %v22215_v0  ;;  %v9661_v0 = vld [vmem:[%s24031_s12 + $0xb0] sm:$0xff]  ;;  %v9674_v39 = vld [vmem:[%s24031_s12 + $0x118] sm:$0xff] }
 0x76a   :  { %14137 = vmatpush1.bf16.msra.mxu1 %v24898_v4  ;;  %14173 = vmatpush1.bf16.msra.mxu0 %v22227_v41  ;;  %v14195_v41 = vpack.c.bf16 %v9662_v56, %v9661_v0  ;;  %v9691_v4 = vld [vmem:[%s24031_s12 + $0x1a0] sm:$0xff] }
 0x76b   :  { %12257 = vmatprep.subr.msk.mxu1 %vm7192_vm4, %v24899_v28  ;;  %12266 = vmatprep.subr.msk.mxu0 %vm7192_vm4, %v22234_v3  ;;  %v9645_v3 = vld [vmem:[%s24031_s12 + $0x30] sm:$0xff]  ;;  %v24913_v28 = vld [vmem:[#allocation101_spill] sm:$0xff]  ;;  %v9679_v56 = vld [vmem:[%s24031_s12 + $0x140] sm:$0xff] }
 0x76e   :  { %12258 = vmatpush1.msk.msra.mxu1 %vm7192_vm4, %v24900_v27  ;;  %12267 = vmatpush1.msk.msra.mxu0 %vm7192_vm4, %v22245_v10  ;;  %v9646_v10 = vld [vmem:[%s24031_s12 + $0x38] sm:$0xff]  ;;  %v9651_v27 = vld [vmem:[%s24031_s12 + $0x60] sm:$0xff] }
 0x76f   :  { %12259 = vmatmul.mubr.msk.f32.vlgmr.msra.gmra.mrb[52].mxu1 %vm7188_vm5, %v21536_v20  ;;  %14151 = vmatprep.subr.bf16.mxu1 %v24901_v22  ;;  %v14197_v50 = vpack.c.bf16 %v9646_v10, %v9645_v3  ;;  %v14221_v22 = vpack.c.bf16 %v9674_v39, %v9673_v54  ;;  %v9697_v3 = vld [vmem:[%s24031_s12 + $0x1d0] sm:$0xff]  ;;  %v9698_v10 = vld [vmem:[%s24031_s12 + $0x1d8] sm:$0xff] }
 0x770   :  { %12268 = vmatmul.mubr.msk.f32.vlgmr.msra.gmra.mrb[38].mxu0 %vm7188_vm5, %v21536_v20  ;;  %14153 = vmatpush1.bf16.msra.mxu1 %v24902_v47  ;;  %v9693_v47 = vld [vmem:[%s24031_s12 + $0x1b0] sm:$0xff]  ;;  %v14235_v17 = vpack.c.bf16 %v9698_v10, %v9697_v3  ;;  %v22701_v3 = vld [vmem:[%s24030_s11] sm:$0xff] }
 0x771   :  { %14155 = vmatprep.subr.bf16.mxu1 %v24903_v8  ;;  %8967 = vmatprep.mubr.f32.mxu1 %v24829_v44  ;;  %v9653_v8 = vld [vmem:[%s24031_s12 + $0x70] sm:$0xff] }
 0x772   :  { %14184 = vmatprep.subr.bf16.mxu0 %v14183_v33  ;;  %v9652_v33 = vld [vmem:[%s24031_s12 + $0x68] sm:$0xff] }
 0x773   :  { %14186 = vmatpush3.bf16.msra.mxu0 %v14185_v46  ;;  %v9675_v46 = vld [vmem:[%s24031_s12 + $0x120] sm:$0xff]  ;;  %v14209_v12 = vpack.c.bf16 %v9652_v33, %v9651_v27 }
 0x774   :  { %14157 = vmatpush1.bf16.msra.mxu1 %v24904_v18  ;;  %14188 = vmatprep.subr.bf16.mxu0 %v14187_v57  ;;  %v9694_v57 = vld [vmem:[%s24031_s12 + $0x1b8] sm:$0xff] }
 0x775   :  { %14159 = vmatprep.subr.bf16.mxu1 %v24905_v2  ;;  %v9654_v18 = vld [vmem:[%s24031_s12 + $0x78] sm:$0xff]  ;;  %v14225_v2 = vpack.c.bf16 %v9676_v59, %v9675_v46  ;;  %v14227_v16 = vpack.c.bf16 %v9694_v57, %v9693_v47 }
 0x777   :  { %14190 = vmatpush3.bf16.msra.mxu0 %v14189_v25  ;;  %v14211_v25 = vpack.c.bf16 %v9670_v30, %v9669_v11  ;;  %v22658_v30 = vld [vmem:[%s24028_s9 + $0x10] sm:$0xff] }
 0x778   :  { %14161 = vmatpush1.bf16.msra.mxu1 %v24906_v55  ;;  %14192 = vmatprep.subr.bf16.mxu0 %v14191_v35  ;;  %v14213_v55 = vpack.c.bf16 %v9654_v18, %v9653_v8  ;;  %v9678_v35 = vld [vmem:[%s24031_s12 + $0x138] sm:$0xff] }
 0x779   :  { %12263 = vmatprep.subr.msk.mxu1 %vm7192_vm4, %v24907_v37  ;;  %v9719_v37 = vld [vmem:[%s24031_s12 + $0x280] sm:$0xff] }
 0x77b   :  { %14194 = vmatpush3.bf16.msra.mxu0 %v14193_v13  ;;  %v14247_v13 = vpack.c.bf16 %v9720_v63, %v9719_v37 }
 0x77c   :  { %12264 = vmatpush1.msk.msra.mxu1 %vm7192_vm4, %v24908_v49  ;;  %14196 = vmatprep.subr.bf16.mxu0 %v14195_v41  ;;  %v9696_v49 = vld [vmem:[%s24031_s12 + $0x1c8] sm:$0xff] }
 0x77d   :  { %12265 = vmatmul.mubr.msk.f32.vlgmr.msra.gmra.mrb[54].mxu1 %vm7188_vm5, %v21536_v20  ;;  %14174 = vmatprep.subr.bf16.mxu1 %v24909_v51  ;;  %v14231_v0 = vpack.c.bf16 %v9696_v49, %v9695_v62  ;;  %v9680_v41 = vld [vmem:[%s24031_s12 + $0x148] sm:$0xff]  ;;  %v22682_v49 = vld [vmem:[%s24028_s9] sm:$0xff] }
 0x77e   :  { %14176 = vmatpush3.bf16.msra.mxu1 %v24910_v1  ;;  %12844 = vmatprep.mubr.msk.f32.mxu1 %vm15261_vm1, %v24829_v44  ;;  %v14229_v1 = vpack.c.bf16 %v9678_v35, %v9677_v48 }
 0x77f   :  { %14177 = vmatprep.subr.bf16.mxu1 %v24909_v51  ;;  %14198 = vmatpush3.bf16.msra.mxu0 %v14197_v50  ;;  %v14233_v50 = vpack.c.bf16 %v9680_v41, %v9679_v56 }
 0x780   :  { %14200 = vmatprep.subr.bf16.mxu0 %v14199_v60  ;;  %v9700_v60 = vld [vmem:[%s24031_s12 + $0x1e8] sm:$0xff] }
 0x782   :  { %14179 = vmatpush3.bf16.msra.mxu1 %v24911_v38  ;;  %v9699_v38 = vld [vmem:[%s24031_s12 + $0x1e0] sm:$0xff] }
 0x783   :  { %14180 = vmatprep.subr.bf16.mxu1 %v24909_v51  ;;  %14202 = vmatpush3.bf16.msra.mxu0 %v14201_v43  ;;  %v14239_v19 = vpack.c.bf16 %v9700_v60, %v9699_v38 }
 0x784   :  { %14204 = vmatprep.subr.bf16.mxu0 %v14203_v40 }
 0x786   :  { %14182 = vmatpush3.bf16.msra.mxu1 %v24912_v6  ;;  %v14243_v6 = vpack.c.bf16 %v9702_v58, %v9701_v7 }
 0x787   :  { %12842 = vmatprep.subr.mxu1 %v24829_v44  ;;  %14206 = vmatpush3.bf16.msra.mxu0 %v14205_v45  ;;  %v14245_v45 = vpack.c.bf16 %v9686_v23, %v9685_v24  ;;  %v9754_v23 = vld [vmem:[%s24031_s12 + $0x398] sm:$0xff] }
 0x788   :  { %14208 = vmatprep.subr.bf16.mxu0 %v14207_v61  ;;  %v22635_v61 = vld [vmem:[%s24028_s9 + $0x8] sm:$0xff] }
 0x78a   :  { %12843 = vmatpush3.msk.msra.mxu1 %vm7192_vm4, %v24913_v28 }
 0x78b   :  { %12845 = vmatmul.mubr.msk.f32.vlgmr.msra.gmra.mrb[56].mxu1 %vm7188_vm5, %v21536_v20  ;;  %14216 = vmatprep.subr.bf16.mxu1 %v14215_v5  ;;  %v14223_v20 = vpack.c.bf16 %v9692_v42, %v9691_v4  ;;  %v9751_v5 = vld [vmem:[%s24031_s12 + $0x380] sm:$0xff]  ;;  %v9123_v42 = vlaneseq }
 0x78c   :  { %14218 = vmatpush3.bf16.msra.mxu1 %v14217_v21  ;;  %14210 = vmatpush3.bf16.msra.mxu0 %v14209_v12  ;;  %v9752_v21 = vld [vmem:[%s24031_s12 + $0x388] sm:$0xff] }
 0x78d   :  { %14220 = vmatprep.subr.bf16.mxu1 %v14219_v31  ;;  %14212 = vmatprep.subr.bf16.mxu0 %v14211_v25  ;;  %v14279_v31 = vpack.c.bf16 %v9752_v21, %v9751_v5  ;;  %v22627_v36 = vshrl.u32 %v9123_v42, 7 }
 0x78f   :  { %v22630_v15 = vsub.s32 4, %v22627_v36  ;;  %v22677_v62 = vsub.s32 2, %v22627_v36  ;;  %v22726_v5 = vsub.s32 0, %v22627_v36  ;;  %v22729_v21 = vsub.s32 1, %v22627_v36 }
 0x790   :  { %14222 = vmatpush3.bf16.msra.mxu1 %v14221_v22  ;;  %14214 = vmatpush3.bf16.msra.mxu0 %v14213_v55 }
 0x791   :  { %14224 = vmatprep.subr.bf16.mxu1 %v14223_v20  ;;  %14248 = vmatprep.subr.bf16.mxu0 %v14247_v13  ;;  %v9174_v27 = vrot.slane %v22635_v61, %v22630_v15  ;;  %v9206_v8 = vrot.slane %v22658_v30, %v22630_v15  ;;  %v22685_v13 = vsub.s32 3, %v22627_v36  ;;  %v9475_v60 = vrot.slane %v22701_v3, %v22677_v62 }
 0x793   :  { %v9138_v41 = vrot.slane %v22682_v49, %v22685_v13  ;;  %v9479_v29 = vrot.slane %v22701_v3, %v22685_v13 }
 0x794   :  { %14226 = vmatpush3.bf16.msra.mxu1 %v14225_v2 }
 0x795   :  { %14228 = vmatprep.subr.bf16.mxu1 %v14227_v16 }
 0x798   :  { %14230 = vmatpush3.bf16.msra.mxu1 %v14229_v1  ;;  %v22690_v1 = vld [vmem:[%s24029_s10] sm:$0xff] }
 0x799   :  { %14232 = vmatprep.subr.bf16.mxu1 %v14231_v0  ;;  %v9134_v0 = vrot.slane %v22682_v49, %v22677_v62  ;;  %v9292_v56 = vrot.slane %v22690_v1, %v22677_v62  ;;  %v9296_v10 = vrot.slane %v22690_v1, %v22685_v13 }
 0x79c   :  { %14234 = vmatpush3.bf16.msra.mxu1 %v14233_v50 }
 0x79d   :  { %14236 = vmatprep.subr.bf16.mxu1 %v14235_v17 }
 0x79e   :  { %v22597_v43 = vpop.f32.mrb[16].mxu0  ;;  %v7405_v32 = vpop.f32.mrb[30].mxu1 }
 0x79f   :  { %v22605_v40 = vpop.f32.mrb[17].mxu0  ;;  %v7407_v53 = vpop.f32.mrb[31].mxu1  ;;  %v9250_v14 = vmul.f32 %v9134_v0, %v7405_v32  ;;  %v9736_v32 = vld [vmem:[%s24031_s12 + $0x308] sm:$0xff]  ;;  %v9755_v0 = vld [vmem:[%s24031_s12 + $0x3a0] sm:$0xff] }
 0x7a0   :  { %14238 = vmatpush3.bf16.msra.mxu1 %v14237_v26 }
 0x7a1   :  { %14240 = vmatprep.subr.bf16.mxu1 %v14239_v19  ;;  %v9251_v19 = vmul.f32 %v9138_v41, %v7407_v53  ;;  %v9753_v53 = vld [vmem:[%s24031_s12 + $0x390] sm:$0xff]  ;;  %v9126_v41 = vrot.slane %v22682_v49, %v22726_v5 }
 0x7a4   :  { %14242 = vmatpush3.bf16.msra.mxu1 %v14241_v9 }
 0x7a5   :  { %14244 = vmatprep.subr.bf16.mxu1 %v14243_v6  ;;  %v9735_v6 = vld [vmem:[%s24031_s12 + $0x300] sm:$0xff] }
 0x7a6   :  { %v14281_v42 = vpack.c.bf16 %v9736_v32, %v9735_v6  ;;  %v9467_v6 = vrot.slane %v22701_v3, %v22726_v5 }
 0x7a8   :  { %14246 = vmatpush3.bf16.msra.mxu1 %v14245_v45  ;;  %v22732_v45 = vsub.s32 6, %v22627_v36 }
 0x7a9   :  { %14280 = vmatprep.subr.bf16.mxu1 %v14279_v31 }
 0x7ac   :  { %v22619_v54 = vpop.f32.mrb[32].mxu1 }
 0x7ad   :  { %v22621_v39 = vpop.f32.mrb[18].mxu0  ;;  %v22623_v4 = vpop.f32.mrb[33].mxu1 }
 0x7ae   :  { %v22625_v28 = vpop.f32.mrb[19].mxu0 }
 0x7bb   :  { %v22639_v33 = vpop.f32.mrb[34].mxu1 }
 0x7bc   :  { %v7760_v22 = vpop.f32.mrb[20].mxu0  ;;  %v22641_v46 = vpop.f32.mrb[35].mxu1 }
 0x7bd   :  { %v22643_v12 = vmul.f32 %v9174_v27, %v7760_v22  ;;  %v22645_v20 = vpop.f32.mrb[21].mxu0  ;;  %v22735_v27 = vsub.s32 7, %v22627_v36 }
 0x7ca   :  { %v22647_v59 = vpop.f32.mrb[36].mxu1 }
 0x7cb   :  { %v22649_v47 = vpop.f32.mrb[22].mxu0  ;;  %v22651_v57 = vpop.f32.mrb[37].mxu1 }
 0x7cc   :  { %v22653_v11 = vpop.f32.mrb[23].mxu0 }
 0x7d9   :  { %v22662_v25 = vpop.f32.mrb[38].mxu1 }
 0x7da   :  { %v8044_v18 = vpop.f32.mrb[24].mxu0  ;;  %v22664_v2 = vpop.f32.mrb[39].mxu1 }
 0x7db   :  { %v22666_v55 = vmul.f32 %v9206_v8, %v8044_v18  ;;  %v22668_v37 = vpop.f32.mrb[25].mxu0  ;;  %v14283_v8 = vpack.c.bf16 %v9754_v23, %v9753_v53  ;;  %v9737_v18 = vld [vmem:[%s24031_s12 + $0x310] sm:$0xff]  ;;  %v9758_v53 = vld [vmem:[%s24031_s12 + $0x3b8] sm:$0xff]  ;;  %v9248_v23 = vmul.f32 %v9126_v41, %v22597_v43 }
 0x7e8   :  { %v22670_v16 = vpop.f32.mrb[40].mxu1 }
 0x7e9   :  { %v22672_v48 = vpop.f32.mrb[26].mxu0  ;;  %v22674_v35 = vpop.f32.mrb[41].mxu1 }
 0x7ea   :  { %v12829_v63 = vpop.f32.mrb[27].mxu0 }
 0x7eb   :  { %v9738_v63 = vld [vmem:[%s24031_s12 + $0x318] sm:$0xff] }
 0x7f7   :  { %v22705_v50 = vpop.f32.mrb[42].mxu1 }
 0x7f8   :  { %v8330_v17 = vpop.f32.mrb[28].mxu0  ;;  %v22707_v34 = vpop.f32.mrb[43].mxu1 }
 0x7f9   :  { %v9408_v38 = vmul.f32 %v9292_v56, %v8330_v17  ;;  %v8332_v26 = vpop.f32.mrb[29].mxu0  ;;  %v9756_v56 = vld [vmem:[%s24031_s12 + $0x3a8] sm:$0xff]  ;;  %v9284_v17 = vrot.slane %v22690_v1, %v22726_v5 }
 0x7fa   :  { %v9409_v52 = vmul.f32 %v9296_v10, %v8332_v26  ;;  %v9130_v10 = vrot.slane %v22682_v49, %v22729_v21  ;;  %v9308_v26 = vrot.slane %v22690_v1, %v22732_v45 }
 0x7fb   :  { %v9433_v7 = vadd.f32 %v9408_v38, %v9250_v14  ;;  %v9739_v14 = vld [vmem:[%s24031_s12 + $0x320] sm:$0xff]  ;;  %v9740_v38 = vld [vmem:[%s24031_s12 + $0x328] sm:$0xff] }
 0x7fc   :  { %v9434_v58 = vadd.f32 %v9409_v52, %v9251_v19  ;;  %v9288_v19 = vrot.slane %v22690_v1, %v22729_v21  ;;  %v14285_v52 = vpack.c.bf16 %v9738_v63, %v9737_v18  ;;  %v14289_v32 = vpack.c.bf16 %v9740_v38, %v9739_v14 }
 0x7fd   :  { %v9591_v9 = vadd.f32 %v9475_v60, %v9433_v7  ;;  %v9150_v60 = vrot.slane %v22682_v49, %v22732_v45  ;;  %v9312_v7 = vrot.slane %v22690_v1, %v22735_v27  ;;  %v9495_v18 = vrot.slane %v22701_v3, %v22735_v27 }
 0x7fe   :  { %v9592_v24 = vadd.f32 %v9479_v29, %v9434_v58  ;;  %v9154_v29 = vrot.slane %v22682_v49, %v22735_v27  ;;  %v14287_v58 = vpack.c.bf16 %v9756_v56, %v9755_v0  ;;  %v9249_v63 = vmul.f32 %v9130_v10, %v22605_v40  ;;  %v9742_v40 = vld [vmem:[%s24031_s12 + $0x338] sm:$0xff] }
 0x7ff   :  { %v9616_v22 = vmax.f32 %v9591_v9, 0.0  ;;  %v9254_v0 = vmul.f32 %v9150_v60, %v22639_v33  ;;  %v9703_v60 = vld [vmem:[%s24031_s12 + $0x200] sm:$0xff] }
 0x800   :  { %v9617_v31 = vmax.f32 %v9592_v24, 0.0  ;;  %v9757_v24 = vld [vmem:[%s24031_s12 + $0x3b0] sm:$0xff]  ;;  %v9255_v44 = vmul.f32 %v9154_v29, %v22641_v46  ;;  %v9760_v29 = vld [vmem:[%s24031_s12 + $0x3c8] sm:$0xff] }
 0x802   :  { %10176 = vmatprep.mubr.f32.mxu1 %v9617_v31 }
 0x803   :  { %10177 = vmatmul.mubr.f32.vlgmr.msra.gmra.mrb[58].mxu1 %v9616_v22 }
 0x804   :  { %14282 = vmatpush3.bf16.msra.mxu1 %v14281_v42 }
 0x805   :  { %14284 = vmatprep.subr.bf16.mxu1 %v14283_v8  ;;  %v9471_v8 = vrot.slane %v22701_v3, %v22729_v21 }
 0x806   :  { %v8259_v9 = vpop.f32.mrb[44].mxu1 }
 0x807   :  { %v9406_v31 = vmul.f32 %v9284_v17, %v8259_v9  ;;  %v8472_v42 = vpop.f32.mrb[30].mxu0  ;;  %v8261_v22 = vpop.f32.mrb[45].mxu1  ;;  %v14291_v17 = vpack.c.bf16 %v9758_v53, %v9757_v24  ;;  %v9741_v9 = vld [vmem:[%s24031_s12 + $0x330] sm:$0xff]  ;;  %v9743_v53 = vld [vmem:[%s24031_s12 + $0x340] sm:$0xff] }
 0x808   :  { %v9412_v56 = vmul.f32 %v9308_v26, %v8472_v42  ;;  %v9407_v14 = vmul.f32 %v9288_v19, %v8261_v22  ;;  %v8474_v38 = vpop.f32.mrb[31].mxu0  ;;  %14286 = vmatpush3.bf16.msra.mxu1 %v14285_v52  ;;  %v9704_v19 = vld [vmem:[%s24031_s12 + $0x208] sm:$0xff]  ;;  %v9759_v52 = vld [vmem:[%s24031_s12 + $0x3c0] sm:$0xff] }
 0x809   :  { %v9431_v43 = vadd.f32 %v9406_v31, %v9248_v23  ;;  %v9413_v41 = vmul.f32 %v9312_v7, %v8474_v38  ;;  %14288 = vmatprep.subr.bf16.mxu1 %v14287_v58  ;;  %v14293_v7 = vpack.c.bf16 %v9742_v40, %v9741_v9  ;;  %v22820_v23 = vsub.s32 5, %v22627_v36  ;;  %v9706_v36 = vld [vmem:[%s24031_s12 + $0x218] sm:$0xff] }
 0x80a   :  { %v22793_v10 = vadd.f32 %v9412_v56, %v9254_v0  ;;  %v9432_v33 = vadd.f32 %v9407_v14, %v9249_v63  ;;  %v14249_v42 = vpack.c.bf16 %v9704_v19, %v9703_v60  ;;  %v14295_v22 = vpack.c.bf16 %v9760_v29, %v9759_v52  ;;  %v9705_v14 = vld [vmem:[%s24031_s12 + $0x210] sm:$0xff]  ;;  %v9746_v60 = vld [vmem:[%s24031_s12 + $0x358] sm:$0xff]  ;;  %v9708_v29 = vld [vmem:[%s24031_s12 + $0x228] sm:$0xff] }
 0x80b   :  { %v9589_v46 = vadd.f32 %v9467_v6, %v9431_v43  ;;  %v9438_v26 = vadd.f32 %v9413_v41, %v9255_v44  ;;  %v9721_v6 = vld [vmem:[%s24031_s12 + $0x290] sm:$0xff]  ;;  %v9722_v44 = vld [vmem:[%s24031_s12 + $0x298] sm:$0xff]  ;;  %v22837_v43 = vld [vmem:[%s24029_s10 + $0x8] sm:$0xff]  ;;  %v9142_v9 = vrot.slane %v22682_v49, %v22630_v15  ;;  %v9300_v19 = vrot.slane %v22690_v1, %v22630_v15 }
 0x80c   :  { %14290 = vmatpush3.bf16.msra.mxu1 %v14289_v32  ;;  %v9590_v58 = vadd.f32 %v9471_v8, %v9432_v33  ;;  %v9744_v32 = vld [vmem:[%s24031_s12 + $0x348] sm:$0xff]  ;;  %v9761_v8 = vld [vmem:[%s24031_s12 + $0x3d0] sm:$0xff]  ;;  %v14251_v56 = vpack.c.bf16 %v9722_v44, %v9721_v6  ;;  %v9723_v41 = vld [vmem:[%s24031_s12 + $0x2a0] sm:$0xff]  ;;  %v14253_v52 = vpack.c.bf16 %v9706_v36, %v9705_v14  ;;  %v9324_v6 = vrot.slane %v22837_v43, %v22677_v62 }
 0x80d   :  { %14292 = vmatprep.subr.bf16.mxu1 %v14291_v17  ;;  %v9596_v24 = vadd.f32 %v9495_v18, %v9438_v26  ;;  %v9762_v18 = vld [vmem:[%s24031_s12 + $0x3d8] sm:$0xff]  ;;  %v9614_v63 = vmax.f32 %v9589_v46, 0.0  ;;  %v14297_v38 = vpack.c.bf16 %v9744_v32, %v9743_v53  ;;  %v9724_v17 = vld [vmem:[%s24031_s12 + $0x2a8] sm:$0xff]  ;;  %v9745_v33 = vld [vmem:[%s24031_s12 + $0x350] sm:$0xff]  ;;  %v9146_v26 = vrot.slane %v22682_v49, %v22820_v23 }
 0x80e   :  { %v9615_v31 = vmax.f32 %v9590_v58, 0.0  ;;  %v14299_v40 = vpack.c.bf16 %v9762_v18, %v9761_v8  ;;  %v9707_v46 = vld [vmem:[%s24031_s12 + $0x220] sm:$0xff]  ;;  %v9764_v58 = vld [vmem:[%s24031_s12 + $0x3e8] sm:$0xff]  ;;  %v9166_v49 = vrot.slane %v22635_v61, %v22677_v62  ;;  %v9304_v44 = vrot.slane %v22690_v1, %v22820_v23  ;;  %v9725_v53 = vld [vmem:[%s24031_s12 + $0x2b0] sm:$0xff] }
 0x80f   :  { %v9621_v0 = vmax.f32 %v9596_v24, 0.0  ;;  %v14255_v24 = vpack.c.bf16 %v9724_v17, %v9723_v41  ;;  %v9726_v32 = vld [vmem:[%s24031_s12 + $0x2b8] sm:$0xff]  ;;  %v14257_v1 = vpack.c.bf16 %v9708_v29, %v9707_v46  ;;  %v9487_v17 = vrot.slane %v22701_v3, %v22820_v23  ;;  %v22905_v46 = vld [vmem:[%s24030_s11 + $0x8] sm:$0xff]  ;;  %v9709_v29 = vld [vmem:[%s24031_s12 + $0x230] sm:$0xff] }
 0x810   :  { %14294 = vmatpush3.bf16.msra.mxu1 %v14293_v7  ;;  %10106 = vmatprep.mubr.f32.mxu0 %v9615_v31  ;;  %v9763_v7 = vld [vmem:[%s24031_s12 + $0x3e0] sm:$0xff]  ;;  %v9170_v31 = vrot.slane %v22635_v61, %v22685_v13  ;;  %v14259_v41 = vpack.c.bf16 %v9726_v32, %v9725_v53  ;;  %v9749_v32 = vld [vmem:[%s24031_s12 + $0x370] sm:$0xff] }
 0x811   :  { %10316 = vmatprep.mubr.f32.mxu1 %v9621_v0  ;;  %10107 = vmatmul.mubr.f32.vlgmr.msra.gmra.mrb[40].mxu0 %v9614_v63  ;;  %v14303_v18 = vpack.c.bf16 %v9764_v58, %v9763_v7  ;;  %v9747_v63 = vld [vmem:[%s24031_s12 + $0x360] sm:$0xff]  ;;  %v9748_v0 = vld [vmem:[%s24031_s12 + $0x368] sm:$0xff]  ;;  %v9710_v7 = vld [vmem:[%s24031_s12 + $0x238] sm:$0xff] }
 0x812   :  { %14250 = vmatpush3.bf16.msra.mxu0 %v14249_v42  ;;  %14296 = vmatprep.subr.bf16.mxu1 %v14295_v22  ;;  %v9328_v42 = vrot.slane %v22837_v43, %v22685_v13  ;;  %v14301_v22 = vpack.c.bf16 %v9746_v60, %v9745_v33  ;;  %v9766_v33 = vld [vmem:[%s24031_s12 + $0x3f8] sm:$0xff]  ;;  %v9253_v60 = vmul.f32 %v9146_v26, %v22623_v4 }
 0x813   :  { %14252 = vmatprep.subr.bf16.mxu0 %v14251_v56  ;;  %v9252_v56 = vmul.f32 %v9142_v9, %v22619_v54  ;;  %v9258_v54 = vmul.f32 %v9166_v49, %v22647_v59  ;;  %v9259_v4 = vmul.f32 %v9170_v31, %v22651_v57  ;;  %v14305_v58 = vpack.c.bf16 %v9748_v0, %v9747_v63  ;;  %v9727_v49 = vld [vmem:[%s24031_s12 + $0x2c0] sm:$0xff]  ;;  %v9750_v31 = vld [vmem:[%s24031_s12 + $0x378] sm:$0xff] }
 0x814   :  { %14298 = vmatpush3.bf16.msra.mxu1 %v14297_v38  ;;  %v9511_v63 = vrot.slane %v22905_v46, %v22685_v13 }
 0x815   :  { %v8401_v8 = vpop.f32.mrb[46].mxu1  ;;  %14300 = vmatprep.subr.bf16.mxu1 %v14299_v40  ;;  %v9765_v40 = vld [vmem:[%s24031_s12 + $0x3f0] sm:$0xff] }
 0x816   :  { %v9410_v14 = vmul.f32 %v9300_v19, %v8401_v8  ;;  %v8614_v36 = vpop.f32.mrb[32].mxu0  ;;  %v8403_v38 = vpop.f32.mrb[47].mxu1  ;;  %14254 = vmatpush3.bf16.msra.mxu0 %v14253_v52  ;;  %v14307_v57 = vpack.c.bf16 %v9766_v33, %v9765_v40  ;;  %v9815_v8 = vld [vmem:[%s24031_s12 + $0x580] sm:$0xff] }
 0x817   :  { %v9416_v9 = vmul.f32 %v9324_v6, %v8614_v36  ;;  %v9411_v19 = vmul.f32 %v9304_v44, %v8403_v38  ;;  %v8616_v52 = vpop.f32.mrb[33].mxu0  ;;  %14256 = vmatprep.subr.bf16.mxu0 %v14255_v24  ;;  %v9728_v6 = vld [vmem:[%s24031_s12 + $0x2c8] sm:$0xff]  ;;  %v9491_v44 = vrot.slane %v22701_v3, %v22732_v45  ;;  %v14309_v36 = vpack.c.bf16 %v9750_v31, %v9749_v32  ;;  %v9729_v38 = vld [vmem:[%s24031_s12 + $0x2d0] sm:$0xff] }
 0x818   :  { %v22914_v59 = vadd.f32 %v9410_v14, %v9252_v56  ;;  %v9417_v26 = vmul.f32 %v9328_v42, %v8616_v52  ;;  %14302 = vmatpush3.bf16.msra.mxu1 %v14301_v22  ;;  %v14261_v22 = vpack.c.bf16 %v9710_v7, %v9709_v29  ;;  %v14263_v56 = vpack.c.bf16 %v9728_v6, %v9727_v49  ;;  %v9711_v14 = vld [vmem:[%s24031_s12 + $0x240] sm:$0xff]  ;;  %v9817_v52 = vld [vmem:[%s24031_s12 + $0x590] sm:$0xff] }
 0x819   :  { %v22924_v24 = vadd.f32 %v9416_v9, %v9258_v54  ;;  %v9436_v53 = vadd.f32 %v9411_v19, %v9253_v60  ;;  %14304 = vmatprep.subr.bf16.mxu1 %v14303_v18  ;;  %v9816_v18 = vld [vmem:[%s24031_s12 + $0x588] sm:$0xff]  ;;  %v9799_v60 = vld [vmem:[%s24031_s12 + $0x500] sm:$0xff]  ;;  %v9713_v7 = vld [vmem:[%s24031_s12 + $0x250] sm:$0xff]  ;;  %v9316_v32 = vrot.slane %v22837_v43, %v22726_v5 }
 0x81a   :  { %v9442_v42 = vadd.f32 %v9417_v26, %v9259_v4  ;;  %14258 = vmatpush3.bf16.msra.mxu0 %v14257_v1  ;;  %v9712_v1 = vld [vmem:[%s24031_s12 + $0x248] sm:$0xff]  ;;  %v14343_v33 = vpack.c.bf16 %v9816_v18, %v9815_v8  ;;  %v9714_v4 = vld [vmem:[%s24031_s12 + $0x258] sm:$0xff]  ;;  %v9158_v26 = vrot.slane %v22635_v61, %v22726_v5  ;;  %v9731_v6 = vld [vmem:[%s24031_s12 + $0x2e0] sm:$0xff]  ;;  %v9340_v18 = vrot.slane %v22837_v43, %v22732_v45 }
 0x81b   :  { %14260 = vmatprep.subr.bf16.mxu0 %v14259_v41  ;;  %v9594_v0 = vadd.f32 %v9487_v17, %v9436_v53  ;;  %v9730_v41 = vld [vmem:[%s24031_s12 + $0x2d8] sm:$0xff]  ;;  %v9595_v17 = vadd.f32 %v9491_v44, %v22793_v10  ;;  %v9800_v54 = vld [vmem:[%s24031_s12 + $0x508] sm:$0xff]  ;;  %v14265_v9 = vpack.c.bf16 %v9712_v1, %v9711_v14  ;;  %v9182_v53 = vrot.slane %v22635_v61, %v22732_v45  ;;  %v9715_v8 = vld [vmem:[%s24031_s12 + $0x260] sm:$0xff] }
 0x81c   :  { %14306 = vmatpush3.bf16.msra.mxu1 %v14305_v58  ;;  %v9600_v19 = vadd.f32 %v9511_v63, %v9442_v42  ;;  %v9818_v10 = vld [vmem:[%s24031_s12 + $0x598] sm:$0xff]  ;;  %v14267_v29 = vpack.c.bf16 %v9730_v41, %v9729_v38  ;;  %v9162_v58 = vrot.slane %v22635_v61, %v22729_v21  ;;  %v14345_v49 = vpack.c.bf16 %v9800_v54, %v9799_v60  ;;  %v9732_v44 = vld [vmem:[%s24031_s12 + $0x2e8] sm:$0xff]  ;;  %v9801_v42 = vld [vmem:[%s24031_s12 + $0x510] sm:$0xff] }
 0x81d   :  { %v9619_v40 = vmax.f32 %v9594_v0, 0.0  ;;  %14308 = vmatprep.subr.bf16.mxu1 %v14307_v57  ;;  %v9620_v57 = vmax.f32 %v9595_v17, 0.0  ;;  %v14347_v31 = vpack.c.bf16 %v9818_v10, %v9817_v52  ;;  %v9320_v63 = vrot.slane %v22837_v43, %v22729_v21  ;;  %v9716_v14 = vld [vmem:[%s24031_s12 + $0x268] sm:$0xff]  ;;  %v9819_v1 = vld [vmem:[%s24031_s12 + $0x5a0] sm:$0xff]  ;;  %v9733_v54 = vld [vmem:[%s24031_s12 + $0x2f0] sm:$0xff] }
 0x81e   :  { %14262 = vmatpush3.bf16.msra.mxu0 %v14261_v22  ;;  %v9802_v22 = vld [vmem:[%s24031_s12 + $0x518] sm:$0xff]  ;;  %v9625_v0 = vmax.f32 %v9600_v19, 0.0  ;;  %v9186_v38 = vrot.slane %v22635_v61, %v22735_v27  ;;  %v9344_v41 = vrot.slane %v22837_v43, %v22735_v27  ;;  %v14271_v17 = vpack.c.bf16 %v9732_v44, %v9731_v6 }
 0x81f   :  { %10246 = vmatprep.mubr.f32.mxu0 %v9619_v40  ;;  %14264 = vmatprep.subr.bf16.mxu0 %v14263_v56  ;;  %v14269_v56 = vpack.c.bf16 %v9714_v4, %v9713_v7  ;;  %v9483_v40 = vrot.slane %v22701_v3, %v22630_v15  ;;  %v14349_v60 = vpack.c.bf16 %v9802_v22, %v9801_v42  ;;  %v9803_v4 = vld [vmem:[%s24031_s12 + $0x520] sm:$0xff] }
 0x820   :  { %14310 = vmatpush3.bf16.msra.mxu1 %v14309_v36  ;;  %v9820_v36 = vld [vmem:[%s24031_s12 + $0x5a8] sm:$0xff]  ;;  %v9256_v19 = vmul.f32 %v9158_v26, %v22621_v39  ;;  %v14273_v7 = vpack.c.bf16 %v9716_v14, %v9715_v8  ;;  %v9257_v6 = vmul.f32 %v9162_v58, %v22625_v28  ;;  %v9262_v44 = vmul.f32 %v9182_v53, %v22662_v25  ;;  %v9717_v25 = vld [vmem:[%s24031_s12 + $0x270] sm:$0xff]  ;;  %v9718_v58 = vld [vmem:[%s24031_s12 + $0x278] sm:$0xff] }
 0x821   :  { %14344 = vmatprep.subr.bf16.mxu1 %v14343_v33  ;;  %v14351_v3 = vpack.c.bf16 %v9820_v36, %v9819_v1  ;;  %v9263_v42 = vmul.f32 %v9186_v38, %v22664_v2  ;;  %v9783_v2 = vld [vmem:[%s24031_s12 + $0x480] sm:$0xff]  ;;  %v9805_v36 = vld [vmem:[%s24031_s12 + $0x530] sm:$0xff]  ;;  %v9806_v38 = vld [vmem:[%s24031_s12 + $0x538] sm:$0xff] }
 0x822   :  { %14266 = vmatpush3.bf16.msra.mxu0 %v14265_v9  ;;  %v9734_v9 = vld [vmem:[%s24031_s12 + $0x2f8] sm:$0xff] }
 0x823   :  { %10317 = vmatmul.mubr.f32.vlgmr.msra.gmra.mrb[60].mxu1 %v9620_v57  ;;  %14268 = vmatprep.subr.bf16.mxu0 %v14267_v29  ;;  %v14275_v28 = vpack.c.bf16 %v9734_v9, %v9733_v54  ;;  %v9767_v9 = vld [vmem:[%s24031_s12 + $0x400] sm:$0xff] }
 0x824   :  { %v8543_v33 = vpop.f32.mrb[48].mxu1  ;;  %14346 = vmatpush3.bf16.msra.mxu1 %v14345_v49  ;;  %10456 = vmatprep.mubr.f32.mxu1 %v9625_v0  ;;  %v9804_v49 = vld [vmem:[%s24031_s12 + $0x528] sm:$0xff] }
 0x825   :  { %v9414_v52 = vmul.f32 %v9316_v32, %v8543_v33  ;;  %v8756_v10 = vpop.f32.mrb[34].mxu0  ;;  %v8545_v29 = vpop.f32.mrb[49].mxu1  ;;  %14348 = vmatprep.subr.bf16.mxu1 %v14347_v31  ;;  %v9821_v32 = vld [vmem:[%s24031_s12 + $0x5b0] sm:$0xff]  ;;  %v9822_v31 = vld [vmem:[%s24031_s12 + $0x5b8] sm:$0xff]  ;;  %v9784_v0 = vld [vmem:[%s24031_s12 + $0x488] sm:$0xff] }
 0x826   :  { %v9420_v57 = vmul.f32 %v9340_v18, %v8756_v10  ;;  %v9415_v39 = vmul.f32 %v9320_v63, %v8545_v29  ;;  %v8758_v26 = vpop.f32.mrb[35].mxu0  ;;  %14270 = vmatpush3.bf16.msra.mxu0 %v14269_v56  ;;  %v14353_v63 = vpack.c.bf16 %v9804_v49, %v9803_v4  ;;  %v9503_v56 = vrot.slane %v22905_v46, %v22729_v21  ;;  %v9824_v33 = vld [vmem:[%s24031_s12 + $0x5c8] sm:$0xff]  ;;  %v9785_v29 = vld [vmem:[%s24031_s12 + $0x490] sm:$0xff] }
 0x827   :  { %v23035_v22 = vadd.f32 %v9414_v52, %v9256_v19  ;;  %v9421_v8 = vmul.f32 %v9344_v41, %v8758_v26  ;;  %14272 = vmatprep.subr.bf16.mxu0 %v14271_v17  ;;  %v14355_v1 = vpack.c.bf16 %v9822_v31, %v9821_v32  ;;  %v14277_v41 = vpack.c.bf16 %v9718_v58, %v9717_v25  ;;  %v9823_v17 = vld [vmem:[%s24031_s12 + $0x5c0] sm:$0xff]  ;;  %v9768_v19 = vld [vmem:[%s24031_s12 + $0x408] sm:$0xff]  ;;  %v23089_v4 = vld [vmem:[%s24029_s10 + $0x10] sm:$0xff] }
 0x828   :  { %v23043_v53 = vadd.f32 %v9420_v57, %v9262_v44  ;;  %v9440_v18 = vadd.f32 %v9415_v39, %v9257_v6  ;;  %14350 = vmatpush3.bf16.msra.mxu1 %v14349_v60  ;;  %v9593_v60 = vadd.f32 %v9483_v40, %v22914_v59  ;;  %v14311_v54 = vpack.c.bf16 %v9784_v0, %v9783_v2  ;;  %v9786_v59 = vld [vmem:[%s24031_s12 + $0x498] sm:$0xff]  ;;  %v9825_v6 = vld [vmem:[%s24031_s12 + $0x5d0] sm:$0xff]  ;;  %v9787_v58 = vld [vmem:[%s24031_s12 + $0x4a0] sm:$0xff] }
 0x829   :  { %v23053_v14 = vadd.f32 %v9421_v8, %v9263_v42  ;;  %14352 = vmatprep.subr.bf16.mxu1 %v14351_v3  ;;  %v14357_v52 = vpack.c.bf16 %v9806_v38, %v9805_v36  ;;  %v14359_v40 = vpack.c.bf16 %v9824_v33, %v9823_v17  ;;  %v9808_v3 = vld [vmem:[%s24031_s12 + $0x548] sm:$0xff]  ;;  %v14313_v49 = vpack.c.bf16 %v9768_v19, %v9767_v9  ;;  %v9826_v44 = vld [vmem:[%s24031_s12 + $0x5d8] sm:$0xff]  ;;  %v9769_v32 = vld [vmem:[%s24031_s12 + $0x410] sm:$0xff] }
 0x82a   :  { %14274 = vmatpush3.bf16.msra.mxu0 %v14273_v7  ;;  %v9598_v10 = vadd.f32 %v9503_v56, %v9440_v18  ;;  %v9807_v7 = vld [vmem:[%s24031_s12 + $0x540] sm:$0xff]  ;;  %v9178_v57 = vrot.slane %v22635_v61, %v22820_v23  ;;  %v9618_v39 = vmax.f32 %v9593_v60, 0.0  ;;  %v14315_v26 = vpack.c.bf16 %v9786_v59, %v9785_v29  ;;  %v9770_v31 = vld [vmem:[%s24031_s12 + $0x418] sm:$0xff]  ;;  %v9809_v25 = vld [vmem:[%s24031_s12 + $0x550] sm:$0xff] }
 0x82b   :  { %14276 = vmatprep.subr.bf16.mxu0 %v14275_v28  ;;  %v9198_v42 = vrot.slane %v22658_v30, %v22677_v62  ;;  %v9332_v8 = vrot.slane %v22837_v43, %v22630_v15  ;;  %v14361_v61 = vpack.c.bf16 %v9808_v3, %v9807_v7  ;;  %v9788_v18 = vld [vmem:[%s24031_s12 + $0x4a8] sm:$0xff]  ;;  %v9336_v2 = vrot.slane %v22837_v43, %v22820_v23  ;;  %v9810_v56 = vld [vmem:[%s24031_s12 + $0x558] sm:$0xff]  ;;  %v9771_v60 = vld [vmem:[%s24031_s12 + $0x420] sm:$0xff] }
 0x82c   :  { %14354 = vmatpush3.bf16.msra.mxu1 %v14353_v63  ;;  %v9623_v28 = vmax.f32 %v9598_v10, 0.0  ;;  %v9356_v63 = vrot.slane %v23089_v4, %v22677_v62  ;;  %v14363_v0 = vpack.c.bf16 %v9826_v44, %v9825_v6  ;;  %v9828_v36 = vld [vmem:[%s24031_s12 + $0x5e8] sm:$0xff]  ;;  %v9202_v38 = vrot.slane %v22658_v30, %v22685_v13  ;;  %v9790_v7 = vld [vmem:[%s24031_s12 + $0x4b8] sm:$0xff] }
 0x82d   :  { %14356 = vmatprep.subr.bf16.mxu1 %v14355_v1  ;;  %v9827_v1 = vld [vmem:[%s24031_s12 + $0x5e0] sm:$0xff]  ;;  %v9360_v43 = vrot.slane %v23089_v4, %v22685_v13  ;;  %v14319_v33 = vpack.c.bf16 %v9788_v18, %v9787_v58  ;;  %v9515_v19 = vrot.slane %v22905_v46, %v22630_v15  ;;  %v14365_v29 = vpack.c.bf16 %v9810_v56, %v9809_v25 }
 0x82e   :  { %14278 = vmatpush3.bf16.msra.mxu0 %v14277_v41  ;;  %v14317_v41 = vpack.c.bf16 %v9770_v31, %v9769_v32  ;;  %v14367_v59 = vpack.c.bf16 %v9828_v36, %v9827_v1  ;;  %v9261_v3 = vmul.f32 %v9178_v57, %v22645_v20  ;;  %v9812_v32 = vld [vmem:[%s24031_s12 + $0x568] sm:$0xff]  ;;  %v9267_v31 = vmul.f32 %v9202_v38, %v22674_v35  ;;  %v9830_v57 = vld [vmem:[%s24031_s12 + $0x5f8] sm:$0xff]  ;;  %v9813_v36 = vld [vmem:[%s24031_s12 + $0x570] sm:$0xff] }
 0x82f   :  { %14312 = vmatprep.subr.bf16.mxu0 %v14311_v54  ;;  %v9772_v54 = vld [vmem:[%s24031_s12 + $0x428] sm:$0xff]  ;;  %v9774_v35 = vld [vmem:[%s24031_s12 + $0x438] sm:$0xff]  ;;  %v9507_v56 = vrot.slane %v22905_v46, %v22677_v62 }
 0x830   :  { %14358 = vmatpush3.bf16.msra.mxu1 %v14357_v52  ;;  %v14321_v20 = vpack.c.bf16 %v9772_v54, %v9771_v60  ;;  %v9814_v38 = vld [vmem:[%s24031_s12 + $0x578] sm:$0xff]  ;;  %v9775_v54 = vld [vmem:[%s24031_s12 + $0x440] sm:$0xff] }
 0x831   :  { %10247 = vmatmul.mubr.f32.vlgmr.msra.gmra.mrb[42].mxu0 %v9618_v39  ;;  %14360 = vmatprep.subr.bf16.mxu1 %v14359_v40  ;;  %v9789_v40 = vld [vmem:[%s24031_s12 + $0x4b0] sm:$0xff] }
 0x832   :  { %14314 = vmatpush3.bf16.msra.mxu0 %v14313_v49  ;;  %10386 = vmatprep.mubr.f32.mxu0 %v9623_v28  ;;  %v9266_v49 = vmul.f32 %v9198_v42, %v22670_v16  ;;  %v9829_v16 = vld [vmem:[%s24031_s12 + $0x5f0] sm:$0xff]  ;;  %v14323_v25 = vpack.c.bf16 %v9790_v7, %v9789_v40  ;;  %v9864_v7 = vld [vmem:[%s24031_s12 + $0x708] sm:$0xff] }
 0x833   :  { %v8685_v17 = vpop.f32.mrb[50].mxu1  ;;  %14316 = vmatprep.subr.bf16.mxu0 %v14315_v26  ;;  %v9811_v26 = vld [vmem:[%s24031_s12 + $0x560] sm:$0xff]  ;;  %v14371_v1 = vpack.c.bf16 %v9830_v57, %v9829_v16  ;;  %v9796_v16 = vld [vmem:[%s24031_s12 + $0x4e8] sm:$0xff]  ;;  %v9214_v57 = vrot.slane %v22658_v30, %v22732_v45 }
 0x834   :  { %v9418_v9 = vmul.f32 %v9332_v8, %v8685_v17  ;;  %v8898_v52 = vpop.f32.mrb[36].mxu0  ;;  %v8687_v10 = vpop.f32.mrb[51].mxu1  ;;  %14362 = vmatpush3.bf16.msra.mxu1 %v14361_v61  ;;  %v9880_v17 = vld [vmem:[%s24031_s12 + $0x788] sm:$0xff] }
 0x835   :  { %v9424_v6 = vmul.f32 %v9356_v63, %v8898_v52  ;;  %v9419_v44 = vmul.f32 %v9336_v2, %v8687_v10  ;;  %v8900_v39 = vpop.f32.mrb[37].mxu0  ;;  %14364 = vmatprep.subr.bf16.mxu1 %v14363_v0  ;;  %v14369_v63 = vpack.c.bf16 %v9812_v32, %v9811_v26  ;;  %v9791_v2 = vld [vmem:[%s24031_s12 + $0x4c0] sm:$0xff]  ;;  %v9792_v0 = vld [vmem:[%s24031_s12 + $0x4c8] sm:$0xff]  ;;  %v9793_v10 = vld [vmem:[%s24031_s12 + $0x4d0] sm:$0xff]  ;;  %v9190_v32 = vrot.slane %v22658_v30, %v22726_v5 }
 0x836   :  { %v9443_v8 = vadd.f32 %v9418_v9, %v22643_v12  ;;  %v9425_v28 = vmul.f32 %v9360_v43, %v8900_v39  ;;  %14318 = vmatpush3.bf16.msra.mxu0 %v14317_v41  ;;  %v9773_v12 = vld [vmem:[%s24031_s12 + $0x430] sm:$0xff]  ;;  %v9879_v41 = vld [vmem:[%s24031_s12 + $0x780] sm:$0xff]  ;;  %v14327_v60 = vpack.c.bf16 %v9792_v0, %v9791_v2  ;;  %v9776_v9 = vld [vmem:[%s24031_s12 + $0x448] sm:$0xff]  ;;  %v9376_v0 = vrot.slane %v23089_v4, %v22735_v27 }
 0x837   :  { %v23165_v42 = vadd.f32 %v9424_v6, %v9266_v49  ;;  %v23167_v61 = vadd.f32 %v9419_v44, %v9261_v3  ;;  %14320 = vmatprep.subr.bf16.mxu0 %v14319_v33  ;;  %v14325_v43 = vpack.c.bf16 %v9774_v35, %v9773_v12  ;;  %v9527_v33 = vrot.slane %v22905_v46, %v22735_v27  ;;  %v9863_v52 = vld [vmem:[%s24031_s12 + $0x700] sm:$0xff]  ;;  %v9777_v3 = vld [vmem:[%s24031_s12 + $0x450] sm:$0xff]  ;;  %v9778_v49 = vld [vmem:[%s24031_s12 + $0x458] sm:$0xff] }
 0x838   :  { %v23175_v58 = vadd.f32 %v9515_v19, %v9443_v8  ;;  %v23177_v18 = vadd.f32 %v9425_v28, %v9267_v31  ;;  %14366 = vmatpush3.bf16.msra.mxu1 %v14365_v29  ;;  %v14373_v19 = vpack.c.bf16 %v9814_v38, %v9813_v36  ;;  %v9794_v29 = vld [vmem:[%s24031_s12 + $0x4d8] sm:$0xff]  ;;  %v14407_v40 = vpack.c.bf16 %v9880_v17, %v9879_v41  ;;  %v23236_v26 = vld [vmem:[%s24031_s12 + $0x710] sm:$0xff]  ;;  %v9883_v17 = vld [vmem:[%s24031_s12 + $0x7a0] sm:$0xff] }
 0x839   :  { %14368 = vmatprep.subr.bf16.mxu1 %v14367_v59  ;;  %v9599_v59 = vadd.f32 %v9507_v56, %v22924_v24  ;;  %v14329_v6 = vpack.c.bf16 %v9776_v9, %v9775_v54  ;;  %v9604_v44 = vadd.f32 %v9527_v33, %v23053_v14  ;;  %v9881_v24 = vld [vmem:[%s24031_s12 + $0x790] sm:$0xff]  ;;  %v9882_v39 = vld [vmem:[%s24031_s12 + $0x798] sm:$0xff]  ;;  %v9194_v31 = vrot.slane %v22658_v30, %v22729_v21  ;;  %v9884_v33 = vld [vmem:[%s24031_s12 + $0x7a8] sm:$0xff] }
 0x83a   :  { %14322 = vmatpush3.bf16.msra.mxu0 %v14321_v20  ;;  %v9348_v14 = vrot.slane %v23089_v4, %v22726_v5  ;;  %v14331_v8 = vpack.c.bf16 %v9794_v29, %v9793_v10  ;;  %v9866_v28 = vld [vmem:[%s24031_s12 + $0x718] sm:$0xff]  ;;  %v9795_v20 = vld [vmem:[%s24031_s12 + $0x4e0] sm:$0xff]  ;;  %v9352_v12 = vrot.slane %v23089_v4, %v22729_v21  ;;  %v14409_v35 = vpack.c.bf16 %v9864_v7, %v9863_v52  ;;  %v9780_v29 = vld [vmem:[%s24031_s12 + $0x468] sm:$0xff] }
 0x83b   :  { %14324 = vmatprep.subr.bf16.mxu0 %v14323_v25  ;;  %v9372_v25 = vrot.slane %v23089_v4, %v22732_v45  ;;  %v9624_v2 = vmax.f32 %v9599_v59, 0.0  ;;  %v14411_v56 = vpack.c.bf16 %v9882_v39, %v9881_v24  ;;  %v9629_v36 = vmax.f32 %v9604_v44, 0.0  ;;  %v9779_v10 = vld [vmem:[%s24031_s12 + $0x460] sm:$0xff]  ;;  %v9868_v39 = vld [vmem:[%s24031_s12 + $0x728] sm:$0xff] }
 0x83c   :  { %14370 = vmatpush3.bf16.msra.mxu1 %v14369_v63  ;;  %v9218_v63 = vrot.slane %v22658_v30, %v22735_v27  ;;  %v14333_v38 = vpack.c.bf16 %v9778_v49, %v9777_v3  ;;  %v14335_v41 = vpack.c.bf16 %v9796_v16, %v9795_v20  ;;  %v9265_v54 = vmul.f32 %v9194_v31, %v22653_v11  ;;  %v9797_v11 = vld [vmem:[%s24031_s12 + $0x4f0] sm:$0xff]  ;;  %v9798_v3 = vld [vmem:[%s24031_s12 + $0x4f8] sm:$0xff]  ;;  %v9867_v24 = vld [vmem:[%s24031_s12 + $0x720] sm:$0xff] }
 0x83d   :  { %14372 = vmatprep.subr.bf16.mxu1 %v14371_v1  ;;  %v9270_v59 = vmul.f32 %v9214_v57, %v22705_v50  ;;  %v14415_v50 = vpack.c.bf16 %v9884_v33, %v9883_v17  ;;  %v14337_v31 = vpack.c.bf16 %v9780_v29, %v9779_v10  ;;  %v14339_v20 = vpack.c.bf16 %v9798_v3, %v9797_v11  ;;  %v9781_v16 = vld [vmem:[%s24031_s12 + $0x470] sm:$0xff]  ;;  %v9782_v57 = vld [vmem:[%s24031_s12 + $0x478] sm:$0xff]  ;;  %v9831_v17 = vld [vmem:[%s24031_s12 + $0x600] sm:$0xff] }
 0x83e   :  { %14326 = vmatpush3.bf16.msra.mxu0 %v14325_v43  ;;  %v14413_v43 = vpack.c.bf16 %v9866_v28, %v23236_v26  ;;  %v9271_v49 = vmul.f32 %v9218_v63, %v22707_v34  ;;  %v9885_v34 = vld [vmem:[%s24031_s12 + $0x7b0] sm:$0xff]  ;;  %v9519_v63 = vrot.slane %v22905_v46, %v22820_v23  ;;  %v9832_v33 = vld [vmem:[%s24031_s12 + $0x608] sm:$0xff]  ;;  %v9871_v10 = vld [vmem:[%s24031_s12 + $0x740] sm:$0xff]  ;;  %v9210_v29 = vrot.slane %v22658_v30, %v22820_v23 }
 0x83f   :  { %14328 = vmatprep.subr.bf16.mxu0 %v14327_v60  ;;  %v9264_v60 = vmul.f32 %v9190_v32, %v22649_v47  ;;  %v9833_v30 = vld [vmem:[%s24031_s12 + $0x610] sm:$0xff] }
 0x840   :  { %14374 = vmatpush3.bf16.msra.mxu1 %v14373_v19 }
 0x841   :  { %14408 = vmatprep.subr.bf16.mxu1 %v14407_v40 }
 0x842   :  { %v8827_v1 = vpop.f32.mrb[52].mxu1  ;;  %14330 = vmatpush3.bf16.msra.mxu0 %v14329_v6 }
 0x843   :  { %v9422_v9 = vmul.f32 %v9348_v14, %v8827_v1  ;;  %v9040_v19 = vpop.f32.mrb[38].mxu0  ;;  %v8829_v52 = vpop.f32.mrb[53].mxu1  ;;  %10457 = vmatmul.mubr.f32.vlgmr.msra.gmra.mrb[62].mxu1 %v9624_v2  ;;  %14332 = vmatprep.subr.bf16.mxu0 %v14331_v8  ;;  %v9886_v14 = vld [vmem:[%s24031_s12 + $0x7b8] sm:$0xff]  ;;  %v9499_v8 = vrot.slane %v22905_v46, %v22726_v5  ;;  %v14341_v1 = vpack.c.bf16 %v9782_v57, %v9781_v16  ;;  %v9873_v16 = vld [vmem:[%s24031_s12 + $0x750] sm:$0xff] }
 0x844   :  { %v9428_v40 = vmul.f32 %v9372_v25, %v9040_v19  ;;  %v9423_v7 = vmul.f32 %v9352_v12, %v8829_v52  ;;  %v9042_v47 = vpop.f32.mrb[39].mxu0  ;;  %14410 = vmatpush3.bf16.msra.mxu1 %v14409_v35  ;;  %10596 = vmatprep.mubr.f32.mxu1 %v9629_v36  ;;  %v14417_v25 = vpack.c.bf16 %v9868_v39, %v9867_v24  ;;  %v9847_v12 = vld [vmem:[%s24031_s12 + $0x680] sm:$0xff]  ;;  %v9848_v35 = vld [vmem:[%s24031_s12 + $0x688] sm:$0xff]  ;;  %v9874_v57 = vld [vmem:[%s24031_s12 + $0x758] sm:$0xff] }
 0x845   :  { %v23286_v6 = vadd.f32 %v9422_v9, %v9264_v60  ;;  %v9429_v44 = vmul.f32 %v9376_v0, %v9042_v47  ;;  %14412 = vmatprep.subr.bf16.mxu1 %v14411_v56  ;;  %v14419_v2 = vpack.c.bf16 %v9886_v14, %v9885_v34  ;;  %v9869_v0 = vld [vmem:[%s24031_s12 + $0x730] sm:$0xff]  ;;  %v9870_v56 = vld [vmem:[%s24031_s12 + $0x738] sm:$0xff]  ;;  %v9887_v36 = vld [vmem:[%s24031_s12 + $0x7c0] sm:$0xff]  ;;  %v9364_v19 = vrot.slane %v23089_v4, %v22630_v15 }
 0x846   :  { %v23294_v26 = vadd.f32 %v9428_v40, %v9270_v59  ;;  %v23296_v32 = vadd.f32 %v9423_v7, %v9265_v54  ;;  %14334 = vmatpush3.bf16.msra.mxu0 %v14333_v38  ;;  %v9888_v38 = vld [vmem:[%s24031_s12 + $0x7c8] sm:$0xff]  ;;  %v14421_v60 = vpack.c.bf16 %v9870_v56, %v9869_v0  ;;  %v9602_v54 = vadd.f32 %v9519_v63, %v23167_v61  ;;  %v9849_v9 = vld [vmem:[%s24031_s12 + $0x690] sm:$0xff]  ;;  %v9890_v47 = vld [vmem:[%s24031_s12 + $0x7d8] sm:$0xff] }
 0x847   :  { %v23306_v28 = vadd.f32 %v9429_v44, %v9271_v49  ;;  %14336 = vmatprep.subr.bf16.mxu0 %v14335_v41  ;;  %v14375_v41 = vpack.c.bf16 %v9848_v35, %v9847_v12  ;;  %v14423_v52 = vpack.c.bf16 %v9888_v38, %v9887_v36  ;;  %v9872_v61 = vld [vmem:[%s24031_s12 + $0x748] sm:$0xff]  ;;  %v9368_v59 = vrot.slane %v23089_v4, %v22820_v23  ;;  %v9889_v7 = vld [vmem:[%s24031_s12 + $0x7d0] sm:$0xff]  ;;  %v9834_v4 = vld [vmem:[%s24031_s12 + $0x618] sm:$0xff] }
 0x848   :  { %14414 = vmatpush3.bf16.msra.mxu1 %v14413_v43  ;;  %v9597_v43 = vadd.f32 %v9499_v8, %v23035_v22  ;;  %v9850_v22 = vld [vmem:[%s24031_s12 + $0x698] sm:$0xff]  ;;  %v14377_v40 = vpack.c.bf16 %v9832_v33, %v9831_v17  ;;  %v23375_v49 = vld [vmem:[%s24030_s11 + $0x10] sm:$0xff]  ;;  %v14425_v24 = vpack.c.bf16 %v9872_v61, %v9871_v10  ;;  %v9851_v39 = vld [vmem:[%s24031_s12 + $0x6a0] sm:$0xff]  ;;  %v14381_v35 = vpack.c.bf16 %v9834_v4, %v9833_v30 }
 0x849   :  { %14416 = vmatprep.subr.bf16.mxu1 %v14415_v50  ;;  %v14379_v3 = vpack.c.bf16 %v9850_v22, %v9849_v9  ;;  %v9627_v50 = vmax.f32 %v9602_v54, 0.0  ;;  %v9547_v14 = vrot.slane %v23375_v49, %v22630_v15  ;;  %v9891_v15 = vld [vmem:[%s24031_s12 + $0x7e0] sm:$0xff]  ;;  %v9892_v63 = vld [vmem:[%s24031_s12 + $0x7e8] sm:$0xff]  ;;  %v14429_v36 = vpack.c.bf16 %v9874_v57, %v9873_v16  ;;  %v9853_v38 = vld [vmem:[%s24031_s12 + $0x6b0] sm:$0xff] }
 0x84a   :  { %14338 = vmatpush3.bf16.msra.mxu0 %v14337_v31  ;;  %v9622_v11 = vmax.f32 %v9597_v43, 0.0  ;;  %v9852_v31 = vld [vmem:[%s24031_s12 + $0x6a8] sm:$0xff]  ;;  %v9875_v17 = vld [vmem:[%s24031_s12 + $0x760] sm:$0xff]  ;;  %v9893_v54 = vld [vmem:[%s24031_s12 + $0x7f0] sm:$0xff]  ;;  %v9543_v30 = vrot.slane %v23375_v49, %v22685_v13 }
 0x84b   :  { %14340 = vmatprep.subr.bf16.mxu0 %v14339_v20  ;;  %v14427_v20 = vpack.c.bf16 %v9890_v47, %v9889_v7  ;;  %v14383_v0 = vpack.c.bf16 %v9852_v31, %v9851_v39  ;;  %v9836_v56 = vld [vmem:[%s24031_s12 + $0x628] sm:$0xff]  ;;  %v9894_v9 = vld [vmem:[%s24031_s12 + $0x7f8] sm:$0xff]  ;;  %v9855_v61 = vld [vmem:[%s24031_s12 + $0x6c0] sm:$0xff] }
 0x84c   :  { %14418 = vmatpush3.bf16.msra.mxu1 %v14417_v25  ;;  %v9269_v25 = vmul.f32 %v9210_v29, %v22668_v37  ;;  %v9835_v37 = vld [vmem:[%s24031_s12 + $0x620] sm:$0xff]  ;;  %v9876_v33 = vld [vmem:[%s24031_s12 + $0x768] sm:$0xff]  ;;  %v9877_v7 = vld [vmem:[%s24031_s12 + $0x770] sm:$0xff] }
 0x84d   :  { %14420 = vmatprep.subr.bf16.mxu1 %v14419_v2  ;;  %v14433_v10 = vpack.c.bf16 %v9876_v33, %v9875_v17  ;;  %v9856_v29 = vld [vmem:[%s24031_s12 + $0x6c8] sm:$0xff]  ;;  %v9878_v47 = vld [vmem:[%s24031_s12 + $0x778] sm:$0xff]  ;;  %v9857_v31 = vld [vmem:[%s24031_s12 + $0x6d0] sm:$0xff] }
 0x84e   :  { %14342 = vmatpush3.bf16.msra.mxu0 %v14341_v1  ;;  %v12271_v4 = vld [vmem:[%s24028_s9 + $0x18] ss:$0 sm:$0xff]  ;;  %v14437_v13 = vpack.c.bf16 %v9878_v47, %v9877_v7  ;;  %v9928_v16 = vld [vmem:[%s24031_s12 + $0x908] sm:$0xff]  ;;  %v9929_v17 = vld [vmem:[%s24031_s12 + $0x910] sm:$0xff] }
 0x84f   :  { %14376 = vmatprep.subr.bf16.mxu0 %v14375_v41  ;;  %v14431_v41 = vpack.c.bf16 %v9892_v63, %v9891_v15  ;;  %v12272_v39 = vld [vmem:[%s24029_s10 + $0x18] ss:$0 sm:$0xff]  ;;  %v9272_v15 = vmul.f32 %v12271_v4, %v22672_v48  ;;  %v9860_v48 = vld [vmem:[%s24031_s12 + $0x6e8] sm:$0xff]  ;;  %v9931_v7 = vld [vmem:[%s24031_s12 + $0x920] sm:$0xff] }
 0x850   :  { %v8969_v44 = vpop.f32.mrb[54].mxu1  ;;  %14422 = vmatpush3.bf16.msra.mxu1 %v14421_v60  ;;  %v14385_v60 = vpack.c.bf16 %v9836_v56, %v9835_v37  ;;  %v9841_v37 = vld [vmem:[%s24031_s12 + $0x650] sm:$0xff]  ;;  %v9930_v33 = vld [vmem:[%s24031_s12 + $0x918] sm:$0xff]  ;;  %v9932_v47 = vld [vmem:[%s24031_s12 + $0x928] sm:$0xff] }
 0x851   :  { %v9426_v34 = vmul.f32 %v9364_v19, %v8969_v44  ;;  %v8971_v8 = vpop.f32.mrb[55].mxu1  ;;  %10387 = vmatmul.mubr.f32.vlgmr.msra.gmra.mrb[44].mxu0 %v9622_v11  ;;  %14424 = vmatprep.subr.bf16.mxu1 %v14423_v52  ;;  %v9837_v19 = vld [vmem:[%s24031_s12 + $0x630] sm:$0xff]  ;;  %v9838_v52 = vld [vmem:[%s24031_s12 + $0x638] sm:$0xff]  ;;  %v14391_v44 = vpack.c.bf16 %v9856_v29, %v9855_v61  ;;  %v14477_v61 = vpack.c.bf16 %v9930_v33, %v9929_v17  ;;  %v9915_v33 = vld [vmem:[%s24031_s12 + $0x8a0] sm:$0xff] }
 0x852   :  { %v9427_v12 = vmul.f32 %v9368_v59, %v8971_v8  ;;  %14378 = vmatpush3.bf16.msra.mxu0 %v14377_v40  ;;  %10526 = vmatprep.mubr.f32.mxu0 %v9627_v50  ;;  %v9523_v59 = vrot.slane %v22905_v46, %v22732_v45  ;;  %v14435_v40 = vpack.c.bf16 %v9894_v9, %v9893_v54  ;;  %v9944_v46 = vld [vmem:[%s24031_s12 + $0x988] sm:$0xff]  ;;  %v9839_v50 = vld [vmem:[%s24031_s12 + $0x640] sm:$0xff]  ;;  %v9861_v29 = vld [vmem:[%s24031_s12 + $0x6f0] sm:$0xff] }
 0x853   :  { %v9451_v2 = vadd.f32 %v9426_v34, %v22666_v55  ;;  %14380 = vmatprep.subr.bf16.mxu0 %v14379_v3  ;;  %v9854_v55 = vld [vmem:[%s24031_s12 + $0x6b8] sm:$0xff]  ;;  %v14389_v11 = vpack.c.bf16 %v9838_v52, %v9837_v19  ;;  %v9943_v3 = vld [vmem:[%s24031_s12 + $0x980] sm:$0xff]  ;;  %v9845_v4 = vld [vmem:[%s24031_s12 + $0x670] sm:$0xff] }
 0x854   :  { %v23405_v1 = vadd.f32 %v9427_v12, %v9269_v25  ;;  %14426 = vmatpush3.bf16.msra.mxu1 %v14425_v24  ;;  %v14387_v22 = vpack.c.bf16 %v9854_v55, %v9853_v38  ;;  %v9840_v24 = vld [vmem:[%s24031_s12 + $0x648] sm:$0xff]  ;;  %v9858_v34 = vld [vmem:[%s24031_s12 + $0x6d8] sm:$0xff]  ;;  %v14471_v8 = vpack.c.bf16 %v9944_v46, %v9943_v3  ;;  %v9608_v12 = vadd.f32 %v9543_v30, %v23177_v18  ;;  %v9947_v9 = vld [vmem:[%s24031_s12 + $0x9a0] sm:$0xff] }
 0x855   :  { %v23413_v43 = vadd.f32 %v9547_v14, %v9451_v2  ;;  %14428 = vmatprep.subr.bf16.mxu1 %v14427_v20  ;;  %v9603_v14 = vadd.f32 %v9523_v59, %v23043_v53  ;;  %v9927_v20 = vld [vmem:[%s24031_s12 + $0x900] sm:$0xff]  ;;  %v14393_v25 = vpack.c.bf16 %v9840_v24, %v9839_v50  ;;  %v9946_v53 = vld [vmem:[%s24031_s12 + $0x998] sm:$0xff]  ;;  %v9949_v3 = vld [vmem:[%s24031_s12 + $0x9b0] sm:$0xff]  ;;  %v14481_v50 = vpack.c.bf16 %v9932_v47, %v9931_v7 }
 0x856   :  { %14382 = vmatpush3.bf16.msra.mxu0 %v14381_v35  ;;  %v9945_v35 = vld [vmem:[%s24031_s12 + $0x990] sm:$0xff]  ;;  %v9842_v18 = vld [vmem:[%s24031_s12 + $0x658] sm:$0xff]  ;;  %v14473_v56 = vpack.c.bf16 %v9928_v16, %v9927_v20  ;;  %v9843_v52 = vld [vmem:[%s24031_s12 + $0x660] sm:$0xff] }
 0x857   :  { %14384 = vmatprep.subr.bf16.mxu0 %v14383_v0  ;;  %v14395_v0 = vpack.c.bf16 %v9858_v34, %v9857_v31  ;;  %v9628_v38 = vmax.f32 %v9603_v14, 0.0  ;;  %v14397_v54 = vpack.c.bf16 %v9842_v18, %v9841_v37  ;;  %v9862_v59 = vld [vmem:[%s24031_s12 + $0x6f8] sm:$0xff]  ;;  %v9911_v24 = vld [vmem:[%s24031_s12 + $0x880] sm:$0xff]  ;;  %v9933_v34 = vld [vmem:[%s24031_s12 + $0x930] sm:$0xff] }
 0x858   :  { %14430 = vmatpush3.bf16.msra.mxu1 %v14429_v36  ;;  %v9859_v36 = vld [vmem:[%s24031_s12 + $0x6e0] sm:$0xff]  ;;  %v9950_v46 = vld [vmem:[%s24031_s12 + $0x9b8] sm:$0xff]  ;;  %v14403_v30 = vpack.c.bf16 %v9862_v59, %v9861_v29  ;;  %v9953_v37 = vld [vmem:[%s24031_s12 + $0x9d0] sm:$0xff] }
 0x859   :  { %14432 = vmatprep.subr.bf16.mxu1 %v14431_v41  ;;  %v14475_v41 = vpack.c.bf16 %v9946_v53, %v9945_v35  ;;  %v14399_v19 = vpack.c.bf16 %v9860_v48, %v9859_v36  ;;  %v14483_v31 = vpack.c.bf16 %v9950_v46, %v9949_v3  ;;  %v9934_v14 = vld [vmem:[%s24031_s12 + $0x938] sm:$0xff]  ;;  %v9951_v20 = vld [vmem:[%s24031_s12 + $0x9c0] sm:$0xff]  ;;  %v9913_v53 = vld [vmem:[%s24031_s12 + $0x890] sm:$0xff] }
 0x85a   :  { %14386 = vmatpush3.bf16.msra.mxu0 %v14385_v60  ;;  %v9633_v60 = vmax.f32 %v9608_v12, 0.0  ;;  %v14485_v12 = vpack.c.bf16 %v9934_v14, %v9933_v34  ;;  %v9954_v18 = vld [vmem:[%s24031_s12 + $0x9d8] sm:$0xff]  ;;  %v9897_v48 = vld [vmem:[%s24031_s12 + $0x810] sm:$0xff]  ;;  %v9900_v29 = vld [vmem:[%s24031_s12 + $0x828] sm:$0xff]  ;;  %v9539_v34 = vrot.slane %v23375_v49, %v22677_v62 }
 0x85b   :  { %14388 = vmatprep.subr.bf16.mxu0 %v14387_v22  ;;  %v9948_v22 = vld [vmem:[%s24031_s12 + $0x9a8] sm:$0xff]  ;;  %v9918_v7 = vld [vmem:[%s24031_s12 + $0x8b8] sm:$0xff] }
 0x85c   :  { %14434 = vmatpush3.bf16.msra.mxu1 %v14433_v10  ;;  %v9844_v10 = vld [vmem:[%s24031_s12 + $0x668] sm:$0xff] }
 0x85d   :  { %14436 = vmatprep.subr.bf16.mxu1 %v14435_v40  ;;  %v14479_v40 = vpack.c.bf16 %v9948_v22, %v9947_v9  ;;  %v9938_v9 = vld [vmem:[%s24031_s12 + $0x958] sm:$0xff]  ;;  %v9940_v3 = vld [vmem:[%s24031_s12 + $0x968] sm:$0xff] }
 0x85e   :  { %v9111_v57 = vpop.f32.mrb[56].mxu1  ;;  %14390 = vmatpush3.bf16.msra.mxu0 %v14389_v11  ;;  %v14401_v11 = vpack.c.bf16 %v9844_v10, %v9843_v52  ;;  %v9956_v52 = vld [vmem:[%s24031_s12 + $0x9e8] sm:$0xff] }
 0x85f   :  { %v9430_v63 = vmul.f32 %v12272_v39, %v9111_v57  ;;  %v12846_v2 = vpop.f32.mrb[57].mxu1  ;;  %14392 = vmatprep.subr.bf16.mxu0 %v14391_v44  ;;  %v9846_v44 = vld [vmem:[%s24031_s12 + $0x678] sm:$0xff]  ;;  %v9912_v39 = vld [vmem:[%s24031_s12 + $0x888] sm:$0xff]  ;;  %v9895_v57 = vld [vmem:[%s24031_s12 + $0x800] sm:$0xff] }
 0x860   :  { %14438 = vmatpush3.bf16.msra.mxu1 %v14437_v13  ;;  %v9535_v13 = vrot.slane %v23375_v49, %v22729_v21  ;;  %v9952_v21 = vld [vmem:[%s24031_s12 + $0x9c8] sm:$0xff]  ;;  %v14439_v16 = vpack.c.bf16 %v9912_v39, %v9911_v24  ;;  %v9935_v2 = vld [vmem:[%s24031_s12 + $0x940] sm:$0xff]  ;;  %v9902_v24 = vld [vmem:[%s24031_s12 + $0x838] sm:$0xff] }
 0x861   :  { %v23500_v55 = vadd.f32 %v9430_v63, %v9272_v15  ;;  %14472 = vmatprep.subr.bf16.mxu1 %v14471_v8  ;;  %v14405_v8 = vpack.c.bf16 %v9846_v44, %v9845_v4  ;;  %v9914_v15 = vld [vmem:[%s24031_s12 + $0x898] sm:$0xff]  ;;  %v14487_v63 = vpack.c.bf16 %v9952_v21, %v9951_v20  ;;  %v10008_v62 = vld [vmem:[%s24031_s12 + $0xb88] sm:$0xff] }
 0x862   :  { %14394 = vmatpush3.bf16.msra.mxu0 %v14393_v25  ;;  %v9896_v25 = vld [vmem:[%s24031_s12 + $0x808] sm:$0xff]  ;;  %v9606_v35 = vadd.f32 %v9535_v13, %v23296_v32  ;;  %v14443_v36 = vpack.c.bf16 %v9914_v15, %v9913_v53  ;;  %v9958_v4 = vld [vmem:[%s24031_s12 + $0x9f8] sm:$0xff]  ;;  %v9919_v13 = vld [vmem:[%s24031_s12 + $0x8c0] sm:$0xff] }
 0x863   :  { %10597 = vmatmul.mubr.f32.vlgmr.msra.gmra.mrb[64].mxu1 %v9628_v38  ;;  %14396 = vmatprep.subr.bf16.mxu0 %v14395_v0  ;;  %v9936_v0 = vld [vmem:[%s24031_s12 + $0x948] sm:$0xff]  ;;  %v14441_v32 = vpack.c.bf16 %v9896_v25, %v9895_v57  ;;  %v9898_v38 = vld [vmem:[%s24031_s12 + $0x818] sm:$0xff]  ;;  %v9559_v57 = vrot.slane %v23375_v49, %v22735_v27  ;;  %v9921_v15 = vld [vmem:[%s24031_s12 + $0x8d0] sm:$0xff] }
 0x864   :  { %14474 = vmatpush3.bf16.msra.mxu1 %v14473_v56  ;;  %10736 = vmatprep.mubr.f32.mxu1 %v9633_v60  ;;  %v9626_v56 = vmax.f32 %v23175_v58, 0.0  ;;  %v14489_v17 = vpack.c.bf16 %v9936_v0, %v9935_v2  ;;  %v9916_v58 = vld [vmem:[%s24031_s12 + $0x8a8] sm:$0xff]  ;;  %v14491_v60 = vpack.c.bf16 %v9954_v18, %v9953_v37  ;;  %v14445_v22 = vpack.c.bf16 %v9898_v38, %v9897_v48  ;;  %v9942_v20 = vld [vmem:[%s24031_s12 + $0x978] sm:$0xff]  ;;  %v9991_v0 = vld [vmem:[%s24031_s12 + $0xb00] sm:$0xff] }
 0x865   :  { %14476 = vmatprep.subr.bf16.mxu1 %v14475_v41  ;;  %v9631_v41 = vmax.f32 %v9606_v35, 0.0  ;;  %v14447_v10 = vpack.c.bf16 %v9916_v58, %v9915_v33  ;;  %v9904_v35 = vld [vmem:[%s24031_s12 + $0x848] sm:$0xff]  ;;  %v9922_v27 = vld [vmem:[%s24031_s12 + $0x8d8] sm:$0xff]  ;;  %v9612_v18 = vadd.f32 %v9559_v57, %v23306_v28  ;;  %v9905_v48 = vld [vmem:[%s24031_s12 + $0x850] sm:$0xff] }
 0x866   :  { %14398 = vmatpush3.bf16.msra.mxu0 %v14397_v54  ;;  %v9937_v54 = vld [vmem:[%s24031_s12 + $0x950] sm:$0xff]  ;;  %v9906_v38 = vld [vmem:[%s24031_s12 + $0x858] sm:$0xff] }
 0x867   :  { %14400 = vmatprep.subr.bf16.mxu0 %v14399_v19  ;;  %v9955_v19 = vld [vmem:[%s24031_s12 + $0x9e0] sm:$0xff]  ;;  %v14493_v59 = vpack.c.bf16 %v9938_v9, %v9937_v54  ;;  %v9994_v54 = vld [vmem:[%s24031_s12 + $0xb18] sm:$0xff]  ;;  %v9637_v9 = vmax.f32 %v9612_v18, 0.0 }
 0x868   :  { %14478 = vmatpush3.bf16.msra.mxu1 %v14477_v61  ;;  %v9899_v61 = vld [vmem:[%s24031_s12 + $0x820] sm:$0xff]  ;;  %v14495_v47 = vpack.c.bf16 %v9956_v52, %v9955_v19  ;;  %v10012_v52 = vld [vmem:[%s24031_s12 + $0xba8] sm:$0xff] }
 0x869   :  { %14480 = vmatprep.subr.bf16.mxu1 %v14479_v40  ;;  %v9917_v40 = vld [vmem:[%s24031_s12 + $0x8b0] sm:$0xff]  ;;  %v14449_v46 = vpack.c.bf16 %v9900_v29, %v9899_v61  ;;  %v10011_v19 = vld [vmem:[%s24031_s12 + $0xba0] sm:$0xff]  ;;  %v9908_v29 = vld [vmem:[%s24031_s12 + $0x868] sm:$0xff] }
 0x86a   :  { %14402 = vmatpush3.bf16.msra.mxu0 %v14401_v11  ;;  %v9939_v11 = vld [vmem:[%s24031_s12 + $0x960] sm:$0xff]  ;;  %v14451_v44 = vpack.c.bf16 %v9918_v7, %v9917_v40  ;;  %v9925_v40 = vld [vmem:[%s24031_s12 + $0x8f0] sm:$0xff]  ;;  %v9926_v7 = vld [vmem:[%s24031_s12 + $0x8f8] sm:$0xff] }
 0x86b   :  { %14404 = vmatprep.subr.bf16.mxu0 %v14403_v30  ;;  %v9957_v30 = vld [vmem:[%s24031_s12 + $0x9f0] sm:$0xff]  ;;  %v14497_v39 = vpack.c.bf16 %v9940_v3, %v9939_v11  ;;  %v9907_v61 = vld [vmem:[%s24031_s12 + $0x860] sm:$0xff]  ;;  %v9996_v3 = vld [vmem:[%s24031_s12 + $0xb28] sm:$0xff] }
 0x86c   :  { %14482 = vmatpush3.bf16.msra.mxu1 %v14481_v50  ;;  %v9901_v50 = vld [vmem:[%s24031_s12 + $0x830] sm:$0xff]  ;;  %v14499_v14 = vpack.c.bf16 %v9958_v4, %v9957_v30  ;;  %v9995_v11 = vld [vmem:[%s24031_s12 + $0xb20] sm:$0xff]  ;;  %v10014_v4 = vld [vmem:[%s24031_s12 + $0xbb8] sm:$0xff] }
 0x86d   :  { %14484 = vmatprep.subr.bf16.mxu1 %v14483_v31  ;;  %v9920_v31 = vld [vmem:[%s24031_s12 + $0x8c8] sm:$0xff]  ;;  %v14453_v21 = vpack.c.bf16 %v9902_v24, %v9901_v50  ;;  %v10013_v30 = vld [vmem:[%s24031_s12 + $0xbb0] sm:$0xff]  ;;  %v14467_v50 = vpack.c.bf16 %v9926_v7, %v9925_v40 }
 0x86e   :  { %14406 = vmatpush3.bf16.msra.mxu0 %v14405_v8  ;;  %v9941_v8 = vld [vmem:[%s24031_s12 + $0x970] sm:$0xff]  ;;  %v14455_v25 = vpack.c.bf16 %v9920_v31, %v9919_v13  ;;  %v14545_v13 = vpack.c.bf16 %v9996_v3, %v9995_v11  ;;  %v9975_v31 = vld [vmem:[%s24031_s12 + $0xa80] sm:$0xff]  ;;  %v10004_v40 = vld [vmem:[%s24031_s12 + $0xb68] sm:$0xff] }
 0x86f   :  { %14440 = vmatprep.subr.bf16.mxu0 %v14439_v16  ;;  %v10007_v16 = vld [vmem:[%s24031_s12 + $0xb80] sm:$0xff]  ;;  %v14501_v53 = vpack.c.bf16 %v9942_v20, %v9941_v8  ;;  %v9909_v24 = vld [vmem:[%s24031_s12 + $0x870] sm:$0xff]  ;;  %v9998_v20 = vld [vmem:[%s24031_s12 + $0xb38] sm:$0xff] }
 0x870   :  { %14486 = vmatpush3.bf16.msra.mxu1 %v14485_v12  ;;  %v9903_v12 = vld [vmem:[%s24031_s12 + $0x840] sm:$0xff]  ;;  %v14535_v2 = vpack.c.bf16 %v10008_v62, %v10007_v16  ;;  %v9997_v8 = vld [vmem:[%s24031_s12 + $0xb30] sm:$0xff]  ;;  %v10022_v11 = vld [vmem:[%s24031_s12 + $0xbf8] sm:$0xff] }
 0x871   :  { %10527 = vmatmul.mubr.f32.vlgmr.msra.gmra.mrb[46].mxu0 %v9626_v56  ;;  %14488 = vmatprep.subr.bf16.mxu1 %v14487_v63  ;;  %v9607_v63 = vadd.f32 %v9539_v34, %v23165_v42  ;;  %v14457_v37 = vpack.c.bf16 %v9904_v35, %v9903_v12  ;;  %v10009_v56 = vld [vmem:[%s24031_s12 + $0xb90] sm:$0xff]  ;;  %v10010_v42 = vld [vmem:[%s24031_s12 + $0xb98] sm:$0xff]  ;;  %v9551_v34 = vrot.slane %v23375_v49, %v22820_v23  ;;  %v10015_v16 = vld [vmem:[%s24031_s12 + $0xbc0] sm:$0xff] }
 0x872   :  { %14442 = vmatpush3.bf16.msra.mxu0 %v14441_v32  ;;  %10666 = vmatprep.mubr.f32.mxu0 %v9631_v41  ;;  %v9992_v32 = vld [vmem:[%s24031_s12 + $0xb08] sm:$0xff]  ;;  %v9923_v41 = vld [vmem:[%s24031_s12 + $0x8e0] sm:$0xff]  ;;  %v14539_v58 = vpack.c.bf16 %v10010_v42, %v10009_v56  ;;  %v14549_v35 = vpack.c.bf16 %v9998_v20, %v9997_v8  ;;  %v9961_v56 = vld [vmem:[%s24031_s12 + $0xa10] sm:$0xff] }
 0x873   :  { %14444 = vmatprep.subr.bf16.mxu0 %v14443_v36  ;;  %v14459_v36 = vpack.c.bf16 %v9922_v27, %v9921_v15  ;;  %v14537_v28 = vpack.c.bf16 %v9992_v32, %v9991_v0  ;;  %v9632_v33 = vmax.f32 %v9607_v63, 0.0  ;;  %v10016_v23 = vld [vmem:[%s24031_s12 + $0xbc8] sm:$0xff]  ;;  %v9977_v15 = vld [vmem:[%s24031_s12 + $0xa90] sm:$0xff]  ;;  %v9999_v63 = vld [vmem:[%s24031_s12 + $0xb40] sm:$0xff] }
 0x874   :  { %14490 = vmatpush3.bf16.msra.mxu1 %v14489_v17  ;;  %v9924_v17 = vld [vmem:[%s24031_s12 + $0x8e8] sm:$0xff]  ;;  %v14551_v27 = vpack.c.bf16 %v10016_v23, %v10015_v16  ;;  %v10017_v0 = vld [vmem:[%s24031_s12 + $0xbd0] sm:$0xff]  ;;  %v10018_v32 = vld [vmem:[%s24031_s12 + $0xbd8] sm:$0xff] }
 0x875   :  { %14492 = vmatprep.subr.bf16.mxu1 %v14491_v60  ;;  %v9993_v60 = vld [vmem:[%s24031_s12 + $0xb10] sm:$0xff]  ;;  %v9960_v12 = vld [vmem:[%s24031_s12 + $0xa08] sm:$0xff]  ;;  %v9962_v42 = vld [vmem:[%s24031_s12 + $0xa18] sm:$0xff] }
 0x876   :  { %14446 = vmatpush3.bf16.msra.mxu0 %v14445_v22  ;;  %v14461_v22 = vpack.c.bf16 %v9906_v38, %v9905_v48  ;;  %v9979_v38 = vld [vmem:[%s24031_s12 + $0xaa0] sm:$0xff]  ;;  %v9985_v8 = vld [vmem:[%s24031_s12 + $0xad0] sm:$0xff]  ;;  %v9986_v20 = vld [vmem:[%s24031_s12 + $0xad8] sm:$0xff] }
 0x877   :  { %14448 = vmatprep.subr.bf16.mxu0 %v14447_v10  ;;  %v14463_v10 = vpack.c.bf16 %v9924_v17, %v9923_v41  ;;  %v14555_v41 = vpack.c.bf16 %v10018_v32, %v10017_v0  ;;  %v10001_v17 = vld [vmem:[%s24031_s12 + $0xb50] sm:$0xff]  ;;  %v14523_v23 = vpack.c.bf16 %v9986_v20, %v9985_v8  ;;  %v10960_v8 = vld [vmem:[%s24033_s14 + $0x38] sm:$0xff] }
 0x878   :  { %14494 = vmatpush3.bf16.msra.mxu1 %v14493_v59  ;;  %v14541_v59 = vpack.c.bf16 %v9994_v54, %v9993_v60  ;;  %v10019_v60 = vld [vmem:[%s24031_s12 + $0xbe0] sm:$0xff]  ;;  %v10020_v54 = vld [vmem:[%s24031_s12 + $0xbe8] sm:$0xff]  ;;  %v9973_v32 = vld [vmem:[%s24031_s12 + $0xa70] sm:$0xff] }
 0x879   :  { %14496 = vmatprep.subr.bf16.mxu1 %v14495_v47  ;;  %v14543_v47 = vpack.c.bf16 %v10012_v52, %v10011_v19  ;;  %v9964_v19 = vld [vmem:[%s24031_s12 + $0xa28] sm:$0xff] }
 0x87a   :  { %14450 = vmatpush3.bf16.msra.mxu0 %v14449_v46  ;;  %v14465_v46 = vpack.c.bf16 %v9908_v29, %v9907_v61  ;;  %v9982_v61 = vld [vmem:[%s24031_s12 + $0xab8] sm:$0xff]  ;;  %v14559_v29 = vpack.c.bf16 %v10020_v54, %v10019_v60 }
 0x87b   :  { %14452 = vmatprep.subr.bf16.mxu0 %v14451_v44  ;;  %v9531_v44 = vrot.slane %v23375_v49, %v22726_v5  ;;  %v9976_v5 = vld [vmem:[%s24031_s12 + $0xa88] sm:$0xff]  ;;  %v10030_v60 = vld [vmem:[%s24031_s12 + $0xc38] sm:$0xff] }
 0x87c   :  { %14498 = vmatpush3.bf16.msra.mxu1 %v14497_v39  ;;  %v9910_v39 = vld [vmem:[%s24031_s12 + $0x878] sm:$0xff]  ;;  %v14503_v57 = vpack.c.bf16 %v9976_v5, %v9975_v31 }
 0x87d   :  { %14500 = vmatprep.subr.bf16.mxu1 %v14499_v14  ;;  %v14547_v14 = vpack.c.bf16 %v10014_v4, %v10013_v30  ;;  %v9605_v62 = vadd.f32 %v9531_v44, %v23286_v6  ;;  %v9978_v6 = vld [vmem:[%s24031_s12 + $0xa98] sm:$0xff]  ;;  %v9983_v44 = vld [vmem:[%s24031_s12 + $0xac0] sm:$0xff] }
 0x87e   :  { %14454 = vmatpush3.bf16.msra.mxu0 %v14453_v21  ;;  %v14469_v21 = vpack.c.bf16 %v9910_v39, %v9909_v24  ;;  %v14507_v18 = vpack.c.bf16 %v9978_v6, %v9977_v15  ;;  %v9966_v30 = vld [vmem:[%s24031_s12 + $0xa38] sm:$0xff]  ;;  %v9555_v24 = vrot.slane %v23375_v49, %v22732_v45  ;;  %v9968_v45 = vld [vmem:[%s24031_s12 + $0xa48] sm:$0xff]  ;;  %v9971_v15 = vld [vmem:[%s24031_s12 + $0xa60] sm:$0xff] }
 0x87f   :  { %14456 = vmatprep.subr.bf16.mxu0 %v14455_v25  ;;  %v9959_v25 = vld [vmem:[%s24031_s12 + $0xa00] sm:$0xff]  ;;  %v10006_v31 = vld [vmem:[%s24031_s12 + $0xb78] sm:$0xff]  ;;  %v9972_v6 = vld [vmem:[%s24031_s12 + $0xa68] sm:$0xff] }
 0x880   :  { %14502 = vmatpush3.bf16.msra.mxu1 %v14501_v53  ;;  %v9610_v53 = vadd.f32 %v9551_v34, %v23405_v1  ;;  %v14505_v1 = vpack.c.bf16 %v9960_v12, %v9959_v25  ;;  %v9987_v25 = vld [vmem:[%s24031_s12 + $0xae0] sm:$0xff]  ;;  %v12273_v54 = vld [vmem:[%s24030_s11 + $0x18] ss:$0 sm:$0xff] }
 0x881   :  { %14536 = vmatprep.subr.bf16.mxu1 %v14535_v2  ;;  %v10000_v2 = vld [vmem:[%s24031_s12 + $0xb48] sm:$0xff] }
 0x882   :  { %14458 = vmatpush3.bf16.msra.mxu0 %v14457_v37  ;;  %v9630_v37 = vmax.f32 %v9605_v62, 0.0  ;;  %v14553_v48 = vpack.c.bf16 %v10000_v2, %v9999_v63  ;;  %v9969_v62 = vld [vmem:[%s24031_s12 + $0xa50] sm:$0xff]  ;;  %v9990_v63 = vld [vmem:[%s24031_s12 + $0xaf8] sm:$0xff]  ;;  %v24914_v2 = vmov 0.0  }
 0x883   :  { %10737 = vmatmul.mubr.f32.vlgmr.msra.gmra.mrb[66].mxu1 %v9632_v33  ;;  %14460 = vmatprep.subr.bf16.mxu0 %v14459_v36  ;;  %v9635_v36 = vmax.f32 %v9610_v53, 0.0  ;;  %v10002_v33 = vld [vmem:[%s24031_s12 + $0xb58] sm:$0xff] }
 0x884   :  { %14538 = vmatpush3.bf16.msra.mxu1 %v14537_v28  ;;  %10876 = vmatprep.mubr.f32.mxu1 %v9637_v9  ;;  %v9980_v28 = vld [vmem:[%s24031_s12 + $0xaa8] sm:$0xff]  ;;  %v14557_v52 = vpack.c.bf16 %v10002_v33, %v10001_v17 }
 0x885   :  { %14540 = vmatprep.subr.bf16.mxu1 %v14539_v58  ;;  %v14509_v58 = vpack.c.bf16 %v9962_v42, %v9961_v56  ;;  %v14511_v9 = vpack.c.bf16 %v9980_v28, %v9979_v38  ;;  %v10023_v56 = vld [vmem:[%s24031_s12 + $0xc00] sm:$0xff]  ;;  %v10024_v42 = vld [vmem:[%s24031_s12 + $0xc08] sm:$0xff]  ;;  %v10025_v38 = vld [vmem:[%s24031_s12 + $0xc10] sm:$0xff] }
 0x886   :  { %14462 = vmatpush3.bf16.msra.mxu0 %v14461_v22  ;;  %v9963_v22 = vld [vmem:[%s24031_s12 + $0xa20] sm:$0xff]  ;;  %v10026_v28 = vld [vmem:[%s24031_s12 + $0xc18] sm:$0xff]  ;;  %v10028_v17 = vld [vmem:[%s24031_s12 + $0xc28] sm:$0xff] }
 0x887   :  { %14464 = vmatprep.subr.bf16.mxu0 %v14463_v10  ;;  %v9981_v10 = vld [vmem:[%s24031_s12 + $0xab0] sm:$0xff]  ;;  %v14513_v7 = vpack.c.bf16 %v9964_v19, %v9963_v22  ;;  %v9613_v22 = vadd.f32 %v12273_v54, %v23500_v55 }
 0x888   :  { %14542 = vmatpush3.bf16.msra.mxu1 %v14541_v59  ;;  %v10003_v59 = vld [vmem:[%s24031_s12 + $0xb60] sm:$0xff]  ;;  %v14515_v3 = vpack.c.bf16 %v9982_v61, %v9981_v10 }
 0x889   :  { %14544 = vmatprep.subr.bf16.mxu1 %v14543_v47  ;;  %v10021_v47 = vld [vmem:[%s24031_s12 + $0xbf0] sm:$0xff]  ;;  %v14561_v4 = vpack.c.bf16 %v10004_v40, %v10003_v59  ;;  %v9638_v19 = vmax.f32 %v9613_v22, 0.0  ;;  %v12274_v59 = vld [vmem:[%s24032_s13] ss:$0 sm:$0xff] }
 0x88a   :  { %14466 = vmatpush3.bf16.msra.mxu0 %v14465_v46  ;;  %v9965_v46 = vld [vmem:[%s24031_s12 + $0xa30] sm:$0xff]  ;;  %v14563_v39 = vpack.c.bf16 %v10022_v11, %v10021_v47 }
 0x88b   :  { %14468 = vmatprep.subr.bf16.mxu0 %v14467_v50  ;;  %v9984_v50 = vld [vmem:[%s24031_s12 + $0xac8] sm:$0xff]  ;;  %v14517_v5 = vpack.c.bf16 %v9966_v30, %v9965_v46  ;;  %v10953_v30 = vld [vmem:[%s24033_s14] sm:$0xff] }
 0x88c   :  { %14546 = vmatpush3.bf16.msra.mxu1 %v14545_v13  ;;  %v10005_v13 = vld [vmem:[%s24031_s12 + $0xb70] sm:$0xff]  ;;  %v14519_v34 = vpack.c.bf16 %v9984_v50, %v9983_v44 }
 0x88d   :  { %14548 = vmatprep.subr.bf16.mxu1 %v14547_v14  ;;  %v9967_v14 = vld [vmem:[%s24031_s12 + $0xa40] sm:$0xff]  ;;  %v14565_v49 = vpack.c.bf16 %v10006_v31, %v10005_v13  ;;  %v10955_v44 = vld [vmem:[%s24033_s14 + $0x10] sm:$0xff]  ;;  %v10958_v31 = vld [vmem:[%s24033_s14 + $0x28] sm:$0xff] }
 0x88e   :  { %14470 = vmatpush3.bf16.msra.mxu0 %v14469_v21  ;;  %v9611_v21 = vadd.f32 %v9555_v24, %v23294_v26  ;;  %v14521_v16 = vpack.c.bf16 %v9968_v45, %v9967_v14  ;;  %v9988_v26 = vld [vmem:[%s24031_s12 + $0xae8] sm:$0xff]  ;;  %v10956_v24 = vld [vmem:[%s24033_s14 + $0x18] sm:$0xff]  ;;  %v10957_v13 = vld [vmem:[%s24033_s14 + $0x20] sm:$0xff] }
 0x88f   :  { %14504 = vmatprep.subr.bf16.mxu0 %v14503_v57  ;;  %v9970_v57 = vld [vmem:[%s24031_s12 + $0xa58] sm:$0xff]  ;;  %v14527_v53 = vpack.c.bf16 %v9988_v26, %v9987_v25  ;;  %v10963_v25 = vld [vmem:[%s24033_s14 + $0x50] sm:$0xff] }
 0x890   :  { %14550 = vmatpush3.bf16.msra.mxu1 %v14549_v35  ;;  %v9636_v12 = vmax.f32 %v9611_v21, 0.0  ;;  %v14525_v35 = vpack.c.bf16 %v9970_v57, %v9969_v62  ;;  %v10964_v26 = vld [vmem:[%s24033_s14 + $0x58] sm:$0xff] }
 0x891   :  { %10667 = vmatmul.mubr.f32.vlgmr.msra.gmra.mrb[48].mxu0 %v9630_v37  ;;  %14552 = vmatprep.subr.bf16.mxu1 %v14551_v27  ;;  %v9989_v27 = vld [vmem:[%s24031_s12 + $0xaf0] sm:$0xff]  ;;  %v9974_v37 = vld [vmem:[%s24031_s12 + $0xa78] sm:$0xff] }
 0x892   :  { %14506 = vmatpush3.bf16.msra.mxu0 %v14505_v1  ;;  %10806 = vmatprep.mubr.f32.mxu0 %v9635_v36  ;;  %v14529_v1 = vpack.c.bf16 %v9972_v6, %v9971_v15  ;;  %v14531_v0 = vpack.c.bf16 %v9990_v63, %v9989_v27  ;;  %v14568_v36 = vpack.c.bf16 %v10024_v42, %v10023_v56  ;;  %v10967_v63 = vld [vmem:[%s24033_s14 + $0x70] sm:$0xff] }
 0x893   :  { %14508 = vmatprep.subr.bf16.mxu0 %v14507_v18  ;;  %v14533_v18 = vpack.c.bf16 %v9974_v37, %v9973_v32 }
 0x894   :  { %14554 = vmatpush3.bf16.msra.mxu1 %v14553_v48  ;;  %v9634_v48 = vmax.f32 %v23413_v43, 0.0  ;;  %v10027_v43 = vld [vmem:[%s24031_s12 + $0xc20] sm:$0xff] }
 0x895   :  { %14556 = vmatprep.subr.bf16.mxu1 %v14555_v41  ;;  %v14571_v41 = vpack.c.bf16 %v10026_v28, %v10025_v38  ;;  %v14574_v33 = vpack.c.bf16 %v10028_v17, %v10027_v43 }
 0x896   :  { %14510 = vmatpush3.bf16.msra.mxu0 %v14509_v58  ;;  %v10029_v58 = vld [vmem:[%s24031_s12 + $0xc30] sm:$0xff] }
 0x897   :  { %14512 = vmatprep.subr.bf16.mxu0 %v14511_v9  ;;  %v14577_v9 = vpack.c.bf16 %v10030_v60, %v10029_v58 }
 0x898   :  { %14558 = vmatpush3.bf16.msra.mxu1 %v14557_v52 }
 0x899   :  { %14560 = vmatprep.subr.bf16.mxu1 %v14559_v29 }
 0x89a   :  { %14514 = vmatpush3.bf16.msra.mxu0 %v14513_v7 }
 0x89b   :  { %14516 = vmatprep.subr.bf16.mxu0 %v14515_v3 }
 0x89c   :  { %14562 = vmatpush3.bf16.msra.mxu1 %v14561_v4  ;;  %v10954_v4 = vld [vmem:[%s24033_s14 + $0x8] sm:$0xff] }
 0x89d   :  { %14564 = vmatprep.subr.bf16.mxu1 %v14563_v39  ;;  %v14580_v50 = vpack.c.bf16 %v10954_v4, %v10953_v30  ;;  %v14583_v39 = vpack.c.bf16 %v10956_v24, %v10955_v44  ;;  %v12276_v4 = vld [vmem:[%s24034_s15] ss:$0 sm:$0xff]  ;;  %s11066_s15 = sshll.u32 %s15263_s7, 4  ;;  %s11067_s15 = int_to_ptr.vmem [resolvable:$true] %s11066_s15 }
 0x89e   :  { %14518 = vmatpush3.bf16.msra.mxu0 %v14517_v5  ;;  %v14586_v5 = vpack.c.bf16 %v10958_v31, %v10957_v13  ;;  %s15235_s13 = scalar_lea.vmem %s11067_s15, 128  ;;  %p15240_p1 = scmp.lt.s32.totalorder %s11067_s15, %s11067_s15 }
 0x89f   :  { %14520 = vmatprep.subr.bf16.mxu0 %v14519_v34  ;;  %p15236_p0 = scmp.ne.s32.totalorder %s11067_s15, %s15235_s13  ;;  %p15241_p2 = scmp.lt.s32.totalorder %s15235_s13, %s15235_s13 }
 0x8a0   :  { %14566 = vmatpush3.bf16.msra.mxu1 %v14565_v49  ;;  %v10959_v49 = vld [vmem:[%s24033_s14 + $0x30] sm:$0xff] }
 0x8a1   :  { %14579 = vmatprep.subr.bf16.mxu1 %v24909_v51  ;;  %v14589_v21 = vpack.c.bf16 %v10960_v8, %v10959_v49  ;;  %p15242_p3 = por %p15241_p2, %p15240_p1 }
 0x8a2   :  { %14522 = vmatpush3.bf16.msra.mxu0 %v14521_v16  ;;  %v10961_v16 = vld [vmem:[%s24033_s14 + $0x40] sm:$0xff] }
 0x8a3   :  { %10877 = vmatmul.mubr.f32.vlgmr.msra.gmra.mrb[68].mxu1 %v9636_v12  ;;  %14524 = vmatprep.subr.bf16.mxu0 %v14523_v23  ;;  %v10962_v23 = vld [vmem:[%s24033_s14 + $0x48] sm:$0xff]  ;;  %v14595_v12 = vpack.c.bf16 %v10964_v26, %v10963_v25  ;;  %p15243_p4 = pnand %p15242_p3, %p15236_p0 }
 0x8a4   :  { %12898 = vmatprep.mubr.msk.f32.mxu1 %vm15261_vm1, %v24914_v2  ;;  %14581 = vmatpush3.bf16.msra.mxu1 %v14580_v50  ;;  %v14592_v57 = vpack.c.bf16 %v10962_v23, %v10961_v16 }
 0x8a5   :  { %14582 = vmatprep.subr.bf16.mxu1 %v24909_v51 }
 0x8a6   :  { %14526 = vmatpush3.bf16.msra.mxu0 %v14525_v35  ;;  %v10965_v35 = vld [vmem:[%s24033_s14 + $0x60] sm:$0xff] }
 0x8a7   :  { %14528 = vmatprep.subr.bf16.mxu0 %v14527_v53  ;;  %v10966_v53 = vld [vmem:[%s24033_s14 + $0x68] sm:$0xff] }
 0x8a8   :  { %14584 = vmatpush3.bf16.msra.mxu1 %v14583_v39  ;;  %v14598_v15 = vpack.c.bf16 %v10966_v53, %v10965_v35 }
 0x8a9   :  { %14585 = vmatprep.subr.bf16.mxu1 %v24909_v51 }
 0x8aa   :  { %14530 = vmatpush3.bf16.msra.mxu0 %v14529_v1 }
 0x8ab   :  { %14532 = vmatprep.subr.bf16.mxu0 %v14531_v0 }
 0x8ac   :  { %14587 = vmatpush3.bf16.msra.mxu1 %v14586_v5 }
 0x8ad   :  { %14588 = vmatprep.subr.bf16.mxu1 %v24909_v51 }
 0x8ae   :  { %14534 = vmatpush3.bf16.msra.mxu0 %v14533_v18 }
 0x8af   :  { %14567 = vmatprep.subr.bf16.mxu0 %v24909_v51 }
 0x8b0   :  { %14590 = vmatpush3.bf16.msra.mxu1 %v14589_v21 }
 0x8b1   :  { %10807 = vmatmul.mubr.f32.vlgmr.msra.gmra.mrb[50].mxu0 %v9634_v48  ;;  %14591 = vmatprep.subr.bf16.mxu1 %v24909_v51 }
 0x8b2   :  { %14569 = vmatpush3.bf16.msra.mxu0 %v14568_v36  ;;  %12863 = vmatprep.mubr.msk.f32.mxu0 %vm15261_vm1, %v24914_v2  ;;  %v10968_v2 = vld [vmem:[%s24033_s14 + $0x78] sm:$0xff] }
 0x8b3   :  { %14570 = vmatprep.subr.bf16.mxu0 %v24909_v51  ;;  %v14601_v0 = vpack.c.bf16 %v10968_v2, %v10967_v63 }
 0x8b4   :  { %14593 = vmatpush3.bf16.msra.mxu1 %v14592_v57 }
 0x8b5   :  { %14594 = vmatprep.subr.bf16.mxu1 %v24909_v51 }
 0x8b6   :  { %14572 = vmatpush3.bf16.msra.mxu0 %v14571_v41 }
 0x8b7   :  { %14573 = vmatprep.subr.bf16.mxu0 %v24909_v51 }
 0x8b8   :  { %14596 = vmatpush3.bf16.msra.mxu1 %v14595_v12 }
 0x8b9   :  { %14597 = vmatprep.subr.bf16.mxu1 %v24909_v51 }
 0x8ba   :  { %14575 = vmatpush3.bf16.msra.mxu0 %v14574_v33 }
 0x8bb   :  { %14576 = vmatprep.subr.bf16.mxu0 %v24909_v51 }
 0x8bc   :  { %14599 = vmatpush3.bf16.msra.mxu1 %v14598_v15 }
 0x8bd   :  { %14600 = vmatprep.subr.bf16.mxu1 %v24909_v51 }
 0x8be   :  { %14578 = vmatpush3.bf16.msra.mxu0 %v14577_v9 }
 0x8c0   :  { %14602 = vmatpush3.bf16.msra.mxu1 %v14601_v0 }
 0x8c1   :  { %12864 = vmatmul.mubr.msk.f32.vlgmr.msra.gmra.mrb[52].mxu0 %vm10038_vm6, %v9638_v19 }
 0x8d6   :  { %v12428_v52 = vpop.f32.mrb[58].mxu1 }
 0x8d7   :  { %v12429_v10 = vpop.f32.mrb[59].mxu1 }
 0x8d8   :  { %v12430_v61 = vadd.f32 %v12429_v10, %v12428_v52 }
 0x8e4   :  { %v12393_v29 = vpop.f32.mrb[40].mxu0 }
 0x8e5   :  { %v12394_v40 = vpop.f32.mrb[41].mxu0 }
 0x8e6   :  { %v12395_v7 = vadd.f32 %v12394_v40, %v12393_v29 }
 0x8e8   :  { %v10109_v47 = vadd.f32 %v12395_v7, %v12274_v59 }
 0x8ea   :  { %v10179_v11 = vadd.f32 %v12430_v61, %v10109_v47 }
 0x8f6   :  { %v12498_v3 = vpop.f32.mrb[60].mxu1 }
 0x8f7   :  { %v12499_v55 = vpop.f32.mrb[61].mxu1 }
 0x8f8   :  { %v12500_v46 = vadd.f32 %v12499_v55, %v12498_v3 }
 0x904   :  { %v12463_v34 = vpop.f32.mrb[42].mxu0 }
 0x905   :  { %v12464_v14 = vpop.f32.mrb[43].mxu0 }
 0x906   :  { %v12465_v45 = vadd.f32 %v12464_v14, %v12463_v34 }
 0x908   :  { %v10249_v20 = vadd.f32 %v12465_v45, %v10179_v11 }
 0x90a   :  { %v10319_v62 = vadd.f32 %v12500_v46, %v10249_v20 }
 0x916   :  { %v12568_v6 = vpop.f32.mrb[62].mxu1 }
 0x917   :  { %v12569_v27 = vpop.f32.mrb[63].mxu1 }
 0x918   :  { %v12570_v1 = vadd.f32 %v12569_v27, %v12568_v6 }
 0x924   :  { %v12533_v32 = vpop.f32.mrb[44].mxu0 }
 0x925   :  { %v12534_v37 = vpop.f32.mrb[45].mxu0 }
 0x926   :  { %v12535_v18 = vadd.f32 %v12534_v37, %v12533_v32 }
 0x928   :  { %v10389_v56 = vadd.f32 %v12535_v18, %v10319_v62 }
 0x92a   :  { %v10459_v42 = vadd.f32 %v12570_v1, %v10389_v56 }
 0x936   :  { %v12638_v36 = vpop.f32.mrb[64].mxu1 }
 0x937   :  { %v12639_v48 = vpop.f32.mrb[65].mxu1 }
 0x938   :  { %v12640_v38 = vadd.f32 %v12639_v48, %v12638_v36 }
 0x944   :  { %v12603_v51 = vpop.f32.mrb[46].mxu0 }
 0x945   :  { %v12604_v28 = vpop.f32.mrb[47].mxu0 }
 0x946   :  { %v12605_v41 = vadd.f32 %v12604_v28, %v12603_v51 }
 0x948   :  { %v10529_v43 = vadd.f32 %v12605_v41, %v10459_v42 }
 0x94a   :  { %v10599_v17 = vadd.f32 %v12640_v38, %v10529_v43 }
 0x956   :  { %v12708_v33 = vpop.f32.mrb[66].mxu1 }
 0x957   :  { %v12709_v58 = vpop.f32.mrb[67].mxu1 }
 0x958   :  { %v12710_v60 = vadd.f32 %v12709_v58, %v12708_v33 }
 0x964   :  { %v12673_v54 = vpop.f32.mrb[48].mxu0 }
 0x965   :  { %v12674_v9 = vpop.f32.mrb[49].mxu0 }
 0x966   :  { %v12675_v22 = vadd.f32 %v12674_v9, %v12673_v54 }
 0x968   :  { %v10669_v19 = vadd.f32 %v12675_v22, %v10599_v17 }
 0x96a   :  { %v10739_v52 = vadd.f32 %v12710_v60, %v10669_v19 }
 0x976   :  { %v12778_v10 = vpop.f32.mrb[68].mxu1 }
 0x977   :  { %v12779_v61 = vpop.f32.mrb[69].mxu1 }
 0x978   :  { %v12780_v29 = vadd.f32 %v12779_v61, %v12778_v10 }
 0x984   :  { %v12743_v59 = vpop.f32.mrb[50].mxu0 }
 0x985   :  { %v12744_v40 = vpop.f32.mrb[51].mxu0 }
 0x986   :  { %v12745_v7 = vadd.f32 %v12744_v40, %v12743_v59 }
 0x988   :  { %v10809_v47 = vadd.f32 %v12745_v7, %v10739_v52 }
 0x98a   :  { %v10879_v11 = vadd.f32 %v12780_v29, %v10809_v47 }
 0x994   :  { %v10948_v3 = vpop.f32.mrb[52].mxu0 }
 0x995   :  { %v10949_v55 = vadd.f32 %v10948_v3, %v10879_v11  ;;  %v12865_v46 = vpop.f32.mrb[53].mxu0 }
 0x997   :  { %v10952_v30 = vmax.f32 %v10949_v55, 0.0 }
 0x999   :  { %12899 = vmatmul.mubr.f32.vlgmr.msra.gmra.mrb[70].mxu1 %v10952_v30 }
 0xa6c   :  { %v11042_v44 = vpop.f32.mrb[70].mxu1 }
 0xa6d   :  { %v11043_v50 = vadd.f32 %v12276_v4, %v11042_v44  ;;  %v12900_v24 = vpop.f32.mrb[71].mxu1 }
 0xa6f   :  { %v11047_v39 = vsel %vm11046_vm7, %v11043_v50, -inf }
 0xa70   :  { %11048 = vmax.xlane.f32.xlu0 %v11047_v39 }
 0xafd   :  { %v11049_v13 = vpop.xlane.xlu0 %11048 }
 0xafe   :  { %v11050_v31 = vsub.f32 %v11043_v50, %v11049_v13 }
 0xb00   :  { %v11051_v5 = vmul.f32 1.442695, %v11050_v31 }
 0xb02   :  { %15231 = vpow2.f32 %v11051_v5 }
 0xb0c   :  { %v15232_v34 = vpop.eup %15231 }
 0xb0d   :  { %v11053_v14 = vsel %vm11046_vm7, %v15232_v34, 0.0 }
 0xb0e   :  { %11054 = vadd.xlane.f32.xlu1 %v11053_v14 }
 0xb9b   :  { %v11055_v45 = vpop.xlane.xlu1 %11054 }
 0xb9c   :  { %15233 = vlog2.f32 %v11055_v45 }
 0xba6   :  { %v15234_v49 = vpop.eup %15233 }
 0xba7   :  { %v11057_v8 = vmul.f32 0.6931472, %v15234_v49 }
 0xba9   :  { %v11058_v20 = vsub.f32 %v11050_v31, %v11057_v8 }
 0xbab   :  { %11059 = vst.msk [vmem:[#allocation2] sm:$0xff] %vm11046_vm7, %v11058_v20 }
 0xbac   :  { %15246 = shalt.err (!%p15243_p4)
}
 0xbad   :  { %s15247_s9 = scalar_lea.hbm %s24035_s16, 128 }
 0xbae   :  { %p15248_p5 = scmp.ne.s32.totalorder %s24035_s16, %s15247_s9  ;;  %p15251_p6 = scmp.lt.u32.totalorder %s15247_s9, %s24035_s16 }
 0xbb0   :  { %p15253_p7 = pnand %p15251_p6, %p15248_p5 }
 0xbb2   :  { %15256 = shalt.err (!%p15253_p7)
}
 0xbb3   :  { %11069 = dma.vmem_to_hbm [thread:$0]  %s11067_s15, 128, %s24035_s16, [#allocation3]  }
 0xbb4   :  { %15257 = dma.done.wait [#allocation3], 128  }
 0xbb5   :  { %15258 = vsyncadd [#allocation3], 4294967168 }
 0xbb6   :  { %11073 = vsyncpa [#allocation3], 1 }

</bundles_post_ra>
